<compile_context>
chip_gen: v6e
topology: v6e:2x2x1
jax: 0.10.0
libtpu: 0.0.40
codegen_flags: <defaults>
</compile_context>

<pallas_src>
import functools

import jax
import jax.numpy as jnp
from jax.experimental import pallas as pl
from jax.experimental.pallas import tpu as pltpu


LANE = 128
VMEM_LIMIT = 32 * 1024 * 1024


def _round_up(x, m):
    return ((x + m - 1) // m) * m


# ----------------------------------------------------------------------------
# Pallas kernels
# ----------------------------------------------------------------------------

def _conv_im2col_kernel(cols_ref, w_ref, scale_ref, shift_ref, mask_ref, o_ref):
    # cols: [1, M, Kp] bf16 (full im2col rows for one batch), w: [Kp, Cp] bf16.
    acc = jnp.dot(cols_ref[0], w_ref[...], preferred_element_type=jnp.float32)
    y = acc * scale_ref[...] + shift_ref[...]          # BatchNorm2d (eval)
    y = jnp.clip(y, 0.0, 20.0)                         # Hardtanh(0, 20)
    o_ref[0] = y * mask_ref[0]                         # MaskConv2d time mask


def _conv_tap_kernel(slab_ref, w_ref, scale_ref, shift_ref, mask_ref, o_ref,
                     acc_ref, *, kh, sh, F2, T2):
    # slab: [1, sh, Fq*T2, Kp] bf16, w: [kh, Kp, Cp] bf16 (VMEM resident).
    # Unrolled tap loop; each tap is a [F2*T2, Kp] x [Kp, Cp] MXU matmul.
    acc_ref[...] = jnp.zeros_like(acc_ref)
    for i in range(kh):
        p, r = i % sh, i // sh
        a = slab_ref[0, p, r * T2:(r + F2) * T2]       # [F2*T2, Kp] (static slice)
        acc_ref[...] += jnp.dot(a, w_ref[i], preferred_element_type=jnp.float32)
    y = acc_ref[...] * scale_ref[...] + shift_ref[...]
    y = jnp.clip(y, 0.0, 20.0)
    o_ref[0] = y * mask_ref[0]


def _gate_kernel(*refs, two_inputs):
    # BN1d(eval) + ReLU + fused (fwd|bwd) input-gate matmul.
    if two_inputs:
        x1_ref, x2_ref, scale_ref, shift_ref, w_ref, b_ref, o_ref = refs
        x = x1_ref[...] + x2_ref[...]          # recombine fwd/bwd halves (zero lanes)
    else:
        x1_ref, scale_ref, shift_ref, w_ref, b_ref, o_ref = refs
        x = x1_ref[...]
    h = jnp.maximum(x * scale_ref[...] + shift_ref[...], 0.0)   # f32 elementwise
    o_ref[...] = (jnp.dot(h.astype(jnp.bfloat16), w_ref[...],
                          preferred_element_type=jnp.float32) + b_ref[...])


def _gru_kernel(gxf_ref, gxb_ref, mf_ref, mb_ref, whh_ref, bhh_ref,
                of_ref, ob_ref, h_ref, *, H, TS):
    # grid = (batch_groups, T/TS).  State [Bb, GP]: fwd lanes [0,H), bwd [H,2H).
    # The bwd direction consumes the time-REVERSED block (gxb/mb/ob index maps),
    # so no gate pre-reversal / output post-reversal is needed.
    tb = pl.program_id(1)

    @pl.when(tb == 0)
    def _init():
        h_ref[...] = jnp.zeros_like(h_ref)

    GP = h_ref.shape[1]
    lane = jax.lax.broadcasted_iota(jnp.int32, (1, GP), 1)
    sel_f = (lane < H).astype(jnp.float32)
    sel_b = jnp.logical_and(lane >= H, lane < 2 * H).astype(jnp.float32)
    lane3 = jax.lax.broadcasted_iota(jnp.int32, (1, 3 * GP), 1) % GP
    sel3_f = (lane3 < H).astype(jnp.float32)
    sel3_b = jnp.logical_and(lane3 >= H, lane3 < 2 * H).astype(jnp.float32)
    bhh = bhh_ref[...]

    for s in range(TS):                                    # unrolled recurrence
        h = h_ref[...]                                     # [Bb, GP] f32
        gh = jnp.dot(h.astype(jnp.bfloat16), whh_ref[...],
                     preferred_element_type=jnp.float32) + bhh
        gx = gxf_ref[s] * sel3_f + gxb_ref[TS - 1 - s] * sel3_b
        r = jax.nn.sigmoid(gx[:, 0:GP] + gh[:, 0:GP])
        z = jax.nn.sigmoid(gx[:, GP:2 * GP] + gh[:, GP:2 * GP])
        n = jnp.tanh(gx[:, 2 * GP:3 * GP] + r * gh[:, 2 * GP:3 * GP])
        h_new = (1.0 - z) * n + z * h
        m_f = mf_ref[s]                                    # [Bb, 1]
        m_b = mb_ref[TS - 1 - s]
        mm = m_f * sel_f + m_b * sel_b                     # per-direction state freeze
        h_ref[...] = mm * h_new + (1.0 - mm) * h
        of_ref[s] = (m_f * sel_f) * h_new                  # fwd half, zeros elsewhere
        ob_ref[TS - 1 - s] = (m_b * sel_b) * h_new         # bwd half, zeros elsewhere


def _head_kernel(xf_ref, xb_ref, g_ref, b_ref, w_ref, bias_ref, o_ref, *, d_real):
    # LayerNorm (over the 2H real lanes) + Linear + log_softmax.  bias_ref has the
    # vocab-pad mask (-1e30 on padded lanes) folded in, so no per-tile iota/where.
    x = xf_ref[...] + xb_ref[...]
    inv_d = 1.0 / d_real
    mu = jnp.sum(x, axis=-1, keepdims=True) * inv_d
    ex2 = jnp.sum(x * x, axis=-1, keepdims=True) * inv_d
    var = ex2 - mu * mu
    xn = (x - mu) * jax.lax.rsqrt(var + 1e-5) * g_ref[...] + b_ref[...]
    logits = jnp.dot(xn.astype(jnp.bfloat16), w_ref[...],
                     preferred_element_type=jnp.float32) + bias_ref[...]
    mx = jnp.max(logits, axis=-1, keepdims=True)
    s = logits - mx
    o_ref[...] = s - jnp.log(jnp.sum(jnp.exp(s), axis=-1, keepdims=True))


# ----------------------------------------------------------------------------
# Conv blocks
# ----------------------------------------------------------------------------

def _fold_bn(bn, Cp, Cout):
    gamma, beta, mean, var = bn
    scale = gamma / jnp.sqrt(var + 1e-5)
    shift = beta - mean * scale
    scale = jnp.pad(scale, (0, Cp - Cout)).reshape(1, Cp)
    shift = jnp.pad(shift, (0, Cp - Cout)).reshape(1, Cp)
    return scale, shift


def _conv_new_len(lengths, kw, sw, pw):
    return jnp.maximum((lengths + 2 * pw - (kw - 1) - 1) // sw + 1, 0)


def _time_mask(new_len, B, F2, T2):
    tmask = (jnp.arange(T2)[None, :] < new_len[:, None]).astype(jnp.float32)
    return jnp.broadcast_to(tmask[:, None, :], (B, F2, T2)).reshape(B, F2 * T2, 1)


def _conv1_block(x, w, bn, lengths, *, kh, kw, sh, sw, ph, pw):
    # Full im2col (C == 1 so K = kh*kw stays small); one MXU matmul per batch.
    B, F, T, C = x.shape
    Cout = w.shape[0]
    Cp = _round_up(Cout, LANE)
    F2 = (F + 2 * ph - kh) // sh + 1
    T2 = (T + 2 * pw - kw) // sw + 1
    K = kh * kw * C
    Kp = _round_up(K, LANE)
    M = F2 * T2

    new_len = _conv_new_len(lengths, kw, sw, pw)

    xp = jnp.pad(x, ((0, 0), (ph, ph), (pw, pw), (0, 0)))
    f_idx = jnp.arange(F2)[:, None] * sh + jnp.arange(kh)[None, :]     # [F2, kh]
    t_idx = jnp.arange(T2)[:, None] * sw + jnp.arange(kw)[None, :]     # [T2, kw]
    cols = xp[:, f_idx]                                    # [B, F2, kh, Tp, C]
    cols = cols[:, :, :, t_idx]                            # [B, F2, kh, T2, kw, C]
    cols = jnp.transpose(cols, (0, 1, 3, 2, 4, 5)).reshape(B, M, K)
    cols = jnp.pad(cols, ((0, 0), (0, 0), (0, Kp - K))).astype(jnp.bfloat16)

    wt = jnp.transpose(w, (2, 3, 1, 0)).reshape(K, Cout)   # (kh, kw, C) x Cout
    wt = jnp.pad(wt, ((0, Kp - K), (0, Cp - Cout))).astype(jnp.bfloat16)

    scale, shift = _fold_bn(bn, Cp, Cout)
    mask = _time_mask(new_len, B, F2, T2)

    out = pl.pallas_call(
        _conv_im2col_kernel,
        out_shape=jax.ShapeDtypeStruct((B, M, Cp), jnp.float32),
        grid=(B,),
        in_specs=[
            pl.BlockSpec((1, M, Kp), lambda b: (b, 0, 0)),
            pl.BlockSpec((Kp, Cp), lambda b: (0, 0)),       # resident weight
            pl.BlockSpec((1, Cp), lambda b: (0, 0)),
            pl.BlockSpec((1, Cp), lambda b: (0, 0)),
            pl.BlockSpec((1, M, 1), lambda b: (b, 0, 0)),
        ],
        out_specs=pl.BlockSpec((1, M, Cp), lambda b: (b, 0, 0)),
        compiler_params=pltpu.CompilerParams(
            dimension_semantics=("parallel",), vmem_limit_bytes=VMEM_LIMIT),
    )(cols, wt, scale, shift, mask)

    out = out[:, :, :Cout].reshape(B, F2, T2, Cout)
    return out, new_len


def _conv2_block(x, w, bn, lengths, *, kh, kw, sh, sw, ph, pw):
    # Time-only im2col (K = kw*C is already MXU-deep); kh freq taps looped
    # (unrolled) in-kernel over a VMEM-resident [kh, Kp, Cp] weight.
    B, F, T, C = x.shape
    Cout = w.shape[0]
    Cp = _round_up(Cout, LANE)
    F2 = (F + 2 * ph - kh) // sh + 1
    T2 = (T + 2 * pw - kw) // sw + 1
    K = kw * C
    Kp = _round_up(K, LANE)
    M = F2 * T2

    new_len = _conv_new_len(lengths, kw, sw, pw)

    xp = jnp.pad(x, ((0, 0), (ph, ph), (pw, pw), (0, 0)))      # [B, Fp, Tp, C]
    Fp = F + 2 * ph
    t_idx = jnp.arange(T2)[:, None] * sw + jnp.arange(kw)[None, :]
    slab = xp[:, :, t_idx, :].reshape(B, Fp, T2, K)            # [B, Fp, T2, kw*C]
    # phase split of the freq axis: input row for (tap i, out row f2) = i + sh*f2
    Fq = (kh - 1) // sh + F2
    if sh * Fq > Fp:
        slab = jnp.pad(slab, ((0, 0), (0, sh * Fq - Fp), (0, 0), (0, 0)))
    slab = slab.reshape(B, Fq, sh, T2, K).transpose(0, 2, 1, 3, 4)  # [B, sh, Fq, T2, K]
    slab = jnp.pad(slab, ((0, 0),) * 4 + ((0, Kp - K),))
    slab = slab.reshape(B, sh, Fq * T2, Kp).astype(jnp.bfloat16)

    wt = jnp.transpose(w, (2, 3, 1, 0)).reshape(kh, K, Cout)   # per-tap [kw*C, Cout]
    wt = jnp.pad(wt, ((0, 0), (0, Kp - K), (0, Cp - Cout))).astype(jnp.bfloat16)

    scale, shift = _fold_bn(bn, Cp, Cout)
    mask = _time_mask(new_len, B, F2, T2)

    out = pl.pallas_call(
        functools.partial(_conv_tap_kernel, kh=kh, sh=sh, F2=F2, T2=T2),
        out_shape=jax.ShapeDtypeStruct((B, M, Cp), jnp.float32),
        grid=(B,),
        in_specs=[
            pl.BlockSpec((1, sh, Fq * T2, Kp), lambda b: (b, 0, 0, 0)),
            pl.BlockSpec((kh, Kp, Cp), lambda b: (0, 0, 0)),   # resident tap weights
            pl.BlockSpec((1, Cp), lambda b: (0, 0)),
            pl.BlockSpec((1, Cp), lambda b: (0, 0)),
            pl.BlockSpec((1, M, 1), lambda b: (b, 0, 0)),
        ],
        out_specs=pl.BlockSpec((1, M, Cp), lambda b: (b, 0, 0)),
        scratch_shapes=[pltpu.VMEM((M, Cp), jnp.float32)],
        compiler_params=pltpu.CompilerParams(
            dimension_semantics=("parallel",), vmem_limit_bytes=VMEM_LIMIT),
    )(slab, wt, scale, shift, mask)

    out = out[:, :, :Cout].reshape(B, F2, T2, Cout)
    return out, new_len


# ----------------------------------------------------------------------------
# RNN layer (fused bidirectional GRU, reversed-time traversal for bwd)
# ----------------------------------------------------------------------------

def _gate_matmul(xs, scale, shift, w_big, b_big):
    # xs: 1 or 2 arrays [M, D]; logical input = sum(xs) (fwd/bwd halves recombine).
    M, D = xs[0].shape
    N = w_big.shape[1]
    tm = min(512, _round_up(M, 8))
    Mp = _round_up(M, tm)
    if Mp != M:
        xs = [jnp.pad(x, ((0, Mp - M), (0, 0))) for x in xs]
    two = len(xs) == 2
    x_specs = [pl.BlockSpec((tm, D), lambda i: (i, 0)) for _ in xs]
    out = pl.pallas_call(
        functools.partial(_gate_kernel, two_inputs=two),
        out_shape=jax.ShapeDtypeStruct((Mp, N), jnp.float32),
        grid=(Mp // tm,),
        in_specs=x_specs + [
            pl.BlockSpec((1, D), lambda i: (0, 0)),
            pl.BlockSpec((1, D), lambda i: (0, 0)),
            pl.BlockSpec((D, N), lambda i: (0, 0)),            # resident bf16 weight
            pl.BlockSpec((1, N), lambda i: (0, 0)),
        ],
        out_specs=pl.BlockSpec((tm, N), lambda i: (i, 0)),
        compiler_params=pltpu.CompilerParams(
            dimension_semantics=("parallel",), vmem_limit_bytes=VMEM_LIMIT),
    )(*xs, scale.reshape(1, D), shift.reshape(1, D), w_big, b_big)
    return out[:M] if Mp != M else out


def _gru(gx, mask, w_hh, b_hh, H, TS, bg):
    # gx: [Tp, B, 3GP] f32; mask: [Tp, B, 1] f32
    Tp, B, N3 = gx.shape
    GP = w_hh.shape[0]
    Bb = B // bg
    ntb = Tp // TS
    out_f, out_b = pl.pallas_call(
        functools.partial(_gru_kernel, H=H, TS=TS),
        out_shape=(jax.ShapeDtypeStruct((Tp, B, GP), jnp.float32),
                   jax.ShapeDtypeStruct((Tp, B, GP), jnp.float32)),
        grid=(bg, ntb),
        in_specs=[
            pl.BlockSpec((TS, Bb, N3), lambda g, t: (t, g, 0)),
            pl.BlockSpec((TS, Bb, N3), lambda g, t, n=ntb: (n - 1 - t, g, 0)),
            pl.BlockSpec((TS, Bb, 1), lambda g, t: (t, g, 0)),
            pl.BlockSpec((TS, Bb, 1), lambda g, t, n=ntb: (n - 1 - t, g, 0)),
            pl.BlockSpec((GP, N3), lambda g, t: (0, 0)),
            pl.BlockSpec((1, N3), lambda g, t: (0, 0)),
        ],
        out_specs=(
            pl.BlockSpec((TS, Bb, GP), lambda g, t: (t, g, 0)),
            pl.BlockSpec((TS, Bb, GP), lambda g, t, n=ntb: (n - 1 - t, g, 0)),
        ),
        scratch_shapes=[pltpu.VMEM((Bb, GP), jnp.float32)],
        compiler_params=pltpu.CompilerParams(
            dimension_semantics=("parallel", "arbitrary"),
            vmem_limit_bytes=VMEM_LIMIT),
    )(gx, gx, mask, mask, w_hh, b_hh)
    return out_f, out_b


def _fuse_gate_cols(wf, wb, H, GP):
    # [D, 3H] fwd/bwd (cols r|z|n) -> [D, 3*GP]; per-gate chunk = [fwd H | bwd H | 0]
    D = wf.shape[0]
    out = jnp.zeros((D, 3 * GP), jnp.float32)
    for g in range(3):
        out = out.at[:, g * GP:g * GP + H].set(wf[:, g * H:(g + 1) * H])
        out = out.at[:, g * GP + H:g * GP + 2 * H].set(wb[:, g * H:(g + 1) * H])
    return out


def _fuse_hh(whh_f, whh_b, H, GP):
    # block-diagonal recurrent weights: rows 0:H drive fwd lanes, H:2H drive bwd
    out = jnp.zeros((GP, 3 * GP), jnp.float32)
    for g in range(3):
        out = out.at[0:H, g * GP:g * GP + H].set(whh_f[:, g * H:(g + 1) * H])
        out = out.at[H:2 * H, g * GP + H:g * GP + 2 * H].set(whh_b[:, g * H:(g + 1) * H])
    return out


def _batch_rnn(xs, mask_tb1, lp, *, TS, bg):
    # xs: list of 1 or 2 arrays [Tp, B, D] (logical input = sum); returns pair.
    Tp, B, D = xs[0].shape
    H = lp["w_hh_f"].shape[0]
    GP = max(LANE, _round_up(2 * H, LANE))

    w_ih = _fuse_gate_cols(lp["w_ih_f"], lp["w_ih_b"], H, GP)   # [D_real, 3GP]
    b_ih = _fuse_gate_cols(lp["b_ih_f"], lp["b_ih_b"], H, GP)
    w_hh = _fuse_hh(lp["w_hh_f"], lp["w_hh_b"], H, GP)
    b_hh = _fuse_gate_cols(lp["b_hh_f"], lp["b_hh_b"], H, GP)

    d_real = lp["w_ih_f"].shape[0]
    if d_real != D:          # pad to the lane-dense inter-layer width (GP lanes)
        w_ih = jnp.pad(w_ih, ((0, D - d_real), (0, 0)))
    scale = jnp.pad(lp["bn_scale"], (0, D - d_real))
    shift = jnp.pad(lp["bn_shift"], (0, D - d_real))

    gx = _gate_matmul([x.reshape(Tp * B, D) for x in xs], scale, shift,
                      w_ih.astype(jnp.bfloat16), b_ih)
    gx = gx.reshape(Tp, B, 3 * GP)
    out_f, out_b = _gru(gx, mask_tb1, w_hh.astype(jnp.bfloat16), b_hh, H, TS, bg)
    return [out_f, out_b]


# ----------------------------------------------------------------------------
# Head
# ----------------------------------------------------------------------------

def _head(xs, params, T2, B):
    Tp = xs[0].shape[0]
    GP = xs[0].shape[-1]
    d_real = params["fc_w"].shape[0]           # 2H
    n_tokens = params["fc_w"].shape[1]
    Np = _round_up(n_tokens, LANE)

    g = jnp.pad(params["ln_g"].reshape(-1), (0, GP - d_real)).reshape(1, GP)
    b = jnp.pad(params["ln_b"].reshape(-1), (0, GP - d_real)).reshape(1, GP)
    w = jnp.pad(params["fc_w"], ((0, GP - d_real), (0, Np - n_tokens))).astype(jnp.bfloat16)
    bias = jnp.pad(params["fc_b"].reshape(-1), (0, Np - n_tokens))
    vmask = jnp.where(jnp.arange(Np) < n_tokens, 0.0, -1e30)    # fold vocab mask in
    bias = (bias + vmask).reshape(1, Np).astype(jnp.float32)

    M = Tp * B
    tm = min(512, _round_up(M, 8))
    Mp = _round_up(M, tm)
    xs2 = [x.reshape(M, GP) for x in xs]
    if Mp != M:
        xs2 = [jnp.pad(x, ((0, Mp - M), (0, 0))) for x in xs2]

    out = pl.pallas_call(
        functools.partial(_head_kernel, d_real=d_real),
        out_shape=jax.ShapeDtypeStruct((Mp, Np), jnp.float32),
        grid=(Mp // tm,),
        in_specs=[
            pl.BlockSpec((tm, GP), lambda i: (i, 0)),
            pl.BlockSpec((tm, GP), lambda i: (i, 0)),
            pl.BlockSpec((1, GP), lambda i: (0, 0)),
            pl.BlockSpec((1, GP), lambda i: (0, 0)),
            pl.BlockSpec((GP, Np), lambda i: (0, 0)),
            pl.BlockSpec((1, Np), lambda i: (0, 0)),
        ],
        out_specs=pl.BlockSpec((tm, Np), lambda i: (i, 0)),
        compiler_params=pltpu.CompilerParams(
            dimension_semantics=("parallel",), vmem_limit_bytes=VMEM_LIMIT),
    )(*xs2, g, b, w, bias)
    out = out[:M].reshape(Tp, B, Np)
    # TODO(synk): the final [T,B]->[B,T] transpose could be fused into the head
    # out_spec when B is sublane-aligned; at these shapes it is a negligible copy.
    return jnp.transpose(out[:T2, :, :n_tokens], (1, 0, 2))


# ----------------------------------------------------------------------------
# Full forward
# ----------------------------------------------------------------------------

def deepspeech2_forward(params, spectrogram, spectrogram_length):
    # spectrogram: [B, n_feats(freq), T(time)], spectrogram_length: [B]
    B = spectrogram.shape[0]
    lengths = spectrogram_length.astype(jnp.int32)
    x = spectrogram.astype(jnp.float32)[..., None]          # [B, F(freq), T(time), 1]

    x, lengths = _conv1_block(x, params["conv1_w"], params["bn1"], lengths,
                              kh=41, kw=11, sh=2, sw=2, ph=20, pw=5)
    x, lengths = _conv2_block(x, params["conv2_w"], params["bn2"], lengths,
                              kh=21, kw=11, sh=2, sw=1, ph=10, pw=5)

    _, F2, T2, C = x.shape
    # [B, F2, T2, C] -> [T2, B, C*F2]  (feature order (c, f2) matches the torch
    # permute(0,3,1,2).view(B, T2, C*F2)); [T, B, *] layout kept through the RNNs.
    x = jnp.transpose(x, (2, 0, 3, 1)).reshape(T2, B, C * F2)

    TS = min(32, T2)                      # timesteps per GRU grid step
    Tp = _round_up(T2, TS)
    if Tp != T2:
        x = jnp.pad(x, ((0, Tp - T2), (0, 0), (0, 0)))
    bg = 2 if (B % 16 == 0) else 1        # v7x: split batch across both TensorCores

    t_idx = jnp.arange(Tp)
    mask = (t_idx[:, None] < lengths[None, :]).astype(jnp.float32)[:, :, None]

    xs = [x]
    for lp in params["rnn"]:
        xs = _batch_rnn(xs, mask, lp, TS=TS, bg=bg)

    log_probs = _head(xs, params, T2, B)                     # [B, T2, n_tokens]
    return {"log_probs": log_probs, "log_probs_length": lengths}


# ----------------------------------------------------------------------------
# Deterministic parameter init (synthetic; shapes follow the PyTorch module)
# ----------------------------------------------------------------------------

def init_params(key, n_feats=16, n_tokens=28, hidden=32, num_layers=2, out_ch=64):
    keys = iter(jax.random.split(key, 256))

    def nrm(shape, s=0.1):
        return jax.random.normal(next(keys), shape, jnp.float32) * s

    def pos(shape):
        return jax.random.uniform(next(keys), shape, jnp.float32, 0.5, 1.5)

    p = {}
    p["conv1_w"] = nrm((out_ch, 1, 41, 11))
    p["bn1"] = (nrm((out_ch,)) + 1.0, nrm((out_ch,)), nrm((out_ch,)), pos((out_ch,)))
    p["conv2_w"] = nrm((out_ch, out_ch, 21, 11), s=0.02)
    p["bn2"] = (nrm((out_ch,)) + 1.0, nrm((out_ch,)), nrm((out_ch,)), pos((out_ch,)))

    rnn_in = out_ch * (n_feats // 4)
    H = hidden
    D = rnn_in
    p["rnn"] = []
    for _ in range(num_layers):
        gamma, beta, mean, var = nrm((D,)) + 1.0, nrm((D,)), nrm((D,)), pos((D,))
        scale = gamma / jnp.sqrt(var + 1e-5)
        shift = beta - mean * scale
        lp = {"bn_scale": scale, "bn_shift": shift}
        for d in ("f", "b"):
            lp[f"w_ih_{d}"] = nrm((D, 3 * H), s=0.05)   # torch weight_ih [3H,D] transposed
            lp[f"b_ih_{d}"] = nrm((1, 3 * H), s=0.05)
            lp[f"w_hh_{d}"] = nrm((H, 3 * H), s=0.05)   # torch weight_hh [3H,H] transposed
            lp[f"b_hh_{d}"] = nrm((1, 3 * H), s=0.05)
        p["rnn"].append(lp)
        D = 2 * H

    p["ln_g"] = (nrm((2 * H,)) + 1.0).reshape(1, -1)
    p["ln_b"] = nrm((2 * H,)).reshape(1, -1)
    p["fc_w"] = nrm((2 * H, n_tokens), s=0.05)
    p["fc_b"] = nrm((1, n_tokens), s=0.05)
    return p


if __name__ == "__main__":
    key = jax.random.PRNGKey(0)
    pkey, xkey = jax.random.split(key)

    # Small config consistent with the module: n_feats=16, time=16, hidden=32,
    # 2 bidirectional GRU layers, 28 tokens, batch 2.
    B, NFEATS, TIME = 2, 16, 16
    params = init_params(pkey, n_feats=NFEATS, n_tokens=28, hidden=32, num_layers=2)

    spectrogram = jax.random.normal(xkey, (B, NFEATS, TIME), jnp.float32)
    spectrogram_length = jnp.array([16, 11], dtype=jnp.int32)  # element 0 is full length

    fwd = jax.jit(deepspeech2_forward)
    out = fwd(params, spectrogram, spectrogram_length)
    jax.block_until_ready(out["log_probs"])

    assert out["log_probs"].shape == (B, 8, 28), out["log_probs"].shape
    assert out["log_probs_length"].shape == (B,)
    assert bool(jnp.all(jnp.isfinite(out["log_probs"])))
    print("KERNEL_OK")
</pallas_src>

<mosaic_0001>
module attributes {stable_mosaic.version = 11 : i64} {
  func.func @_conv_im2col_kernel(%arg0: i32, %arg1: memref<1x64x512xbf16, #tpu.memory_space<vmem>>, %arg2: memref<512x128xbf16, #tpu.memory_space<vmem>>, %arg3: memref<1x128xf32, #tpu.memory_space<vmem>>, %arg4: memref<1x128xf32, #tpu.memory_space<vmem>>, %arg5: memref<1x64x1xf32, #tpu.memory_space<vmem>>, %arg6: memref<1x64x128xf32, #tpu.memory_space<vmem>>) attributes {dimension_semantics = [#tpu.dimension_semantics<parallel>], iteration_bounds = array<i64: 2>, scalar_prefetch = 0 : i64, scratch_operands = 0 : i64, tpu.core_type = #tpu.core_type<tc>, window_params = [{transform_indices = @transform_0, window_bounds = array<i64: 1, 64, 512>}, {pipeline_mode = #tpu.pipeline_mode<synchronous>, transform_indices = @transform_1, window_bounds = array<i64: 512, 128>}, {pipeline_mode = #tpu.pipeline_mode<synchronous>, transform_indices = @transform_2, window_bounds = array<i64: 1, 128>}, {pipeline_mode = #tpu.pipeline_mode<synchronous>, transform_indices = @transform_3, window_bounds = array<i64: 1, 128>}, {transform_indices = @transform_4, window_bounds = array<i64: 1, 64, 1>}, {transform_indices = @transform_5, window_bounds = array<i64: 1, 64, 128>}]} {
    %c0 = arith.constant 0 : index
    %c0_0 = arith.constant 0 : index
    %c0_1 = arith.constant 0 : index
    %0 = vector.load %arg1[%c0, %c0_0, %c0_1] : memref<1x64x512xbf16, #tpu.memory_space<vmem>>, vector<1x64x512xbf16>
    %1 = vector.shape_cast %0 : vector<1x64x512xbf16> to vector<64x512xbf16>
    %c0_2 = arith.constant 0 : index
    %c0_3 = arith.constant 0 : index
    %2 = vector.load %arg2[%c0_2, %c0_3] : memref<512x128xbf16, #tpu.memory_space<vmem>>, vector<512x128xbf16>
    %cst = arith.constant dense<0.000000e+00> : vector<64x128xf32>
    %3 = tpu.matmul %1, %2, %cst {dimension_numbers = #tpu.dot_dimension_numbers<[1], [0], [0], [1], [0, 0, 1, 1], [], []>} : vector<64x512xbf16>, vector<512x128xbf16>, vector<64x128xf32> -> vector<64x128xf32>
    %c0_4 = arith.constant 0 : index
    %c0_5 = arith.constant 0 : index
    %4 = vector.load %arg3[%c0_4, %c0_5] : memref<1x128xf32, #tpu.memory_space<vmem>>, vector<1x128xf32>
    %5 = vector.broadcast %4 : vector<1x128xf32> to vector<64x128xf32>
    %6 = arith.mulf %3, %5 : vector<64x128xf32>
    %c0_6 = arith.constant 0 : index
    %c0_7 = arith.constant 0 : index
    %7 = vector.load %arg4[%c0_6, %c0_7] : memref<1x128xf32, #tpu.memory_space<vmem>>, vector<1x128xf32>
    %8 = vector.broadcast %7 : vector<1x128xf32> to vector<64x128xf32>
    %9 = arith.addf %6, %8 : vector<64x128xf32>
    %cst_8 = arith.constant 0.000000e+00 : f32
    %cst_9 = arith.constant 2.000000e+01 : f32
    %10 = vector.broadcast %cst_8 : f32 to vector<64x128xf32>
    %11 = arith.maximumf %10, %9 : vector<64x128xf32>
    %12 = vector.broadcast %cst_9 : f32 to vector<64x128xf32>
    %13 = arith.minimumf %12, %11 : vector<64x128xf32>
    %c0_10 = arith.constant 0 : index
    %c0_11 = arith.constant 0 : index
    %c0_12 = arith.constant 0 : index
    %14 = vector.load %arg5[%c0_10, %c0_11, %c0_12] : memref<1x64x1xf32, #tpu.memory_space<vmem>>, vector<1x64x1xf32>
    %15 = vector.shape_cast %14 : vector<1x64x1xf32> to vector<64x1xf32>
    %16 = vector.broadcast %15 : vector<64x1xf32> to vector<64x128xf32>
    %17 = arith.mulf %13, %16 : vector<64x128xf32>
    %c0_13 = arith.constant 0 : index
    %c0_14 = arith.constant 0 : index
    %c0_15 = arith.constant 0 : index
    %18 = vector.load %arg6[%c0_13, %c0_14, %c0_15] : memref<1x64x128xf32, #tpu.memory_space<vmem>>, vector<1x64x128xf32>
    %19 = vector.shape_cast %18 : vector<1x64x128xf32> to vector<64x128xf32>
    %20 = vector.shape_cast %17 : vector<64x128xf32> to vector<1x64x128xf32>
    tpu.vector_store %arg6[%c0_13, %c0_14, %c0_15], %20 {strides = array<i32>} : memref<1x64x128xf32, #tpu.memory_space<vmem>>, vector<1x64x128xf32>,
    return
  }
  func.func @transform_0(%arg0: i32) -> (i32, i32, i32) {
    %c0_i32 = arith.constant 0 : i32
    %c0_i32_0 = arith.constant 0 : i32
    %c0_i32_1 = arith.constant 0 : i32
    return %arg0, %c0_i32, %c0_i32_0 : i32, i32, i32
  }
  func.func @transform_1(%arg0: i32) -> (i32, i32) {
    %c0_i32 = arith.constant 0 : i32
    %c0_i32_0 = arith.constant 0 : i32
    %c0_i32_1 = arith.constant 0 : i32
    return %c0_i32, %c0_i32_0 : i32, i32
  }
  func.func @transform_2(%arg0: i32) -> (i32, i32) {
    %c0_i32 = arith.constant 0 : i32
    %c0_i32_0 = arith.constant 0 : i32
    %c0_i32_1 = arith.constant 0 : i32
    return %c0_i32, %c0_i32_0 : i32, i32
  }
  func.func @transform_3(%arg0: i32) -> (i32, i32) {
    %c0_i32 = arith.constant 0 : i32
    %c0_i32_0 = arith.constant 0 : i32
    %c0_i32_1 = arith.constant 0 : i32
    return %c0_i32, %c0_i32_0 : i32, i32
  }
  func.func @transform_4(%arg0: i32) -> (i32, i32, i32) {
    %c0_i32 = arith.constant 0 : i32
    %c0_i32_0 = arith.constant 0 : i32
    %c0_i32_1 = arith.constant 0 : i32
    return %arg0, %c0_i32, %c0_i32_0 : i32, i32, i32
  }
  func.func @transform_5(%arg0: i32) -> (i32, i32, i32) {
    %c0_i32 = arith.constant 0 : i32
    %c0_i32_0 = arith.constant 0 : i32
    %c0_i32_1 = arith.constant 0 : i32
    return %arg0, %c0_i32, %c0_i32_0 : i32, i32, i32
  }
}

module attributes {stable_mosaic.version = 11 : i64} {
  func.func @_conv_tap_kernel(%arg0: i32, %arg1: memref<1x2x112x768xbf16, #tpu.memory_space<vmem>>, %arg2: memref<21x768x128xbf16, #tpu.memory_space<vmem>>, %arg3: memref<1x128xf32, #tpu.memory_space<vmem>>, %arg4: memref<1x128xf32, #tpu.memory_space<vmem>>, %arg5: memref<1x32x1xf32, #tpu.memory_space<vmem>>, %arg6: memref<1x32x128xf32, #tpu.memory_space<vmem>>, %arg7: memref<32x128xf32, #tpu.memory_space<vmem>>) attributes {dimension_semantics = [#tpu.dimension_semantics<parallel>], iteration_bounds = array<i64: 2>, scalar_prefetch = 0 : i64, scratch_operands = 1 : i64, tpu.core_type = #tpu.core_type<tc>, window_params = [{transform_indices = @transform_0, window_bounds = array<i64: 1, 2, 112, 768>}, {pipeline_mode = #tpu.pipeline_mode<synchronous>, transform_indices = @transform_1, window_bounds = array<i64: 21, 768, 128>}, {pipeline_mode = #tpu.pipeline_mode<synchronous>, transform_indices = @transform_2, window_bounds = array<i64: 1, 128>}, {pipeline_mode = #tpu.pipeline_mode<synchronous>, transform_indices = @transform_3, window_bounds = array<i64: 1, 128>}, {transform_indices = @transform_4, window_bounds = array<i64: 1, 32, 1>}, {transform_indices = @transform_5, window_bounds = array<i64: 1, 32, 128>}]} {
    %cst = arith.constant 0.000000e+00 : f32
    %0 = vector.broadcast %cst : f32 to vector<32x128xf32>
    %c0 = arith.constant 0 : index
    %c0_0 = arith.constant 0 : index
    %1 = vector.load %arg7[%c0, %c0_0] : memref<32x128xf32, #tpu.memory_space<vmem>>, vector<32x128xf32>
    tpu.vector_store %arg7[%c0, %c0_0], %0 {strides = array<i32>} : memref<32x128xf32, #tpu.memory_space<vmem>>, vector<32x128xf32>,
    %c0_1 = arith.constant 0 : index
    %c0_2 = arith.constant 0 : index
    %c0_3 = arith.constant 0 : index
    %c0_4 = arith.constant 0 : index
    %2 = vector.load %arg1[%c0_1, %c0_2, %c0_3, %c0_4] : memref<1x2x112x768xbf16, #tpu.memory_space<vmem>>, vector<1x1x32x768xbf16>
    %3 = vector.shape_cast %2 : vector<1x1x32x768xbf16> to vector<32x768xbf16>
    %c0_5 = arith.constant 0 : index
    %c0_6 = arith.constant 0 : index
    %4 = vector.load %arg7[%c0_5, %c0_6] : memref<32x128xf32, #tpu.memory_space<vmem>>, vector<32x128xf32>
    %c0_7 = arith.constant 0 : index
    %c0_8 = arith.constant 0 : index
    %c0_9 = arith.constant 0 : index
    %5 = vector.load %arg2[%c0_7, %c0_8, %c0_9] : memref<21x768x128xbf16, #tpu.memory_space<vmem>>, vector<1x768x128xbf16>
    %6 = vector.shape_cast %5 : vector<1x768x128xbf16> to vector<768x128xbf16>
    %cst_10 = arith.constant dense<0.000000e+00> : vector<32x128xf32>
    %7 = tpu.matmul %3, %6, %cst_10 {dimension_numbers = #tpu.dot_dimension_numbers<[1], [0], [0], [1], [0, 0, 1, 1], [], []>} : vector<32x768xbf16>, vector<768x128xbf16>, vector<32x128xf32> -> vector<32x128xf32>
    %8 = arith.addf %4, %7 : vector<32x128xf32>
    %c0_11 = arith.constant 0 : index
    %c0_12 = arith.constant 0 : index
    %9 = vector.load %arg7[%c0_11, %c0_12] : memref<32x128xf32, #tpu.memory_space<vmem>>, vector<32x128xf32>
    tpu.vector_store %arg7[%c0_11, %c0_12], %8 {strides = array<i32>} : memref<32x128xf32, #tpu.memory_space<vmem>>, vector<32x128xf32>,
    %c0_13 = arith.constant 0 : index
    %c1 = arith.constant 1 : index
    %c0_14 = arith.constant 0 : index
    %c0_15 = arith.constant 0 : index
    %10 = vector.load %arg1[%c0_13, %c1, %c0_14, %c0_15] : memref<1x2x112x768xbf16, #tpu.memory_space<vmem>>, vector<1x1x32x768xbf16>
    %11 = vector.shape_cast %10 : vector<1x1x32x768xbf16> to vector<32x768xbf16>
    %c0_16 = arith.constant 0 : index
    %c0_17 = arith.constant 0 : index
    %12 = vector.load %arg7[%c0_16, %c0_17] : memref<32x128xf32, #tpu.memory_space<vmem>>, vector<32x128xf32>
    %c1_18 = arith.constant 1 : index
    %c0_19 = arith.constant 0 : index
    %c0_20 = arith.constant 0 : index
    %13 = vector.load %arg2[%c1_18, %c0_19, %c0_20] : memref<21x768x128xbf16, #tpu.memory_space<vmem>>, vector<1x768x128xbf16>
    %14 = vector.shape_cast %13 : vector<1x768x128xbf16> to vector<768x128xbf16>
    %cst_21 = arith.constant dense<0.000000e+00> : vector<32x128xf32>
    %15 = tpu.matmul %11, %14, %cst_21 {dimension_numbers = #tpu.dot_dimension_numbers<[1], [0], [0], [1], [0, 0, 1, 1], [], []>} : vector<32x768xbf16>, vector<768x128xbf16>, vector<32x128xf32> -> vector<32x128xf32>
    %16 = arith.addf %12, %15 : vector<32x128xf32>
    %c0_22 = arith.constant 0 : index
    %c0_23 = arith.constant 0 : index
    %17 = vector.load %arg7[%c0_22, %c0_23] : memref<32x128xf32, #tpu.memory_space<vmem>>, vector<32x128xf32>
    tpu.vector_store %arg7[%c0_22, %c0_23], %16 {strides = array<i32>} : memref<32x128xf32, #tpu.memory_space<vmem>>, vector<32x128xf32>,
    %c0_24 = arith.constant 0 : index
    %c0_25 = arith.constant 0 : index
    %c8 = arith.constant 8 : index
    %c0_26 = arith.constant 0 : index
    %18 = vector.load %arg1[%c0_24, %c0_25, %c8, %c0_26] : memref<1x2x112x768xbf16, #tpu.memory_space<vmem>>, vector<1x1x32x768xbf16>
    %19 = vector.shape_cast %18 : vector<1x1x32x768xbf16> to vector<32x768xbf16>
    %c0_27 = arith.constant 0 : index
    %c0_28 = arith.constant 0 : index
    %20 = vector.load %arg7[%c0_27, %c0_28] : memref<32x128xf32, #tpu.memory_space<vmem>>, vector<32x128xf32>
    %c2 = arith.constant 2 : index
    %c0_29 = arith.constant 0 : index
    %c0_30 = arith.constant 0 : index
    %21 = vector.load %arg2[%c2, %c0_29, %c0_30] : memref<21x768x128xbf16, #tpu.memory_space<vmem>>, vector<1x768x128xbf16>
    %22 = vector.shape_cast %21 : vector<1x768x128xbf16> to vector<768x128xbf16>
    %cst_31 = arith.constant dense<0.000000e+00> : vector<32x128xf32>
    %23 = tpu.matmul %19, %22, %cst_31 {dimension_numbers = #tpu.dot_dimension_numbers<[1], [0], [0], [1], [0, 0, 1, 1], [], []>} : vector<32x768xbf16>, vector<768x128xbf16>, vector<32x128xf32> -> vector<32x128xf32>
    %24 = arith.addf %20, %23 : vector<32x128xf32>
    %c0_32 = arith.constant 0 : index
    %c0_33 = arith.constant 0 : index
    %25 = vector.load %arg7[%c0_32, %c0_33] : memref<32x128xf32, #tpu.memory_space<vmem>>, vector<32x128xf32>
    tpu.vector_store %arg7[%c0_32, %c0_33], %24 {strides = array<i32>} : memref<32x128xf32, #tpu.memory_space<vmem>>, vector<32x128xf32>,
    %c0_34 = arith.constant 0 : index
    %c1_35 = arith.constant 1 : index
    %c8_36 = arith.constant 8 : index
    %c0_37 = arith.constant 0 : index
    %26 = vector.load %arg1[%c0_34, %c1_35, %c8_36, %c0_37] : memref<1x2x112x768xbf16, #tpu.memory_space<vmem>>, vector<1x1x32x768xbf16>
    %27 = vector.shape_cast %26 : vector<1x1x32x768xbf16> to vector<32x768xbf16>
    %c0_38 = arith.constant 0 : index
    %c0_39 = arith.constant 0 : index
    %28 = vector.load %arg7[%c0_38, %c0_39] : memref<32x128xf32, #tpu.memory_space<vmem>>, vector<32x128xf32>
    %c3 = arith.constant 3 : index
    %c0_40 = arith.constant 0 : index
    %c0_41 = arith.constant 0 : index
    %29 = vector.load %arg2[%c3, %c0_40, %c0_41] : memref<21x768x128xbf16, #tpu.memory_space<vmem>>, vector<1x768x128xbf16>
    %30 = vector.shape_cast %29 : vector<1x768x128xbf16> to vector<768x128xbf16>
    %cst_42 = arith.constant dense<0.000000e+00> : vector<32x128xf32>
    %31 = tpu.matmul %27, %30, %cst_42 {dimension_numbers = #tpu.dot_dimension_numbers<[1], [0], [0], [1], [0, 0, 1, 1], [], []>} : vector<32x768xbf16>, vector<768x128xbf16>, vector<32x128xf32> -> vector<32x128xf32>
    %32 = arith.addf %28, %31 : vector<32x128xf32>
    %c0_43 = arith.constant 0 : index
    %c0_44 = arith.constant 0 : index
    %33 = vector.load %arg7[%c0_43, %c0_44] : memref<32x128xf32, #tpu.memory_space<vmem>>, vector<32x128xf32>
    tpu.vector_store %arg7[%c0_43, %c0_44], %32 {strides = array<i32>} : memref<32x128xf32, #tpu.memory_space<vmem>>, vector<32x128xf32>,
    %c0_45 = arith.constant 0 : index
    %c0_46 = arith.constant 0 : index
    %c16 = arith.constant 16 : index
    %c0_47 = arith.constant 0 : index
    %34 = vector.load %arg1[%c0_45, %c0_46, %c16, %c0_47] : memref<1x2x112x768xbf16, #tpu.memory_space<vmem>>, vector<1x1x32x768xbf16>
    %35 = vector.shape_cast %34 : vector<1x1x32x768xbf16> to vector<32x768xbf16>
    %c0_48 = arith.constant 0 : index
    %c0_49 = arith.constant 0 : index
    %36 = vector.load %arg7[%c0_48, %c0_49] : memref<32x128xf32, #tpu.memory_space<vmem>>, vector<32x128xf32>
    %c4 = arith.constant 4 : index
    %c0_50 = arith.constant 0 : index
    %c0_51 = arith.constant 0 : index
    %37 = vector.load %arg2[%c4, %c0_50, %c0_51] : memref<21x768x128xbf16, #tpu.memory_space<vmem>>, vector<1x768x128xbf16>
    %38 = vector.shape_cast %37 : vector<1x768x128xbf16> to vector<768x128xbf16>
    %cst_52 = arith.constant dense<0.000000e+00> : vector<32x128xf32>
    %39 = tpu.matmul %35, %38, %cst_52 {dimension_numbers = #tpu.dot_dimension_numbers<[1], [0], [0], [1], [0, 0, 1, 1], [], []>} : vector<32x768xbf16>, vector<768x128xbf16>, vector<32x128xf32> -> vector<32x128xf32>
    %40 = arith.addf %36, %39 : vector<32x128xf32>
    %c0_53 = arith.constant 0 : index
    %c0_54 = arith.constant 0 : index
    %41 = vector.load %arg7[%c0_53, %c0_54] : memref<32x128xf32, #tpu.memory_space<vmem>>, vector<32x128xf32>
    tpu.vector_store %arg7[%c0_53, %c0_54], %40 {strides = array<i32>} : memref<32x128xf32, #tpu.memory_space<vmem>>, vector<32x128xf32>,
    %c0_55 = arith.constant 0 : index
    %c1_56 = arith.constant 1 : index
    %c16_57 = arith.constant 16 : index
    %c0_58 = arith.constant 0 : index
    %42 = vector.load %arg1[%c0_55, %c1_56, %c16_57, %c0_58] : memref<1x2x112x768xbf16, #tpu.memory_space<vmem>>, vector<1x1x32x768xbf16>
    %43 = vector.shape_cast %42 : vector<1x1x32x768xbf16> to vector<32x768xbf16>
    %c0_59 = arith.constant 0 : index
    %c0_60 = arith.constant 0 : index
    %44 = vector.load %arg7[%c0_59, %c0_60] : memref<32x128xf32, #tpu.memory_space<vmem>>, vector<32x128xf32>
    %c5 = arith.constant 5 : index
    %c0_61 = arith.constant 0 : index
    %c0_62 = arith.constant 0 : index
    %45 = vector.load %arg2[%c5, %c0_61, %c0_62] : memref<21x768x128xbf16, #tpu.memory_space<vmem>>, vector<1x768x128xbf16>
    %46 = vector.shape_cast %45 : vector<1x768x128xbf16> to vector<768x128xbf16>
    %cst_63 = arith.constant dense<0.000000e+00> : vector<32x128xf32>
    %47 = tpu.matmul %43, %46, %cst_63 {dimension_numbers = #tpu.dot_dimension_numbers<[1], [0], [0], [1], [0, 0, 1, 1], [], []>} : vector<32x768xbf16>, vector<768x128xbf16>, vector<32x128xf32> -> vector<32x128xf32>
    %48 = arith.addf %44, %47 : vector<32x128xf32>
    %c0_64 = arith.constant 0 : index
    %c0_65 = arith.constant 0 : index
    %49 = vector.load %arg7[%c0_64, %c0_65] : memref<32x128xf32, #tpu.memory_space<vmem>>, vector<32x128xf32>
    tpu.vector_store %arg7[%c0_64, %c0_65], %48 {strides = array<i32>} : memref<32x128xf32, #tpu.memory_space<vmem>>, vector<32x128xf32>,
    %c0_66 = arith.constant 0 : index
    %c0_67 = arith.constant 0 : index
    %c24 = arith.constant 24 : index
    %c0_68 = arith.constant 0 : index
    %50 = vector.load %arg1[%c0_66, %c0_67, %c24, %c0_68] : memref<1x2x112x768xbf16, #tpu.memory_space<vmem>>, vector<1x1x32x768xbf16>
    %51 = vector.shape_cast %50 : vector<1x1x32x768xbf16> to vector<32x768xbf16>
    %c0_69 = arith.constant 0 : index
    %c0_70 = arith.constant 0 : index
    %52 = vector.load %arg7[%c0_69, %c0_70] : memref<32x128xf32, #tpu.memory_space<vmem>>, vector<32x128xf32>
    %c6 = arith.constant 6 : index
    %c0_71 = arith.constant 0 : index
    %c0_72 = arith.constant 0 : index
    %53 = vector.load %arg2[%c6, %c0_71, %c0_72] : memref<21x768x128xbf16, #tpu.memory_space<vmem>>, vector<1x768x128xbf16>
    %54 = vector.shape_cast %53 : vector<1x768x128xbf16> to vector<768x128xbf16>
    %cst_73 = arith.constant dense<0.000000e+00> : vector<32x128xf32>
    %55 = tpu.matmul %51, %54, %cst_73 {dimension_numbers = #tpu.dot_dimension_numbers<[1], [0], [0], [1], [0, 0, 1, 1], [], []>} : vector<32x768xbf16>, vector<768x128xbf16>, vector<32x128xf32> -> vector<32x128xf32>
    %56 = arith.addf %52, %55 : vector<32x128xf32>
    %c0_74 = arith.constant 0 : index
    %c0_75 = arith.constant 0 : index
    %57 = vector.load %arg7[%c0_74, %c0_75] : memref<32x128xf32, #tpu.memory_space<vmem>>, vector<32x128xf32>
    tpu.vector_store %arg7[%c0_74, %c0_75], %56 {strides = array<i32>} : memref<32x128xf32, #tpu.memory_space<vmem>>, vector<32x128xf32>,
    %c0_76 = arith.constant 0 : index
    %c1_77 = arith.constant 1 : index
    %c24_78 = arith.constant 24 : index
    %c0_79 = arith.constant 0 : index
    %58 = vector.load %arg1[%c0_76, %c1_77, %c24_78, %c0_79] : memref<1x2x112x768xbf16, #tpu.memory_space<vmem>>, vector<1x1x32x768xbf16>
    %59 = vector.shape_cast %58 : vector<1x1x32x768xbf16> to vector<32x768xbf16>
    %c0_80 = arith.constant 0 : index
    %c0_81 = arith.constant 0 : index
    %60 = vector.load %arg7[%c0_80, %c0_81] : memref<32x128xf32, #tpu.memory_space<vmem>>, vector<32x128xf32>
    %c7 = arith.constant 7 : index
    %c0_82 = arith.constant 0 : index
    %c0_83 = arith.constant 0 : index
    %61 = vector.load %arg2[%c7, %c0_82, %c0_83] : memref<21x768x128xbf16, #tpu.memory_space<vmem>>, vector<1x768x128xbf16>
    %62 = vector.shape_cast %61 : vector<1x768x128xbf16> to vector<768x128xbf16>
    %cst_84 = arith.constant dense<0.000000e+00> : vector<32x128xf32>
    %63 = tpu.matmul %59, %62, %cst_84 {dimension_numbers = #tpu.dot_dimension_numbers<[1], [0], [0], [1], [0, 0, 1, 1], [], []>} : vector<32x768xbf16>, vector<768x128xbf16>, vector<32x128xf32> -> vector<32x128xf32>
    %64 = arith.addf %60, %63 : vector<32x128xf32>
    %c0_85 = arith.constant 0 : index
    %c0_86 = arith.constant 0 : index
    %65 = vector.load %arg7[%c0_85, %c0_86] : memref<32x128xf32, #tpu.memory_space<vmem>>, vector<32x128xf32>
    tpu.vector_store %arg7[%c0_85, %c0_86], %64 {strides = array<i32>} : memref<32x128xf32, #tpu.memory_space<vmem>>, vector<32x128xf32>,
    %c0_87 = arith.constant 0 : index
    %c0_88 = arith.constant 0 : index
    %c32 = arith.constant 32 : index
    %c0_89 = arith.constant 0 : index
    %66 = vector.load %arg1[%c0_87, %c0_88, %c32, %c0_89] : memref<1x2x112x768xbf16, #tpu.memory_space<vmem>>, vector<1x1x32x768xbf16>
    %67 = vector.shape_cast %66 : vector<1x1x32x768xbf16> to vector<32x768xbf16>
    %c0_90 = arith.constant 0 : index
    %c0_91 = arith.constant 0 : index
    %68 = vector.load %arg7[%c0_90, %c0_91] : memref<32x128xf32, #tpu.memory_space<vmem>>, vector<32x128xf32>
    %c8_92 = arith.constant 8 : index
    %c0_93 = arith.constant 0 : index
    %c0_94 = arith.constant 0 : index
    %69 = vector.load %arg2[%c8_92, %c0_93, %c0_94] : memref<21x768x128xbf16, #tpu.memory_space<vmem>>, vector<1x768x128xbf16>
    %70 = vector.shape_cast %69 : vector<1x768x128xbf16> to vector<768x128xbf16>
    %cst_95 = arith.constant dense<0.000000e+00> : vector<32x128xf32>
    %71 = tpu.matmul %67, %70, %cst_95 {dimension_numbers = #tpu.dot_dimension_numbers<[1], [0], [0], [1], [0, 0, 1, 1], [], []>} : vector<32x768xbf16>, vector<768x128xbf16>, vector<32x128xf32> -> vector<32x128xf32>
    %72 = arith.addf %68, %71 : vector<32x128xf32>
    %c0_96 = arith.constant 0 : index
    %c0_97 = arith.constant 0 : index
    %73 = vector.load %arg7[%c0_96, %c0_97] : memref<32x128xf32, #tpu.memory_space<vmem>>, vector<32x128xf32>
    tpu.vector_store %arg7[%c0_96, %c0_97], %72 {strides = array<i32>} : memref<32x128xf32, #tpu.memory_space<vmem>>, vector<32x128xf32>,
    %c0_98 = arith.constant 0 : index
    %c1_99 = arith.constant 1 : index
    %c32_100 = arith.constant 32 : index
    %c0_101 = arith.constant 0 : index
    %74 = vector.load %arg1[%c0_98, %c1_99, %c32_100, %c0_101] : memref<1x2x112x768xbf16, #tpu.memory_space<vmem>>, vector<1x1x32x768xbf16>
    %75 = vector.shape_cast %74 : vector<1x1x32x768xbf16> to vector<32x768xbf16>
    %c0_102 = arith.constant 0 : index
    %c0_103 = arith.constant 0 : index
    %76 = vector.load %arg7[%c0_102, %c0_103] : memref<32x128xf32, #tpu.memory_space<vmem>>, vector<32x128xf32>
    %c9 = arith.constant 9 : index
    %c0_104 = arith.constant 0 : index
    %c0_105 = arith.constant 0 : index
    %77 = vector.load %arg2[%c9, %c0_104, %c0_105] : memref<21x768x128xbf16, #tpu.memory_space<vmem>>, vector<1x768x128xbf16>
    %78 = vector.shape_cast %77 : vector<1x768x128xbf16> to vector<768x128xbf16>
    %cst_106 = arith.constant dense<0.000000e+00> : vector<32x128xf32>
    %79 = tpu.matmul %75, %78, %cst_106 {dimension_numbers = #tpu.dot_dimension_numbers<[1], [0], [0], [1], [0, 0, 1, 1], [], []>} : vector<32x768xbf16>, vector<768x128xbf16>, vector<32x128xf32> -> vector<32x128xf32>
    %80 = arith.addf %76, %79 : vector<32x128xf32>
    %c0_107 = arith.constant 0 : index
    %c0_108 = arith.constant 0 : index
    %81 = vector.load %arg7[%c0_107, %c0_108] : memref<32x128xf32, #tpu.memory_space<vmem>>, vector<32x128xf32>
    tpu.vector_store %arg7[%c0_107, %c0_108], %80 {strides = array<i32>} : memref<32x128xf32, #tpu.memory_space<vmem>>, vector<32x128xf32>,
    %c0_109 = arith.constant 0 : index
    %c0_110 = arith.constant 0 : index
    %c40 = arith.constant 40 : index
    %c0_111 = arith.constant 0 : index
    %82 = vector.load %arg1[%c0_109, %c0_110, %c40, %c0_111] : memref<1x2x112x768xbf16, #tpu.memory_space<vmem>>, vector<1x1x32x768xbf16>
    %83 = vector.shape_cast %82 : vector<1x1x32x768xbf16> to vector<32x768xbf16>
    %c0_112 = arith.constant 0 : index
    %c0_113 = arith.constant 0 : index
    %84 = vector.load %arg7[%c0_112, %c0_113] : memref<32x128xf32, #tpu.memory_space<vmem>>, vector<32x128xf32>
    %c10 = arith.constant 10 : index
    %c0_114 = arith.constant 0 : index
    %c0_115 = arith.constant 0 : index
    %85 = vector.load %arg2[%c10, %c0_114, %c0_115] : memref<21x768x128xbf16, #tpu.memory_space<vmem>>, vector<1x768x128xbf16>
    %86 = vector.shape_cast %85 : vector<1x768x128xbf16> to vector<768x128xbf16>
    %cst_116 = arith.constant dense<0.000000e+00> : vector<32x128xf32>
    %87 = tpu.matmul %83, %86, %cst_116 {dimension_numbers = #tpu.dot_dimension_numbers<[1], [0], [0], [1], [0, 0, 1, 1], [], []>} : vector<32x768xbf16>, vector<768x128xbf16>, vector<32x128xf32> -> vector<32x128xf32>
    %88 = arith.addf %84, %87 : vector<32x128xf32>
    %c0_117 = arith.constant 0 : index
    %c0_118 = arith.constant 0 : index
    %89 = vector.load %arg7[%c0_117, %c0_118] : memref<32x128xf32, #tpu.memory_space<vmem>>, vector<32x128xf32>
    tpu.vector_store %arg7[%c0_117, %c0_118], %88 {strides = array<i32>} : memref<32x128xf32, #tpu.memory_space<vmem>>, vector<32x128xf32>,
    %c0_119 = arith.constant 0 : index
    %c1_120 = arith.constant 1 : index
    %c40_121 = arith.constant 40 : index
    %c0_122 = arith.constant 0 : index
    %90 = vector.load %arg1[%c0_119, %c1_120, %c40_121, %c0_122] : memref<1x2x112x768xbf16, #tpu.memory_space<vmem>>, vector<1x1x32x768xbf16>
    %91 = vector.shape_cast %90 : vector<1x1x32x768xbf16> to vector<32x768xbf16>
    %c0_123 = arith.constant 0 : index
    %c0_124 = arith.constant 0 : index
    %92 = vector.load %arg7[%c0_123, %c0_124] : memref<32x128xf32, #tpu.memory_space<vmem>>, vector<32x128xf32>
    %c11 = arith.constant 11 : index
    %c0_125 = arith.constant 0 : index
    %c0_126 = arith.constant 0 : index
    %93 = vector.load %arg2[%c11, %c0_125, %c0_126] : memref<21x768x128xbf16, #tpu.memory_space<vmem>>, vector<1x768x128xbf16>
    %94 = vector.shape_cast %93 : vector<1x768x128xbf16> to vector<768x128xbf16>
    %cst_127 = arith.constant dense<0.000000e+00> : vector<32x128xf32>
    %95 = tpu.matmul %91, %94, %cst_127 {dimension_numbers = #tpu.dot_dimension_numbers<[1], [0], [0], [1], [0, 0, 1, 1], [], []>} : vector<32x768xbf16>, vector<768x128xbf16>, vector<32x128xf32> -> vector<32x128xf32>
    %96 = arith.addf %92, %95 : vector<32x128xf32>
    %c0_128 = arith.constant 0 : index
    %c0_129 = arith.constant 0 : index
    %97 = vector.load %arg7[%c0_128, %c0_129] : memref<32x128xf32, #tpu.memory_space<vmem>>, vector<32x128xf32>
    tpu.vector_store %arg7[%c0_128, %c0_129], %96 {strides = array<i32>} : memref<32x128xf32, #tpu.memory_space<vmem>>, vector<32x128xf32>,
    %c0_130 = arith.constant 0 : index
    %c0_131 = arith.constant 0 : index
    %c48 = arith.constant 48 : index
    %c0_132 = arith.constant 0 : index
    %98 = vector.load %arg1[%c0_130, %c0_131, %c48, %c0_132] : memref<1x2x112x768xbf16, #tpu.memory_space<vmem>>, vector<1x1x32x768xbf16>
    %99 = vector.shape_cast %98 : vector<1x1x32x768xbf16> to vector<32x768xbf16>
    %c0_133 = arith.constant 0 : index
    %c0_134 = arith.constant 0 : index
    %100 = vector.load %arg7[%c0_133, %c0_134] : memref<32x128xf32, #tpu.memory_space<vmem>>, vector<32x128xf32>
    %c12 = arith.constant 12 : index
    %c0_135 = arith.constant 0 : index
    %c0_136 = arith.constant 0 : index
    %101 = vector.load %arg2[%c12, %c0_135, %c0_136] : memref<21x768x128xbf16, #tpu.memory_space<vmem>>, vector<1x768x128xbf16>
    %102 = vector.shape_cast %101 : vector<1x768x128xbf16> to vector<768x128xbf16>
    %cst_137 = arith.constant dense<0.000000e+00> : vector<32x128xf32>
    %103 = tpu.matmul %99, %102, %cst_137 {dimension_numbers = #tpu.dot_dimension_numbers<[1], [0], [0], [1], [0, 0, 1, 1], [], []>} : vector<32x768xbf16>, vector<768x128xbf16>, vector<32x128xf32> -> vector<32x128xf32>
    %104 = arith.addf %100, %103 : vector<32x128xf32>
    %c0_138 = arith.constant 0 : index
    %c0_139 = arith.constant 0 : index
    %105 = vector.load %arg7[%c0_138, %c0_139] : memref<32x128xf32, #tpu.memory_space<vmem>>, vector<32x128xf32>
    tpu.vector_store %arg7[%c0_138, %c0_139], %104 {strides = array<i32>} : memref<32x128xf32, #tpu.memory_space<vmem>>, vector<32x128xf32>,
    %c0_140 = arith.constant 0 : index
    %c1_141 = arith.constant 1 : index
    %c48_142 = arith.constant 48 : index
    %c0_143 = arith.constant 0 : index
    %106 = vector.load %arg1[%c0_140, %c1_141, %c48_142, %c0_143] : memref<1x2x112x768xbf16, #tpu.memory_space<vmem>>, vector<1x1x32x768xbf16>
    %107 = vector.shape_cast %106 : vector<1x1x32x768xbf16> to vector<32x768xbf16>
    %c0_144 = arith.constant 0 : index
    %c0_145 = arith.constant 0 : index
    %108 = vector.load %arg7[%c0_144, %c0_145] : memref<32x128xf32, #tpu.memory_space<vmem>>, vector<32x128xf32>
    %c13 = arith.constant 13 : index
    %c0_146 = arith.constant 0 : index
    %c0_147 = arith.constant 0 : index
    %109 = vector.load %arg2[%c13, %c0_146, %c0_147] : memref<21x768x128xbf16, #tpu.memory_space<vmem>>, vector<1x768x128xbf16>
    %110 = vector.shape_cast %109 : vector<1x768x128xbf16> to vector<768x128xbf16>
    %cst_148 = arith.constant dense<0.000000e+00> : vector<32x128xf32>
    %111 = tpu.matmul %107, %110, %cst_148 {dimension_numbers = #tpu.dot_dimension_numbers<[1], [0], [0], [1], [0, 0, 1, 1], [], []>} : vector<32x768xbf16>, vector<768x128xbf16>, vector<32x128xf32> -> vector<32x128xf32>
    %112 = arith.addf %108, %111 : vector<32x128xf32>
    %c0_149 = arith.constant 0 : index
    %c0_150 = arith.constant 0 : index
    %113 = vector.load %arg7[%c0_149, %c0_150] : memref<32x128xf32, #tpu.memory_space<vmem>>, vector<32x128xf32>
    tpu.vector_store %arg7[%c0_149, %c0_150], %112 {strides = array<i32>} : memref<32x128xf32, #tpu.memory_space<vmem>>, vector<32x128xf32>,
    %c0_151 = arith.constant 0 : index
    %c0_152 = arith.constant 0 : index
    %c56 = arith.constant 56 : index
    %c0_153 = arith.constant 0 : index
    %114 = vector.load %arg1[%c0_151, %c0_152, %c56, %c0_153] : memref<1x2x112x768xbf16, #tpu.memory_space<vmem>>, vector<1x1x32x768xbf16>
    %115 = vector.shape_cast %114 : vector<1x1x32x768xbf16> to vector<32x768xbf16>
    %c0_154 = arith.constant 0 : index
    %c0_155 = arith.constant 0 : index
    %116 = vector.load %arg7[%c0_154, %c0_155] : memref<32x128xf32, #tpu.memory_space<vmem>>, vector<32x128xf32>
    %c14 = arith.constant 14 : index
    %c0_156 = arith.constant 0 : index
    %c0_157 = arith.constant 0 : index
    %117 = vector.load %arg2[%c14, %c0_156, %c0_157] : memref<21x768x128xbf16, #tpu.memory_space<vmem>>, vector<1x768x128xbf16>
    %118 = vector.shape_cast %117 : vector<1x768x128xbf16> to vector<768x128xbf16>
    %cst_158 = arith.constant dense<0.000000e+00> : vector<32x128xf32>
    %119 = tpu.matmul %115, %118, %cst_158 {dimension_numbers = #tpu.dot_dimension_numbers<[1], [0], [0], [1], [0, 0, 1, 1], [], []>} : vector<32x768xbf16>, vector<768x128xbf16>, vector<32x128xf32> -> vector<32x128xf32>
    %120 = arith.addf %116, %119 : vector<32x128xf32>
    %c0_159 = arith.constant 0 : index
    %c0_160 = arith.constant 0 : index
    %121 = vector.load %arg7[%c0_159, %c0_160] : memref<32x128xf32, #tpu.memory_space<vmem>>, vector<32x128xf32>
    tpu.vector_store %arg7[%c0_159, %c0_160], %120 {strides = array<i32>} : memref<32x128xf32, #tpu.memory_space<vmem>>, vector<32x128xf32>,
    %c0_161 = arith.constant 0 : index
    %c1_162 = arith.constant 1 : index
    %c56_163 = arith.constant 56 : index
    %c0_164 = arith.constant 0 : index
    %122 = vector.load %arg1[%c0_161, %c1_162, %c56_163, %c0_164] : memref<1x2x112x768xbf16, #tpu.memory_space<vmem>>, vector<1x1x32x768xbf16>
    %123 = vector.shape_cast %122 : vector<1x1x32x768xbf16> to vector<32x768xbf16>
    %c0_165 = arith.constant 0 : index
    %c0_166 = arith.constant 0 : index
    %124 = vector.load %arg7[%c0_165, %c0_166] : memref<32x128xf32, #tpu.memory_space<vmem>>, vector<32x128xf32>
    %c15 = arith.constant 15 : index
    %c0_167 = arith.constant 0 : index
    %c0_168 = arith.constant 0 : index
    %125 = vector.load %arg2[%c15, %c0_167, %c0_168] : memref<21x768x128xbf16, #tpu.memory_space<vmem>>, vector<1x768x128xbf16>
    %126 = vector.shape_cast %125 : vector<1x768x128xbf16> to vector<768x128xbf16>
    %cst_169 = arith.constant dense<0.000000e+00> : vector<32x128xf32>
    %127 = tpu.matmul %123, %126, %cst_169 {dimension_numbers = #tpu.dot_dimension_numbers<[1], [0], [0], [1], [0, 0, 1, 1], [], []>} : vector<32x768xbf16>, vector<768x128xbf16>, vector<32x128xf32> -> vector<32x128xf32>
    %128 = arith.addf %124, %127 : vector<32x128xf32>
    %c0_170 = arith.constant 0 : index
    %c0_171 = arith.constant 0 : index
    %129 = vector.load %arg7[%c0_170, %c0_171] : memref<32x128xf32, #tpu.memory_space<vmem>>, vector<32x128xf32>
    tpu.vector_store %arg7[%c0_170, %c0_171], %128 {strides = array<i32>} : memref<32x128xf32, #tpu.memory_space<vmem>>, vector<32x128xf32>,
    %c0_172 = arith.constant 0 : index
    %c0_173 = arith.constant 0 : index
    %c64 = arith.constant 64 : index
    %c0_174 = arith.constant 0 : index
    %130 = vector.load %arg1[%c0_172, %c0_173, %c64, %c0_174] : memref<1x2x112x768xbf16, #tpu.memory_space<vmem>>, vector<1x1x32x768xbf16>
    %131 = vector.shape_cast %130 : vector<1x1x32x768xbf16> to vector<32x768xbf16>
    %c0_175 = arith.constant 0 : index
    %c0_176 = arith.constant 0 : index
    %132 = vector.load %arg7[%c0_175, %c0_176] : memref<32x128xf32, #tpu.memory_space<vmem>>, vector<32x128xf32>
    %c16_177 = arith.constant 16 : index
    %c0_178 = arith.constant 0 : index
    %c0_179 = arith.constant 0 : index
    %133 = vector.load %arg2[%c16_177, %c0_178, %c0_179] : memref<21x768x128xbf16, #tpu.memory_space<vmem>>, vector<1x768x128xbf16>
    %134 = vector.shape_cast %133 : vector<1x768x128xbf16> to vector<768x128xbf16>
    %cst_180 = arith.constant dense<0.000000e+00> : vector<32x128xf32>
    %135 = tpu.matmul %131, %134, %cst_180 {dimension_numbers = #tpu.dot_dimension_numbers<[1], [0], [0], [1], [0, 0, 1, 1], [], []>} : vector<32x768xbf16>, vector<768x128xbf16>, vector<32x128xf32> -> vector<32x128xf32>
    %136 = arith.addf %132, %135 : vector<32x128xf32>
    %c0_181 = arith.constant 0 : index
    %c0_182 = arith.constant 0 : index
    %137 = vector.load %arg7[%c0_181, %c0_182] : memref<32x128xf32, #tpu.memory_space<vmem>>, vector<32x128xf32>
    tpu.vector_store %arg7[%c0_181, %c0_182], %136 {strides = array<i32>} : memref<32x128xf32, #tpu.memory_space<vmem>>, vector<32x128xf32>,
    %c0_183 = arith.constant 0 : index
    %c1_184 = arith.constant 1 : index
    %c64_185 = arith.constant 64 : index
    %c0_186 = arith.constant 0 : index
    %138 = vector.load %arg1[%c0_183, %c1_184, %c64_185, %c0_186] : memref<1x2x112x768xbf16, #tpu.memory_space<vmem>>, vector<1x1x32x768xbf16>
    %139 = vector.shape_cast %138 : vector<1x1x32x768xbf16> to vector<32x768xbf16>
    %c0_187 = arith.constant 0 : index
    %c0_188 = arith.constant 0 : index
    %140 = vector.load %arg7[%c0_187, %c0_188] : memref<32x128xf32, #tpu.memory_space<vmem>>, vector<32x128xf32>
    %c17 = arith.constant 17 : index
    %c0_189 = arith.constant 0 : index
    %c0_190 = arith.constant 0 : index
    %141 = vector.load %arg2[%c17, %c0_189, %c0_190] : memref<21x768x128xbf16, #tpu.memory_space<vmem>>, vector<1x768x128xbf16>
    %142 = vector.shape_cast %141 : vector<1x768x128xbf16> to vector<768x128xbf16>
    %cst_191 = arith.constant dense<0.000000e+00> : vector<32x128xf32>
    %143 = tpu.matmul %139, %142, %cst_191 {dimension_numbers = #tpu.dot_dimension_numbers<[1], [0], [0], [1], [0, 0, 1, 1], [], []>} : vector<32x768xbf16>, vector<768x128xbf16>, vector<32x128xf32> -> vector<32x128xf32>
    %144 = arith.addf %140, %143 : vector<32x128xf32>
    %c0_192 = arith.constant 0 : index
    %c0_193 = arith.constant 0 : index
    %145 = vector.load %arg7[%c0_192, %c0_193] : memref<32x128xf32, #tpu.memory_space<vmem>>, vector<32x128xf32>
    tpu.vector_store %arg7[%c0_192, %c0_193], %144 {strides = array<i32>} : memref<32x128xf32, #tpu.memory_space<vmem>>, vector<32x128xf32>,
    %c0_194 = arith.constant 0 : index
    %c0_195 = arith.constant 0 : index
    %c72 = arith.constant 72 : index
    %c0_196 = arith.constant 0 : index
    %146 = vector.load %arg1[%c0_194, %c0_195, %c72, %c0_196] : memref<1x2x112x768xbf16, #tpu.memory_space<vmem>>, vector<1x1x32x768xbf16>
    %147 = vector.shape_cast %146 : vector<1x1x32x768xbf16> to vector<32x768xbf16>
    %c0_197 = arith.constant 0 : index
    %c0_198 = arith.constant 0 : index
    %148 = vector.load %arg7[%c0_197, %c0_198] : memref<32x128xf32, #tpu.memory_space<vmem>>, vector<32x128xf32>
    %c18 = arith.constant 18 : index
    %c0_199 = arith.constant 0 : index
    %c0_200 = arith.constant 0 : index
    %149 = vector.load %arg2[%c18, %c0_199, %c0_200] : memref<21x768x128xbf16, #tpu.memory_space<vmem>>, vector<1x768x128xbf16>
    %150 = vector.shape_cast %149 : vector<1x768x128xbf16> to vector<768x128xbf16>
    %cst_201 = arith.constant dense<0.000000e+00> : vector<32x128xf32>
    %151 = tpu.matmul %147, %150, %cst_201 {dimension_numbers = #tpu.dot_dimension_numbers<[1], [0], [0], [1], [0, 0, 1, 1], [], []>} : vector<32x768xbf16>, vector<768x128xbf16>, vector<32x128xf32> -> vector<32x128xf32>
    %152 = arith.addf %148, %151 : vector<32x128xf32>
    %c0_202 = arith.constant 0 : index
    %c0_203 = arith.constant 0 : index
    %153 = vector.load %arg7[%c0_202, %c0_203] : memref<32x128xf32, #tpu.memory_space<vmem>>, vector<32x128xf32>
    tpu.vector_store %arg7[%c0_202, %c0_203], %152 {strides = array<i32>} : memref<32x128xf32, #tpu.memory_space<vmem>>, vector<32x128xf32>,
    %c0_204 = arith.constant 0 : index
    %c1_205 = arith.constant 1 : index
    %c72_206 = arith.constant 72 : index
    %c0_207 = arith.constant 0 : index
    %154 = vector.load %arg1[%c0_204, %c1_205, %c72_206, %c0_207] : memref<1x2x112x768xbf16, #tpu.memory_space<vmem>>, vector<1x1x32x768xbf16>
    %155 = vector.shape_cast %154 : vector<1x1x32x768xbf16> to vector<32x768xbf16>
    %c0_208 = arith.constant 0 : index
    %c0_209 = arith.constant 0 : index
    %156 = vector.load %arg7[%c0_208, %c0_209] : memref<32x128xf32, #tpu.memory_space<vmem>>, vector<32x128xf32>
    %c19 = arith.constant 19 : index
    %c0_210 = arith.constant 0 : index
    %c0_211 = arith.constant 0 : index
    %157 = vector.load %arg2[%c19, %c0_210, %c0_211] : memref<21x768x128xbf16, #tpu.memory_space<vmem>>, vector<1x768x128xbf16>
    %158 = vector.shape_cast %157 : vector<1x768x128xbf16> to vector<768x128xbf16>
    %cst_212 = arith.constant dense<0.000000e+00> : vector<32x128xf32>
    %159 = tpu.matmul %155, %158, %cst_212 {dimension_numbers = #tpu.dot_dimension_numbers<[1], [0], [0], [1], [0, 0, 1, 1], [], []>} : vector<32x768xbf16>, vector<768x128xbf16>, vector<32x128xf32> -> vector<32x128xf32>
    %160 = arith.addf %156, %159 : vector<32x128xf32>
    %c0_213 = arith.constant 0 : index
    %c0_214 = arith.constant 0 : index
    %161 = vector.load %arg7[%c0_213, %c0_214] : memref<32x128xf32, #tpu.memory_space<vmem>>, vector<32x128xf32>
    tpu.vector_store %arg7[%c0_213, %c0_214], %160 {strides = array<i32>} : memref<32x128xf32, #tpu.memory_space<vmem>>, vector<32x128xf32>,
    %c0_215 = arith.constant 0 : index
    %c0_216 = arith.constant 0 : index
    %c80 = arith.constant 80 : index
    %c0_217 = arith.constant 0 : index
    %162 = vector.load %arg1[%c0_215, %c0_216, %c80, %c0_217] : memref<1x2x112x768xbf16, #tpu.memory_space<vmem>>, vector<1x1x32x768xbf16>
    %163 = vector.shape_cast %162 : vector<1x1x32x768xbf16> to vector<32x768xbf16>
    %c0_218 = arith.constant 0 : index
    %c0_219 = arith.constant 0 : index
    %164 = vector.load %arg7[%c0_218, %c0_219] : memref<32x128xf32, #tpu.memory_space<vmem>>, vector<32x128xf32>
    %c20 = arith.constant 20 : index
    %c0_220 = arith.constant 0 : index
    %c0_221 = arith.constant 0 : index
    %165 = vector.load %arg2[%c20, %c0_220, %c0_221] : memref<21x768x128xbf16, #tpu.memory_space<vmem>>, vector<1x768x128xbf16>
    %166 = vector.shape_cast %165 : vector<1x768x128xbf16> to vector<768x128xbf16>
    %cst_222 = arith.constant dense<0.000000e+00> : vector<32x128xf32>
    %167 = tpu.matmul %163, %166, %cst_222 {dimension_numbers = #tpu.dot_dimension_numbers<[1], [0], [0], [1], [0, 0, 1, 1], [], []>} : vector<32x768xbf16>, vector<768x128xbf16>, vector<32x128xf32> -> vector<32x128xf32>
    %168 = arith.addf %164, %167 : vector<32x128xf32>
    %c0_223 = arith.constant 0 : index
    %c0_224 = arith.constant 0 : index
    %169 = vector.load %arg7[%c0_223, %c0_224] : memref<32x128xf32, #tpu.memory_space<vmem>>, vector<32x128xf32>
    tpu.vector_store %arg7[%c0_223, %c0_224], %168 {strides = array<i32>} : memref<32x128xf32, #tpu.memory_space<vmem>>, vector<32x128xf32>,
    %c0_225 = arith.constant 0 : index
    %c0_226 = arith.constant 0 : index
    %170 = vector.load %arg7[%c0_225, %c0_226] : memref<32x128xf32, #tpu.memory_space<vmem>>, vector<32x128xf32>
    %c0_227 = arith.constant 0 : index
    %c0_228 = arith.constant 0 : index
    %171 = vector.load %arg3[%c0_227, %c0_228] : memref<1x128xf32, #tpu.memory_space<vmem>>, vector<1x128xf32>
    %172 = vector.broadcast %171 : vector<1x128xf32> to vector<32x128xf32>
    %173 = arith.mulf %170, %172 : vector<32x128xf32>
    %c0_229 = arith.constant 0 : index
    %c0_230 = arith.constant 0 : index
    %174 = vector.load %arg4[%c0_229, %c0_230] : memref<1x128xf32, #tpu.memory_space<vmem>>, vector<1x128xf32>
    %175 = vector.broadcast %174 : vector<1x128xf32> to vector<32x128xf32>
    %176 = arith.addf %173, %175 : vector<32x128xf32>
    %cst_231 = arith.constant 0.000000e+00 : f32
    %cst_232 = arith.constant 2.000000e+01 : f32
    %177 = vector.broadcast %cst_231 : f32 to vector<32x128xf32>
    %178 = arith.maximumf %177, %176 : vector<32x128xf32>
    %179 = vector.broadcast %cst_232 : f32 to vector<32x128xf32>
    %180 = arith.minimumf %179, %178 : vector<32x128xf32>
    %c0_233 = arith.constant 0 : index
    %c0_234 = arith.constant 0 : index
    %c0_235 = arith.constant 0 : index
    %181 = vector.load %arg5[%c0_233, %c0_234, %c0_235] : memref<1x32x1xf32, #tpu.memory_space<vmem>>, vector<1x32x1xf32>
    %182 = vector.shape_cast %181 : vector<1x32x1xf32> to vector<32x1xf32>
    %183 = vector.broadcast %182 : vector<32x1xf32> to vector<32x128xf32>
    %184 = arith.mulf %180, %183 : vector<32x128xf32>
    %c0_236 = arith.constant 0 : index
    %c0_237 = arith.constant 0 : index
    %c0_238 = arith.constant 0 : index
    %185 = vector.load %arg6[%c0_236, %c0_237, %c0_238] : memref<1x32x128xf32, #tpu.memory_space<vmem>>, vector<1x32x128xf32>
    %186 = vector.shape_cast %185 : vector<1x32x128xf32> to vector<32x128xf32>
    %187 = vector.shape_cast %184 : vector<32x128xf32> to vector<1x32x128xf32>
    tpu.vector_store %arg6[%c0_236, %c0_237, %c0_238], %187 {strides = array<i32>} : memref<1x32x128xf32, #tpu.memory_space<vmem>>, vector<1x32x128xf32>,
    return
  }
  func.func @transform_0(%arg0: i32) -> (i32, i32, i32, i32) {
    %c0_i32 = arith.constant 0 : i32
    %c0_i32_0 = arith.constant 0 : i32
    %c0_i32_1 = arith.constant 0 : i32
    %c0_i32_2 = arith.constant 0 : i32
    return %arg0, %c0_i32, %c0_i32_0, %c0_i32_1 : i32, i32, i32, i32
  }
  func.func @transform_1(%arg0: i32) -> (i32, i32, i32) {
    %c0_i32 = arith.constant 0 : i32
    %c0_i32_0 = arith.constant 0 : i32
    %c0_i32_1 = arith.constant 0 : i32
    %c0_i32_2 = arith.constant 0 : i32
    return %c0_i32, %c0_i32_0, %c0_i32_1 : i32, i32, i32
  }
  func.func @transform_2(%arg0: i32) -> (i32, i32) {
    %c0_i32 = arith.constant 0 : i32
    %c0_i32_0 = arith.constant 0 : i32
    %c0_i32_1 = arith.constant 0 : i32
    return %c0_i32, %c0_i32_0 : i32, i32
  }
  func.func @transform_3(%arg0: i32) -> (i32, i32) {
    %c0_i32 = arith.constant 0 : i32
    %c0_i32_0 = arith.constant 0 : i32
    %c0_i32_1 = arith.constant 0 : i32
    return %c0_i32, %c0_i32_0 : i32, i32
  }
  func.func @transform_4(%arg0: i32) -> (i32, i32, i32) {
    %c0_i32 = arith.constant 0 : i32
    %c0_i32_0 = arith.constant 0 : i32
    %c0_i32_1 = arith.constant 0 : i32
    return %arg0, %c0_i32, %c0_i32_0 : i32, i32, i32
  }
  func.func @transform_5(%arg0: i32) -> (i32, i32, i32) {
    %c0_i32 = arith.constant 0 : i32
    %c0_i32_0 = arith.constant 0 : i32
    %c0_i32_1 = arith.constant 0 : i32
    return %arg0, %c0_i32, %c0_i32_0 : i32, i32, i32
  }
}

module attributes {stable_mosaic.version = 11 : i64} {
  func.func @_gate_kernel(%arg0: i32, %arg1: memref<16x256xf32, #tpu.memory_space<vmem>>, %arg2: memref<1x256xf32, #tpu.memory_space<vmem>>, %arg3: memref<1x256xf32, #tpu.memory_space<vmem>>, %arg4: memref<256x384xbf16, #tpu.memory_space<vmem>>, %arg5: memref<1x384xf32, #tpu.memory_space<vmem>>, %arg6: memref<16x384xf32, #tpu.memory_space<vmem>>) attributes {dimension_semantics = [#tpu.dimension_semantics<parallel>], iteration_bounds = array<i64: 1>, scalar_prefetch = 0 : i64, scratch_operands = 0 : i64, tpu.core_type = #tpu.core_type<tc>, window_params = [{transform_indices = @transform_0, window_bounds = array<i64: 16, 256>}, {pipeline_mode = #tpu.pipeline_mode<synchronous>, transform_indices = @transform_1, window_bounds = array<i64: 1, 256>}, {pipeline_mode = #tpu.pipeline_mode<synchronous>, transform_indices = @transform_2, window_bounds = array<i64: 1, 256>}, {pipeline_mode = #tpu.pipeline_mode<synchronous>, transform_indices = @transform_3, window_bounds = array<i64: 256, 384>}, {pipeline_mode = #tpu.pipeline_mode<synchronous>, transform_indices = @transform_4, window_bounds = array<i64: 1, 384>}, {transform_indices = @transform_5, window_bounds = array<i64: 16, 384>}]} {
    %c0 = arith.constant 0 : index
    %c0_0 = arith.constant 0 : index
    %0 = vector.load %arg1[%c0, %c0_0] : memref<16x256xf32, #tpu.memory_space<vmem>>, vector<16x256xf32>
    %c0_1 = arith.constant 0 : index
    %c0_2 = arith.constant 0 : index
    %1 = vector.load %arg2[%c0_1, %c0_2] : memref<1x256xf32, #tpu.memory_space<vmem>>, vector<1x256xf32>
    %2 = vector.broadcast %1 : vector<1x256xf32> to vector<16x256xf32>
    %3 = arith.mulf %0, %2 : vector<16x256xf32>
    %c0_3 = arith.constant 0 : index
    %c0_4 = arith.constant 0 : index
    %4 = vector.load %arg3[%c0_3, %c0_4] : memref<1x256xf32, #tpu.memory_space<vmem>>, vector<1x256xf32>
    %5 = vector.broadcast %4 : vector<1x256xf32> to vector<16x256xf32>
    %6 = arith.addf %3, %5 : vector<16x256xf32>
    %cst = arith.constant 0.000000e+00 : f32
    %7 = vector.broadcast %cst : f32 to vector<16x256xf32>
    %8 = arith.maximumf %6, %7 : vector<16x256xf32>
    %9 = arith.truncf %8 : vector<16x256xf32> to vector<16x256xbf16>
    %c0_5 = arith.constant 0 : index
    %c0_6 = arith.constant 0 : index
    %10 = vector.load %arg4[%c0_5, %c0_6] : memref<256x384xbf16, #tpu.memory_space<vmem>>, vector<256x384xbf16>
    %cst_7 = arith.constant dense<0.000000e+00> : vector<16x384xf32>
    %11 = tpu.matmul %9, %10, %cst_7 {dimension_numbers = #tpu.dot_dimension_numbers<[1], [0], [0], [1], [0, 0, 1, 1], [], []>} : vector<16x256xbf16>, vector<256x384xbf16>, vector<16x384xf32> -> vector<16x384xf32>
    %c0_8 = arith.constant 0 : index
    %c0_9 = arith.constant 0 : index
    %12 = vector.load %arg5[%c0_8, %c0_9] : memref<1x384xf32, #tpu.memory_space<vmem>>, vector<1x384xf32>
    %13 = vector.broadcast %12 : vector<1x384xf32> to vector<16x384xf32>
    %14 = arith.addf %11, %13 : vector<16x384xf32>
    %c0_10 = arith.constant 0 : index
    %c0_11 = arith.constant 0 : index
    %15 = vector.load %arg6[%c0_10, %c0_11] : memref<16x384xf32, #tpu.memory_space<vmem>>, vector<16x384xf32>
    tpu.vector_store %arg6[%c0_10, %c0_11], %14 {strides = array<i32>} : memref<16x384xf32, #tpu.memory_space<vmem>>, vector<16x384xf32>,
    return
  }
  func.func @transform_0(%arg0: i32) -> (i32, i32) {
    %c0_i32 = arith.constant 0 : i32
    %c0_i32_0 = arith.constant 0 : i32
    return %arg0, %c0_i32 : i32, i32
  }
  func.func @transform_1(%arg0: i32) -> (i32, i32) {
    %c0_i32 = arith.constant 0 : i32
    %c0_i32_0 = arith.constant 0 : i32
    %c0_i32_1 = arith.constant 0 : i32
    return %c0_i32, %c0_i32_0 : i32, i32
  }
  func.func @transform_2(%arg0: i32) -> (i32, i32) {
    %c0_i32 = arith.constant 0 : i32
    %c0_i32_0 = arith.constant 0 : i32
    %c0_i32_1 = arith.constant 0 : i32
    return %c0_i32, %c0_i32_0 : i32, i32
  }
  func.func @transform_3(%arg0: i32) -> (i32, i32) {
    %c0_i32 = arith.constant 0 : i32
    %c0_i32_0 = arith.constant 0 : i32
    %c0_i32_1 = arith.constant 0 : i32
    return %c0_i32, %c0_i32_0 : i32, i32
  }
  func.func @transform_4(%arg0: i32) -> (i32, i32) {
    %c0_i32 = arith.constant 0 : i32
    %c0_i32_0 = arith.constant 0 : i32
    %c0_i32_1 = arith.constant 0 : i32
    return %c0_i32, %c0_i32_0 : i32, i32
  }
  func.func @transform_5(%arg0: i32) -> (i32, i32) {
    %c0_i32 = arith.constant 0 : i32
    %c0_i32_0 = arith.constant 0 : i32
    return %arg0, %c0_i32 : i32, i32
  }
}

module attributes {stable_mosaic.version = 11 : i64} {
  func.func @_gru_kernel(%arg0: i32, %arg1: i32, %arg2: memref<8x2x384xf32, #tpu.memory_space<vmem>>, %arg3: memref<8x2x384xf32, #tpu.memory_space<vmem>>, %arg4: memref<8x2x1xf32, #tpu.memory_space<vmem>>, %arg5: memref<8x2x1xf32, #tpu.memory_space<vmem>>, %arg6: memref<128x384xbf16, #tpu.memory_space<vmem>>, %arg7: memref<1x384xf32, #tpu.memory_space<vmem>>, %arg8: memref<8x2x128xf32, #tpu.memory_space<vmem>>, %arg9: memref<8x2x128xf32, #tpu.memory_space<vmem>>, %arg10: memref<2x128xf32, #tpu.memory_space<vmem>>) attributes {dimension_semantics = [#tpu.dimension_semantics<parallel>, #tpu.dimension_semantics<arbitrary>], iteration_bounds = array<i64: 1, 1>, scalar_prefetch = 0 : i64, scratch_operands = 1 : i64, tpu.core_type = #tpu.core_type<tc>, window_params = [{transform_indices = @transform_0, window_bounds = array<i64: 8, 2, 384>}, {transform_indices = @transform_1, window_bounds = array<i64: 8, 2, 384>}, {transform_indices = @transform_2, window_bounds = array<i64: 8, 2, 1>}, {transform_indices = @transform_3, window_bounds = array<i64: 8, 2, 1>}, {pipeline_mode = #tpu.pipeline_mode<synchronous>, transform_indices = @transform_4, window_bounds = array<i64: 128, 384>}, {pipeline_mode = #tpu.pipeline_mode<synchronous>, transform_indices = @transform_5, window_bounds = array<i64: 1, 384>}, {transform_indices = @transform_6, window_bounds = array<i64: 8, 2, 128>}, {transform_indices = @transform_7, window_bounds = array<i64: 8, 2, 128>}]} {
    %c0_i32 = arith.constant 0 : i32
    %0 = arith.cmpi eq, %arg1, %c0_i32 : i32
    %1 = arith.extui %0 : i1 to i32
    %c0_i32_0 = arith.constant 0 : i32
    %2 = arith.cmpi ne, %1, %c0_i32_0 : i32
    scf.if %2 {
      %cst_234 = arith.constant 0.000000e+00 : f32
      %620 = vector.broadcast %cst_234 : f32 to vector<2x128xf32>
      %c0_235 = arith.constant 0 : index
      %c0_236 = arith.constant 0 : index
      %621 = vector.load %arg10[%c0_235, %c0_236] : memref<2x128xf32, #tpu.memory_space<vmem>>, vector<2x128xf32>
      tpu.vector_store %arg10[%c0_235, %c0_236], %620 {strides = array<i32>} : memref<2x128xf32, #tpu.memory_space<vmem>>, vector<2x128xf32>,
    } else {
    }
    %3 = tpu.iota {dimensions = array<i32: 1>} : vector<1x128xi32>
    %c32_i32 = arith.constant 32 : i32
    %4 = vector.broadcast %c32_i32 : i32 to vector<1x128xi32>
    %5 = arith.cmpi slt, %3, %4 : vector<1x128xi32>
    %6 = arith.extui %5 : vector<1x128xi1> to vector<1x128xi32>
    %7 = arith.sitofp %6 : vector<1x128xi32> to vector<1x128xf32>
    %c32_i32_1 = arith.constant 32 : i32
    %8 = vector.broadcast %c32_i32_1 : i32 to vector<1x128xi32>
    %9 = arith.cmpi sge, %3, %8 : vector<1x128xi32>
    %c64_i32 = arith.constant 64 : i32
    %10 = vector.broadcast %c64_i32 : i32 to vector<1x128xi32>
    %11 = arith.cmpi slt, %3, %10 : vector<1x128xi32>
    %12 = arith.andi %9, %11 : vector<1x128xi1>
    %13 = arith.extui %12 : vector<1x128xi1> to vector<1x128xi32>
    %14 = arith.sitofp %13 : vector<1x128xi32> to vector<1x128xf32>
    %15 = tpu.iota {dimensions = array<i32: 1>} : vector<1x384xi32>
    %c128_i32 = arith.constant 128 : i32
    %c0_i32_2 = arith.constant 0 : i32
    %16 = arith.cmpi eq, %c128_i32, %c0_i32_2 : i32
    %c1_i32 = arith.constant 1 : i32
    %17 = arith.select %16, %c1_i32, %c128_i32 : i32
    %18 = vector.broadcast %17 : i32 to vector<1x384xi32>
    %19 = arith.remsi %15, %18 : vector<1x384xi32>
    %c0_i32_3 = arith.constant 0 : i32
    %20 = vector.broadcast %c0_i32_3 : i32 to vector<1x384xi32>
    %21 = arith.cmpi ne, %19, %20 : vector<1x384xi32>
    %c0_i32_4 = arith.constant 0 : i32
    %22 = vector.broadcast %c0_i32_4 : i32 to vector<1x384xi32>
    %23 = arith.cmpi slt, %19, %22 : vector<1x384xi32>
    %c0_i32_5 = arith.constant 0 : i32
    %24 = arith.cmpi slt, %17, %c0_i32_5 : i32
    %25 = vector.broadcast %24 : i1 to vector<1x384xi1>
    %26 = vector.broadcast %25 : vector<1x384xi1> to vector<1x384xi1>
    %27 = arith.xori %23, %26 : vector<1x384xi1>
    %28 = arith.andi %27, %21 : vector<1x384xi1>
    %29 = vector.broadcast %17 : i32 to vector<1x384xi32>
    %30 = arith.addi %19, %29 : vector<1x384xi32>
    %31 = arith.select %28, %30, %19 : vector<1x384xi1>, vector<1x384xi32>
    %c32_i32_6 = arith.constant 32 : i32
    %32 = vector.broadcast %c32_i32_6 : i32 to vector<1x384xi32>
    %33 = arith.cmpi slt, %31, %32 : vector<1x384xi32>
    %34 = arith.extui %33 : vector<1x384xi1> to vector<1x384xi32>
    %35 = arith.sitofp %34 : vector<1x384xi32> to vector<1x384xf32>
    %c32_i32_7 = arith.constant 32 : i32
    %36 = vector.broadcast %c32_i32_7 : i32 to vector<1x384xi32>
    %37 = arith.cmpi sge, %31, %36 : vector<1x384xi32>
    %c64_i32_8 = arith.constant 64 : i32
    %38 = vector.broadcast %c64_i32_8 : i32 to vector<1x384xi32>
    %39 = arith.cmpi slt, %31, %38 : vector<1x384xi32>
    %40 = arith.andi %37, %39 : vector<1x384xi1>
    %41 = arith.extui %40 : vector<1x384xi1> to vector<1x384xi32>
    %42 = arith.sitofp %41 : vector<1x384xi32> to vector<1x384xf32>
    %c0 = arith.constant 0 : index
    %c0_9 = arith.constant 0 : index
    %43 = vector.load %arg7[%c0, %c0_9] : memref<1x384xf32, #tpu.memory_space<vmem>>, vector<1x384xf32>
    %c0_10 = arith.constant 0 : index
    %c0_11 = arith.constant 0 : index
    %44 = vector.load %arg10[%c0_10, %c0_11] : memref<2x128xf32, #tpu.memory_space<vmem>>, vector<2x128xf32>
    %45 = arith.truncf %44 : vector<2x128xf32> to vector<2x128xbf16>
    %c0_12 = arith.constant 0 : index
    %c0_13 = arith.constant 0 : index
    %46 = vector.load %arg6[%c0_12, %c0_13] : memref<128x384xbf16, #tpu.memory_space<vmem>>, vector<128x384xbf16>
    %cst = arith.constant dense<0.000000e+00> : vector<2x384xf32>
    %47 = tpu.matmul %45, %46, %cst {dimension_numbers = #tpu.dot_dimension_numbers<[1], [0], [0], [1], [0, 0, 1, 1], [], []>} : vector<2x128xbf16>, vector<128x384xbf16>, vector<2x384xf32> -> vector<2x384xf32>
    %48 = vector.broadcast %43 : vector<1x384xf32> to vector<2x384xf32>
    %49 = arith.addf %47, %48 : vector<2x384xf32>
    %c0_14 = arith.constant 0 : index
    %c0_15 = arith.constant 0 : index
    %c0_16 = arith.constant 0 : index
    %50 = vector.load %arg2[%c0_14, %c0_15, %c0_16] : memref<8x2x384xf32, #tpu.memory_space<vmem>>, vector<1x2x384xf32>
    %51 = vector.shape_cast %50 : vector<1x2x384xf32> to vector<2x384xf32>
    %52 = vector.broadcast %35 : vector<1x384xf32> to vector<2x384xf32>
    %53 = arith.mulf %51, %52 : vector<2x384xf32>
    %c7 = arith.constant 7 : index
    %c0_17 = arith.constant 0 : index
    %c0_18 = arith.constant 0 : index
    %54 = vector.load %arg3[%c7, %c0_17, %c0_18] : memref<8x2x384xf32, #tpu.memory_space<vmem>>, vector<1x2x384xf32>
    %55 = vector.shape_cast %54 : vector<1x2x384xf32> to vector<2x384xf32>
    %56 = vector.broadcast %42 : vector<1x384xf32> to vector<2x384xf32>
    %57 = arith.mulf %55, %56 : vector<2x384xf32>
    %58 = arith.addf %53, %57 : vector<2x384xf32>
    %59 = vector.extract_strided_slice %58 {offsets = [0, 0], sizes = [2, 128], strides = [1, 1]} : vector<2x384xf32> to vector<2x128xf32>
    %60 = vector.extract_strided_slice %49 {offsets = [0, 0], sizes = [2, 128], strides = [1, 1]} : vector<2x384xf32> to vector<2x128xf32>
    %61 = arith.addf %59, %60 : vector<2x128xf32>
    %62 = arith.negf %61 : vector<2x128xf32>
    %63 = math.exp %62 : vector<2x128xf32>
    %cst_19 = arith.constant 1.000000e+00 : f32
    %64 = vector.broadcast %cst_19 : f32 to vector<2x128xf32>
    %65 = arith.addf %64, %63 : vector<2x128xf32>
    %66 = arith.divf %64, %65 : vector<2x128xf32>
    %67 = vector.extract_strided_slice %58 {offsets = [0, 128], sizes = [2, 128], strides = [1, 1]} : vector<2x384xf32> to vector<2x128xf32>
    %68 = vector.extract_strided_slice %49 {offsets = [0, 128], sizes = [2, 128], strides = [1, 1]} : vector<2x384xf32> to vector<2x128xf32>
    %69 = arith.addf %67, %68 : vector<2x128xf32>
    %70 = arith.negf %69 : vector<2x128xf32>
    %71 = math.exp %70 : vector<2x128xf32>
    %cst_20 = arith.constant 1.000000e+00 : f32
    %72 = vector.broadcast %cst_20 : f32 to vector<2x128xf32>
    %73 = arith.addf %72, %71 : vector<2x128xf32>
    %74 = arith.divf %72, %73 : vector<2x128xf32>
    %75 = vector.extract_strided_slice %58 {offsets = [0, 256], sizes = [2, 128], strides = [1, 1]} : vector<2x384xf32> to vector<2x128xf32>
    %76 = vector.extract_strided_slice %49 {offsets = [0, 256], sizes = [2, 128], strides = [1, 1]} : vector<2x384xf32> to vector<2x128xf32>
    %77 = arith.mulf %66, %76 : vector<2x128xf32>
    %78 = arith.addf %75, %77 : vector<2x128xf32>
    %79 = math.tanh %78 : vector<2x128xf32>
    %cst_21 = arith.constant 1.000000e+00 : f32
    %80 = vector.broadcast %cst_21 : f32 to vector<2x128xf32>
    %81 = arith.subf %80, %74 : vector<2x128xf32>
    %82 = arith.mulf %81, %79 : vector<2x128xf32>
    %83 = arith.mulf %74, %44 : vector<2x128xf32>
    %84 = arith.addf %82, %83 : vector<2x128xf32>
    %c0_22 = arith.constant 0 : index
    %c0_23 = arith.constant 0 : index
    %c0_24 = arith.constant 0 : index
    %85 = vector.load %arg4[%c0_22, %c0_23, %c0_24] : memref<8x2x1xf32, #tpu.memory_space<vmem>>, vector<1x2x1xf32>
    %86 = vector.shape_cast %85 : vector<1x2x1xf32> to vector<2x1xf32>
    %c7_25 = arith.constant 7 : index
    %c0_26 = arith.constant 0 : index
    %c0_27 = arith.constant 0 : index
    %87 = vector.load %arg5[%c7_25, %c0_26, %c0_27] : memref<8x2x1xf32, #tpu.memory_space<vmem>>, vector<1x2x1xf32>
    %88 = vector.shape_cast %87 : vector<1x2x1xf32> to vector<2x1xf32>
    %89 = vector.broadcast %86 : vector<2x1xf32> to vector<2x128xf32>
    %90 = vector.broadcast %7 : vector<1x128xf32> to vector<2x128xf32>
    %91 = arith.mulf %89, %90 : vector<2x128xf32>
    %92 = vector.broadcast %88 : vector<2x1xf32> to vector<2x128xf32>
    %93 = vector.broadcast %14 : vector<1x128xf32> to vector<2x128xf32>
    %94 = arith.mulf %92, %93 : vector<2x128xf32>
    %95 = arith.addf %91, %94 : vector<2x128xf32>
    %96 = arith.mulf %95, %84 : vector<2x128xf32>
    %cst_28 = arith.constant 1.000000e+00 : f32
    %97 = vector.broadcast %cst_28 : f32 to vector<2x128xf32>
    %98 = arith.subf %97, %95 : vector<2x128xf32>
    %99 = arith.mulf %98, %44 : vector<2x128xf32>
    %100 = arith.addf %96, %99 : vector<2x128xf32>
    %c0_29 = arith.constant 0 : index
    %c0_30 = arith.constant 0 : index
    %101 = vector.load %arg10[%c0_29, %c0_30] : memref<2x128xf32, #tpu.memory_space<vmem>>, vector<2x128xf32>
    tpu.vector_store %arg10[%c0_29, %c0_30], %100 {strides = array<i32>} : memref<2x128xf32, #tpu.memory_space<vmem>>, vector<2x128xf32>,
    %102 = vector.broadcast %86 : vector<2x1xf32> to vector<2x128xf32>
    %103 = vector.broadcast %7 : vector<1x128xf32> to vector<2x128xf32>
    %104 = arith.mulf %102, %103 : vector<2x128xf32>
    %105 = arith.mulf %104, %84 : vector<2x128xf32>
    %c0_31 = arith.constant 0 : index
    %c0_32 = arith.constant 0 : index
    %c0_33 = arith.constant 0 : index
    %106 = vector.load %arg8[%c0_31, %c0_32, %c0_33] : memref<8x2x128xf32, #tpu.memory_space<vmem>>, vector<1x2x128xf32>
    %107 = vector.shape_cast %106 : vector<1x2x128xf32> to vector<2x128xf32>
    %108 = vector.shape_cast %105 : vector<2x128xf32> to vector<1x2x128xf32>
    tpu.vector_store %arg8[%c0_31, %c0_32, %c0_33], %108 {strides = array<i32>} : memref<8x2x128xf32, #tpu.memory_space<vmem>>, vector<1x2x128xf32>,
    %109 = vector.broadcast %88 : vector<2x1xf32> to vector<2x128xf32>
    %110 = vector.broadcast %14 : vector<1x128xf32> to vector<2x128xf32>
    %111 = arith.mulf %109, %110 : vector<2x128xf32>
    %112 = arith.mulf %111, %84 : vector<2x128xf32>
    %c7_34 = arith.constant 7 : index
    %c0_35 = arith.constant 0 : index
    %c0_36 = arith.constant 0 : index
    %113 = vector.load %arg9[%c7_34, %c0_35, %c0_36] : memref<8x2x128xf32, #tpu.memory_space<vmem>>, vector<1x2x128xf32>
    %114 = vector.shape_cast %113 : vector<1x2x128xf32> to vector<2x128xf32>
    %115 = vector.shape_cast %112 : vector<2x128xf32> to vector<1x2x128xf32>
    tpu.vector_store %arg9[%c7_34, %c0_35, %c0_36], %115 {strides = array<i32>} : memref<8x2x128xf32, #tpu.memory_space<vmem>>, vector<1x2x128xf32>,
    %c0_37 = arith.constant 0 : index
    %c0_38 = arith.constant 0 : index
    %116 = vector.load %arg10[%c0_37, %c0_38] : memref<2x128xf32, #tpu.memory_space<vmem>>, vector<2x128xf32>
    %117 = arith.truncf %116 : vector<2x128xf32> to vector<2x128xbf16>
    %c0_39 = arith.constant 0 : index
    %c0_40 = arith.constant 0 : index
    %118 = vector.load %arg6[%c0_39, %c0_40] : memref<128x384xbf16, #tpu.memory_space<vmem>>, vector<128x384xbf16>
    %cst_41 = arith.constant dense<0.000000e+00> : vector<2x384xf32>
    %119 = tpu.matmul %117, %118, %cst_41 {dimension_numbers = #tpu.dot_dimension_numbers<[1], [0], [0], [1], [0, 0, 1, 1], [], []>} : vector<2x128xbf16>, vector<128x384xbf16>, vector<2x384xf32> -> vector<2x384xf32>
    %120 = vector.broadcast %43 : vector<1x384xf32> to vector<2x384xf32>
    %121 = arith.addf %119, %120 : vector<2x384xf32>
    %c1 = arith.constant 1 : index
    %c0_42 = arith.constant 0 : index
    %c0_43 = arith.constant 0 : index
    %122 = vector.load %arg2[%c1, %c0_42, %c0_43] : memref<8x2x384xf32, #tpu.memory_space<vmem>>, vector<1x2x384xf32>
    %123 = vector.shape_cast %122 : vector<1x2x384xf32> to vector<2x384xf32>
    %124 = vector.broadcast %35 : vector<1x384xf32> to vector<2x384xf32>
    %125 = arith.mulf %123, %124 : vector<2x384xf32>
    %c6 = arith.constant 6 : index
    %c0_44 = arith.constant 0 : index
    %c0_45 = arith.constant 0 : index
    %126 = vector.load %arg3[%c6, %c0_44, %c0_45] : memref<8x2x384xf32, #tpu.memory_space<vmem>>, vector<1x2x384xf32>
    %127 = vector.shape_cast %126 : vector<1x2x384xf32> to vector<2x384xf32>
    %128 = vector.broadcast %42 : vector<1x384xf32> to vector<2x384xf32>
    %129 = arith.mulf %127, %128 : vector<2x384xf32>
    %130 = arith.addf %125, %129 : vector<2x384xf32>
    %131 = vector.extract_strided_slice %130 {offsets = [0, 0], sizes = [2, 128], strides = [1, 1]} : vector<2x384xf32> to vector<2x128xf32>
    %132 = vector.extract_strided_slice %121 {offsets = [0, 0], sizes = [2, 128], strides = [1, 1]} : vector<2x384xf32> to vector<2x128xf32>
    %133 = arith.addf %131, %132 : vector<2x128xf32>
    %134 = arith.negf %133 : vector<2x128xf32>
    %135 = math.exp %134 : vector<2x128xf32>
    %cst_46 = arith.constant 1.000000e+00 : f32
    %136 = vector.broadcast %cst_46 : f32 to vector<2x128xf32>
    %137 = arith.addf %136, %135 : vector<2x128xf32>
    %138 = arith.divf %136, %137 : vector<2x128xf32>
    %139 = vector.extract_strided_slice %130 {offsets = [0, 128], sizes = [2, 128], strides = [1, 1]} : vector<2x384xf32> to vector<2x128xf32>
    %140 = vector.extract_strided_slice %121 {offsets = [0, 128], sizes = [2, 128], strides = [1, 1]} : vector<2x384xf32> to vector<2x128xf32>
    %141 = arith.addf %139, %140 : vector<2x128xf32>
    %142 = arith.negf %141 : vector<2x128xf32>
    %143 = math.exp %142 : vector<2x128xf32>
    %cst_47 = arith.constant 1.000000e+00 : f32
    %144 = vector.broadcast %cst_47 : f32 to vector<2x128xf32>
    %145 = arith.addf %144, %143 : vector<2x128xf32>
    %146 = arith.divf %144, %145 : vector<2x128xf32>
    %147 = vector.extract_strided_slice %130 {offsets = [0, 256], sizes = [2, 128], strides = [1, 1]} : vector<2x384xf32> to vector<2x128xf32>
    %148 = vector.extract_strided_slice %121 {offsets = [0, 256], sizes = [2, 128], strides = [1, 1]} : vector<2x384xf32> to vector<2x128xf32>
    %149 = arith.mulf %138, %148 : vector<2x128xf32>
    %150 = arith.addf %147, %149 : vector<2x128xf32>
    %151 = math.tanh %150 : vector<2x128xf32>
    %cst_48 = arith.constant 1.000000e+00 : f32
    %152 = vector.broadcast %cst_48 : f32 to vector<2x128xf32>
    %153 = arith.subf %152, %146 : vector<2x128xf32>
    %154 = arith.mulf %153, %151 : vector<2x128xf32>
    %155 = arith.mulf %146, %116 : vector<2x128xf32>
    %156 = arith.addf %154, %155 : vector<2x128xf32>
    %c1_49 = arith.constant 1 : index
    %c0_50 = arith.constant 0 : index
    %c0_51 = arith.constant 0 : index
    %157 = vector.load %arg4[%c1_49, %c0_50, %c0_51] : memref<8x2x1xf32, #tpu.memory_space<vmem>>, vector<1x2x1xf32>
    %158 = vector.shape_cast %157 : vector<1x2x1xf32> to vector<2x1xf32>
    %c6_52 = arith.constant 6 : index
    %c0_53 = arith.constant 0 : index
    %c0_54 = arith.constant 0 : index
    %159 = vector.load %arg5[%c6_52, %c0_53, %c0_54] : memref<8x2x1xf32, #tpu.memory_space<vmem>>, vector<1x2x1xf32>
    %160 = vector.shape_cast %159 : vector<1x2x1xf32> to vector<2x1xf32>
    %161 = vector.broadcast %158 : vector<2x1xf32> to vector<2x128xf32>
    %162 = vector.broadcast %7 : vector<1x128xf32> to vector<2x128xf32>
    %163 = arith.mulf %161, %162 : vector<2x128xf32>
    %164 = vector.broadcast %160 : vector<2x1xf32> to vector<2x128xf32>
    %165 = vector.broadcast %14 : vector<1x128xf32> to vector<2x128xf32>
    %166 = arith.mulf %164, %165 : vector<2x128xf32>
    %167 = arith.addf %163, %166 : vector<2x128xf32>
    %168 = arith.mulf %167, %156 : vector<2x128xf32>
    %cst_55 = arith.constant 1.000000e+00 : f32
    %169 = vector.broadcast %cst_55 : f32 to vector<2x128xf32>
    %170 = arith.subf %169, %167 : vector<2x128xf32>
    %171 = arith.mulf %170, %116 : vector<2x128xf32>
    %172 = arith.addf %168, %171 : vector<2x128xf32>
    %c0_56 = arith.constant 0 : index
    %c0_57 = arith.constant 0 : index
    %173 = vector.load %arg10[%c0_56, %c0_57] : memref<2x128xf32, #tpu.memory_space<vmem>>, vector<2x128xf32>
    tpu.vector_store %arg10[%c0_56, %c0_57], %172 {strides = array<i32>} : memref<2x128xf32, #tpu.memory_space<vmem>>, vector<2x128xf32>,
    %174 = vector.broadcast %158 : vector<2x1xf32> to vector<2x128xf32>
    %175 = vector.broadcast %7 : vector<1x128xf32> to vector<2x128xf32>
    %176 = arith.mulf %174, %175 : vector<2x128xf32>
    %177 = arith.mulf %176, %156 : vector<2x128xf32>
    %c1_58 = arith.constant 1 : index
    %c0_59 = arith.constant 0 : index
    %c0_60 = arith.constant 0 : index
    %178 = vector.load %arg8[%c1_58, %c0_59, %c0_60] : memref<8x2x128xf32, #tpu.memory_space<vmem>>, vector<1x2x128xf32>
    %179 = vector.shape_cast %178 : vector<1x2x128xf32> to vector<2x128xf32>
    %180 = vector.shape_cast %177 : vector<2x128xf32> to vector<1x2x128xf32>
    tpu.vector_store %arg8[%c1_58, %c0_59, %c0_60], %180 {strides = array<i32>} : memref<8x2x128xf32, #tpu.memory_space<vmem>>, vector<1x2x128xf32>,
    %181 = vector.broadcast %160 : vector<2x1xf32> to vector<2x128xf32>
    %182 = vector.broadcast %14 : vector<1x128xf32> to vector<2x128xf32>
    %183 = arith.mulf %181, %182 : vector<2x128xf32>
    %184 = arith.mulf %183, %156 : vector<2x128xf32>
    %c6_61 = arith.constant 6 : index
    %c0_62 = arith.constant 0 : index
    %c0_63 = arith.constant 0 : index
    %185 = vector.load %arg9[%c6_61, %c0_62, %c0_63] : memref<8x2x128xf32, #tpu.memory_space<vmem>>, vector<1x2x128xf32>
    %186 = vector.shape_cast %185 : vector<1x2x128xf32> to vector<2x128xf32>
    %187 = vector.shape_cast %184 : vector<2x128xf32> to vector<1x2x128xf32>
    tpu.vector_store %arg9[%c6_61, %c0_62, %c0_63], %187 {strides = array<i32>} : memref<8x2x128xf32, #tpu.memory_space<vmem>>, vector<1x2x128xf32>,
    %c0_64 = arith.constant 0 : index
    %c0_65 = arith.constant 0 : index
    %188 = vector.load %arg10[%c0_64, %c0_65] : memref<2x128xf32, #tpu.memory_space<vmem>>, vector<2x128xf32>
    %189 = arith.truncf %188 : vector<2x128xf32> to vector<2x128xbf16>
    %c0_66 = arith.constant 0 : index
    %c0_67 = arith.constant 0 : index
    %190 = vector.load %arg6[%c0_66, %c0_67] : memref<128x384xbf16, #tpu.memory_space<vmem>>, vector<128x384xbf16>
    %cst_68 = arith.constant dense<0.000000e+00> : vector<2x384xf32>
    %191 = tpu.matmul %189, %190, %cst_68 {dimension_numbers = #tpu.dot_dimension_numbers<[1], [0], [0], [1], [0, 0, 1, 1], [], []>} : vector<2x128xbf16>, vector<128x384xbf16>, vector<2x384xf32> -> vector<2x384xf32>
    %192 = vector.broadcast %43 : vector<1x384xf32> to vector<2x384xf32>
    %193 = arith.addf %191, %192 : vector<2x384xf32>
    %c2 = arith.constant 2 : index
    %c0_69 = arith.constant 0 : index
    %c0_70 = arith.constant 0 : index
    %194 = vector.load %arg2[%c2, %c0_69, %c0_70] : memref<8x2x384xf32, #tpu.memory_space<vmem>>, vector<1x2x384xf32>
    %195 = vector.shape_cast %194 : vector<1x2x384xf32> to vector<2x384xf32>
    %196 = vector.broadcast %35 : vector<1x384xf32> to vector<2x384xf32>
    %197 = arith.mulf %195, %196 : vector<2x384xf32>
    %c5 = arith.constant 5 : index
    %c0_71 = arith.constant 0 : index
    %c0_72 = arith.constant 0 : index
    %198 = vector.load %arg3[%c5, %c0_71, %c0_72] : memref<8x2x384xf32, #tpu.memory_space<vmem>>, vector<1x2x384xf32>
    %199 = vector.shape_cast %198 : vector<1x2x384xf32> to vector<2x384xf32>
    %200 = vector.broadcast %42 : vector<1x384xf32> to vector<2x384xf32>
    %201 = arith.mulf %199, %200 : vector<2x384xf32>
    %202 = arith.addf %197, %201 : vector<2x384xf32>
    %203 = vector.extract_strided_slice %202 {offsets = [0, 0], sizes = [2, 128], strides = [1, 1]} : vector<2x384xf32> to vector<2x128xf32>
    %204 = vector.extract_strided_slice %193 {offsets = [0, 0], sizes = [2, 128], strides = [1, 1]} : vector<2x384xf32> to vector<2x128xf32>
    %205 = arith.addf %203, %204 : vector<2x128xf32>
    %206 = arith.negf %205 : vector<2x128xf32>
    %207 = math.exp %206 : vector<2x128xf32>
    %cst_73 = arith.constant 1.000000e+00 : f32
    %208 = vector.broadcast %cst_73 : f32 to vector<2x128xf32>
    %209 = arith.addf %208, %207 : vector<2x128xf32>
    %210 = arith.divf %208, %209 : vector<2x128xf32>
    %211 = vector.extract_strided_slice %202 {offsets = [0, 128], sizes = [2, 128], strides = [1, 1]} : vector<2x384xf32> to vector<2x128xf32>
    %212 = vector.extract_strided_slice %193 {offsets = [0, 128], sizes = [2, 128], strides = [1, 1]} : vector<2x384xf32> to vector<2x128xf32>
    %213 = arith.addf %211, %212 : vector<2x128xf32>
    %214 = arith.negf %213 : vector<2x128xf32>
    %215 = math.exp %214 : vector<2x128xf32>
    %cst_74 = arith.constant 1.000000e+00 : f32
    %216 = vector.broadcast %cst_74 : f32 to vector<2x128xf32>
    %217 = arith.addf %216, %215 : vector<2x128xf32>
    %218 = arith.divf %216, %217 : vector<2x128xf32>
    %219 = vector.extract_strided_slice %202 {offsets = [0, 256], sizes = [2, 128], strides = [1, 1]} : vector<2x384xf32> to vector<2x128xf32>
    %220 = vector.extract_strided_slice %193 {offsets = [0, 256], sizes = [2, 128], strides = [1, 1]} : vector<2x384xf32> to vector<2x128xf32>
    %221 = arith.mulf %210, %220 : vector<2x128xf32>
    %222 = arith.addf %219, %221 : vector<2x128xf32>
    %223 = math.tanh %222 : vector<2x128xf32>
    %cst_75 = arith.constant 1.000000e+00 : f32
    %224 = vector.broadcast %cst_75 : f32 to vector<2x128xf32>
    %225 = arith.subf %224, %218 : vector<2x128xf32>
    %226 = arith.mulf %225, %223 : vector<2x128xf32>
    %227 = arith.mulf %218, %188 : vector<2x128xf32>
    %228 = arith.addf %226, %227 : vector<2x128xf32>
    %c2_76 = arith.constant 2 : index
    %c0_77 = arith.constant 0 : index
    %c0_78 = arith.constant 0 : index
    %229 = vector.load %arg4[%c2_76, %c0_77, %c0_78] : memref<8x2x1xf32, #tpu.memory_space<vmem>>, vector<1x2x1xf32>
    %230 = vector.shape_cast %229 : vector<1x2x1xf32> to vector<2x1xf32>
    %c5_79 = arith.constant 5 : index
    %c0_80 = arith.constant 0 : index
    %c0_81 = arith.constant 0 : index
    %231 = vector.load %arg5[%c5_79, %c0_80, %c0_81] : memref<8x2x1xf32, #tpu.memory_space<vmem>>, vector<1x2x1xf32>
    %232 = vector.shape_cast %231 : vector<1x2x1xf32> to vector<2x1xf32>
    %233 = vector.broadcast %230 : vector<2x1xf32> to vector<2x128xf32>
    %234 = vector.broadcast %7 : vector<1x128xf32> to vector<2x128xf32>
    %235 = arith.mulf %233, %234 : vector<2x128xf32>
    %236 = vector.broadcast %232 : vector<2x1xf32> to vector<2x128xf32>
    %237 = vector.broadcast %14 : vector<1x128xf32> to vector<2x128xf32>
    %238 = arith.mulf %236, %237 : vector<2x128xf32>
    %239 = arith.addf %235, %238 : vector<2x128xf32>
    %240 = arith.mulf %239, %228 : vector<2x128xf32>
    %cst_82 = arith.constant 1.000000e+00 : f32
    %241 = vector.broadcast %cst_82 : f32 to vector<2x128xf32>
    %242 = arith.subf %241, %239 : vector<2x128xf32>
    %243 = arith.mulf %242, %188 : vector<2x128xf32>
    %244 = arith.addf %240, %243 : vector<2x128xf32>
    %c0_83 = arith.constant 0 : index
    %c0_84 = arith.constant 0 : index
    %245 = vector.load %arg10[%c0_83, %c0_84] : memref<2x128xf32, #tpu.memory_space<vmem>>, vector<2x128xf32>
    tpu.vector_store %arg10[%c0_83, %c0_84], %244 {strides = array<i32>} : memref<2x128xf32, #tpu.memory_space<vmem>>, vector<2x128xf32>,
    %246 = vector.broadcast %230 : vector<2x1xf32> to vector<2x128xf32>
    %247 = vector.broadcast %7 : vector<1x128xf32> to vector<2x128xf32>
    %248 = arith.mulf %246, %247 : vector<2x128xf32>
    %249 = arith.mulf %248, %228 : vector<2x128xf32>
    %c2_85 = arith.constant 2 : index
    %c0_86 = arith.constant 0 : index
    %c0_87 = arith.constant 0 : index
    %250 = vector.load %arg8[%c2_85, %c0_86, %c0_87] : memref<8x2x128xf32, #tpu.memory_space<vmem>>, vector<1x2x128xf32>
    %251 = vector.shape_cast %250 : vector<1x2x128xf32> to vector<2x128xf32>
    %252 = vector.shape_cast %249 : vector<2x128xf32> to vector<1x2x128xf32>
    tpu.vector_store %arg8[%c2_85, %c0_86, %c0_87], %252 {strides = array<i32>} : memref<8x2x128xf32, #tpu.memory_space<vmem>>, vector<1x2x128xf32>,
    %253 = vector.broadcast %232 : vector<2x1xf32> to vector<2x128xf32>
    %254 = vector.broadcast %14 : vector<1x128xf32> to vector<2x128xf32>
    %255 = arith.mulf %253, %254 : vector<2x128xf32>
    %256 = arith.mulf %255, %228 : vector<2x128xf32>
    %c5_88 = arith.constant 5 : index
    %c0_89 = arith.constant 0 : index
    %c0_90 = arith.constant 0 : index
    %257 = vector.load %arg9[%c5_88, %c0_89, %c0_90] : memref<8x2x128xf32, #tpu.memory_space<vmem>>, vector<1x2x128xf32>
    %258 = vector.shape_cast %257 : vector<1x2x128xf32> to vector<2x128xf32>
    %259 = vector.shape_cast %256 : vector<2x128xf32> to vector<1x2x128xf32>
    tpu.vector_store %arg9[%c5_88, %c0_89, %c0_90], %259 {strides = array<i32>} : memref<8x2x128xf32, #tpu.memory_space<vmem>>, vector<1x2x128xf32>,
    %c0_91 = arith.constant 0 : index
    %c0_92 = arith.constant 0 : index
    %260 = vector.load %arg10[%c0_91, %c0_92] : memref<2x128xf32, #tpu.memory_space<vmem>>, vector<2x128xf32>
    %261 = arith.truncf %260 : vector<2x128xf32> to vector<2x128xbf16>
    %c0_93 = arith.constant 0 : index
    %c0_94 = arith.constant 0 : index
    %262 = vector.load %arg6[%c0_93, %c0_94] : memref<128x384xbf16, #tpu.memory_space<vmem>>, vector<128x384xbf16>
    %cst_95 = arith.constant dense<0.000000e+00> : vector<2x384xf32>
    %263 = tpu.matmul %261, %262, %cst_95 {dimension_numbers = #tpu.dot_dimension_numbers<[1], [0], [0], [1], [0, 0, 1, 1], [], []>} : vector<2x128xbf16>, vector<128x384xbf16>, vector<2x384xf32> -> vector<2x384xf32>
    %264 = vector.broadcast %43 : vector<1x384xf32> to vector<2x384xf32>
    %265 = arith.addf %263, %264 : vector<2x384xf32>
    %c3 = arith.constant 3 : index
    %c0_96 = arith.constant 0 : index
    %c0_97 = arith.constant 0 : index
    %266 = vector.load %arg2[%c3, %c0_96, %c0_97] : memref<8x2x384xf32, #tpu.memory_space<vmem>>, vector<1x2x384xf32>
    %267 = vector.shape_cast %266 : vector<1x2x384xf32> to vector<2x384xf32>
    %268 = vector.broadcast %35 : vector<1x384xf32> to vector<2x384xf32>
    %269 = arith.mulf %267, %268 : vector<2x384xf32>
    %c4 = arith.constant 4 : index
    %c0_98 = arith.constant 0 : index
    %c0_99 = arith.constant 0 : index
    %270 = vector.load %arg3[%c4, %c0_98, %c0_99] : memref<8x2x384xf32, #tpu.memory_space<vmem>>, vector<1x2x384xf32>
    %271 = vector.shape_cast %270 : vector<1x2x384xf32> to vector<2x384xf32>
    %272 = vector.broadcast %42 : vector<1x384xf32> to vector<2x384xf32>
    %273 = arith.mulf %271, %272 : vector<2x384xf32>
    %274 = arith.addf %269, %273 : vector<2x384xf32>
    %275 = vector.extract_strided_slice %274 {offsets = [0, 0], sizes = [2, 128], strides = [1, 1]} : vector<2x384xf32> to vector<2x128xf32>
    %276 = vector.extract_strided_slice %265 {offsets = [0, 0], sizes = [2, 128], strides = [1, 1]} : vector<2x384xf32> to vector<2x128xf32>
    %277 = arith.addf %275, %276 : vector<2x128xf32>
    %278 = arith.negf %277 : vector<2x128xf32>
    %279 = math.exp %278 : vector<2x128xf32>
    %cst_100 = arith.constant 1.000000e+00 : f32
    %280 = vector.broadcast %cst_100 : f32 to vector<2x128xf32>
    %281 = arith.addf %280, %279 : vector<2x128xf32>
    %282 = arith.divf %280, %281 : vector<2x128xf32>
    %283 = vector.extract_strided_slice %274 {offsets = [0, 128], sizes = [2, 128], strides = [1, 1]} : vector<2x384xf32> to vector<2x128xf32>
    %284 = vector.extract_strided_slice %265 {offsets = [0, 128], sizes = [2, 128], strides = [1, 1]} : vector<2x384xf32> to vector<2x128xf32>
    %285 = arith.addf %283, %284 : vector<2x128xf32>
    %286 = arith.negf %285 : vector<2x128xf32>
    %287 = math.exp %286 : vector<2x128xf32>
    %cst_101 = arith.constant 1.000000e+00 : f32
    %288 = vector.broadcast %cst_101 : f32 to vector<2x128xf32>
    %289 = arith.addf %288, %287 : vector<2x128xf32>
    %290 = arith.divf %288, %289 : vector<2x128xf32>
    %291 = vector.extract_strided_slice %274 {offsets = [0, 256], sizes = [2, 128], strides = [1, 1]} : vector<2x384xf32> to vector<2x128xf32>
    %292 = vector.extract_strided_slice %265 {offsets = [0, 256], sizes = [2, 128], strides = [1, 1]} : vector<2x384xf32> to vector<2x128xf32>
    %293 = arith.mulf %282, %292 : vector<2x128xf32>
    %294 = arith.addf %291, %293 : vector<2x128xf32>
    %295 = math.tanh %294 : vector<2x128xf32>
    %cst_102 = arith.constant 1.000000e+00 : f32
    %296 = vector.broadcast %cst_102 : f32 to vector<2x128xf32>
    %297 = arith.subf %296, %290 : vector<2x128xf32>
    %298 = arith.mulf %297, %295 : vector<2x128xf32>
    %299 = arith.mulf %290, %260 : vector<2x128xf32>
    %300 = arith.addf %298, %299 : vector<2x128xf32>
    %c3_103 = arith.constant 3 : index
    %c0_104 = arith.constant 0 : index
    %c0_105 = arith.constant 0 : index
    %301 = vector.load %arg4[%c3_103, %c0_104, %c0_105] : memref<8x2x1xf32, #tpu.memory_space<vmem>>, vector<1x2x1xf32>
    %302 = vector.shape_cast %301 : vector<1x2x1xf32> to vector<2x1xf32>
    %c4_106 = arith.constant 4 : index
    %c0_107 = arith.constant 0 : index
    %c0_108 = arith.constant 0 : index
    %303 = vector.load %arg5[%c4_106, %c0_107, %c0_108] : memref<8x2x1xf32, #tpu.memory_space<vmem>>, vector<1x2x1xf32>
    %304 = vector.shape_cast %303 : vector<1x2x1xf32> to vector<2x1xf32>
    %305 = vector.broadcast %302 : vector<2x1xf32> to vector<2x128xf32>
    %306 = vector.broadcast %7 : vector<1x128xf32> to vector<2x128xf32>
    %307 = arith.mulf %305, %306 : vector<2x128xf32>
    %308 = vector.broadcast %304 : vector<2x1xf32> to vector<2x128xf32>
    %309 = vector.broadcast %14 : vector<1x128xf32> to vector<2x128xf32>
    %310 = arith.mulf %308, %309 : vector<2x128xf32>
    %311 = arith.addf %307, %310 : vector<2x128xf32>
    %312 = arith.mulf %311, %300 : vector<2x128xf32>
    %cst_109 = arith.constant 1.000000e+00 : f32
    %313 = vector.broadcast %cst_109 : f32 to vector<2x128xf32>
    %314 = arith.subf %313, %311 : vector<2x128xf32>
    %315 = arith.mulf %314, %260 : vector<2x128xf32>
    %316 = arith.addf %312, %315 : vector<2x128xf32>
    %c0_110 = arith.constant 0 : index
    %c0_111 = arith.constant 0 : index
    %317 = vector.load %arg10[%c0_110, %c0_111] : memref<2x128xf32, #tpu.memory_space<vmem>>, vector<2x128xf32>
    tpu.vector_store %arg10[%c0_110, %c0_111], %316 {strides = array<i32>} : memref<2x128xf32, #tpu.memory_space<vmem>>, vector<2x128xf32>,
    %318 = vector.broadcast %302 : vector<2x1xf32> to vector<2x128xf32>
    %319 = vector.broadcast %7 : vector<1x128xf32> to vector<2x128xf32>
    %320 = arith.mulf %318, %319 : vector<2x128xf32>
    %321 = arith.mulf %320, %300 : vector<2x128xf32>
    %c3_112 = arith.constant 3 : index
    %c0_113 = arith.constant 0 : index
    %c0_114 = arith.constant 0 : index
    %322 = vector.load %arg8[%c3_112, %c0_113, %c0_114] : memref<8x2x128xf32, #tpu.memory_space<vmem>>, vector<1x2x128xf32>
    %323 = vector.shape_cast %322 : vector<1x2x128xf32> to vector<2x128xf32>
    %324 = vector.shape_cast %321 : vector<2x128xf32> to vector<1x2x128xf32>
    tpu.vector_store %arg8[%c3_112, %c0_113, %c0_114], %324 {strides = array<i32>} : memref<8x2x128xf32, #tpu.memory_space<vmem>>, vector<1x2x128xf32>,
    %325 = vector.broadcast %304 : vector<2x1xf32> to vector<2x128xf32>
    %326 = vector.broadcast %14 : vector<1x128xf32> to vector<2x128xf32>
    %327 = arith.mulf %325, %326 : vector<2x128xf32>
    %328 = arith.mulf %327, %300 : vector<2x128xf32>
    %c4_115 = arith.constant 4 : index
    %c0_116 = arith.constant 0 : index
    %c0_117 = arith.constant 0 : index
    %329 = vector.load %arg9[%c4_115, %c0_116, %c0_117] : memref<8x2x128xf32, #tpu.memory_space<vmem>>, vector<1x2x128xf32>
    %330 = vector.shape_cast %329 : vector<1x2x128xf32> to vector<2x128xf32>
    %331 = vector.shape_cast %328 : vector<2x128xf32> to vector<1x2x128xf32>
    tpu.vector_store %arg9[%c4_115, %c0_116, %c0_117], %331 {strides = array<i32>} : memref<8x2x128xf32, #tpu.memory_space<vmem>>, vector<1x2x128xf32>,
    %c0_118 = arith.constant 0 : index
    %c0_119 = arith.constant 0 : index
    %332 = vector.load %arg10[%c0_118, %c0_119] : memref<2x128xf32, #tpu.memory_space<vmem>>, vector<2x128xf32>
    %333 = arith.truncf %332 : vector<2x128xf32> to vector<2x128xbf16>
    %c0_120 = arith.constant 0 : index
    %c0_121 = arith.constant 0 : index
    %334 = vector.load %arg6[%c0_120, %c0_121] : memref<128x384xbf16, #tpu.memory_space<vmem>>, vector<128x384xbf16>
    %cst_122 = arith.constant dense<0.000000e+00> : vector<2x384xf32>
    %335 = tpu.matmul %333, %334, %cst_122 {dimension_numbers = #tpu.dot_dimension_numbers<[1], [0], [0], [1], [0, 0, 1, 1], [], []>} : vector<2x128xbf16>, vector<128x384xbf16>, vector<2x384xf32> -> vector<2x384xf32>
    %336 = vector.broadcast %43 : vector<1x384xf32> to vector<2x384xf32>
    %337 = arith.addf %335, %336 : vector<2x384xf32>
    %c4_123 = arith.constant 4 : index
    %c0_124 = arith.constant 0 : index
    %c0_125 = arith.constant 0 : index
    %338 = vector.load %arg2[%c4_123, %c0_124, %c0_125] : memref<8x2x384xf32, #tpu.memory_space<vmem>>, vector<1x2x384xf32>
    %339 = vector.shape_cast %338 : vector<1x2x384xf32> to vector<2x384xf32>
    %340 = vector.broadcast %35 : vector<1x384xf32> to vector<2x384xf32>
    %341 = arith.mulf %339, %340 : vector<2x384xf32>
    %c3_126 = arith.constant 3 : index
    %c0_127 = arith.constant 0 : index
    %c0_128 = arith.constant 0 : index
    %342 = vector.load %arg3[%c3_126, %c0_127, %c0_128] : memref<8x2x384xf32, #tpu.memory_space<vmem>>, vector<1x2x384xf32>
    %343 = vector.shape_cast %342 : vector<1x2x384xf32> to vector<2x384xf32>
    %344 = vector.broadcast %42 : vector<1x384xf32> to vector<2x384xf32>
    %345 = arith.mulf %343, %344 : vector<2x384xf32>
    %346 = arith.addf %341, %345 : vector<2x384xf32>
    %347 = vector.extract_strided_slice %346 {offsets = [0, 0], sizes = [2, 128], strides = [1, 1]} : vector<2x384xf32> to vector<2x128xf32>
    %348 = vector.extract_strided_slice %337 {offsets = [0, 0], sizes = [2, 128], strides = [1, 1]} : vector<2x384xf32> to vector<2x128xf32>
    %349 = arith.addf %347, %348 : vector<2x128xf32>
    %350 = arith.negf %349 : vector<2x128xf32>
    %351 = math.exp %350 : vector<2x128xf32>
    %cst_129 = arith.constant 1.000000e+00 : f32
    %352 = vector.broadcast %cst_129 : f32 to vector<2x128xf32>
    %353 = arith.addf %352, %351 : vector<2x128xf32>
    %354 = arith.divf %352, %353 : vector<2x128xf32>
    %355 = vector.extract_strided_slice %346 {offsets = [0, 128], sizes = [2, 128], strides = [1, 1]} : vector<2x384xf32> to vector<2x128xf32>
    %356 = vector.extract_strided_slice %337 {offsets = [0, 128], sizes = [2, 128], strides = [1, 1]} : vector<2x384xf32> to vector<2x128xf32>
    %357 = arith.addf %355, %356 : vector<2x128xf32>
    %358 = arith.negf %357 : vector<2x128xf32>
    %359 = math.exp %358 : vector<2x128xf32>
    %cst_130 = arith.constant 1.000000e+00 : f32
    %360 = vector.broadcast %cst_130 : f32 to vector<2x128xf32>
    %361 = arith.addf %360, %359 : vector<2x128xf32>
    %362 = arith.divf %360, %361 : vector<2x128xf32>
    %363 = vector.extract_strided_slice %346 {offsets = [0, 256], sizes = [2, 128], strides = [1, 1]} : vector<2x384xf32> to vector<2x128xf32>
    %364 = vector.extract_strided_slice %337 {offsets = [0, 256], sizes = [2, 128], strides = [1, 1]} : vector<2x384xf32> to vector<2x128xf32>
    %365 = arith.mulf %354, %364 : vector<2x128xf32>
    %366 = arith.addf %363, %365 : vector<2x128xf32>
    %367 = math.tanh %366 : vector<2x128xf32>
    %cst_131 = arith.constant 1.000000e+00 : f32
    %368 = vector.broadcast %cst_131 : f32 to vector<2x128xf32>
    %369 = arith.subf %368, %362 : vector<2x128xf32>
    %370 = arith.mulf %369, %367 : vector<2x128xf32>
    %371 = arith.mulf %362, %332 : vector<2x128xf32>
    %372 = arith.addf %370, %371 : vector<2x128xf32>
    %c4_132 = arith.constant 4 : index
    %c0_133 = arith.constant 0 : index
    %c0_134 = arith.constant 0 : index
    %373 = vector.load %arg4[%c4_132, %c0_133, %c0_134] : memref<8x2x1xf32, #tpu.memory_space<vmem>>, vector<1x2x1xf32>
    %374 = vector.shape_cast %373 : vector<1x2x1xf32> to vector<2x1xf32>
    %c3_135 = arith.constant 3 : index
    %c0_136 = arith.constant 0 : index
    %c0_137 = arith.constant 0 : index
    %375 = vector.load %arg5[%c3_135, %c0_136, %c0_137] : memref<8x2x1xf32, #tpu.memory_space<vmem>>, vector<1x2x1xf32>
    %376 = vector.shape_cast %375 : vector<1x2x1xf32> to vector<2x1xf32>
    %377 = vector.broadcast %374 : vector<2x1xf32> to vector<2x128xf32>
    %378 = vector.broadcast %7 : vector<1x128xf32> to vector<2x128xf32>
    %379 = arith.mulf %377, %378 : vector<2x128xf32>
    %380 = vector.broadcast %376 : vector<2x1xf32> to vector<2x128xf32>
    %381 = vector.broadcast %14 : vector<1x128xf32> to vector<2x128xf32>
    %382 = arith.mulf %380, %381 : vector<2x128xf32>
    %383 = arith.addf %379, %382 : vector<2x128xf32>
    %384 = arith.mulf %383, %372 : vector<2x128xf32>
    %cst_138 = arith.constant 1.000000e+00 : f32
    %385 = vector.broadcast %cst_138 : f32 to vector<2x128xf32>
    %386 = arith.subf %385, %383 : vector<2x128xf32>
    %387 = arith.mulf %386, %332 : vector<2x128xf32>
    %388 = arith.addf %384, %387 : vector<2x128xf32>
    %c0_139 = arith.constant 0 : index
    %c0_140 = arith.constant 0 : index
    %389 = vector.load %arg10[%c0_139, %c0_140] : memref<2x128xf32, #tpu.memory_space<vmem>>, vector<2x128xf32>
    tpu.vector_store %arg10[%c0_139, %c0_140], %388 {strides = array<i32>} : memref<2x128xf32, #tpu.memory_space<vmem>>, vector<2x128xf32>,
    %390 = vector.broadcast %374 : vector<2x1xf32> to vector<2x128xf32>
    %391 = vector.broadcast %7 : vector<1x128xf32> to vector<2x128xf32>
    %392 = arith.mulf %390, %391 : vector<2x128xf32>
    %393 = arith.mulf %392, %372 : vector<2x128xf32>
    %c4_141 = arith.constant 4 : index
    %c0_142 = arith.constant 0 : index
    %c0_143 = arith.constant 0 : index
    %394 = vector.load %arg8[%c4_141, %c0_142, %c0_143] : memref<8x2x128xf32, #tpu.memory_space<vmem>>, vector<1x2x128xf32>
    %395 = vector.shape_cast %394 : vector<1x2x128xf32> to vector<2x128xf32>
    %396 = vector.shape_cast %393 : vector<2x128xf32> to vector<1x2x128xf32>
    tpu.vector_store %arg8[%c4_141, %c0_142, %c0_143], %396 {strides = array<i32>} : memref<8x2x128xf32, #tpu.memory_space<vmem>>, vector<1x2x128xf32>,
    %397 = vector.broadcast %376 : vector<2x1xf32> to vector<2x128xf32>
    %398 = vector.broadcast %14 : vector<1x128xf32> to vector<2x128xf32>
    %399 = arith.mulf %397, %398 : vector<2x128xf32>
    %400 = arith.mulf %399, %372 : vector<2x128xf32>
    %c3_144 = arith.constant 3 : index
    %c0_145 = arith.constant 0 : index
    %c0_146 = arith.constant 0 : index
    %401 = vector.load %arg9[%c3_144, %c0_145, %c0_146] : memref<8x2x128xf32, #tpu.memory_space<vmem>>, vector<1x2x128xf32>
    %402 = vector.shape_cast %401 : vector<1x2x128xf32> to vector<2x128xf32>
    %403 = vector.shape_cast %400 : vector<2x128xf32> to vector<1x2x128xf32>
    tpu.vector_store %arg9[%c3_144, %c0_145, %c0_146], %403 {strides = array<i32>} : memref<8x2x128xf32, #tpu.memory_space<vmem>>, vector<1x2x128xf32>,
    %c0_147 = arith.constant 0 : index
    %c0_148 = arith.constant 0 : index
    %404 = vector.load %arg10[%c0_147, %c0_148] : memref<2x128xf32, #tpu.memory_space<vmem>>, vector<2x128xf32>
    %405 = arith.truncf %404 : vector<2x128xf32> to vector<2x128xbf16>
    %c0_149 = arith.constant 0 : index
    %c0_150 = arith.constant 0 : index
    %406 = vector.load %arg6[%c0_149, %c0_150] : memref<128x384xbf16, #tpu.memory_space<vmem>>, vector<128x384xbf16>
    %cst_151 = arith.constant dense<0.000000e+00> : vector<2x384xf32>
    %407 = tpu.matmul %405, %406, %cst_151 {dimension_numbers = #tpu.dot_dimension_numbers<[1], [0], [0], [1], [0, 0, 1, 1], [], []>} : vector<2x128xbf16>, vector<128x384xbf16>, vector<2x384xf32> -> vector<2x384xf32>
    %408 = vector.broadcast %43 : vector<1x384xf32> to vector<2x384xf32>
    %409 = arith.addf %407, %408 : vector<2x384xf32>
    %c5_152 = arith.constant 5 : index
    %c0_153 = arith.constant 0 : index
    %c0_154 = arith.constant 0 : index
    %410 = vector.load %arg2[%c5_152, %c0_153, %c0_154] : memref<8x2x384xf32, #tpu.memory_space<vmem>>, vector<1x2x384xf32>
    %411 = vector.shape_cast %410 : vector<1x2x384xf32> to vector<2x384xf32>
    %412 = vector.broadcast %35 : vector<1x384xf32> to vector<2x384xf32>
    %413 = arith.mulf %411, %412 : vector<2x384xf32>
    %c2_155 = arith.constant 2 : index
    %c0_156 = arith.constant 0 : index
    %c0_157 = arith.constant 0 : index
    %414 = vector.load %arg3[%c2_155, %c0_156, %c0_157] : memref<8x2x384xf32, #tpu.memory_space<vmem>>, vector<1x2x384xf32>
    %415 = vector.shape_cast %414 : vector<1x2x384xf32> to vector<2x384xf32>
    %416 = vector.broadcast %42 : vector<1x384xf32> to vector<2x384xf32>
    %417 = arith.mulf %415, %416 : vector<2x384xf32>
    %418 = arith.addf %413, %417 : vector<2x384xf32>
    %419 = vector.extract_strided_slice %418 {offsets = [0, 0], sizes = [2, 128], strides = [1, 1]} : vector<2x384xf32> to vector<2x128xf32>
    %420 = vector.extract_strided_slice %409 {offsets = [0, 0], sizes = [2, 128], strides = [1, 1]} : vector<2x384xf32> to vector<2x128xf32>
    %421 = arith.addf %419, %420 : vector<2x128xf32>
    %422 = arith.negf %421 : vector<2x128xf32>
    %423 = math.exp %422 : vector<2x128xf32>
    %cst_158 = arith.constant 1.000000e+00 : f32
    %424 = vector.broadcast %cst_158 : f32 to vector<2x128xf32>
    %425 = arith.addf %424, %423 : vector<2x128xf32>
    %426 = arith.divf %424, %425 : vector<2x128xf32>
    %427 = vector.extract_strided_slice %418 {offsets = [0, 128], sizes = [2, 128], strides = [1, 1]} : vector<2x384xf32> to vector<2x128xf32>
    %428 = vector.extract_strided_slice %409 {offsets = [0, 128], sizes = [2, 128], strides = [1, 1]} : vector<2x384xf32> to vector<2x128xf32>
    %429 = arith.addf %427, %428 : vector<2x128xf32>
    %430 = arith.negf %429 : vector<2x128xf32>
    %431 = math.exp %430 : vector<2x128xf32>
    %cst_159 = arith.constant 1.000000e+00 : f32
    %432 = vector.broadcast %cst_159 : f32 to vector<2x128xf32>
    %433 = arith.addf %432, %431 : vector<2x128xf32>
    %434 = arith.divf %432, %433 : vector<2x128xf32>
    %435 = vector.extract_strided_slice %418 {offsets = [0, 256], sizes = [2, 128], strides = [1, 1]} : vector<2x384xf32> to vector<2x128xf32>
    %436 = vector.extract_strided_slice %409 {offsets = [0, 256], sizes = [2, 128], strides = [1, 1]} : vector<2x384xf32> to vector<2x128xf32>
    %437 = arith.mulf %426, %436 : vector<2x128xf32>
    %438 = arith.addf %435, %437 : vector<2x128xf32>
    %439 = math.tanh %438 : vector<2x128xf32>
    %cst_160 = arith.constant 1.000000e+00 : f32
    %440 = vector.broadcast %cst_160 : f32 to vector<2x128xf32>
    %441 = arith.subf %440, %434 : vector<2x128xf32>
    %442 = arith.mulf %441, %439 : vector<2x128xf32>
    %443 = arith.mulf %434, %404 : vector<2x128xf32>
    %444 = arith.addf %442, %443 : vector<2x128xf32>
    %c5_161 = arith.constant 5 : index
    %c0_162 = arith.constant 0 : index
    %c0_163 = arith.constant 0 : index
    %445 = vector.load %arg4[%c5_161, %c0_162, %c0_163] : memref<8x2x1xf32, #tpu.memory_space<vmem>>, vector<1x2x1xf32>
    %446 = vector.shape_cast %445 : vector<1x2x1xf32> to vector<2x1xf32>
    %c2_164 = arith.constant 2 : index
    %c0_165 = arith.constant 0 : index
    %c0_166 = arith.constant 0 : index
    %447 = vector.load %arg5[%c2_164, %c0_165, %c0_166] : memref<8x2x1xf32, #tpu.memory_space<vmem>>, vector<1x2x1xf32>
    %448 = vector.shape_cast %447 : vector<1x2x1xf32> to vector<2x1xf32>
    %449 = vector.broadcast %446 : vector<2x1xf32> to vector<2x128xf32>
    %450 = vector.broadcast %7 : vector<1x128xf32> to vector<2x128xf32>
    %451 = arith.mulf %449, %450 : vector<2x128xf32>
    %452 = vector.broadcast %448 : vector<2x1xf32> to vector<2x128xf32>
    %453 = vector.broadcast %14 : vector<1x128xf32> to vector<2x128xf32>
    %454 = arith.mulf %452, %453 : vector<2x128xf32>
    %455 = arith.addf %451, %454 : vector<2x128xf32>
    %456 = arith.mulf %455, %444 : vector<2x128xf32>
    %cst_167 = arith.constant 1.000000e+00 : f32
    %457 = vector.broadcast %cst_167 : f32 to vector<2x128xf32>
    %458 = arith.subf %457, %455 : vector<2x128xf32>
    %459 = arith.mulf %458, %404 : vector<2x128xf32>
    %460 = arith.addf %456, %459 : vector<2x128xf32>
    %c0_168 = arith.constant 0 : index
    %c0_169 = arith.constant 0 : index
    %461 = vector.load %arg10[%c0_168, %c0_169] : memref<2x128xf32, #tpu.memory_space<vmem>>, vector<2x128xf32>
    tpu.vector_store %arg10[%c0_168, %c0_169], %460 {strides = array<i32>} : memref<2x128xf32, #tpu.memory_space<vmem>>, vector<2x128xf32>,
    %462 = vector.broadcast %446 : vector<2x1xf32> to vector<2x128xf32>
    %463 = vector.broadcast %7 : vector<1x128xf32> to vector<2x128xf32>
    %464 = arith.mulf %462, %463 : vector<2x128xf32>
    %465 = arith.mulf %464, %444 : vector<2x128xf32>
    %c5_170 = arith.constant 5 : index
    %c0_171 = arith.constant 0 : index
    %c0_172 = arith.constant 0 : index
    %466 = vector.load %arg8[%c5_170, %c0_171, %c0_172] : memref<8x2x128xf32, #tpu.memory_space<vmem>>, vector<1x2x128xf32>
    %467 = vector.shape_cast %466 : vector<1x2x128xf32> to vector<2x128xf32>
    %468 = vector.shape_cast %465 : vector<2x128xf32> to vector<1x2x128xf32>
    tpu.vector_store %arg8[%c5_170, %c0_171, %c0_172], %468 {strides = array<i32>} : memref<8x2x128xf32, #tpu.memory_space<vmem>>, vector<1x2x128xf32>,
    %469 = vector.broadcast %448 : vector<2x1xf32> to vector<2x128xf32>
    %470 = vector.broadcast %14 : vector<1x128xf32> to vector<2x128xf32>
    %471 = arith.mulf %469, %470 : vector<2x128xf32>
    %472 = arith.mulf %471, %444 : vector<2x128xf32>
    %c2_173 = arith.constant 2 : index
    %c0_174 = arith.constant 0 : index
    %c0_175 = arith.constant 0 : index
    %473 = vector.load %arg9[%c2_173, %c0_174, %c0_175] : memref<8x2x128xf32, #tpu.memory_space<vmem>>, vector<1x2x128xf32>
    %474 = vector.shape_cast %473 : vector<1x2x128xf32> to vector<2x128xf32>
    %475 = vector.shape_cast %472 : vector<2x128xf32> to vector<1x2x128xf32>
    tpu.vector_store %arg9[%c2_173, %c0_174, %c0_175], %475 {strides = array<i32>} : memref<8x2x128xf32, #tpu.memory_space<vmem>>, vector<1x2x128xf32>,
    %c0_176 = arith.constant 0 : index
    %c0_177 = arith.constant 0 : index
    %476 = vector.load %arg10[%c0_176, %c0_177] : memref<2x128xf32, #tpu.memory_space<vmem>>, vector<2x128xf32>
    %477 = arith.truncf %476 : vector<2x128xf32> to vector<2x128xbf16>
    %c0_178 = arith.constant 0 : index
    %c0_179 = arith.constant 0 : index
    %478 = vector.load %arg6[%c0_178, %c0_179] : memref<128x384xbf16, #tpu.memory_space<vmem>>, vector<128x384xbf16>
    %cst_180 = arith.constant dense<0.000000e+00> : vector<2x384xf32>
    %479 = tpu.matmul %477, %478, %cst_180 {dimension_numbers = #tpu.dot_dimension_numbers<[1], [0], [0], [1], [0, 0, 1, 1], [], []>} : vector<2x128xbf16>, vector<128x384xbf16>, vector<2x384xf32> -> vector<2x384xf32>
    %480 = vector.broadcast %43 : vector<1x384xf32> to vector<2x384xf32>
    %481 = arith.addf %479, %480 : vector<2x384xf32>
    %c6_181 = arith.constant 6 : index
    %c0_182 = arith.constant 0 : index
    %c0_183 = arith.constant 0 : index
    %482 = vector.load %arg2[%c6_181, %c0_182, %c0_183] : memref<8x2x384xf32, #tpu.memory_space<vmem>>, vector<1x2x384xf32>
    %483 = vector.shape_cast %482 : vector<1x2x384xf32> to vector<2x384xf32>
    %484 = vector.broadcast %35 : vector<1x384xf32> to vector<2x384xf32>
    %485 = arith.mulf %483, %484 : vector<2x384xf32>
    %c1_184 = arith.constant 1 : index
    %c0_185 = arith.constant 0 : index
    %c0_186 = arith.constant 0 : index
    %486 = vector.load %arg3[%c1_184, %c0_185, %c0_186] : memref<8x2x384xf32, #tpu.memory_space<vmem>>, vector<1x2x384xf32>
    %487 = vector.shape_cast %486 : vector<1x2x384xf32> to vector<2x384xf32>
    %488 = vector.broadcast %42 : vector<1x384xf32> to vector<2x384xf32>
    %489 = arith.mulf %487, %488 : vector<2x384xf32>
    %490 = arith.addf %485, %489 : vector<2x384xf32>
    %491 = vector.extract_strided_slice %490 {offsets = [0, 0], sizes = [2, 128], strides = [1, 1]} : vector<2x384xf32> to vector<2x128xf32>
    %492 = vector.extract_strided_slice %481 {offsets = [0, 0], sizes = [2, 128], strides = [1, 1]} : vector<2x384xf32> to vector<2x128xf32>
    %493 = arith.addf %491, %492 : vector<2x128xf32>
    %494 = arith.negf %493 : vector<2x128xf32>
    %495 = math.exp %494 : vector<2x128xf32>
    %cst_187 = arith.constant 1.000000e+00 : f32
    %496 = vector.broadcast %cst_187 : f32 to vector<2x128xf32>
    %497 = arith.addf %496, %495 : vector<2x128xf32>
    %498 = arith.divf %496, %497 : vector<2x128xf32>
    %499 = vector.extract_strided_slice %490 {offsets = [0, 128], sizes = [2, 128], strides = [1, 1]} : vector<2x384xf32> to vector<2x128xf32>
    %500 = vector.extract_strided_slice %481 {offsets = [0, 128], sizes = [2, 128], strides = [1, 1]} : vector<2x384xf32> to vector<2x128xf32>
    %501 = arith.addf %499, %500 : vector<2x128xf32>
    %502 = arith.negf %501 : vector<2x128xf32>
    %503 = math.exp %502 : vector<2x128xf32>
    %cst_188 = arith.constant 1.000000e+00 : f32
    %504 = vector.broadcast %cst_188 : f32 to vector<2x128xf32>
    %505 = arith.addf %504, %503 : vector<2x128xf32>
    %506 = arith.divf %504, %505 : vector<2x128xf32>
    %507 = vector.extract_strided_slice %490 {offsets = [0, 256], sizes = [2, 128], strides = [1, 1]} : vector<2x384xf32> to vector<2x128xf32>
    %508 = vector.extract_strided_slice %481 {offsets = [0, 256], sizes = [2, 128], strides = [1, 1]} : vector<2x384xf32> to vector<2x128xf32>
    %509 = arith.mulf %498, %508 : vector<2x128xf32>
    %510 = arith.addf %507, %509 : vector<2x128xf32>
    %511 = math.tanh %510 : vector<2x128xf32>
    %cst_189 = arith.constant 1.000000e+00 : f32
    %512 = vector.broadcast %cst_189 : f32 to vector<2x128xf32>
    %513 = arith.subf %512, %506 : vector<2x128xf32>
    %514 = arith.mulf %513, %511 : vector<2x128xf32>
    %515 = arith.mulf %506, %476 : vector<2x128xf32>
    %516 = arith.addf %514, %515 : vector<2x128xf32>
    %c6_190 = arith.constant 6 : index
    %c0_191 = arith.constant 0 : index
    %c0_192 = arith.constant 0 : index
    %517 = vector.load %arg4[%c6_190, %c0_191, %c0_192] : memref<8x2x1xf32, #tpu.memory_space<vmem>>, vector<1x2x1xf32>
    %518 = vector.shape_cast %517 : vector<1x2x1xf32> to vector<2x1xf32>
    %c1_193 = arith.constant 1 : index
    %c0_194 = arith.constant 0 : index
    %c0_195 = arith.constant 0 : index
    %519 = vector.load %arg5[%c1_193, %c0_194, %c0_195] : memref<8x2x1xf32, #tpu.memory_space<vmem>>, vector<1x2x1xf32>
    %520 = vector.shape_cast %519 : vector<1x2x1xf32> to vector<2x1xf32>
    %521 = vector.broadcast %518 : vector<2x1xf32> to vector<2x128xf32>
    %522 = vector.broadcast %7 : vector<1x128xf32> to vector<2x128xf32>
    %523 = arith.mulf %521, %522 : vector<2x128xf32>
    %524 = vector.broadcast %520 : vector<2x1xf32> to vector<2x128xf32>
    %525 = vector.broadcast %14 : vector<1x128xf32> to vector<2x128xf32>
    %526 = arith.mulf %524, %525 : vector<2x128xf32>
    %527 = arith.addf %523, %526 : vector<2x128xf32>
    %528 = arith.mulf %527, %516 : vector<2x128xf32>
    %cst_196 = arith.constant 1.000000e+00 : f32
    %529 = vector.broadcast %cst_196 : f32 to vector<2x128xf32>
    %530 = arith.subf %529, %527 : vector<2x128xf32>
    %531 = arith.mulf %530, %476 : vector<2x128xf32>
    %532 = arith.addf %528, %531 : vector<2x128xf32>
    %c0_197 = arith.constant 0 : index
    %c0_198 = arith.constant 0 : index
    %533 = vector.load %arg10[%c0_197, %c0_198] : memref<2x128xf32, #tpu.memory_space<vmem>>, vector<2x128xf32>
    tpu.vector_store %arg10[%c0_197, %c0_198], %532 {strides = array<i32>} : memref<2x128xf32, #tpu.memory_space<vmem>>, vector<2x128xf32>,
    %534 = vector.broadcast %518 : vector<2x1xf32> to vector<2x128xf32>
    %535 = vector.broadcast %7 : vector<1x128xf32> to vector<2x128xf32>
    %536 = arith.mulf %534, %535 : vector<2x128xf32>
    %537 = arith.mulf %536, %516 : vector<2x128xf32>
    %c6_199 = arith.constant 6 : index
    %c0_200 = arith.constant 0 : index
    %c0_201 = arith.constant 0 : index
    %538 = vector.load %arg8[%c6_199, %c0_200, %c0_201] : memref<8x2x128xf32, #tpu.memory_space<vmem>>, vector<1x2x128xf32>
    %539 = vector.shape_cast %538 : vector<1x2x128xf32> to vector<2x128xf32>
    %540 = vector.shape_cast %537 : vector<2x128xf32> to vector<1x2x128xf32>
    tpu.vector_store %arg8[%c6_199, %c0_200, %c0_201], %540 {strides = array<i32>} : memref<8x2x128xf32, #tpu.memory_space<vmem>>, vector<1x2x128xf32>,
    %541 = vector.broadcast %520 : vector<2x1xf32> to vector<2x128xf32>
    %542 = vector.broadcast %14 : vector<1x128xf32> to vector<2x128xf32>
    %543 = arith.mulf %541, %542 : vector<2x128xf32>
    %544 = arith.mulf %543, %516 : vector<2x128xf32>
    %c1_202 = arith.constant 1 : index
    %c0_203 = arith.constant 0 : index
    %c0_204 = arith.constant 0 : index
    %545 = vector.load %arg9[%c1_202, %c0_203, %c0_204] : memref<8x2x128xf32, #tpu.memory_space<vmem>>, vector<1x2x128xf32>
    %546 = vector.shape_cast %545 : vector<1x2x128xf32> to vector<2x128xf32>
    %547 = vector.shape_cast %544 : vector<2x128xf32> to vector<1x2x128xf32>
    tpu.vector_store %arg9[%c1_202, %c0_203, %c0_204], %547 {strides = array<i32>} : memref<8x2x128xf32, #tpu.memory_space<vmem>>, vector<1x2x128xf32>,
    %c0_205 = arith.constant 0 : index
    %c0_206 = arith.constant 0 : index
    %548 = vector.load %arg10[%c0_205, %c0_206] : memref<2x128xf32, #tpu.memory_space<vmem>>, vector<2x128xf32>
    %549 = arith.truncf %548 : vector<2x128xf32> to vector<2x128xbf16>
    %c0_207 = arith.constant 0 : index
    %c0_208 = arith.constant 0 : index
    %550 = vector.load %arg6[%c0_207, %c0_208] : memref<128x384xbf16, #tpu.memory_space<vmem>>, vector<128x384xbf16>
    %cst_209 = arith.constant dense<0.000000e+00> : vector<2x384xf32>
    %551 = tpu.matmul %549, %550, %cst_209 {dimension_numbers = #tpu.dot_dimension_numbers<[1], [0], [0], [1], [0, 0, 1, 1], [], []>} : vector<2x128xbf16>, vector<128x384xbf16>, vector<2x384xf32> -> vector<2x384xf32>
    %552 = vector.broadcast %43 : vector<1x384xf32> to vector<2x384xf32>
    %553 = arith.addf %551, %552 : vector<2x384xf32>
    %c7_210 = arith.constant 7 : index
    %c0_211 = arith.constant 0 : index
    %c0_212 = arith.constant 0 : index
    %554 = vector.load %arg2[%c7_210, %c0_211, %c0_212] : memref<8x2x384xf32, #tpu.memory_space<vmem>>, vector<1x2x384xf32>
    %555 = vector.shape_cast %554 : vector<1x2x384xf32> to vector<2x384xf32>
    %556 = vector.broadcast %35 : vector<1x384xf32> to vector<2x384xf32>
    %557 = arith.mulf %555, %556 : vector<2x384xf32>
    %c0_213 = arith.constant 0 : index
    %c0_214 = arith.constant 0 : index
    %c0_215 = arith.constant 0 : index
    %558 = vector.load %arg3[%c0_213, %c0_214, %c0_215] : memref<8x2x384xf32, #tpu.memory_space<vmem>>, vector<1x2x384xf32>
    %559 = vector.shape_cast %558 : vector<1x2x384xf32> to vector<2x384xf32>
    %560 = vector.broadcast %42 : vector<1x384xf32> to vector<2x384xf32>
    %561 = arith.mulf %559, %560 : vector<2x384xf32>
    %562 = arith.addf %557, %561 : vector<2x384xf32>
    %563 = vector.extract_strided_slice %562 {offsets = [0, 0], sizes = [2, 128], strides = [1, 1]} : vector<2x384xf32> to vector<2x128xf32>
    %564 = vector.extract_strided_slice %553 {offsets = [0, 0], sizes = [2, 128], strides = [1, 1]} : vector<2x384xf32> to vector<2x128xf32>
    %565 = arith.addf %563, %564 : vector<2x128xf32>
    %566 = arith.negf %565 : vector<2x128xf32>
    %567 = math.exp %566 : vector<2x128xf32>
    %cst_216 = arith.constant 1.000000e+00 : f32
    %568 = vector.broadcast %cst_216 : f32 to vector<2x128xf32>
    %569 = arith.addf %568, %567 : vector<2x128xf32>
    %570 = arith.divf %568, %569 : vector<2x128xf32>
    %571 = vector.extract_strided_slice %562 {offsets = [0, 128], sizes = [2, 128], strides = [1, 1]} : vector<2x384xf32> to vector<2x128xf32>
    %572 = vector.extract_strided_slice %553 {offsets = [0, 128], sizes = [2, 128], strides = [1, 1]} : vector<2x384xf32> to vector<2x128xf32>
    %573 = arith.addf %571, %572 : vector<2x128xf32>
    %574 = arith.negf %573 : vector<2x128xf32>
    %575 = math.exp %574 : vector<2x128xf32>
    %cst_217 = arith.constant 1.000000e+00 : f32
    %576 = vector.broadcast %cst_217 : f32 to vector<2x128xf32>
    %577 = arith.addf %576, %575 : vector<2x128xf32>
    %578 = arith.divf %576, %577 : vector<2x128xf32>
    %579 = vector.extract_strided_slice %562 {offsets = [0, 256], sizes = [2, 128], strides = [1, 1]} : vector<2x384xf32> to vector<2x128xf32>
    %580 = vector.extract_strided_slice %553 {offsets = [0, 256], sizes = [2, 128], strides = [1, 1]} : vector<2x384xf32> to vector<2x128xf32>
    %581 = arith.mulf %570, %580 : vector<2x128xf32>
    %582 = arith.addf %579, %581 : vector<2x128xf32>
    %583 = math.tanh %582 : vector<2x128xf32>
    %cst_218 = arith.constant 1.000000e+00 : f32
    %584 = vector.broadcast %cst_218 : f32 to vector<2x128xf32>
    %585 = arith.subf %584, %578 : vector<2x128xf32>
    %586 = arith.mulf %585, %583 : vector<2x128xf32>
    %587 = arith.mulf %578, %548 : vector<2x128xf32>
    %588 = arith.addf %586, %587 : vector<2x128xf32>
    %c7_219 = arith.constant 7 : index
    %c0_220 = arith.constant 0 : index
    %c0_221 = arith.constant 0 : index
    %589 = vector.load %arg4[%c7_219, %c0_220, %c0_221] : memref<8x2x1xf32, #tpu.memory_space<vmem>>, vector<1x2x1xf32>
    %590 = vector.shape_cast %589 : vector<1x2x1xf32> to vector<2x1xf32>
    %c0_222 = arith.constant 0 : index
    %c0_223 = arith.constant 0 : index
    %c0_224 = arith.constant 0 : index
    %591 = vector.load %arg5[%c0_222, %c0_223, %c0_224] : memref<8x2x1xf32, #tpu.memory_space<vmem>>, vector<1x2x1xf32>
    %592 = vector.shape_cast %591 : vector<1x2x1xf32> to vector<2x1xf32>
    %593 = vector.broadcast %590 : vector<2x1xf32> to vector<2x128xf32>
    %594 = vector.broadcast %7 : vector<1x128xf32> to vector<2x128xf32>
    %595 = arith.mulf %593, %594 : vector<2x128xf32>
    %596 = vector.broadcast %592 : vector<2x1xf32> to vector<2x128xf32>
    %597 = vector.broadcast %14 : vector<1x128xf32> to vector<2x128xf32>
    %598 = arith.mulf %596, %597 : vector<2x128xf32>
    %599 = arith.addf %595, %598 : vector<2x128xf32>
    %600 = arith.mulf %599, %588 : vector<2x128xf32>
    %cst_225 = arith.constant 1.000000e+00 : f32
    %601 = vector.broadcast %cst_225 : f32 to vector<2x128xf32>
    %602 = arith.subf %601, %599 : vector<2x128xf32>
    %603 = arith.mulf %602, %548 : vector<2x128xf32>
    %604 = arith.addf %600, %603 : vector<2x128xf32>
    %c0_226 = arith.constant 0 : index
    %c0_227 = arith.constant 0 : index
    %605 = vector.load %arg10[%c0_226, %c0_227] : memref<2x128xf32, #tpu.memory_space<vmem>>, vector<2x128xf32>
    tpu.vector_store %arg10[%c0_226, %c0_227], %604 {strides = array<i32>} : memref<2x128xf32, #tpu.memory_space<vmem>>, vector<2x128xf32>,
    %606 = vector.broadcast %590 : vector<2x1xf32> to vector<2x128xf32>
    %607 = vector.broadcast %7 : vector<1x128xf32> to vector<2x128xf32>
    %608 = arith.mulf %606, %607 : vector<2x128xf32>
    %609 = arith.mulf %608, %588 : vector<2x128xf32>
    %c7_228 = arith.constant 7 : index
    %c0_229 = arith.constant 0 : index
    %c0_230 = arith.constant 0 : index
    %610 = vector.load %arg8[%c7_228, %c0_229, %c0_230] : memref<8x2x128xf32, #tpu.memory_space<vmem>>, vector<1x2x128xf32>
    %611 = vector.shape_cast %610 : vector<1x2x128xf32> to vector<2x128xf32>
    %612 = vector.shape_cast %609 : vector<2x128xf32> to vector<1x2x128xf32>
    tpu.vector_store %arg8[%c7_228, %c0_229, %c0_230], %612 {strides = array<i32>} : memref<8x2x128xf32, #tpu.memory_space<vmem>>, vector<1x2x128xf32>,
    %613 = vector.broadcast %592 : vector<2x1xf32> to vector<2x128xf32>
    %614 = vector.broadcast %14 : vector<1x128xf32> to vector<2x128xf32>
    %615 = arith.mulf %613, %614 : vector<2x128xf32>
    %616 = arith.mulf %615, %588 : vector<2x128xf32>
    %c0_231 = arith.constant 0 : index
    %c0_232 = arith.constant 0 : index
    %c0_233 = arith.constant 0 : index
    %617 = vector.load %arg9[%c0_231, %c0_232, %c0_233] : memref<8x2x128xf32, #tpu.memory_space<vmem>>, vector<1x2x128xf32>
    %618 = vector.shape_cast %617 : vector<1x2x128xf32> to vector<2x128xf32>
    %619 = vector.shape_cast %616 : vector<2x128xf32> to vector<1x2x128xf32>
    tpu.vector_store %arg9[%c0_231, %c0_232, %c0_233], %619 {strides = array<i32>} : memref<8x2x128xf32, #tpu.memory_space<vmem>>, vector<1x2x128xf32>,
    return
  }
  func.func @transform_0(%arg0: i32, %arg1: i32) -> (i32, i32, i32) {
    %c0_i32 = arith.constant 0 : i32
    %c0_i32_0 = arith.constant 0 : i32
    return %arg1, %arg0, %c0_i32 : i32, i32, i32
  }
  func.func @transform_1(%arg0: i32, %arg1: i32) -> (i32, i32, i32) {
    %c0_i32 = arith.constant 0 : i32
    %0 = arith.subi %c0_i32, %arg1 : i32
    %c0_i32_0 = arith.constant 0 : i32
    %c0_i32_1 = arith.constant 0 : i32
    return %0, %arg0, %c0_i32_0 : i32, i32, i32
  }
  func.func @transform_2(%arg0: i32, %arg1: i32) -> (i32, i32, i32) {
    %c0_i32 = arith.constant 0 : i32
    %c0_i32_0 = arith.constant 0 : i32
    return %arg1, %arg0, %c0_i32 : i32, i32, i32
  }
  func.func @transform_3(%arg0: i32, %arg1: i32) -> (i32, i32, i32) {
    %c0_i32 = arith.constant 0 : i32
    %0 = arith.subi %c0_i32, %arg1 : i32
    %c0_i32_0 = arith.constant 0 : i32
    %c0_i32_1 = arith.constant 0 : i32
    return %0, %arg0, %c0_i32_0 : i32, i32, i32
  }
  func.func @transform_4(%arg0: i32, %arg1: i32) -> (i32, i32) {
    %c0_i32 = arith.constant 0 : i32
    %c0_i32_0 = arith.constant 0 : i32
    %c0_i32_1 = arith.constant 0 : i32
    return %c0_i32, %c0_i32_0 : i32, i32
  }
  func.func @transform_5(%arg0: i32, %arg1: i32) -> (i32, i32) {
    %c0_i32 = arith.constant 0 : i32
    %c0_i32_0 = arith.constant 0 : i32
    %c0_i32_1 = arith.constant 0 : i32
    return %c0_i32, %c0_i32_0 : i32, i32
  }
  func.func @transform_6(%arg0: i32, %arg1: i32) -> (i32, i32, i32) {
    %c0_i32 = arith.constant 0 : i32
    %c0_i32_0 = arith.constant 0 : i32
    return %arg1, %arg0, %c0_i32 : i32, i32, i32
  }
  func.func @transform_7(%arg0: i32, %arg1: i32) -> (i32, i32, i32) {
    %c0_i32 = arith.constant 0 : i32
    %0 = arith.subi %c0_i32, %arg1 : i32
    %c0_i32_0 = arith.constant 0 : i32
    %c0_i32_1 = arith.constant 0 : i32
    return %0, %arg0, %c0_i32_0 : i32, i32, i32
  }
}

module attributes {stable_mosaic.version = 11 : i64} {
  func.func @_gate_kernel(%arg0: i32, %arg1: memref<16x128xf32, #tpu.memory_space<vmem>>, %arg2: memref<16x128xf32, #tpu.memory_space<vmem>>, %arg3: memref<1x128xf32, #tpu.memory_space<vmem>>, %arg4: memref<1x128xf32, #tpu.memory_space<vmem>>, %arg5: memref<128x384xbf16, #tpu.memory_space<vmem>>, %arg6: memref<1x384xf32, #tpu.memory_space<vmem>>, %arg7: memref<16x384xf32, #tpu.memory_space<vmem>>) attributes {dimension_semantics = [#tpu.dimension_semantics<parallel>], iteration_bounds = array<i64: 1>, scalar_prefetch = 0 : i64, scratch_operands = 0 : i64, tpu.core_type = #tpu.core_type<tc>, window_params = [{transform_indices = @transform_0, window_bounds = array<i64: 16, 128>}, {transform_indices = @transform_1, window_bounds = array<i64: 16, 128>}, {pipeline_mode = #tpu.pipeline_mode<synchronous>, transform_indices = @transform_2, window_bounds = array<i64: 1, 128>}, {pipeline_mode = #tpu.pipeline_mode<synchronous>, transform_indices = @transform_3, window_bounds = array<i64: 1, 128>}, {pipeline_mode = #tpu.pipeline_mode<synchronous>, transform_indices = @transform_4, window_bounds = array<i64: 128, 384>}, {pipeline_mode = #tpu.pipeline_mode<synchronous>, transform_indices = @transform_5, window_bounds = array<i64: 1, 384>}, {transform_indices = @transform_6, window_bounds = array<i64: 16, 384>}]} {
    %c0 = arith.constant 0 : index
    %c0_0 = arith.constant 0 : index
    %0 = vector.load %arg1[%c0, %c0_0] : memref<16x128xf32, #tpu.memory_space<vmem>>, vector<16x128xf32>
    %c0_1 = arith.constant 0 : index
    %c0_2 = arith.constant 0 : index
    %1 = vector.load %arg2[%c0_1, %c0_2] : memref<16x128xf32, #tpu.memory_space<vmem>>, vector<16x128xf32>
    %2 = arith.addf %0, %1 : vector<16x128xf32>
    %c0_3 = arith.constant 0 : index
    %c0_4 = arith.constant 0 : index
    %3 = vector.load %arg3[%c0_3, %c0_4] : memref<1x128xf32, #tpu.memory_space<vmem>>, vector<1x128xf32>
    %4 = vector.broadcast %3 : vector<1x128xf32> to vector<16x128xf32>
    %5 = arith.mulf %2, %4 : vector<16x128xf32>
    %c0_5 = arith.constant 0 : index
    %c0_6 = arith.constant 0 : index
    %6 = vector.load %arg4[%c0_5, %c0_6] : memref<1x128xf32, #tpu.memory_space<vmem>>, vector<1x128xf32>
    %7 = vector.broadcast %6 : vector<1x128xf32> to vector<16x128xf32>
    %8 = arith.addf %5, %7 : vector<16x128xf32>
    %cst = arith.constant 0.000000e+00 : f32
    %9 = vector.broadcast %cst : f32 to vector<16x128xf32>
    %10 = arith.maximumf %8, %9 : vector<16x128xf32>
    %11 = arith.truncf %10 : vector<16x128xf32> to vector<16x128xbf16>
    %c0_7 = arith.constant 0 : index
    %c0_8 = arith.constant 0 : index
    %12 = vector.load %arg5[%c0_7, %c0_8] : memref<128x384xbf16, #tpu.memory_space<vmem>>, vector<128x384xbf16>
    %cst_9 = arith.constant dense<0.000000e+00> : vector<16x384xf32>
    %13 = tpu.matmul %11, %12, %cst_9 {dimension_numbers = #tpu.dot_dimension_numbers<[1], [0], [0], [1], [0, 0, 1, 1], [], []>} : vector<16x128xbf16>, vector<128x384xbf16>, vector<16x384xf32> -> vector<16x384xf32>
    %c0_10 = arith.constant 0 : index
    %c0_11 = arith.constant 0 : index
    %14 = vector.load %arg6[%c0_10, %c0_11] : memref<1x384xf32, #tpu.memory_space<vmem>>, vector<1x384xf32>
    %15 = vector.broadcast %14 : vector<1x384xf32> to vector<16x384xf32>
    %16 = arith.addf %13, %15 : vector<16x384xf32>
    %c0_12 = arith.constant 0 : index
    %c0_13 = arith.constant 0 : index
    %17 = vector.load %arg7[%c0_12, %c0_13] : memref<16x384xf32, #tpu.memory_space<vmem>>, vector<16x384xf32>
    tpu.vector_store %arg7[%c0_12, %c0_13], %16 {strides = array<i32>} : memref<16x384xf32, #tpu.memory_space<vmem>>, vector<16x384xf32>,
    return
  }
  func.func @transform_0(%arg0: i32) -> (i32, i32) {
    %c0_i32 = arith.constant 0 : i32
    %c0_i32_0 = arith.constant 0 : i32
    return %arg0, %c0_i32 : i32, i32
  }
  func.func @transform_1(%arg0: i32) -> (i32, i32) {
    %c0_i32 = arith.constant 0 : i32
    %c0_i32_0 = arith.constant 0 : i32
    return %arg0, %c0_i32 : i32, i32
  }
  func.func @transform_2(%arg0: i32) -> (i32, i32) {
    %c0_i32 = arith.constant 0 : i32
    %c0_i32_0 = arith.constant 0 : i32
    %c0_i32_1 = arith.constant 0 : i32
    return %c0_i32, %c0_i32_0 : i32, i32
  }
  func.func @transform_3(%arg0: i32) -> (i32, i32) {
    %c0_i32 = arith.constant 0 : i32
    %c0_i32_0 = arith.constant 0 : i32
    %c0_i32_1 = arith.constant 0 : i32
    return %c0_i32, %c0_i32_0 : i32, i32
  }
  func.func @transform_4(%arg0: i32) -> (i32, i32) {
    %c0_i32 = arith.constant 0 : i32
    %c0_i32_0 = arith.constant 0 : i32
    %c0_i32_1 = arith.constant 0 : i32
    return %c0_i32, %c0_i32_0 : i32, i32
  }
  func.func @transform_5(%arg0: i32) -> (i32, i32) {
    %c0_i32 = arith.constant 0 : i32
    %c0_i32_0 = arith.constant 0 : i32
    %c0_i32_1 = arith.constant 0 : i32
    return %c0_i32, %c0_i32_0 : i32, i32
  }
  func.func @transform_6(%arg0: i32) -> (i32, i32) {
    %c0_i32 = arith.constant 0 : i32
    %c0_i32_0 = arith.constant 0 : i32
    return %arg0, %c0_i32 : i32, i32
  }
}

module attributes {stable_mosaic.version = 11 : i64} {
  func.func @_head_kernel(%arg0: i32, %arg1: memref<16x128xf32, #tpu.memory_space<vmem>>, %arg2: memref<16x128xf32, #tpu.memory_space<vmem>>, %arg3: memref<1x128xf32, #tpu.memory_space<vmem>>, %arg4: memref<1x128xf32, #tpu.memory_space<vmem>>, %arg5: memref<128x128xbf16, #tpu.memory_space<vmem>>, %arg6: memref<1x128xf32, #tpu.memory_space<vmem>>, %arg7: memref<16x128xf32, #tpu.memory_space<vmem>>) attributes {dimension_semantics = [#tpu.dimension_semantics<parallel>], iteration_bounds = array<i64: 1>, scalar_prefetch = 0 : i64, scratch_operands = 0 : i64, tpu.core_type = #tpu.core_type<tc>, window_params = [{transform_indices = @transform_0, window_bounds = array<i64: 16, 128>}, {transform_indices = @transform_1, window_bounds = array<i64: 16, 128>}, {pipeline_mode = #tpu.pipeline_mode<synchronous>, transform_indices = @transform_2, window_bounds = array<i64: 1, 128>}, {pipeline_mode = #tpu.pipeline_mode<synchronous>, transform_indices = @transform_3, window_bounds = array<i64: 1, 128>}, {pipeline_mode = #tpu.pipeline_mode<synchronous>, transform_indices = @transform_4, window_bounds = array<i64: 128, 128>}, {pipeline_mode = #tpu.pipeline_mode<synchronous>, transform_indices = @transform_5, window_bounds = array<i64: 1, 128>}, {transform_indices = @transform_6, window_bounds = array<i64: 16, 128>}]} {
    %c0 = arith.constant 0 : index
    %c0_0 = arith.constant 0 : index
    %0 = vector.load %arg1[%c0, %c0_0] : memref<16x128xf32, #tpu.memory_space<vmem>>, vector<16x128xf32>
    %c0_1 = arith.constant 0 : index
    %c0_2 = arith.constant 0 : index
    %1 = vector.load %arg2[%c0_1, %c0_2] : memref<16x128xf32, #tpu.memory_space<vmem>>, vector<16x128xf32>
    %2 = arith.addf %0, %1 : vector<16x128xf32>
    %cst = arith.constant dense<0.000000e+00> : vector<16xf32>
    %3 = vector.multi_reduction <add>, %2, %cst [1] : vector<16x128xf32> to vector<16xf32>
    %4 = vector.shape_cast %3 : vector<16xf32> to vector<16x1xf32>
    %cst_3 = arith.constant 1.562500e-02 : f32
    %5 = vector.broadcast %cst_3 : f32 to vector<16x1xf32>
    %6 = arith.mulf %4, %5 : vector<16x1xf32>
    %7 = arith.mulf %2, %2 : vector<16x128xf32>
    %cst_4 = arith.constant dense<0.000000e+00> : vector<16xf32>
    %8 = vector.multi_reduction <add>, %7, %cst_4 [1] : vector<16x128xf32> to vector<16xf32>
    %9 = vector.shape_cast %8 : vector<16xf32> to vector<16x1xf32>
    %cst_5 = arith.constant 1.562500e-02 : f32
    %10 = vector.broadcast %cst_5 : f32 to vector<16x1xf32>
    %11 = arith.mulf %9, %10 : vector<16x1xf32>
    %12 = arith.mulf %6, %6 : vector<16x1xf32>
    %13 = arith.subf %11, %12 : vector<16x1xf32>
    %14 = vector.broadcast %6 : vector<16x1xf32> to vector<16x128xf32>
    %15 = arith.subf %2, %14 : vector<16x128xf32>
    %cst_6 = arith.constant 9.99999974E-6 : f32
    %16 = vector.broadcast %cst_6 : f32 to vector<16x1xf32>
    %17 = arith.addf %13, %16 : vector<16x1xf32>
    %18 = math.rsqrt %17 : vector<16x1xf32>
    %19 = vector.broadcast %18 : vector<16x1xf32> to vector<16x128xf32>
    %20 = arith.mulf %15, %19 : vector<16x128xf32>
    %c0_7 = arith.constant 0 : index
    %c0_8 = arith.constant 0 : index
    %21 = vector.load %arg3[%c0_7, %c0_8] : memref<1x128xf32, #tpu.memory_space<vmem>>, vector<1x128xf32>
    %22 = vector.broadcast %21 : vector<1x128xf32> to vector<16x128xf32>
    %23 = arith.mulf %20, %22 : vector<16x128xf32>
    %c0_9 = arith.constant 0 : index
    %c0_10 = arith.constant 0 : index
    %24 = vector.load %arg4[%c0_9, %c0_10] : memref<1x128xf32, #tpu.memory_space<vmem>>, vector<1x128xf32>
    %25 = vector.broadcast %24 : vector<1x128xf32> to vector<16x128xf32>
    %26 = arith.addf %23, %25 : vector<16x128xf32>
    %27 = arith.truncf %26 : vector<16x128xf32> to vector<16x128xbf16>
    %c0_11 = arith.constant 0 : index
    %c0_12 = arith.constant 0 : index
    %28 = vector.load %arg5[%c0_11, %c0_12] : memref<128x128xbf16, #tpu.memory_space<vmem>>, vector<128x128xbf16>
    %cst_13 = arith.constant dense<0.000000e+00> : vector<16x128xf32>
    %29 = tpu.matmul %27, %28, %cst_13 {dimension_numbers = #tpu.dot_dimension_numbers<[1], [0], [0], [1], [0, 0, 1, 1], [], []>} : vector<16x128xbf16>, vector<128x128xbf16>, vector<16x128xf32> -> vector<16x128xf32>
    %c0_14 = arith.constant 0 : index
    %c0_15 = arith.constant 0 : index
    %30 = vector.load %arg6[%c0_14, %c0_15] : memref<1x128xf32, #tpu.memory_space<vmem>>, vector<1x128xf32>
    %31 = vector.broadcast %30 : vector<1x128xf32> to vector<16x128xf32>
    %32 = arith.addf %29, %31 : vector<16x128xf32>
    %cst_16 = arith.constant dense<0xFF800000> : vector<16xf32>
    %33 = vector.multi_reduction <maximumf>, %32, %cst_16 [1] : vector<16x128xf32> to vector<16xf32>
    %34 = vector.shape_cast %33 : vector<16xf32> to vector<16x1xf32>
    %35 = vector.broadcast %34 : vector<16x1xf32> to vector<16x128xf32>
    %36 = arith.subf %32, %35 : vector<16x128xf32>
    %37 = math.exp %36 : vector<16x128xf32>
    %cst_17 = arith.constant dense<0.000000e+00> : vector<16xf32>
    %38 = vector.multi_reduction <add>, %37, %cst_17 [1] : vector<16x128xf32> to vector<16xf32>
    %39 = vector.shape_cast %38 : vector<16xf32> to vector<16x1xf32>
    %40 = math.log %39 : vector<16x1xf32>
    %41 = vector.broadcast %40 : vector<16x1xf32> to vector<16x128xf32>
    %42 = arith.subf %36, %41 : vector<16x128xf32>
    %c0_18 = arith.constant 0 : index
    %c0_19 = arith.constant 0 : index
    %43 = vector.load %arg7[%c0_18, %c0_19] : memref<16x128xf32, #tpu.memory_space<vmem>>, vector<16x128xf32>
    tpu.vector_store %arg7[%c0_18, %c0_19], %42 {strides = array<i32>} : memref<16x128xf32, #tpu.memory_space<vmem>>, vector<16x128xf32>,
    return
  }
  func.func @transform_0(%arg0: i32) -> (i32, i32) {
    %c0_i32 = arith.constant 0 : i32
    %c0_i32_0 = arith.constant 0 : i32
    return %arg0, %c0_i32 : i32, i32
  }
  func.func @transform_1(%arg0: i32) -> (i32, i32) {
    %c0_i32 = arith.constant 0 : i32
    %c0_i32_0 = arith.constant 0 : i32
    return %arg0, %c0_i32 : i32, i32
  }
  func.func @transform_2(%arg0: i32) -> (i32, i32) {
    %c0_i32 = arith.constant 0 : i32
    %c0_i32_0 = arith.constant 0 : i32
    %c0_i32_1 = arith.constant 0 : i32
    return %c0_i32, %c0_i32_0 : i32, i32
  }
  func.func @transform_3(%arg0: i32) -> (i32, i32) {
    %c0_i32 = arith.constant 0 : i32
    %c0_i32_0 = arith.constant 0 : i32
    %c0_i32_1 = arith.constant 0 : i32
    return %c0_i32, %c0_i32_0 : i32, i32
  }
  func.func @transform_4(%arg0: i32) -> (i32, i32) {
    %c0_i32 = arith.constant 0 : i32
    %c0_i32_0 = arith.constant 0 : i32
    %c0_i32_1 = arith.constant 0 : i32
    return %c0_i32, %c0_i32_0 : i32, i32
  }
  func.func @transform_5(%arg0: i32) -> (i32, i32) {
    %c0_i32 = arith.constant 0 : i32
    %c0_i32_0 = arith.constant 0 : i32
    %c0_i32_1 = arith.constant 0 : i32
    return %c0_i32, %c0_i32_0 : i32, i32
  }
  func.func @transform_6(%arg0: i32) -> (i32, i32) {
    %c0_i32 = arith.constant 0 : i32
    %c0_i32_0 = arith.constant 0 : i32
    return %arg0, %c0_i32 : i32, i32
  }
}

</mosaic_0001>

<bundles_post_ra>
// kernel: deepspeech2_forward.7
= control target key start
LH: loop header
LB: loop body
LE: loop exit
PB: predicated region body
PF: predicated region fallthrough
CT: control target
= control target key end

     0   :  { %s1157_s18 = smov 0   ;;  %s1339_s0 = inlined_call_operand.vmem [shape: bf16[2,64,512], index: 0, kind: input, shape index: {}]   ;;  %s1340_s1 = inlined_call_operand.vmem [shape: bf16[512,128], index: 1, kind: input, shape index: {}]   ;;  %s1341_s2 = inlined_call_operand.vmem [shape: f32[1,128], index: 2, kind: input, shape index: {}]   ;;  %s1342_s3 = inlined_call_operand.vmem [shape: f32[1,128], index: 3, kind: input, shape index: {}]   ;;  %s1343_s4 = inlined_call_operand.vmem [shape: f32[2,64,1], index: 4, kind: input, shape index: {}]   ;;  %s1344_s5 = inlined_call_operand.vmem [shape: f32[2,64,128], index: 5, kind: output, shape index: {}]  }
   0x1 LB: > { %s905_s19 = sadd.s32 4294967295, %s1124_s18   ;;  %p909_p0 = scmp.ge.s32.totalorder %s1124_s18, 1  ;;  %s1124_s18 = sphi %s1157_s18, %s15_s18  }
   0x2   : > { %p197_p1 = scmp.lt.s32.totalorder %s1124_s18, 3 }
   0x4   : > { %p198_p2 = pnand %p909_p0, %p197_p1 }
   0x5   : > { %p230_p3 = scmp.lt.s32.totalorder (!%p198_p2), %s905_s19, 1 }
   0x6   : > { %201 = sbr.rel (%p198_p2) target bundleno = 284 (0x11c), region = 40 }
   0xb   : > { %v1062_v0 = vld [vmem:[%s1340_s1 + $0x78] sm:$0xff]   ;;  %v1126_v3 = vmov 0   ;;  %v1066_v5 = vld [vmem:[%s1340_s1 + $0x70] sm:$0xff]   ;;  %v1070_v9 = vld [vmem:[%s1340_s1 + $0x68] sm:$0xff]   ;;  %s1346_s19 = smov (!%p230_p3, %s905_s19), 1 }
   0xc   : > { %v1063_v1 = vld [vmem:[%s1340_s1 + $0xf8] sm:$0xff]   ;;  %971 = vmatprep.subr.bf16.mxu0 %v1062_v0  ;;  %1060 = vset.pattern.permute.xlu0 %v1126_v3  ;;  %v1067_v6 = vld [vmem:[%s1340_s1 + $0xf0] sm:$0xff]   ;;  %v1071_v10 = vld [vmem:[%s1340_s1 + $0xe8] sm:$0xff]   ;;  %s968_s28 = sshll.u32 %s1346_s19, 7  ;;  %s969_s17 = sshll.u32 %s1346_s19, 6 }
   0xd   : > { %v1064_v2 = vld [vmem:[%s1340_s1 + $0x38] sm:$0xff]   ;;  %1011 = vmatprep.subr.bf16.mxu1 %v1063_v1  ;;  %1061 = vset.pattern.permute.xlu1 %v1126_v3  ;;  %v1068_v7 = vld [vmem:[%s1340_s1 + $0x30] sm:$0xff]   ;;  %v1072_v11 = vld [vmem:[%s1340_s1 + $0x28] sm:$0xff]   ;;  %s1265_s12 = scalar_lea.vmem %s1339_s0, %s968_s28  ;;  %s239_s22 = scalar_lea.vmem %s1343_s4, %s969_s17 }
   0xe   : > { %v1065_v4 = vld [vmem:[%s1340_s1 + $0xb8] sm:$0xff]   ;;  %972 = vmatpush3.bf16.msra.mxu0 %v1064_v2  ;;  %v1069_v8 = vld [vmem:[%s1340_s1 + $0xb0] sm:$0xff]   ;;  %v1073_v12 = vld [vmem:[%s1340_s1 + $0xa8] sm:$0xff]   ;;  %s1314_s29 = scalar_lea.vmem %s1344_s5, %s969_s17 }
   0xf   : > { %1012 = vmatpush3.bf16.msra.mxu1 %v1065_v4  ;;  %973 = vmatprep.subr.bf16.mxu0 %v1066_v5  ;;  %v1074_v13 = vld [vmem:[%s1340_s1 + $0x60] sm:$0xff]   ;;  %v1078_v17 = vld [vmem:[%s1340_s1 + $0x58] sm:$0xff]   ;;  %v1082_v21 = vld [vmem:[%s1340_s1 + $0x50] sm:$0xff]  }
  0x10   : > { %1013 = vmatprep.subr.bf16.mxu1 %v1067_v6  ;;  %v1075_v14 = vld [vmem:[%s1340_s1 + $0xe0] sm:$0xff]   ;;  %v1079_v18 = vld [vmem:[%s1340_s1 + $0xd8] sm:$0xff]   ;;  %v1083_v22 = vld [vmem:[%s1340_s1 + $0xd0] sm:$0xff]  }
  0x11   : > { %v1076_v15 = vld [vmem:[%s1340_s1 + $0x20] sm:$0xff]   ;;  %v1080_v19 = vld [vmem:[%s1340_s1 + $0x18] sm:$0xff]   ;;  %v1084_v23 = vld [vmem:[%s1340_s1 + $0x10] sm:$0xff]  }
  0x12   : > { %974 = vmatpush3.bf16.msra.mxu0 %v1068_v7  ;;  %v1077_v16 = vld [vmem:[%s1340_s1 + $0xa0] sm:$0xff]   ;;  %v1081_v20 = vld [vmem:[%s1340_s1 + $0x98] sm:$0xff]   ;;  %v1085_v24 = vld [vmem:[%s1340_s1 + $0x90] sm:$0xff]  }
  0x13   : > { %1014 = vmatpush3.bf16.msra.mxu1 %v1069_v8  ;;  %975 = vmatprep.subr.bf16.mxu0 %v1070_v9  ;;  %v1086_v25 = vld [vmem:[%s1340_s1 + $0x48] sm:$0xff]   ;;  %v1090_v29 = vld [vmem:[%s1340_s1 + $0x40] sm:$0xff]   ;;  %v776_v44 = vld [vmem:[%s239_s22 + $0x10] sm:$0xff] }
  0x14   : > { %1015 = vmatprep.subr.bf16.mxu1 %v1071_v10  ;;  %v1087_v26 = vld [vmem:[%s1340_s1 + $0xc8] sm:$0xff]   ;;  %v1091_v30 = vld [vmem:[%s1340_s1 + $0xc0] sm:$0xff]   ;;  %794 = vperm.xlu1 %1061, %v776_v44   ;;  %v777_v46 = vld [vmem:[%s239_s22 + $0x18] sm:$0xff] }
  0x15   : > { %v1088_v27 = vld [vmem:[%s1340_s1 + $0x8] sm:$0xff]   ;;  %v1092_v31 = vld [vmem:[%s1340_s1] sm:$0xff]   ;;  %v780_v53 = vld [vmem:[%s239_s22 + $0x30] sm:$0xff] }
  0x16   : > { %976 = vmatpush3.bf16.msra.mxu0 %v1072_v11  ;;  %v1089_v28 = vld [vmem:[%s1340_s1 + $0x88] sm:$0xff]   ;;  %v1093_v32 = vld [vmem:[%s1340_s1 + $0x80] sm:$0xff]   ;;  %v781_v54 = vld [vmem:[%s239_s22 + $0x38] sm:$0xff] }
  0x17   : > { %1016 = vmatpush3.bf16.msra.mxu1 %v1073_v12  ;;  %977 = vmatprep.subr.bf16.mxu0 %v1074_v13  ;;  %v1094_v33 = vld [vmem:[%s1265_s12] ss:$16 sps:$4 sm:$0xff]   ;;  %v1096_v34 = vld [vmem:[%s1265_s12 + $0x4] ss:$16 sps:$4 sm:$0xff]   ;;  %v1097_v35 = vld [vmem:[%s1265_s12 + $0x8] ss:$16 sps:$4 sm:$0xff]  }
  0x18   : > { %1017 = vmatprep.subr.bf16.mxu1 %v1075_v14  ;;  %v1099_v36 = vld [vmem:[%s1265_s12 + $0xc] ss:$16 sps:$4 sm:$0xff]   ;;  %630 = vmatprep.mubr.bf16.mxu0 %v1096_v34  ;;  %v1100_v37 = vld [vmem:[%s1265_s12 + $0x24] ss:$16 sps:$4 sm:$0xff]   ;;  %v1104_v39 = vld [vmem:[%s1265_s12 + $0x20] ss:$16 sps:$4 sm:$0xff]  }
  0x19   : > { %695 = vmatprep.mubr.bf16.mxu1 %v1099_v36  ;;  %v1102_v38 = vld [vmem:[%s1265_s12 + $0x2c] ss:$16 sps:$4 sm:$0xff]   ;;  %v1105_v40 = vld [vmem:[%s1265_s12 + $0x28] ss:$16 sps:$4 sm:$0xff]   ;;  %v1106_v41 = vld [vmem:[%s1265_s12 + $0x44] ss:$16 sps:$4 sm:$0xff]   ;;  %799 = vperm.xlu1 %1061, %v777_v46  }
  0x1a   : > { %978 = vmatpush3.bf16.msra.mxu0 %v1076_v15  ;;  %v1108_v42 = vld [vmem:[%s1265_s12 + $0x4c] ss:$16 sps:$4 sm:$0xff]   ;;  %v774_v43 = vld [vmem:[%s239_s22] sm:$0xff]  ;;  %v1111_v49 = vld [vmem:[%s1265_s12 + $0x48] ss:$16 sps:$4 sm:$0xff]  }
  0x1b   : > { %1018 = vmatpush3.bf16.msra.mxu1 %v1077_v16  ;;  %979 = vmatprep.subr.bf16.mxu0 %v1078_v17  ;;  %v775_v45 = vld [vmem:[%s239_s22 + $0x8] sm:$0xff]  ;;  %v1110_v47 = vld [vmem:[%s1265_s12 + $0x40] ss:$16 sps:$4 sm:$0xff]   ;;  %v1112_v50 = vld [vmem:[%s1265_s12 + $0x64] ss:$16 sps:$4 sm:$0xff]  }
  0x1c   : > { %1019 = vmatprep.subr.bf16.mxu1 %v1079_v18  ;;  %784 = vperm.xlu0 %1060, %v774_v43   ;;  %v778_v48 = vld [vmem:[%s239_s22 + $0x20] sm:$0xff]  ;;  %v779_v51 = vld [vmem:[%s239_s22 + $0x28] sm:$0xff] }
  0x1d   : > { %v1114_v52 = vld [vmem:[%s1265_s12 + $0x6c] ss:$16 sps:$4 sm:$0xff]   ;;  %809 = vperm.xlu1 %1061, %v779_v51   ;;  %v1116_v55 = vld [vmem:[%s1265_s12 + $0x60] ss:$16 sps:$4 sm:$0xff]   ;;  %v1117_v56 = vld [vmem:[%s1265_s12 + $0x68] ss:$16 sps:$4 sm:$0xff]  }
  0x1e   : > { %980 = vmatpush3.bf16.msra.mxu0 %v1080_v19  ;;  %v1298_v0 = vld [vmem:[%s1341_s2] ss:$0 sm:$0xff] }
  0x1f   : > { %1020 = vmatpush3.bf16.msra.mxu1 %v1081_v20  ;;  %981 = vmatprep.subr.bf16.mxu0 %v1082_v21  ;;  %v1303_v6 = vld [vmem:[%s1342_s3] ss:$0 sm:$0xff] }
  0x20   : > { %1021 = vmatprep.subr.bf16.mxu1 %v1083_v22  ;;  %789 = vperm.xlu0 %1060, %v775_v45  }
  0x21   : > { %819 = vperm.xlu1 %1061, %v781_v54  }
  0x22   : > { %982 = vmatpush3.bf16.msra.mxu0 %v1084_v23 }
  0x23   : > { %1022 = vmatpush3.bf16.msra.mxu1 %v1085_v24  ;;  %983 = vmatprep.subr.bf16.mxu0 %v1086_v25 }
  0x24   : > { %1023 = vmatprep.subr.bf16.mxu1 %v1087_v26  ;;  %804 = vperm.xlu0 %1060, %v778_v48  }
  0x26   : > { %984 = vmatpush3.bf16.msra.mxu0 %v1088_v27 }
  0x27   : > { %1024 = vmatpush3.bf16.msra.mxu1 %v1089_v28  ;;  %985 = vmatprep.subr.bf16.mxu0 %v1090_v29 }
  0x28   : > { %1025 = vmatprep.subr.bf16.mxu1 %v1091_v30  ;;  %814 = vperm.xlu0 %1060, %v780_v53  }
  0x2a   : > { %986 = vmatpush3.bf16.msra.mxu0 %v1092_v31 }
  0x2b   : > { %1026 = vmatpush3.bf16.msra.mxu1 %v1093_v32 }
  0x2d   : > { %631 = vmatmul.mubr.bf16.vlgmr.msra.gmra.mxu0 %v1094_v33 }
  0x2e   : > { %696 = vmatmul.mubr.bf16.vlgmr.msra.gmra.mxu1 %v1097_v35  ;;  %638 = vmatprep.mubr.bf16.mxu0 %v1100_v37 }
  0x2f   : > { %703 = vmatprep.mubr.bf16.mxu1 %v1102_v38 }
  0x35   : > { %639 = vmatmul.mubr.bf16.gmra.mxu0 %v1104_v39 }
  0x36   : > { %704 = vmatmul.mubr.bf16.gmra.mxu1 %v1105_v40  ;;  %646 = vmatprep.mubr.bf16.mxu0 %v1106_v41 }
  0x37   : > { %711 = vmatprep.mubr.bf16.mxu1 %v1108_v42 }
  0x3d   : > { %647 = vmatmul.mubr.bf16.gmra.mxu0 %v1110_v47 }
  0x3e   : > { %712 = vmatmul.mubr.bf16.gmra.mxu1 %v1111_v49  ;;  %654 = vmatprep.mubr.bf16.mxu0 %v1112_v50 }
  0x3f   : > { %719 = vmatprep.mubr.bf16.mxu1 %v1114_v52 }
  0x45   : > { %655 = vmatmul.mubr.bf16.gmra.mxu0 %v1116_v55 }
  0x46   : > { %720 = vmatmul.mubr.bf16.gmra.mxu1 %v1117_v56 }
  0x8f   : > { %v795_v46 = vpop.permute.xlu1 %794 }
  0x97   : > { %v785_v16 = vpop.permute.xlu0 %784 }
  0x9b   : > { %v790_v34 = vpop.permute.xlu0 %789 }
  0xed   : > { %v987_v57 = vpop.f32.mrf.mxu0 }
  0xee   : > { %v1027_v58 = vpop.f32.mrf.mxu1 }
  0xef   : > { %v988_v59 = vpop.f32.mrf.mxu0 }
  0xf0   : > { %v989_v60 = vadd.f32 %v988_v59, %v987_v57  ;;  %v1028_v61 = vpop.f32.mrf.mxu1 }
  0xf1   : > { %v1029_v62 = vadd.f32 %v1028_v61, %v1027_v58  ;;  %v990_v63 = vpop.f32.mrf.mxu0 }
  0xf2   : > { %v1030_v1 = vpop.f32.mrf.mxu1 }
  0xf3   : > { %v698_v2 = vadd.f32 %v1029_v62, %v989_v60  ;;  %v991_v3 = vpop.f32.mrf.mxu0 }
  0xf4   : > { %v992_v4 = vadd.f32 %v991_v3, %v990_v63  ;;  %v1031_v5 = vpop.f32.mrf.mxu1 }
  0xf5   : > { %v735_v7 = vmul.f32 %v1298_v0, %v698_v2  ;;  %v1032_v8 = vadd.f32 %v1031_v5, %v1030_v1  ;;  %v993_v9 = vpop.f32.mrf.mxu0  ;;  %v800_v1 = vpop.permute.xlu1 %799 }
  0xf6   : > { %v1033_v10 = vpop.f32.mrf.mxu1 }
  0xf7   : > { %v701_v11 = vadd.f32 %v1032_v8, %v992_v4  ;;  %v994_v12 = vpop.f32.mrf.mxu0  ;;  %v750_v13 = vadd.f32 %v1303_v6, %v735_v7 }
  0xf8   : > { %v995_v14 = vadd.f32 %v994_v12, %v993_v9  ;;  %v1034_v15 = vpop.f32.mrf.mxu1 }
  0xf9   : > { %v736_v17 = vmul.f32 %v1298_v0, %v701_v11  ;;  %v1035_v18 = vadd.f32 %v1034_v15, %v1033_v10  ;;  %v996_v19 = vpop.f32.mrf.mxu0  ;;  %v758_v20 = vmax.f32 %v750_v13, 0.0  ;;  %v805_v15 = vpop.permute.xlu0 %804 }
  0xfa   : > { %v1036_v21 = vpop.f32.mrf.mxu1 }
  0xfb   : > { %v706_v22 = vadd.f32 %v1035_v18, %v995_v14  ;;  %v766_v23 = vmin.f32 %v758_v20, 20.0  ;;  %v997_v24 = vpop.f32.mrf.mxu0  ;;  %v751_v25 = vadd.f32 %v1303_v6, %v736_v17 }
  0xfc   : > { %v998_v26 = vadd.f32 %v997_v24, %v996_v19  ;;  %v1037_v27 = vpop.f32.mrf.mxu1 }
  0xfd   : > { %v737_v28 = vmul.f32 %v1298_v0, %v706_v22  ;;  %v822_v29 = vmul.f32 %v785_v16, %v766_v23  ;;  %v1038_v30 = vadd.f32 %v1037_v27, %v1036_v21  ;;  %v999_v31 = vpop.f32.mrf.mxu0  ;;  %v759_v32 = vmax.f32 %v751_v25, 0.0  ;;  %v810_v25 = vpop.permute.xlu1 %809 }
  0xfe   : > { %v1039_v33 = vpop.f32.mrf.mxu1 }
  0xff   : > { %830 = vst [vmem:[%s1314_s29] sm:$0xff] %v822_v29  ;;  %v709_v35 = vadd.f32 %v1038_v30, %v998_v26  ;;  %v752_v36 = vadd.f32 %v1303_v6, %v737_v28  ;;  %v767_v37 = vmin.f32 %v759_v32, 20.0  ;;  %v1000_v38 = vpop.f32.mrf.mxu0 }
 0x100   : > { %v1001_v39 = vadd.f32 %v1000_v38, %v999_v31  ;;  %v1040_v40 = vpop.f32.mrf.mxu1  ;;  %v815_v31 = vpop.permute.xlu0 %814 }
 0x101   : > { %v738_v41 = vmul.f32 %v1298_v0, %v709_v35  ;;  %v760_v42 = vmax.f32 %v752_v36, 0.0  ;;  %v823_v43 = vmul.f32 %v790_v34, %v767_v37  ;;  %v1041_v44 = vadd.f32 %v1040_v40, %v1039_v33  ;;  %v1002_v45 = vpop.f32.mrf.mxu0  ;;  %v820_v35 = vpop.permute.xlu1 %819 }
 0x102   : > { %v1042_v47 = vpop.f32.mrf.mxu1 }
 0x103   : > { %v768_v48 = vmin.f32 %v760_v42, 20.0  ;;  %831 = vst [vmem:[%s1314_s29 + $0x8] sm:$0xff] %v823_v43  ;;  %v714_v49 = vadd.f32 %v1041_v44, %v1001_v39  ;;  %v753_v50 = vadd.f32 %v1303_v6, %v738_v41  ;;  %v1003_v51 = vpop.f32.mrf.mxu0 }
 0x104   : > { %v1004_v52 = vadd.f32 %v1003_v51, %v1002_v45  ;;  %v1043_v53 = vpop.f32.mrf.mxu1 }
 0x105   : > { %v824_v54 = vmul.f32 %v795_v46, %v768_v48  ;;  %v739_v55 = vmul.f32 %v1298_v0, %v714_v49  ;;  %v761_v56 = vmax.f32 %v753_v50, 0.0  ;;  %v1044_v57 = vadd.f32 %v1043_v53, %v1042_v47  ;;  %v1005_v58 = vpop.f32.mrf.mxu0 }
 0x106   : > { %v1045_v59 = vpop.f32.mrf.mxu1 }
 0x107   : > { %832 = vst [vmem:[%s1314_s29 + $0x10] sm:$0xff] %v824_v54  ;;  %v769_v60 = vmin.f32 %v761_v56, 20.0  ;;  %v717_v61 = vadd.f32 %v1044_v57, %v1004_v52  ;;  %v754_v62 = vadd.f32 %v1303_v6, %v739_v55  ;;  %v1006_v63 = vpop.f32.mrf.mxu0 }
 0x108   : > { %v1007_v2 = vadd.f32 %v1006_v63, %v1005_v58  ;;  %v1046_v3 = vpop.f32.mrf.mxu1 }
 0x109   : > { %v825_v4 = vmul.f32 %v800_v1, %v769_v60  ;;  %v740_v5 = vmul.f32 %v1298_v0, %v717_v61  ;;  %v762_v7 = vmax.f32 %v754_v62, 0.0  ;;  %v1047_v8 = vadd.f32 %v1046_v3, %v1045_v59  ;;  %v1008_v9 = vpop.f32.mrf.mxu0 }
 0x10a   : > { %v1048_v10 = vpop.f32.mrf.mxu1 }
 0x10b   : > { %833 = vst [vmem:[%s1314_s29 + $0x18] sm:$0xff] %v825_v4  ;;  %v755_v11 = vadd.f32 %v1303_v6, %v740_v5  ;;  %v770_v12 = vmin.f32 %v762_v7, 20.0  ;;  %v722_v13 = vadd.f32 %v1047_v8, %v1007_v2  ;;  %v1009_v14 = vpop.f32.mrf.mxu0 }
 0x10c   : > { %v1010_v16 = vadd.f32 %v1009_v14, %v1008_v9  ;;  %v1049_v17 = vpop.f32.mrf.mxu1 }
 0x10d   : > { %v763_v18 = vmax.f32 %v755_v11, 0.0  ;;  %v826_v19 = vmul.f32 %v805_v15, %v770_v12  ;;  %v741_v20 = vmul.f32 %v1298_v0, %v722_v13  ;;  %v1050_v21 = vadd.f32 %v1049_v17, %v1048_v10 }
 0x10f   : > { %v771_v22 = vmin.f32 %v763_v18, 20.0  ;;  %834 = vst [vmem:[%s1314_s29 + $0x20] sm:$0xff] %v826_v19  ;;  %v756_v23 = vadd.f32 %v1303_v6, %v741_v20  ;;  %v725_v24 = vadd.f32 %v1050_v21, %v1010_v16 }
 0x111   : > { %v827_v26 = vmul.f32 %v810_v25, %v771_v22  ;;  %v764_v27 = vmax.f32 %v756_v23, 0.0  ;;  %v742_v28 = vmul.f32 %v1298_v0, %v725_v24 }
 0x113   : > { %835 = vst [vmem:[%s1314_s29 + $0x28] sm:$0xff] %v827_v26  ;;  %v772_v29 = vmin.f32 %v764_v27, 20.0  ;;  %v757_v30 = vadd.f32 %v1303_v6, %v742_v28 }
 0x115   : > { %v828_v32 = vmul.f32 %v815_v31, %v772_v29  ;;  %v765_v33 = vmax.f32 %v757_v30, 0.0 }
 0x117   : > { %836 = vst [vmem:[%s1314_s29 + $0x30] sm:$0xff] %v828_v32  ;;  %v773_v34 = vmin.f32 %v765_v33, 20.0 }
 0x119   : > { %v829_v36 = vmul.f32 %v820_v35, %v773_v34 }
 0x11b   : > { %837 = vst [vmem:[%s1314_s29 + $0x38] sm:$0xff] %v829_v36 }
 0x11c PF: > { %s15_s18 = sadd.s32 1, %s1124_s18  }
 0x11d   : > { %p12_p4 = scmp.ge.s32.totalorder %s15_s18, 4  }
 0x11f   :  { %14 = sbr.rel (!%p12_p4) target bundleno = 1 (0x1), region = 73 }

// kernel: deepspeech2_forward.8
= control target key start
LH: loop header
LB: loop body
LE: loop exit
PB: predicated region body
PF: predicated region fallthrough
CT: control target
= control target key end

     0   :  { %s19741_s18 = smov 0   ;;  %s23872_s0 = inlined_call_operand.vmem [shape: bf16[2,2,112,768], index: 0, kind: input, shape index: {}]   ;;  %s23873_s1 = inlined_call_operand.vmem [shape: bf16[21,768,128], index: 1, kind: input, shape index: {}]   ;;  %s23874_s2 = inlined_call_operand.vmem [shape: f32[1,128], index: 2, kind: input, shape index: {}]   ;;  %s23875_s3 = inlined_call_operand.vmem [shape: f32[1,128], index: 3, kind: input, shape index: {}]   ;;  %s23876_s4 = inlined_call_operand.vmem [shape: f32[2,32,1], index: 4, kind: input, shape index: {}]   ;;  %s23877_s5 = inlined_call_operand.vmem [shape: f32[2,32,128], index: 5, kind: output, shape index: {}]  }
   0x1 LB: > { %s13319_s19 = sadd.s32 4294967295, %s19708_s18   ;;  %p13323_p0 = scmp.ge.s32.totalorder %s19708_s18, 1  ;;  %s19708_s18 = sphi %s19741_s18, %s15_s18  }
   0x2   : > { %p197_p1 = scmp.lt.s32.totalorder %s19708_s18, 3 }
   0x4   : > { %p198_p2 = pnand %p13323_p0, %p197_p1 }
   0x6   : > { %201 = sbr.rel (%p198_p2) target bundleno = 1294 (0x50e), region = 40 }
   0xb   : > { %v18427_v0 = vld [vmem:[%s23873_s1 + $0x78] sm:$0xff]   ;;  %v18431_v4 = vld [vmem:[%s23873_s1 + $0x70] sm:$0xff]   ;;  %v18435_v8 = vld [vmem:[%s23873_s1 + $0x68] sm:$0xff]   ;;  %p230_p3 = scmp.lt.s32.totalorder %s13319_s19, 1 }
   0xc   : > { %v18428_v1 = vld [vmem:[%s23873_s1 + $0xf8] sm:$0xff]   ;;  %16635 = vmatprep.subr.bf16.mxu0 %v18427_v0  ;;  %v18432_v5 = vld [vmem:[%s23873_s1 + $0xf0] sm:$0xff]   ;;  %v18436_v9 = vld [vmem:[%s23873_s1 + $0xe8] sm:$0xff]  }
   0xd   : > { %v18429_v2 = vld [vmem:[%s23873_s1 + $0x38] sm:$0xff]   ;;  %16663 = vmatprep.subr.bf16.mxu1 %v18428_v1  ;;  %v18433_v6 = vld [vmem:[%s23873_s1 + $0x30] sm:$0xff]   ;;  %v18437_v10 = vld [vmem:[%s23873_s1 + $0x28] sm:$0xff]   ;;  %s23901_s19 = smov (!%p230_p3, %s13319_s19), 1 }
   0xe   : > { %v18430_v3 = vld [vmem:[%s23873_s1 + $0xb8] sm:$0xff]   ;;  %16636 = vmatpush3.bf16.msra.mxu0 %v18429_v2  ;;  %v18434_v7 = vld [vmem:[%s23873_s1 + $0xb0] sm:$0xff]   ;;  %v18438_v11 = vld [vmem:[%s23873_s1 + $0xa8] sm:$0xff]   ;;  %s18415_s26 = smul.u32 672, %s23901_s19  ;;  %s16633_s17 = sshll.u32 %s23901_s19, 5 }
   0xf   : > { %16664 = vmatpush3.bf16.msra.mxu1 %v18430_v3  ;;  %16637 = vmatprep.subr.bf16.mxu0 %v18431_v4  ;;  %v18439_v12 = vld [vmem:[%s23873_s1 + $0x60] sm:$0xff]   ;;  %v18443_v16 = vld [vmem:[%s23873_s1 + $0x58] sm:$0xff]   ;;  %v18447_v20 = vld [vmem:[%s23873_s1 + $0x50] sm:$0xff]   ;;  %s239_s24 = scalar_lea.vmem %s23876_s4, %s16633_s17  ;;  %s244_s23 = scalar_lea.vmem %s23877_s5, %s16633_s17 }
  0x10   : > { %16665 = vmatprep.subr.bf16.mxu1 %v18432_v5  ;;  %v18440_v13 = vld [vmem:[%s23873_s1 + $0xe0] sm:$0xff]   ;;  %v18444_v17 = vld [vmem:[%s23873_s1 + $0xd8] sm:$0xff]   ;;  %v18448_v21 = vld [vmem:[%s23873_s1 + $0xd0] sm:$0xff]   ;;  %s19849_s12 = scalar_lea.vmem %s23872_s0, %s18415_s26 }
  0x11   : > { %v18441_v14 = vld [vmem:[%s23873_s1 + $0x20] sm:$0xff]   ;;  %v18445_v18 = vld [vmem:[%s23873_s1 + $0x18] sm:$0xff]   ;;  %v18449_v22 = vld [vmem:[%s23873_s1 + $0x10] sm:$0xff]  }
  0x12   : > { %16638 = vmatpush3.bf16.msra.mxu0 %v18433_v6  ;;  %v18442_v15 = vld [vmem:[%s23873_s1 + $0xa0] sm:$0xff]   ;;  %v18446_v19 = vld [vmem:[%s23873_s1 + $0x98] sm:$0xff]   ;;  %v18450_v23 = vld [vmem:[%s23873_s1 + $0x90] sm:$0xff]  }
  0x13   : > { %16666 = vmatpush3.bf16.msra.mxu1 %v18434_v7  ;;  %16639 = vmatprep.subr.bf16.mxu0 %v18435_v8  ;;  %v18451_v24 = vld [vmem:[%s23873_s1 + $0x48] sm:$0xff]   ;;  %v18455_v28 = vld [vmem:[%s23873_s1 + $0x40] sm:$0xff]   ;;  %v19859_v33 = vld [vmem:[%s19849_s12 + $0x18] sm:$0xff] }
  0x14   : > { %16667 = vmatprep.subr.bf16.mxu1 %v18436_v9  ;;  %v18452_v25 = vld [vmem:[%s23873_s1 + $0xc8] sm:$0xff]   ;;  %v18456_v29 = vld [vmem:[%s23873_s1 + $0xc0] sm:$0xff]   ;;  %v18463_v40 = vld [vmem:[%s23873_s1 + $0x178] sm:$0xff]  }
  0x15   : > { %v18453_v26 = vld [vmem:[%s23873_s1 + $0x8] sm:$0xff]   ;;  %v18457_v30 = vld [vmem:[%s23873_s1] sm:$0xff]   ;;  %v18464_v41 = vld [vmem:[%s23873_s1 + $0x1f8] sm:$0xff]  }
  0x16   : > { %16640 = vmatpush3.bf16.msra.mxu0 %v18437_v10  ;;  %v18454_v27 = vld [vmem:[%s23873_s1 + $0x88] sm:$0xff]   ;;  %v18458_v31 = vld [vmem:[%s23873_s1 + $0x80] sm:$0xff]   ;;  %v18465_v42 = vld [vmem:[%s23873_s1 + $0x138] sm:$0xff]  }
  0x17   : > { %16668 = vmatpush3.bf16.msra.mxu1 %v18438_v11  ;;  %16641 = vmatprep.subr.bf16.mxu0 %v18439_v12  ;;  %v250_v32 = vld [vmem:[%s19849_s12] sm:$0xff]  ;;  %v251_v34 = vld [vmem:[%s19849_s12 + $0x8] sm:$0xff]  ;;  %v18466_v43 = vld [vmem:[%s23873_s1 + $0x1b8] sm:$0xff]  }
  0x18   : > { %16669 = vmatprep.subr.bf16.mxu1 %v18440_v13  ;;  %v13329_v35 = vcombine.low %v250_v32, %v19859_v33  ;;  %v13330_v36 = vcombine.high %v250_v32, %v19859_v33  ;;  %v19865_v37 = vld [vmem:[%s19849_s12 + $0x20] sm:$0xff]  ;;  %v18467_v44 = vld [vmem:[%s23873_s1 + $0x170] sm:$0xff]   ;;  %v18471_v48 = vld [vmem:[%s23873_s1 + $0x168] sm:$0xff]  }
  0x19   : > { %v13331_v38 = vcombine.low %v251_v34, %v19865_v37  ;;  %v13332_v39 = vcombine.high %v251_v34, %v19865_v37  ;;  %v18468_v45 = vld [vmem:[%s23873_s1 + $0x1f0] sm:$0xff]   ;;  %v18472_v49 = vld [vmem:[%s23873_s1 + $0x1e8] sm:$0xff]   ;;  %v18475_v52 = vld [vmem:[%s23873_s1 + $0x160] sm:$0xff]  }
  0x1a   : > { %16642 = vmatpush3.bf16.msra.mxu0 %v18441_v14  ;;  %742 = vmatprep.mubr.bf16.mxu0 %v13330_v36  ;;  %v18469_v46 = vld [vmem:[%s23873_s1 + $0x130] sm:$0xff]   ;;  %v18473_v50 = vld [vmem:[%s23873_s1 + $0x128] sm:$0xff]   ;;  %v18476_v53 = vld [vmem:[%s23873_s1 + $0x1e0] sm:$0xff]  }
  0x1b   : > { %16670 = vmatpush3.bf16.msra.mxu1 %v18442_v15  ;;  %16643 = vmatprep.subr.bf16.mxu0 %v18443_v16  ;;  %v18470_v47 = vld [vmem:[%s23873_s1 + $0x1b0] sm:$0xff]   ;;  %v18474_v51 = vld [vmem:[%s23873_s1 + $0x1a8] sm:$0xff]   ;;  %v18477_v54 = vld [vmem:[%s23873_s1 + $0x120] sm:$0xff]  }
  0x1c   : > { %16671 = vmatprep.subr.bf16.mxu1 %v18444_v17  ;;  %791 = vmatprep.mubr.bf16.mxu1 %v13332_v39  ;;  %v18478_v55 = vld [vmem:[%s23873_s1 + $0x1a0] sm:$0xff]   ;;  %v18479_v56 = vld [vmem:[%s23873_s1 + $0x158] sm:$0xff]   ;;  %v19930_v60 = vld [vmem:[%s19849_s12 + $0x30] sm:$0xff] }
  0x1d   : > { %v18480_v57 = vld [vmem:[%s23873_s1 + $0x1d8] sm:$0xff]   ;;  %v19933_v61 = vld [vmem:[%s19849_s12 + $0x48] sm:$0xff]  ;;  %v19941_v0 = vld [vmem:[%s19849_s12 + $0x50] sm:$0xff]  ;;  %v13653_v2 = vcombine.low %v19859_v33, %v19930_v60 }
  0x1e   : > { %16644 = vmatpush3.bf16.msra.mxu0 %v18445_v18  ;;  %v18481_v58 = vld [vmem:[%s23873_s1 + $0x118] sm:$0xff]   ;;  %v13336_v62 = vcombine.high %v19930_v60, %v19933_v61  ;;  %v13335_v1 = vcombine.low %v19930_v60, %v19933_v61  ;;  %v18487_v5 = vld [vmem:[%s23873_s1 + $0x150] sm:$0xff]   ;;  %v18491_v10 = vld [vmem:[%s23873_s1 + $0x148] sm:$0xff]  }
  0x1f   : > { %16672 = vmatpush3.bf16.msra.mxu1 %v18446_v19  ;;  %16645 = vmatprep.subr.bf16.mxu0 %v18447_v20  ;;  %v18482_v59 = vld [vmem:[%s23873_s1 + $0x198] sm:$0xff]   ;;  %v18488_v7 = vld [vmem:[%s23873_s1 + $0x1d0] sm:$0xff]   ;;  %v18492_v11 = vld [vmem:[%s23873_s1 + $0x1c8] sm:$0xff]  }
  0x20   : > { %16673 = vmatprep.subr.bf16.mxu1 %v18448_v21  ;;  %v19938_v63 = vld [vmem:[%s19849_s12 + $0x38] sm:$0xff]  ;;  %v18489_v8 = vld [vmem:[%s23873_s1 + $0x110] sm:$0xff]   ;;  %v18493_v12 = vld [vmem:[%s23873_s1 + $0x108] sm:$0xff]  }
  0x21   : > { %v13338_v3 = vcombine.high %v19938_v63, %v19941_v0  ;;  %v13337_v4 = vcombine.low %v19938_v63, %v19941_v0  ;;  %v13655_v6 = vcombine.low %v19865_v37, %v19938_v63  ;;  %v18490_v9 = vld [vmem:[%s23873_s1 + $0x190] sm:$0xff]   ;;  %v18494_v13 = vld [vmem:[%s23873_s1 + $0x188] sm:$0xff]   ;;  %v18495_v14 = vld [vmem:[%s23873_s1 + $0x140] sm:$0xff]  }
  0x22   : > { %16646 = vmatpush3.bf16.msra.mxu0 %v18449_v22  ;;  %v18496_v15 = vld [vmem:[%s23873_s1 + $0x1c0] sm:$0xff]   ;;  %v252_v18 = vld [vmem:[%s19849_s12 + $0x10] sm:$0xff]  ;;  %v19991_v19 = vld [vmem:[%s19849_s12 + $0x28] sm:$0xff] }
  0x23   : > { %16674 = vmatpush3.bf16.msra.mxu1 %v18450_v23  ;;  %16647 = vmatprep.subr.bf16.mxu0 %v18451_v24  ;;  %v18497_v16 = vld [vmem:[%s23873_s1 + $0x100] sm:$0xff]   ;;  %v13389_v20 = vld [vmem:[%s19849_s12 + $0x150] sm:$0xff]  ;;  %v19995_v21 = vld [vmem:[%s19849_s12 + $0x168] sm:$0xff]  ;;  %v13333_v22 = vcombine.low %v252_v18, %v19991_v19  ;;  %v13334_v23 = vcombine.high %v252_v18, %v19991_v19 }
  0x24   : > { %16675 = vmatprep.subr.bf16.mxu1 %v18452_v25  ;;  %v18498_v17 = vld [vmem:[%s23873_s1 + $0x180] sm:$0xff]   ;;  %v13497_v24 = vcombine.low %v13389_v20, %v19995_v21  ;;  %v13498_v25 = vcombine.high %v13389_v20, %v19995_v21  ;;  %v18509_v32 = vld [vmem:[%s23873_s1 + $0x230] sm:$0xff]   ;;  %v20029_v36 = vld [vmem:[%s19849_s12 + $0x58] sm:$0xff] }
  0x25   : > { %v18510_v34 = vld [vmem:[%s23873_s1 + $0x2b0] sm:$0xff]   ;;  %v13391_v18 = vld [vmem:[%s19849_s12 + $0x160] sm:$0xff]  ;;  %v20133_v20 = vld [vmem:[%s19849_s12 + $0x178] sm:$0xff] }
  0x26   : > { %16648 = vmatpush3.bf16.msra.mxu0 %v18453_v26  ;;  %v18503_v26 = vld [vmem:[%s23873_s1 + $0x278] sm:$0xff]  }
  0x27   : > { %16676 = vmatpush3.bf16.msra.mxu1 %v18454_v27  ;;  %16649 = vmatprep.subr.bf16.mxu0 %v18455_v28  ;;  %v18504_v27 = vld [vmem:[%s23873_s1 + $0x2f8] sm:$0xff]  }
  0x28   : > { %16677 = vmatprep.subr.bf16.mxu1 %v18456_v29  ;;  %v18505_v28 = vld [vmem:[%s23873_s1 + $0x238] sm:$0xff]  }
  0x29   : > { %v18506_v29 = vld [vmem:[%s23873_s1 + $0x2b8] sm:$0xff]  }
  0x2a   : > { %16650 = vmatpush3.bf16.msra.mxu0 %v18457_v30  ;;  %v18507_v30 = vld [vmem:[%s23873_s1 + $0x270] sm:$0xff]  }
  0x2b   : > { %16678 = vmatpush3.bf16.msra.mxu1 %v18458_v31  ;;  %16691 = vmatprep.subr.bf16.mxu0 %v18463_v40  ;;  %v18508_v31 = vld [vmem:[%s23873_s1 + $0x2f0] sm:$0xff]   ;;  %v18513_v40 = vld [vmem:[%s23873_s1 + $0x268] sm:$0xff]  }
  0x2c   : > { %16719 = vmatprep.subr.bf16.mxu1 %v18464_v41 }
  0x2d   : > { %743 = vmatmul.mubr.bf16.vlgmr.msra.gmra.mxu0 %v13329_v35  ;;  %v20026_v35 = vld [vmem:[%s19849_s12 + $0x40] sm:$0xff] }
  0x2e   : > { %792 = vmatmul.mubr.bf16.vlgmr.msra.gmra.mxu1 %v13331_v38  ;;  %16692 = vmatpush3.bf16.msra.mxu0 %v18465_v42  ;;  %v13340_v38 = vcombine.high %v20026_v35, %v20029_v36  ;;  %v13339_v39 = vcombine.low %v20026_v35, %v20029_v36  ;;  %v13657_v41 = vcombine.low %v19991_v19, %v20026_v35  ;;  %v18514_v42 = vld [vmem:[%s23873_s1 + $0x2e8] sm:$0xff]  }
  0x2f   : > { %16720 = vmatpush3.bf16.msra.mxu1 %v18466_v43  ;;  %16693 = vmatprep.subr.bf16.mxu0 %v18467_v44  ;;  %v13658_v43 = vcombine.high %v19991_v19, %v20026_v35  ;;  %v18515_v44 = vld [vmem:[%s23873_s1 + $0x228] sm:$0xff]   ;;  %v18629_v19 = vld [vmem:[%s23873_s1 + $0x530] sm:$0xff]  }
  0x30   : > { %16721 = vmatprep.subr.bf16.mxu1 %v18468_v45  ;;  %750 = vmatprep.mubr.bf16.mxu0 %v13336_v62  ;;  %v18516_v45 = vld [vmem:[%s23873_s1 + $0x2a8] sm:$0xff]   ;;  %v18527_v62 = vld [vmem:[%s23873_s1 + $0x250] sm:$0xff]  }
  0x31   : > { %799 = vmatprep.mubr.bf16.mxu1 %v13338_v3  ;;  %v18529_v3 = vld [vmem:[%s23873_s1 + $0x210] sm:$0xff]  }
  0x32   : > { %16694 = vmatpush3.bf16.msra.mxu0 %v18469_v46  ;;  %v18517_v46 = vld [vmem:[%s23873_s1 + $0x260] sm:$0xff]   ;;  %v20418_v35 = vld [vmem:[%s19849_s12 + $0x70] sm:$0xff] }
  0x33   : > { %16722 = vmatpush3.bf16.msra.mxu1 %v18470_v47  ;;  %16695 = vmatprep.subr.bf16.mxu0 %v18471_v48  ;;  %v18518_v47 = vld [vmem:[%s23873_s1 + $0x2e0] sm:$0xff]  }
  0x34   : > { %16723 = vmatprep.subr.bf16.mxu1 %v18472_v49  ;;  %v18519_v48 = vld [vmem:[%s23873_s1 + $0x220] sm:$0xff]  }
  0x35   : > { %751 = vmatmul.mubr.bf16.gmra.mxu0 %v13335_v1  ;;  %v18520_v49 = vld [vmem:[%s23873_s1 + $0x2a0] sm:$0xff]   ;;  %v18528_v1 = vld [vmem:[%s23873_s1 + $0x2d0] sm:$0xff]  }
  0x36   : > { %16696 = vmatpush3.bf16.msra.mxu0 %v18473_v50  ;;  %800 = vmatmul.mubr.bf16.gmra.mxu1 %v13337_v4  ;;  %v18521_v50 = vld [vmem:[%s23873_s1 + $0x258] sm:$0xff]   ;;  %v18530_v4 = vld [vmem:[%s23873_s1 + $0x290] sm:$0xff]  }
  0x37   : > { %16724 = vmatpush3.bf16.msra.mxu1 %v18474_v51  ;;  %16697 = vmatprep.subr.bf16.mxu0 %v18475_v52  ;;  %v18522_v51 = vld [vmem:[%s23873_s1 + $0x2d8] sm:$0xff]  }
  0x38   : > { %16725 = vmatprep.subr.bf16.mxu1 %v18476_v53  ;;  %840 = vmatprep.mubr.bf16.mxu0 %v13334_v23  ;;  %v18523_v52 = vld [vmem:[%s23873_s1 + $0x218] sm:$0xff]   ;;  %v13502_v23 = vcombine.high %v13391_v18, %v20133_v20 }
  0x39   : > { %1359 = vmatprep.mubr.bf16.mxu1 %v13498_v25  ;;  %v18524_v53 = vld [vmem:[%s23873_s1 + $0x298] sm:$0xff]  }
  0x3a   : > { %16698 = vmatpush3.bf16.msra.mxu0 %v18477_v54  ;;  %v20076_v54 = vld [vmem:[%s19849_s12 + $0x180] sm:$0xff]  ;;  %v18544_v25 = vld [vmem:[%s23873_s1 + $0x3f8] sm:$0xff]  }
  0x3b   : > { %16726 = vmatpush3.bf16.msra.mxu1 %v18478_v55  ;;  %16699 = vmatprep.subr.bf16.mxu0 %v18479_v56  ;;  %v20079_v55 = vld [vmem:[%s19849_s12 + $0x198] sm:$0xff]  ;;  %v13821_v56 = vcombine.low %v19995_v21, %v20076_v54 }
  0x3c   : > { %16727 = vmatprep.subr.bf16.mxu1 %v18480_v57  ;;  %v13822_v57 = vcombine.high %v19995_v21, %v20076_v54  ;;  %v18630_v21 = vld [vmem:[%s23873_s1 + $0x5b0] sm:$0xff]  }
  0x3e   : > { %16700 = vmatpush3.bf16.msra.mxu0 %v18481_v58  ;;  %v13504_v58 = vcombine.high %v20076_v54, %v20079_v55 }
  0x3f   : > { %16728 = vmatpush3.bf16.msra.mxu1 %v18482_v59  ;;  %16701 = vmatprep.subr.bf16.mxu0 %v18487_v5  ;;  %v13503_v59 = vcombine.low %v20076_v54, %v20079_v55  ;;  %v18531_v5 = vld [vmem:[%s23873_s1 + $0x248] sm:$0xff]   ;;  %v13663_v54 = vcombine.low %v20029_v36, %v20418_v35 }
  0x40   : > { %16729 = vmatprep.subr.bf16.mxu1 %v18488_v7  ;;  %v18532_v7 = vld [vmem:[%s23873_s1 + $0x2c8] sm:$0xff]  }
  0x42   : > { %16702 = vmatpush3.bf16.msra.mxu0 %v18489_v8  ;;  %v18533_v8 = vld [vmem:[%s23873_s1 + $0x208] sm:$0xff]  }
  0x43   : > { %16730 = vmatpush3.bf16.msra.mxu1 %v18490_v9  ;;  %16703 = vmatprep.subr.bf16.mxu0 %v18491_v10  ;;  %v18534_v9 = vld [vmem:[%s23873_s1 + $0x288] sm:$0xff]   ;;  %v18535_v10 = vld [vmem:[%s23873_s1 + $0x240] sm:$0xff]  }
  0x44   : > { %16731 = vmatprep.subr.bf16.mxu1 %v18492_v11  ;;  %v18536_v11 = vld [vmem:[%s23873_s1 + $0x2c0] sm:$0xff]  }
  0x46   : > { %16704 = vmatpush3.bf16.msra.mxu0 %v18493_v12  ;;  %v18537_v12 = vld [vmem:[%s23873_s1 + $0x200] sm:$0xff]  }
  0x47   : > { %16732 = vmatpush3.bf16.msra.mxu1 %v18494_v13  ;;  %16705 = vmatprep.subr.bf16.mxu0 %v18495_v14  ;;  %v18538_v13 = vld [vmem:[%s23873_s1 + $0x280] sm:$0xff]   ;;  %v13390_v14 = vld [vmem:[%s19849_s12 + $0x158] sm:$0xff] }
  0x48   : > { %16733 = vmatprep.subr.bf16.mxu1 %v18496_v15  ;;  %v20127_v15 = vld [vmem:[%s19849_s12 + $0x170] sm:$0xff] }
  0x4a   : > { %16706 = vmatpush3.bf16.msra.mxu0 %v18497_v16  ;;  %v13499_v16 = vcombine.low %v13390_v14, %v20127_v15 }
  0x4b   : > { %16734 = vmatpush3.bf16.msra.mxu1 %v18498_v17  ;;  %16747 = vmatprep.subr.bf16.mxu0 %v18503_v26  ;;  %v13500_v17 = vcombine.high %v13390_v14, %v20127_v15  ;;  %v18545_v26 = vld [vmem:[%s23873_s1 + $0x338] sm:$0xff]   ;;  %v18571_v14 = vld [vmem:[%s23873_s1 + $0x348] sm:$0xff]  }
  0x4c   : > { %16775 = vmatprep.subr.bf16.mxu1 %v18504_v27  ;;  %v18546_v27 = vld [vmem:[%s23873_s1 + $0x3b8] sm:$0xff]  }
  0x4d   : > { %841 = vmatmul.mubr.bf16.vlgmr.msra.gmra.mxu0 %v13333_v22  ;;  %v13501_v22 = vcombine.low %v13391_v18, %v20133_v20  ;;  %v18574_v18 = vld [vmem:[%s23873_s1 + $0x388] sm:$0xff]  }
  0x4e   : > { %1360 = vmatmul.mubr.bf16.vlgmr.msra.gmra.mxu1 %v13497_v24  ;;  %16748 = vmatpush3.bf16.msra.mxu0 %v18505_v28  ;;  %v18543_v24 = vld [vmem:[%s23873_s1 + $0x378] sm:$0xff]   ;;  %v18547_v28 = vld [vmem:[%s23873_s1 + $0x370] sm:$0xff]  }
  0x4f   : > { %16776 = vmatpush3.bf16.msra.mxu1 %v18506_v29  ;;  %16749 = vmatprep.subr.bf16.mxu0 %v18507_v30  ;;  %v18548_v29 = vld [vmem:[%s23873_s1 + $0x3f0] sm:$0xff]  }
  0x50   : > { %16777 = vmatprep.subr.bf16.mxu1 %v18508_v31  ;;  %848 = vmatprep.mubr.bf16.mxu0 %v13340_v38  ;;  %v18549_v30 = vld [vmem:[%s23873_s1 + $0x330] sm:$0xff]  }
  0x51   : > { %1367 = vmatprep.mubr.bf16.mxu1 %v13504_v58  ;;  %v18550_v31 = vld [vmem:[%s23873_s1 + $0x3b0] sm:$0xff]   ;;  %v13656_v58 = vcombine.high %v19865_v37, %v19938_v63  ;;  %v18591_v63 = vld [vmem:[%s23873_s1 + $0x468] sm:$0xff]  }
  0x52   : > { %16750 = vmatpush3.bf16.msra.mxu0 %v18509_v32  ;;  %v20162_v32 = vld [vmem:[%s19849_s12 + $0x188] sm:$0xff]  ;;  %v18590_v37 = vld [vmem:[%s23873_s1 + $0x4b0] sm:$0xff]  }
  0x53   : > { %16778 = vmatpush3.bf16.msra.mxu1 %v18510_v34  ;;  %16751 = vmatprep.subr.bf16.mxu0 %v18513_v40  ;;  %v20165_v34 = vld [vmem:[%s19849_s12 + $0x1a0] sm:$0xff]  ;;  %v13823_v38 = vcombine.low %v20127_v15, %v20162_v32 }
  0x54   : > { %16779 = vmatprep.subr.bf16.mxu1 %v18514_v42  ;;  %v13506_v40 = vcombine.high %v20162_v32, %v20165_v34  ;;  %v13505_v42 = vcombine.low %v20162_v32, %v20165_v34 }
  0x55   : > { %849 = vmatmul.mubr.bf16.gmra.mxu0 %v13339_v39  ;;  %v13824_v39 = vcombine.high %v20127_v15, %v20162_v32  ;;  %v18668_v15 = vld [vmem:[%s23873_s1 + $0x6f0] sm:$0xff]  }
  0x56   : > { %16752 = vmatpush3.bf16.msra.mxu0 %v18515_v44  ;;  %1368 = vmatmul.mubr.bf16.gmra.mxu1 %v13503_v59  ;;  %v18553_v44 = vld [vmem:[%s23873_s1 + $0x368] sm:$0xff]   ;;  %v18669_v32 = vld [vmem:[%s23873_s1 + $0x630] sm:$0xff]  }
  0x57   : > { %16780 = vmatpush3.bf16.msra.mxu1 %v18516_v45  ;;  %16753 = vmatprep.subr.bf16.mxu0 %v18517_v46  ;;  %v18554_v45 = vld [vmem:[%s23873_s1 + $0x3e8] sm:$0xff]   ;;  %v20182_v46 = vld [vmem:[%s19849_s12 + $0x190] sm:$0xff] }
  0x58   : > { %16781 = vmatprep.subr.bf16.mxu1 %v18518_v47  ;;  %1408 = vmatprep.mubr.bf16.mxu0 %v13500_v17  ;;  %v20185_v47 = vld [vmem:[%s19849_s12 + $0x1a8] sm:$0xff]  ;;  %v13826_v59 = vcombine.high %v20133_v20, %v20182_v46 }
  0x59   : > { %1457 = vmatprep.mubr.bf16.mxu1 %v13502_v23  ;;  %v18573_v17 = vld [vmem:[%s23873_s1 + $0x308] sm:$0xff]   ;;  %v18576_v23 = vld [vmem:[%s23873_s1 + $0x3c0] sm:$0xff]  }
  0x5a   : > { %16754 = vmatpush3.bf16.msra.mxu0 %v18519_v48  ;;  %v13654_v48 = vcombine.high %v19859_v33, %v19930_v60  ;;  %v18588_v33 = vld [vmem:[%s23873_s1 + $0x4f0] sm:$0xff]  }
  0x5b   : > { %16782 = vmatpush3.bf16.msra.mxu1 %v18520_v49  ;;  %16755 = vmatprep.subr.bf16.mxu0 %v18521_v50  ;;  %v13508_v49 = vcombine.high %v20182_v46, %v20185_v47  ;;  %v18556_v50 = vld [vmem:[%s23873_s1 + $0x328] sm:$0xff]   ;;  %v18589_v60 = vld [vmem:[%s23873_s1 + $0x430] sm:$0xff]  }
  0x5c   : > { %16783 = vmatprep.subr.bf16.mxu1 %v18522_v51  ;;  %v13507_v51 = vcombine.low %v20182_v46, %v20185_v47 }
  0x5e   : > { %16756 = vmatpush3.bf16.msra.mxu0 %v18523_v52  ;;  %v13825_v52 = vcombine.low %v20133_v20, %v20182_v46  ;;  %v18670_v20 = vld [vmem:[%s23873_s1 + $0x6b0] sm:$0xff]  }
  0x5f   : > { %16784 = vmatpush3.bf16.msra.mxu1 %v18524_v53  ;;  %16757 = vmatprep.subr.bf16.mxu0 %v18527_v62  ;;  %v18557_v53 = vld [vmem:[%s23873_s1 + $0x3a8] sm:$0xff]   ;;  %v18559_v62 = vld [vmem:[%s23873_s1 + $0x360] sm:$0xff]  }
  0x60   : > { %16785 = vmatprep.subr.bf16.mxu1 %v18528_v1  ;;  %v18560_v1 = vld [vmem:[%s23873_s1 + $0x3e0] sm:$0xff]  }
  0x62   : > { %16758 = vmatpush3.bf16.msra.mxu0 %v18529_v3  ;;  %v18561_v3 = vld [vmem:[%s23873_s1 + $0x320] sm:$0xff]  }
  0x63   : > { %16786 = vmatpush3.bf16.msra.mxu1 %v18530_v4  ;;  %16759 = vmatprep.subr.bf16.mxu0 %v18531_v5  ;;  %v18562_v4 = vld [vmem:[%s23873_s1 + $0x3a0] sm:$0xff]   ;;  %v18563_v5 = vld [vmem:[%s23873_s1 + $0x358] sm:$0xff]  }
  0x64   : > { %16787 = vmatprep.subr.bf16.mxu1 %v18532_v7  ;;  %v18564_v7 = vld [vmem:[%s23873_s1 + $0x3d8] sm:$0xff]  }
  0x66   : > { %16760 = vmatpush3.bf16.msra.mxu0 %v18533_v8  ;;  %v18565_v8 = vld [vmem:[%s23873_s1 + $0x318] sm:$0xff]  }
  0x67   : > { %16788 = vmatpush3.bf16.msra.mxu1 %v18534_v9  ;;  %16761 = vmatprep.subr.bf16.mxu0 %v18535_v10  ;;  %v18566_v9 = vld [vmem:[%s23873_s1 + $0x398] sm:$0xff]   ;;  %v18567_v10 = vld [vmem:[%s23873_s1 + $0x350] sm:$0xff]  }
  0x68   : > { %16789 = vmatprep.subr.bf16.mxu1 %v18536_v11  ;;  %v18568_v11 = vld [vmem:[%s23873_s1 + $0x3d0] sm:$0xff]  }
  0x6a   : > { %16762 = vmatpush3.bf16.msra.mxu0 %v18537_v12  ;;  %v18569_v12 = vld [vmem:[%s23873_s1 + $0x310] sm:$0xff]  }
  0x6b   : > { %16790 = vmatpush3.bf16.msra.mxu1 %v18538_v13  ;;  %16803 = vmatprep.subr.bf16.mxu0 %v18543_v24  ;;  %v18570_v13 = vld [vmem:[%s23873_s1 + $0x390] sm:$0xff]   ;;  %v18577_v24 = vld [vmem:[%s23873_s1 + $0x300] sm:$0xff]  }
  0x6c   : > { %16831 = vmatprep.subr.bf16.mxu1 %v18544_v25  ;;  %v18578_v25 = vld [vmem:[%s23873_s1 + $0x380] sm:$0xff]  }
  0x6d   : > { %1409 = vmatmul.mubr.bf16.vlgmr.msra.gmra.mxu0 %v13499_v16  ;;  %v18572_v16 = vld [vmem:[%s23873_s1 + $0x3c8] sm:$0xff]  }
  0x6e   : > { %1458 = vmatmul.mubr.bf16.vlgmr.msra.gmra.mxu1 %v13501_v22  ;;  %16804 = vmatpush3.bf16.msra.mxu0 %v18545_v26  ;;  %v18575_v22 = vld [vmem:[%s23873_s1 + $0x340] sm:$0xff]   ;;  %v18583_v26 = vld [vmem:[%s23873_s1 + $0x478] sm:$0xff]  }
  0x6f   : > { %16832 = vmatpush3.bf16.msra.mxu1 %v18546_v27  ;;  %16805 = vmatprep.subr.bf16.mxu0 %v18547_v28  ;;  %v18584_v27 = vld [vmem:[%s23873_s1 + $0x4f8] sm:$0xff]  }
  0x70   : > { %16833 = vmatprep.subr.bf16.mxu1 %v18548_v29  ;;  %1416 = vmatprep.mubr.bf16.mxu0 %v13506_v40  ;;  %v18585_v28 = vld [vmem:[%s23873_s1 + $0x438] sm:$0xff]   ;;  %v18595_v40 = vld [vmem:[%s23873_s1 + $0x460] sm:$0xff]  }
  0x71   : > { %1465 = vmatprep.mubr.bf16.mxu1 %v13508_v49  ;;  %v18586_v29 = vld [vmem:[%s23873_s1 + $0x4b8] sm:$0xff]  }
  0x72   : > { %16806 = vmatpush3.bf16.msra.mxu0 %v18549_v30  ;;  %v18587_v30 = vld [vmem:[%s23873_s1 + $0x470] sm:$0xff]   ;;  %v18600_v49 = vld [vmem:[%s23873_s1 + $0x4d8] sm:$0xff]  }
  0x73   : > { %16834 = vmatpush3.bf16.msra.mxu1 %v18550_v31  ;;  %16807 = vmatprep.subr.bf16.mxu0 %v18553_v44  ;;  %v18594_v31 = vld [vmem:[%s23873_s1 + $0x4a8] sm:$0xff]   ;;  %v18597_v44 = vld [vmem:[%s23873_s1 + $0x420] sm:$0xff]  }
  0x74   : > { %16835 = vmatprep.subr.bf16.mxu1 %v18554_v45  ;;  %v18598_v45 = vld [vmem:[%s23873_s1 + $0x4a0] sm:$0xff]  }
  0x75   : > { %1417 = vmatmul.mubr.bf16.gmra.mxu0 %v13505_v42  ;;  %v18596_v42 = vld [vmem:[%s23873_s1 + $0x4e0] sm:$0xff]  }
  0x76   : > { %16808 = vmatpush3.bf16.msra.mxu0 %v18556_v50  ;;  %1975 = vmatprep.mubr.bf16.mxu0 %v13654_v48  ;;  %v18599_v48 = vld [vmem:[%s23873_s1 + $0x458] sm:$0xff]  }
  0x77   : > { %16836 = vmatpush3.bf16.msra.mxu1 %v18557_v53  ;;  %16809 = vmatprep.subr.bf16.mxu0 %v18559_v62  ;;  %v18601_v50 = vld [vmem:[%s23873_s1 + $0x418] sm:$0xff]   ;;  %v20332_v53 = vld [vmem:[%s19849_s12 + $0x60] sm:$0xff] }
  0x78   : > { %1466 = vmatmul.mubr.bf16.gmra.mxu1 %v13507_v51  ;;  %16837 = vmatprep.subr.bf16.mxu1 %v18560_v1  ;;  %v18602_v51 = vld [vmem:[%s23873_s1 + $0x498] sm:$0xff]   ;;  %v13660_v62 = vcombine.high %v19933_v61, %v20332_v53 }
  0x79   : > { %2024 = vmatprep.mubr.bf16.mxu1 %v13656_v58  ;;  %v20335_v58 = vld [vmem:[%s19849_s12 + $0x68] sm:$0xff] }
  0x7a   : > { %16810 = vmatpush3.bf16.msra.mxu0 %v18561_v3  ;;  %v13662_v1 = vcombine.high %v19941_v0, %v20335_v58  ;;  %v13659_v3 = vcombine.low %v19933_v61, %v20332_v53  ;;  %v18610_v61 = vld [vmem:[%s23873_s1 + $0x490] sm:$0xff]  }
  0x7b   : > { %16838 = vmatpush3.bf16.msra.mxu1 %v18562_v4  ;;  %16811 = vmatprep.subr.bf16.mxu0 %v18563_v5  ;;  %v13661_v4 = vcombine.low %v19941_v0, %v20335_v58  ;;  %v18607_v5 = vld [vmem:[%s23873_s1 + $0x450] sm:$0xff]   ;;  %v18611_v0 = vld [vmem:[%s23873_s1 + $0x448] sm:$0xff]  }
  0x7c   : > { %16839 = vmatprep.subr.bf16.mxu1 %v18564_v7  ;;  %v18608_v7 = vld [vmem:[%s23873_s1 + $0x4d0] sm:$0xff]  }
  0x7e   : > { %16812 = vmatpush3.bf16.msra.mxu0 %v18565_v8  ;;  %v18609_v8 = vld [vmem:[%s23873_s1 + $0x410] sm:$0xff]  }
  0x7f   : > { %16840 = vmatpush3.bf16.msra.mxu1 %v18566_v9  ;;  %16813 = vmatprep.subr.bf16.mxu0 %v18567_v10  ;;  %v18612_v9 = vld [vmem:[%s23873_s1 + $0x4c8] sm:$0xff]  }
  0x80   : > { %16841 = vmatprep.subr.bf16.mxu1 %v18568_v11  ;;  %v18613_v10 = vld [vmem:[%s23873_s1 + $0x408] sm:$0xff]  }
  0x81   : > { %v18614_v11 = vld [vmem:[%s23873_s1 + $0x488] sm:$0xff]  }
  0x82   : > { %16814 = vmatpush3.bf16.msra.mxu0 %v18569_v12  ;;  %v18615_v12 = vld [vmem:[%s23873_s1 + $0x440] sm:$0xff]  }
  0x83   : > { %16842 = vmatpush3.bf16.msra.mxu1 %v18570_v13  ;;  %16815 = vmatprep.subr.bf16.mxu0 %v18571_v14  ;;  %v18616_v13 = vld [vmem:[%s23873_s1 + $0x4c0] sm:$0xff]   ;;  %v18623_v14 = vld [vmem:[%s23873_s1 + $0x578] sm:$0xff]  }
  0x84   : > { %16843 = vmatprep.subr.bf16.mxu1 %v18572_v16  ;;  %v18624_v16 = vld [vmem:[%s23873_s1 + $0x5f8] sm:$0xff]  }
  0x86   : > { %16816 = vmatpush3.bf16.msra.mxu0 %v18573_v17  ;;  %v18625_v17 = vld [vmem:[%s23873_s1 + $0x538] sm:$0xff]  }
  0x87   : > { %16844 = vmatpush3.bf16.msra.mxu1 %v18574_v18  ;;  %16817 = vmatprep.subr.bf16.mxu0 %v18575_v22  ;;  %v18626_v18 = vld [vmem:[%s23873_s1 + $0x5b8] sm:$0xff]   ;;  %v18627_v22 = vld [vmem:[%s23873_s1 + $0x570] sm:$0xff]  }
  0x88   : > { %16845 = vmatprep.subr.bf16.mxu1 %v18576_v23  ;;  %v18628_v23 = vld [vmem:[%s23873_s1 + $0x5f0] sm:$0xff]  }
  0x8a   : > { %16818 = vmatpush3.bf16.msra.mxu0 %v18577_v24  ;;  %v18634_v24 = vld [vmem:[%s23873_s1 + $0x5e8] sm:$0xff]  }
  0x8b   : > { %16846 = vmatpush3.bf16.msra.mxu1 %v18578_v25  ;;  %16859 = vmatprep.subr.bf16.mxu0 %v18583_v26  ;;  %v18635_v25 = vld [vmem:[%s23873_s1 + $0x528] sm:$0xff]   ;;  %v18637_v26 = vld [vmem:[%s23873_s1 + $0x560] sm:$0xff]  }
  0x8c   : > { %16887 = vmatprep.subr.bf16.mxu1 %v18584_v27  ;;  %v18638_v27 = vld [vmem:[%s23873_s1 + $0x5e0] sm:$0xff]  }
  0x8d   : > { %1976 = vmatmul.mubr.bf16.vlgmr.msra.gmra.mxu0 %v13653_v2  ;;  %v18592_v2 = vld [vmem:[%s23873_s1 + $0x4e8] sm:$0xff]  }
  0x8e   : > { %2025 = vmatmul.mubr.bf16.vlgmr.msra.gmra.mxu1 %v13655_v6  ;;  %16860 = vmatpush3.bf16.msra.mxu0 %v18585_v28  ;;  %v18593_v6 = vld [vmem:[%s23873_s1 + $0x428] sm:$0xff]   ;;  %v18639_v28 = vld [vmem:[%s23873_s1 + $0x520] sm:$0xff]  }
  0x8f   : > { %16888 = vmatpush3.bf16.msra.mxu1 %v18586_v29  ;;  %16861 = vmatprep.subr.bf16.mxu0 %v18587_v30  ;;  %v18640_v29 = vld [vmem:[%s23873_s1 + $0x5a0] sm:$0xff]   ;;  %v18641_v30 = vld [vmem:[%s23873_s1 + $0x558] sm:$0xff]  }
  0x90   : > { %16889 = vmatprep.subr.bf16.mxu1 %v18588_v33  ;;  %1983 = vmatprep.mubr.bf16.mxu0 %v13660_v62  ;;  %v18642_v33 = vld [vmem:[%s23873_s1 + $0x5d8] sm:$0xff]  }
  0x91   : > { %2032 = vmatprep.mubr.bf16.mxu1 %v13662_v1  ;;  %v18663_v62 = vld [vmem:[%s23873_s1 + $0x678] sm:$0xff]  }
  0x92   : > { %16862 = vmatpush3.bf16.msra.mxu0 %v18589_v60  ;;  %v18644_v60 = vld [vmem:[%s23873_s1 + $0x598] sm:$0xff]  }
  0x93   : > { %16890 = vmatpush3.bf16.msra.mxu1 %v18590_v37  ;;  %16863 = vmatprep.subr.bf16.mxu0 %v18591_v63  ;;  %v20464_v37 = vld [vmem:[%s19849_s12 + $0x1b0] sm:$0xff]  ;;  %v18664_v1 = vld [vmem:[%s23873_s1 + $0x6f8] sm:$0xff]  }
  0x94   : > { %16891 = vmatprep.subr.bf16.mxu1 %v18592_v2  ;;  %v13828_v63 = vcombine.high %v20079_v55, %v20464_v37  ;;  %v13827_v2 = vcombine.low %v20079_v55, %v20464_v37  ;;  %v18650_v55 = vld [vmem:[%s23873_s1 + $0x590] sm:$0xff]  }
  0x95   : > { %1984 = vmatmul.mubr.bf16.gmra.mxu0 %v13659_v3  ;;  %v18665_v3 = vld [vmem:[%s23873_s1 + $0x638] sm:$0xff]  }
  0x96   : > { %16864 = vmatpush3.bf16.msra.mxu0 %v18593_v6  ;;  %2033 = vmatmul.mubr.bf16.gmra.mxu1 %v13661_v4  ;;  %v18647_v6 = vld [vmem:[%s23873_s1 + $0x550] sm:$0xff]   ;;  %v18666_v4 = vld [vmem:[%s23873_s1 + $0x6b8] sm:$0xff]  }
  0x97   : > { %16892 = vmatpush3.bf16.msra.mxu1 %v18594_v31  ;;  %16865 = vmatprep.subr.bf16.mxu0 %v18595_v40  ;;  %v18648_v31 = vld [vmem:[%s23873_s1 + $0x5d0] sm:$0xff]  }
  0x98   : > { %16893 = vmatprep.subr.bf16.mxu1 %v18596_v42  ;;  %2073 = vmatprep.mubr.bf16.mxu0 %v13658_v43  ;;  %v18617_v43 = vld [vmem:[%s23873_s1 + $0x400] sm:$0xff]   ;;  %v18649_v40 = vld [vmem:[%s23873_s1 + $0x510] sm:$0xff]   ;;  %v18651_v42 = vld [vmem:[%s23873_s1 + $0x548] sm:$0xff]  }
  0x99   : > { %2591 = vmatprep.mubr.bf16.mxu1 %v13822_v57  ;;  %v18618_v57 = vld [vmem:[%s23873_s1 + $0x480] sm:$0xff]  }
  0x9a   : > { %16866 = vmatpush3.bf16.msra.mxu0 %v18597_v44  ;;  %v18652_v44 = vld [vmem:[%s23873_s1 + $0x5c8] sm:$0xff]  }
  0x9b   : > { %16894 = vmatpush3.bf16.msra.mxu1 %v18598_v45  ;;  %16867 = vmatprep.subr.bf16.mxu0 %v18599_v48  ;;  %v18653_v45 = vld [vmem:[%s23873_s1 + $0x508] sm:$0xff]  }
  0x9c   : > { %16895 = vmatprep.subr.bf16.mxu1 %v18600_v49  ;;  %v18654_v48 = vld [vmem:[%s23873_s1 + $0x588] sm:$0xff]   ;;  %v18656_v49 = vld [vmem:[%s23873_s1 + $0x5c0] sm:$0xff]  }
  0x9e   : > { %16868 = vmatpush3.bf16.msra.mxu0 %v18601_v50  ;;  %v18657_v50 = vld [vmem:[%s23873_s1 + $0x500] sm:$0xff]  }
  0x9f   : > { %16896 = vmatpush3.bf16.msra.mxu1 %v18602_v51  ;;  %16869 = vmatprep.subr.bf16.mxu0 %v18607_v5  ;;  %v18658_v51 = vld [vmem:[%s23873_s1 + $0x580] sm:$0xff]   ;;  %v18667_v5 = vld [vmem:[%s23873_s1 + $0x670] sm:$0xff]  }
  0xa0   : > { %16897 = vmatprep.subr.bf16.mxu1 %v18608_v7  ;;  %v18673_v7 = vld [vmem:[%s23873_s1 + $0x668] sm:$0xff]  }
  0xa2   : > { %16870 = vmatpush3.bf16.msra.mxu0 %v18609_v8  ;;  %v18674_v8 = vld [vmem:[%s23873_s1 + $0x6e8] sm:$0xff]  }
  0xa3   : > { %16898 = vmatpush3.bf16.msra.mxu1 %v18610_v61  ;;  %16871 = vmatprep.subr.bf16.mxu0 %v18611_v0  ;;  %v13724_v61 = vld [vmem:[%s19849_s12 + $0x1c0] sm:$0xff] }
  0xa4   : > { %16899 = vmatprep.subr.bf16.mxu1 %v18612_v9  ;;  %v13832_v0 = vcombine.high %v20185_v47, %v13724_v61  ;;  %v18676_v9 = vld [vmem:[%s23873_s1 + $0x628] sm:$0xff]  }
  0xa6   : > { %16872 = vmatpush3.bf16.msra.mxu0 %v18613_v10  ;;  %v18677_v10 = vld [vmem:[%s23873_s1 + $0x6a8] sm:$0xff]  }
  0xa7   : > { %16900 = vmatpush3.bf16.msra.mxu1 %v18614_v11  ;;  %16873 = vmatprep.subr.bf16.mxu0 %v18615_v12  ;;  %v18679_v11 = vld [vmem:[%s23873_s1 + $0x660] sm:$0xff]  }
  0xa8   : > { %16901 = vmatprep.subr.bf16.mxu1 %v18616_v13  ;;  %v18680_v12 = vld [vmem:[%s23873_s1 + $0x6e0] sm:$0xff]  }
  0xa9   : > { %v18682_v13 = vld [vmem:[%s23873_s1 + $0x6a0] sm:$0xff]  }
  0xaa   : > { %16874 = vmatpush3.bf16.msra.mxu0 %v18617_v43  ;;  %v18683_v43 = vld [vmem:[%s23873_s1 + $0x658] sm:$0xff]  }
  0xab   : > { %16902 = vmatpush3.bf16.msra.mxu1 %v18618_v57  ;;  %16915 = vmatprep.subr.bf16.mxu0 %v18623_v14  ;;  %v18684_v57 = vld [vmem:[%s23873_s1 + $0x6d8] sm:$0xff]  }
  0xac   : > { %16943 = vmatprep.subr.bf16.mxu1 %v18624_v16  ;;  %v18685_v14 = vld [vmem:[%s23873_s1 + $0x618] sm:$0xff]  }
  0xad   : > { %2074 = vmatmul.mubr.bf16.vlgmr.msra.gmra.mxu0 %v13657_v41  ;;  %v13664_v41 = vcombine.high %v20029_v36, %v20418_v35  ;;  %v18636_v36 = vld [vmem:[%s23873_s1 + $0x5a8] sm:$0xff]   ;;  %v18686_v16 = vld [vmem:[%s23873_s1 + $0x698] sm:$0xff]  }
  0xae   : > { %2592 = vmatmul.mubr.bf16.vlgmr.msra.gmra.mxu1 %v13821_v56  ;;  %16916 = vmatpush3.bf16.msra.mxu0 %v18625_v17  ;;  %v18633_v56 = vld [vmem:[%s23873_s1 + $0x568] sm:$0xff]   ;;  %v18687_v17 = vld [vmem:[%s23873_s1 + $0x650] sm:$0xff]  }
  0xaf   : > { %16944 = vmatpush3.bf16.msra.mxu1 %v18626_v18  ;;  %16917 = vmatprep.subr.bf16.mxu0 %v18627_v22  ;;  %v18688_v18 = vld [vmem:[%s23873_s1 + $0x6d0] sm:$0xff]  }
  0xb0   : > { %16945 = vmatprep.subr.bf16.mxu1 %v18628_v23  ;;  %2081 = vmatprep.mubr.bf16.mxu0 %v13664_v41  ;;  %v18689_v22 = vld [vmem:[%s23873_s1 + $0x610] sm:$0xff]   ;;  %v18693_v41 = vld [vmem:[%s23873_s1 + $0x608] sm:$0xff]  }
  0xb1   : > { %2599 = vmatprep.mubr.bf16.mxu1 %v13828_v63  ;;  %v18690_v23 = vld [vmem:[%s23873_s1 + $0x690] sm:$0xff]  }
  0xb2   : > { %16918 = vmatpush3.bf16.msra.mxu0 %v18629_v19  ;;  %v18691_v19 = vld [vmem:[%s23873_s1 + $0x648] sm:$0xff]  }
  0xb3   : > { %16946 = vmatpush3.bf16.msra.mxu1 %v18630_v21  ;;  %16919 = vmatprep.subr.bf16.mxu0 %v18633_v56  ;;  %v18692_v21 = vld [vmem:[%s23873_s1 + $0x6c8] sm:$0xff]  }
  0xb4   : > { %16947 = vmatprep.subr.bf16.mxu1 %v18634_v24  ;;  %v18694_v56 = vld [vmem:[%s23873_s1 + $0x688] sm:$0xff]  }
  0xb5   : > { %2082 = vmatmul.mubr.bf16.gmra.mxu0 %v13663_v54  ;;  %v18699_v63 = vld [vmem:[%s19849_s12 + $0x30] ss:$24 sps:$4 sm:$0xff]  }
  0xb6   : > { %16920 = vmatpush3.bf16.msra.mxu0 %v18635_v25  ;;  %2640 = vmatprep.mubr.bf16.mxu0 %v13824_v39  ;;  %v18643_v39 = vld [vmem:[%s23873_s1 + $0x518] sm:$0xff]   ;;  %v18695_v25 = vld [vmem:[%s23873_s1 + $0x640] sm:$0xff]  }
  0xb7   : > { %16948 = vmatpush3.bf16.msra.mxu1 %v18636_v36  ;;  %16921 = vmatprep.subr.bf16.mxu0 %v18637_v26  ;;  %v18696_v26 = vld [vmem:[%s23873_s1 + $0x6c0] sm:$0xff]  }
  0xb8   : > { %16949 = vmatprep.subr.bf16.mxu1 %v18638_v27  ;;  %2600 = vmatmul.mubr.bf16.gmra.mxu1 %v13827_v2 }
  0xb9   : > { %2689 = vmatprep.mubr.bf16.mxu1 %v13826_v59  ;;  %v18655_v59 = vld [vmem:[%s23873_s1 + $0x540] sm:$0xff]  }
  0xba   : > { %16922 = vmatpush3.bf16.msra.mxu0 %v18639_v28 }
  0xbb   : > { %16950 = vmatpush3.bf16.msra.mxu1 %v18640_v29  ;;  %16923 = vmatprep.subr.bf16.mxu0 %v18641_v30  ;;  %v18697_v29 = vld [vmem:[%s23873_s1 + $0x600] sm:$0xff]  }
  0xbc   : > { %16951 = vmatprep.subr.bf16.mxu1 %v18642_v33 }
  0xbe   : > { %16924 = vmatpush3.bf16.msra.mxu0 %v18643_v39  ;;  %v18698_v39 = vld [vmem:[%s23873_s1 + $0x680] sm:$0xff]  }
  0xbf   : > { %16952 = vmatpush3.bf16.msra.mxu1 %v18644_v60  ;;  %16925 = vmatprep.subr.bf16.mxu0 %v18647_v6 }
  0xc0   : > { %16953 = vmatprep.subr.bf16.mxu1 %v18648_v31  ;;  %v18701_v31 = vld [vmem:[%s19849_s12 + $0x34] ss:$24 sps:$4 sm:$0xff]  }
  0xc2   : > { %16926 = vmatpush3.bf16.msra.mxu0 %v18649_v40 }
  0xc3   : > { %16954 = vmatpush3.bf16.msra.mxu1 %v18650_v55  ;;  %16927 = vmatprep.subr.bf16.mxu0 %v18651_v42  ;;  %v18702_v42 = vld [vmem:[%s19849_s12 + $0x38] ss:$24 sps:$4 sm:$0xff]  }
  0xc4   : > { %16955 = vmatprep.subr.bf16.mxu1 %v18652_v44  ;;  %v18704_v44 = vld [vmem:[%s19849_s12 + $0x3c] ss:$24 sps:$4 sm:$0xff]  }
  0xc6   : > { %16928 = vmatpush3.bf16.msra.mxu0 %v18653_v45 }
  0xc7   : > { %16956 = vmatpush3.bf16.msra.mxu1 %v18654_v48  ;;  %16929 = vmatprep.subr.bf16.mxu0 %v18655_v59  ;;  %v18705_v48 = vld [vmem:[%s23873_s1 + $0x778] sm:$0xff]  }
  0xc8   : > { %16957 = vmatprep.subr.bf16.mxu1 %v18656_v49  ;;  %v18706_v59 = vld [vmem:[%s23873_s1 + $0x7f8] sm:$0xff]  }
  0xca   : > { %16930 = vmatpush3.bf16.msra.mxu0 %v18657_v50  ;;  %v18707_v50 = vld [vmem:[%s23873_s1 + $0x738] sm:$0xff]  }
  0xcb   : > { %16958 = vmatpush3.bf16.msra.mxu1 %v18658_v51  ;;  %16971 = vmatprep.subr.bf16.mxu0 %v18663_v62  ;;  %v18708_v51 = vld [vmem:[%s23873_s1 + $0x7b8] sm:$0xff]   ;;  %v18709_v62 = vld [vmem:[%s23873_s1 + $0x770] sm:$0xff]  }
  0xcc   : > { %16999 = vmatprep.subr.bf16.mxu1 %v18664_v1  ;;  %v18710_v1 = vld [vmem:[%s23873_s1 + $0x7f0] sm:$0xff]  }
  0xcd   : > { %2641 = vmatmul.mubr.bf16.vlgmr.msra.gmra.mxu0 %v13823_v38  ;;  %v13723_v38 = vld [vmem:[%s19849_s12 + $0x1b8] sm:$0xff] }
  0xce   : > { %2690 = vmatmul.mubr.bf16.vlgmr.msra.gmra.mxu1 %v13825_v52  ;;  %16972 = vmatpush3.bf16.msra.mxu0 %v18665_v3  ;;  %v13830_v46 = vcombine.high %v20165_v34, %v13723_v38  ;;  %v13829_v52 = vcombine.low %v20165_v34, %v13723_v38  ;;  %v13831_v34 = vcombine.low %v20185_v47, %v13724_v61  ;;  %v18681_v47 = vld [vmem:[%s23873_s1 + $0x620] sm:$0xff]   ;;  %v18711_v3 = vld [vmem:[%s23873_s1 + $0x730] sm:$0xff]  }
  0xcf   : > { %17000 = vmatpush3.bf16.msra.mxu1 %v18666_v4  ;;  %16973 = vmatprep.subr.bf16.mxu0 %v18667_v5  ;;  %v18712_v4 = vld [vmem:[%s23873_s1 + $0x7b0] sm:$0xff]   ;;  %v18713_v5 = vld [vmem:[%s23873_s1 + $0x768] sm:$0xff]   ;;  %v18717_v38 = vld [vmem:[%s23873_s1 + $0x760] sm:$0xff]  }
  0xd0   : > { %17001 = vmatprep.subr.bf16.mxu1 %v18668_v15  ;;  %2648 = vmatprep.mubr.bf16.mxu0 %v13830_v46  ;;  %v18714_v15 = vld [vmem:[%s23873_s1 + $0x7e8] sm:$0xff]  }
  0xd1   : > { %2697 = vmatprep.mubr.bf16.mxu1 %v13832_v0  ;;  %v18720_v0 = vld [vmem:[%s23873_s1 + $0x7a0] sm:$0xff]  }
  0xd2   : > { %16974 = vmatpush3.bf16.msra.mxu0 %v18669_v32  ;;  %v18715_v32 = vld [vmem:[%s23873_s1 + $0x728] sm:$0xff]  }
  0xd3   : > { %17002 = vmatpush3.bf16.msra.mxu1 %v18670_v20  ;;  %16975 = vmatprep.subr.bf16.mxu0 %v18673_v7  ;;  %v18716_v20 = vld [vmem:[%s23873_s1 + $0x7a8] sm:$0xff]  }
  0xd4   : > { %17003 = vmatprep.subr.bf16.mxu1 %v18674_v8  ;;  %v18719_v8 = vld [vmem:[%s23873_s1 + $0x720] sm:$0xff]  }
  0xd5   : > { %2649 = vmatmul.mubr.bf16.gmra.mxu0 %v13829_v52  ;;  %v18718_v52 = vld [vmem:[%s23873_s1 + $0x7e0] sm:$0xff]  }
  0xd6   : > { %16976 = vmatpush3.bf16.msra.mxu0 %v18676_v9  ;;  %2698 = vmatmul.mubr.bf16.gmra.mxu1 %v13831_v34 }
  0xd7   : > { %17004 = vmatpush3.bf16.msra.mxu1 %v18677_v10  ;;  %16977 = vmatprep.subr.bf16.mxu0 %v18679_v11  ;;  %v18721_v10 = vld [vmem:[%s23873_s1 + $0x758] sm:$0xff]  }
  0xd8   : > { %17005 = vmatprep.subr.bf16.mxu1 %v18680_v12  ;;  %3207 = vmatprep.mubr.bf16.mxu0 %v18701_v31 }
  0xd9   : > { %3256 = vmatprep.mubr.bf16.mxu1 %v18704_v44 }
  0xda   : > { %16978 = vmatpush3.bf16.msra.mxu0 %v18681_v47  ;;  %v18722_v47 = vld [vmem:[%s23873_s1 + $0x7d8] sm:$0xff]  }
  0xdb   : > { %17006 = vmatpush3.bf16.msra.mxu1 %v18682_v13  ;;  %16979 = vmatprep.subr.bf16.mxu0 %v18683_v43  ;;  %v18723_v43 = vld [vmem:[%s23873_s1 + $0x718] sm:$0xff]  }
  0xdc   : > { %17007 = vmatprep.subr.bf16.mxu1 %v18684_v57 }
  0xde   : > { %16980 = vmatpush3.bf16.msra.mxu0 %v18685_v14 }
  0xdf   : > { %17008 = vmatpush3.bf16.msra.mxu1 %v18686_v16  ;;  %16981 = vmatprep.subr.bf16.mxu0 %v18687_v17  ;;  %v18724_v16 = vld [vmem:[%s23873_s1 + $0x798] sm:$0xff]  }
  0xe0   : > { %17009 = vmatprep.subr.bf16.mxu1 %v18688_v18  ;;  %v2723_v17 = vld [vmem:[%s19849_s12 + $0x78] sm:$0xff] }
  0xe2   : > { %16982 = vmatpush3.bf16.msra.mxu0 %v18689_v22 }
  0xe3   : > { %17010 = vmatpush3.bf16.msra.mxu1 %v18690_v23  ;;  %16983 = vmatprep.subr.bf16.mxu0 %v18691_v19  ;;  %v13984_v23 = vcombine.high %v20332_v53, %v2723_v17  ;;  %v2724_v19 = vld [vmem:[%s19849_s12 + $0x80] sm:$0xff] }
  0xe4   : > { %17011 = vmatprep.subr.bf16.mxu1 %v18692_v21  ;;  %v13983_v21 = vcombine.low %v20332_v53, %v2723_v17  ;;  %v18731_v53 = vld [vmem:[%s23873_s1 + $0x710] sm:$0xff]  }
  0xe6   : > { %16984 = vmatpush3.bf16.msra.mxu0 %v18693_v41 }
  0xe7   : > { %17012 = vmatpush3.bf16.msra.mxu1 %v18694_v56  ;;  %16985 = vmatprep.subr.bf16.mxu0 %v18695_v25  ;;  %v13985_v56 = vcombine.low %v20335_v58, %v2724_v19  ;;  %v18730_v25 = vld [vmem:[%s23873_s1 + $0x7d0] sm:$0xff]  }
  0xe8   : > { %17013 = vmatprep.subr.bf16.mxu1 %v18696_v26  ;;  %v18733_v26 = vld [vmem:[%s23873_s1 + $0x748] sm:$0xff]  }
  0xea   : > { %16986 = vmatpush3.bf16.msra.mxu0 %v18697_v29 }
  0xeb   : > { %17014 = vmatpush3.bf16.msra.mxu1 %v18698_v39  ;;  %17027 = vmatprep.subr.bf16.mxu0 %v18705_v48 }
  0xec   : > { %17055 = vmatprep.subr.bf16.mxu1 %v18706_v59  ;;  %v18741_v59 = vld [vmem:[%s19849_s12 + $0x40] ss:$24 sps:$4 sm:$0xff]  }
  0xed   : > { %v16651_v54 = vpop.f32.mrf.mxu0  ;;  %3208 = vmatmul.mubr.bf16.vlgmr.msra.gmra.mxu0 %v18699_v63  ;;  %v18737_v63 = vld [vmem:[%s23873_s1 + $0x740] sm:$0xff]  }
  0xee   : > { %v16679_v24 = vpop.f32.mrf.mxu1  ;;  %3257 = vmatmul.mubr.bf16.vlgmr.msra.gmra.mxu1 %v18702_v42  ;;  %17028 = vmatpush3.bf16.msra.mxu0 %v18707_v50  ;;  %v18739_v42 = vld [vmem:[%s23873_s1 + $0x700] sm:$0xff]  }
  0xef   : > { %v16652_v36 = vpop.f32.mrf.mxu0  ;;  %17056 = vmatpush3.bf16.msra.mxu1 %v18708_v51  ;;  %17029 = vmatprep.subr.bf16.mxu0 %v18709_v62  ;;  %v18743_v50 = vld [vmem:[%s19849_s12 + $0x44] ss:$24 sps:$4 sm:$0xff]   ;;  %v18744_v62 = vld [vmem:[%s19849_s12 + $0x180] ss:$24 sps:$4 sm:$0xff]  }
  0xf0   : > { %v16653_v27 = vadd.f32 %v16652_v36, %v16651_v54  ;;  %v16680_v28 = vpop.f32.mrf.mxu1  ;;  %17057 = vmatprep.subr.bf16.mxu1 %v18710_v1  ;;  %v13986_v54 = vcombine.high %v20335_v58, %v2724_v19  ;;  %3215 = vmatprep.mubr.bf16.mxu0 %v13984_v23  ;;  %v18732_v58 = vld [vmem:[%s23873_s1 + $0x790] sm:$0xff]   ;;  %v18746_v1 = vld [vmem:[%s19849_s12 + $0x184] ss:$24 sps:$4 sm:$0xff]  }
  0xf1   : > { %v16681_v30 = vadd.f32 %v16680_v28, %v16679_v24  ;;  %v16654_v33 = vpop.f32.mrf.mxu0  ;;  %v18729_v24 = vld [vmem:[%s23873_s1 + $0x750] sm:$0xff]   ;;  %v18764_v19 = vld [vmem:[%s23873_s1 + $0x8a0] sm:$0xff]  }
  0xf2   : > { %v16682_v60 = vpop.f32.mrf.mxu1  ;;  %17030 = vmatpush3.bf16.msra.mxu0 %v18711_v3  ;;  %3264 = vmatprep.mubr.bf16.mxu1 %v13986_v54  ;;  %v18747_v3 = vld [vmem:[%s23873_s1 + $0x878] sm:$0xff]  }
  0xf3   : > { %v20618_v2 = vadd.f32 %v16681_v30, %v16653_v27  ;;  %v16655_v6 = vpop.f32.mrf.mxu0  ;;  %17058 = vmatpush3.bf16.msra.mxu1 %v18712_v4  ;;  %17031 = vmatprep.subr.bf16.mxu0 %v18713_v5  ;;  %v18734_v27 = vld [vmem:[%s23873_s1 + $0x7c8] sm:$0xff]   ;;  %v18748_v5 = vld [vmem:[%s23873_s1 + $0x8f8] sm:$0xff]  }
  0xf4   : > { %v16656_v40 = vadd.f32 %v16655_v6, %v16654_v33  ;;  %v16683_v55 = vpop.f32.mrf.mxu1  ;;  %17059 = vmatprep.subr.bf16.mxu1 %v18714_v15  ;;  %v18735_v30 = vld [vmem:[%s23873_s1 + $0x708] sm:$0xff]   ;;  %v18749_v15 = vld [vmem:[%s23873_s1 + $0x838] sm:$0xff]  }
  0xf5   : > { %v16684_v45 = vadd.f32 %v16683_v55, %v16682_v60  ;;  %v16657_v46 = vpop.f32.mrf.mxu0  ;;  %3216 = vmatmul.mubr.bf16.gmra.mxu0 %v13983_v21  ;;  %v18736_v33 = vld [vmem:[%s23873_s1 + $0x788] sm:$0xff]   ;;  %v18766_v54 = vld [vmem:[%s23873_s1 + $0x8d8] sm:$0xff]  }
  0xf6   : > { %17032 = vmatpush3.bf16.msra.mxu0 %v18715_v32  ;;  %v16685_v7 = vpop.f32.mrf.mxu1  ;;  %3265 = vmatmul.mubr.bf16.gmra.mxu1 %v13985_v56  ;;  %v18767_v56 = vld [vmem:[%s23873_s1 + $0x818] sm:$0xff]  }
  0xf7   : > { %v20629_v49 = vadd.f32 %v16684_v45, %v16656_v40  ;;  %17060 = vmatpush3.bf16.msra.mxu1 %v18716_v20  ;;  %17033 = vmatprep.subr.bf16.mxu0 %v18717_v38  ;;  %v16658_v61 = vpop.f32.mrf.mxu0  ;;  %v18738_v40 = vld [vmem:[%s23873_s1 + $0x7c0] sm:$0xff]   ;;  %v18751_v38 = vld [vmem:[%s23873_s1 + $0x870] sm:$0xff]  }
  0xf8   : > { %17061 = vmatprep.subr.bf16.mxu1 %v18718_v52  ;;  %v16659_v9 = vadd.f32 %v16658_v61, %v16657_v46  ;;  %v16686_v34 = vpop.f32.mrf.mxu1  ;;  %v18740_v45 = vld [vmem:[%s23873_s1 + $0x780] sm:$0xff]   ;;  %3305 = vmatprep.mubr.bf16.mxu0 %v18743_v50  ;;  %v18752_v52 = vld [vmem:[%s23873_s1 + $0x8f0] sm:$0xff]  }
  0xf9   : > { %v16687_v11 = vadd.f32 %v16686_v34, %v16685_v7  ;;  %v16660_v12 = vpop.f32.mrf.mxu0  ;;  %3823 = vmatprep.mubr.bf16.mxu1 %v18746_v1  ;;  %v18780_v50 = vld [vmem:[%s23873_s1 + $0x8c0] sm:$0xff]  }
  0xfa   : > { %17034 = vmatpush3.bf16.msra.mxu0 %v18719_v8  ;;  %v16688_v13 = vpop.f32.mrf.mxu1  ;;  %v18753_v8 = vld [vmem:[%s23873_s1 + $0x830] sm:$0xff]   ;;  %v18781_v1 = vld [vmem:[%s23873_s1 + $0x800] sm:$0xff]  }
  0xfb   : > { %17062 = vmatpush3.bf16.msra.mxu1 %v18720_v0  ;;  %17035 = vmatprep.subr.bf16.mxu0 %v18721_v10  ;;  %v20682_v57 = vadd.f32 %v16687_v11, %v16659_v9  ;;  %v16661_v14 = vpop.f32.mrf.mxu0  ;;  %v18754_v9 = vld [vmem:[%s23873_s1 + $0x8b0] sm:$0xff]   ;;  %v2725_v10 = vld [vmem:[%s19849_s12 + $0x88] sm:$0xff] }
  0xfc   : > { %17063 = vmatprep.subr.bf16.mxu1 %v18722_v47  ;;  %v16662_v18 = vadd.f32 %v16661_v14, %v16660_v12  ;;  %v16689_v22 = vpop.f32.mrf.mxu1  ;;  %v13988_v11 = vcombine.high %v20418_v35, %v2725_v10  ;;  %v13987_v12 = vcombine.low %v20418_v35, %v2725_v10  ;;  %v18757_v47 = vld [vmem:[%s23873_s1 + $0x868] sm:$0xff]   ;;  %v18790_v10 = vld [vmem:[%s23873_s1 + $0x9f8] sm:$0xff]  }
  0xfd   : > { %v16690_v41 = vadd.f32 %v16689_v22, %v16688_v13  ;;  %v18759_v14 = vld [vmem:[%s23873_s1 + $0x828] sm:$0xff]   ;;  %v18763_v22 = vld [vmem:[%s23873_s1 + $0x820] sm:$0xff]  }
  0xfe   : > { %17036 = vmatpush3.bf16.msra.mxu0 %v18723_v43  ;;  %v18758_v43 = vld [vmem:[%s23873_s1 + $0x8e8] sm:$0xff]  }
  0xff   : > { %17064 = vmatpush3.bf16.msra.mxu1 %v18724_v16  ;;  %v20699_v36 = vadd.f32 %v16690_v41, %v16662_v18  ;;  %17037 = vmatprep.subr.bf16.mxu0 %v18729_v24  ;;  %v18760_v35 = vld [vmem:[%s23873_s1 + $0x8a8] sm:$0xff]   ;;  %v18761_v16 = vld [vmem:[%s23873_s1 + $0x860] sm:$0xff]   ;;  %v18765_v41 = vld [vmem:[%s23873_s1 + $0x858] sm:$0xff]  }
 0x100   : > { %17065 = vmatprep.subr.bf16.mxu1 %v18730_v25  ;;  %v18762_v18 = vld [vmem:[%s23873_s1 + $0x8e0] sm:$0xff]   ;;  %v18768_v24 = vld [vmem:[%s23873_s1 + $0x898] sm:$0xff]   ;;  %v14046_v25 = vld [vmem:[%s19849_s12 + $0x1c8] sm:$0xff] }
 0x102   : > { %17038 = vmatpush3.bf16.msra.mxu0 %v18731_v53  ;;  %v14152_v53 = vcombine.high %v20464_v37, %v14046_v25 }
 0x103   : > { %17066 = vmatpush3.bf16.msra.mxu1 %v18732_v58  ;;  %17039 = vmatprep.subr.bf16.mxu0 %v18733_v26  ;;  %v14151_v58 = vcombine.low %v20464_v37, %v14046_v25  ;;  %v18771_v26 = vld [vmem:[%s23873_s1 + $0x850] sm:$0xff]  }
 0x104   : > { %17067 = vmatprep.subr.bf16.mxu1 %v18734_v27  ;;  %v18772_v27 = vld [vmem:[%s23873_s1 + $0x8d0] sm:$0xff]  }
 0x105   : > { %v18774_v37 = vld [vmem:[%s23873_s1 + $0x890] sm:$0xff]  }
 0x106   : > { %17040 = vmatpush3.bf16.msra.mxu0 %v18735_v30  ;;  %v18775_v30 = vld [vmem:[%s23873_s1 + $0x848] sm:$0xff]  }
 0x107   : > { %17068 = vmatpush3.bf16.msra.mxu1 %v18736_v33  ;;  %17041 = vmatprep.subr.bf16.mxu0 %v18737_v63  ;;  %v18777_v63 = vld [vmem:[%s23873_s1 + $0x808] sm:$0xff]  }
 0x108   : > { %17069 = vmatprep.subr.bf16.mxu1 %v18738_v40  ;;  %v18778_v40 = vld [vmem:[%s23873_s1 + $0x888] sm:$0xff]  }
 0x10a   : > { %17042 = vmatpush3.bf16.msra.mxu0 %v18739_v42 }
 0x10b   : > { %17070 = vmatpush3.bf16.msra.mxu1 %v18740_v45  ;;  %17083 = vmatprep.subr.bf16.mxu0 %v18747_v3  ;;  %v18779_v45 = vld [vmem:[%s23873_s1 + $0x840] sm:$0xff]  }
 0x10c   : > { %17111 = vmatprep.subr.bf16.mxu1 %v18748_v5  ;;  %v18782_v5 = vld [vmem:[%s23873_s1 + $0x880] sm:$0xff]  }
 0x10d   : > { %v16707_v28 = vpop.f32.mrf.mxu0  ;;  %3306 = vmatmul.mubr.bf16.vlgmr.msra.gmra.mxu0 %v18741_v59 }
 0x10e   : > { %v16735_v29 = vpop.f32.mrf.mxu1  ;;  %3824 = vmatmul.mubr.bf16.vlgmr.msra.gmra.mxu1 %v18744_v62  ;;  %17084 = vmatpush3.bf16.msra.mxu0 %v18749_v15 }
 0x10f   : > { %v16708_v39 = vpop.f32.mrf.mxu0  ;;  %17085 = vmatprep.subr.bf16.mxu0 %v18751_v38  ;;  %3313 = vmatprep.mubr.bf16.mxu0 %v13988_v11  ;;  %v18786_v38 = vld [vmem:[%s19849_s12 + $0x190] ss:$24 sps:$4 sm:$0xff]  }
 0x110   : > { %v16736_v60 = vpop.f32.mrf.mxu1  ;;  %v16709_v6 = vadd.f32 %v16708_v39, %v16707_v28  ;;  %3831 = vmatprep.mubr.bf16.mxu1 %v14152_v53  ;;  %v18773_v28 = vld [vmem:[%s23873_s1 + $0x810] sm:$0xff]   ;;  %v18776_v39 = vld [vmem:[%s23873_s1 + $0x8c8] sm:$0xff]  }
 0x111   : > { %v20722_v31 = vadd.f32 %v16736_v60, %v16735_v29  ;;  %v16710_v55 = vpop.f32.mrf.mxu0 }
 0x112   : > { %v20731_v44 = vadd.f32 %v16709_v6, %v20618_v2  ;;  %v20767_v0 = vpop.f32.mrf.mxu1  ;;  %17086 = vmatpush3.bf16.msra.mxu0 %v18753_v8 }
 0x113   : > { %v16711_v48 = vpop.f32.mrf.mxu0  ;;  %17087 = vmatprep.subr.bf16.mxu0 %v18757_v47 }
 0x114   : > { %v16712_v51 = vadd.f32 %v16711_v48, %v16710_v55 }
 0x115   : > { %v16713_v4 = vpop.f32.mrf.mxu0  ;;  %3314 = vmatmul.mubr.bf16.gmra.mxu0 %v13987_v12 }
 0x116   : > { %v20744_v2 = vadd.f32 %v16712_v51, %v20629_v49  ;;  %v18750_v49 = vld [vmem:[%s23873_s1 + $0x8b8] sm:$0xff]   ;;  %17088 = vmatpush3.bf16.msra.mxu0 %v18759_v14  ;;  %3832 = vmatmul.mubr.bf16.gmra.mxu1 %v14151_v58  ;;  %v18799_v58 = vld [vmem:[%s23873_s1 + $0x968] sm:$0xff]  }
 0x117   : > { %v16714_v32 = vpop.f32.mrf.mxu0  ;;  %17112 = vmatpush3.bf16.msra.mxu1 %v18750_v49  ;;  %17089 = vmatprep.subr.bf16.mxu0 %v18761_v16 }
 0x118   : > { %v16715_v20 = vadd.f32 %v16714_v32, %v16713_v4  ;;  %17113 = vmatprep.subr.bf16.mxu1 %v18752_v52 }
 0x119   : > { %v16716_v46 = vpop.f32.mrf.mxu0 }
 0x11a   : > { %v20762_v7 = vadd.f32 %v16715_v20, %v20682_v57  ;;  %v20784_v57 = vpop.f32.mrf.mxu1  ;;  %17090 = vmatpush3.bf16.msra.mxu0 %v18763_v22  ;;  %v18785_v20 = vld [vmem:[%s19849_s12 + $0x18c] ss:$24 sps:$4 sm:$0xff]  }
 0x11b   : > { %v16717_v61 = vpop.f32.mrf.mxu0  ;;  %17114 = vmatpush3.bf16.msra.mxu1 %v18754_v9  ;;  %17091 = vmatprep.subr.bf16.mxu0 %v18765_v41  ;;  %v16740_v4 = vadd.f32 %v20784_v57, %v20767_v0  ;;  %v18789_v9 = vld [vmem:[%s23873_s1 + $0x978] sm:$0xff]  }
 0x11c   : > { %v16718_v34 = vadd.f32 %v16717_v61, %v16716_v46  ;;  %17115 = vmatprep.subr.bf16.mxu1 %v18758_v43  ;;  %v16741_v17 = vpop.f32.mrf.mxu1  ;;  %3872 = vmatprep.mubr.bf16.mxu0 %v18785_v20  ;;  %v18788_v61 = vld [vmem:[%s19849_s12 + $0x194] ss:$24 sps:$4 sm:$0xff]   ;;  %v18792_v57 = vld [vmem:[%s23873_s1 + $0x9b8] sm:$0xff]  }
 0x11d   : > { %3921 = vmatprep.mubr.bf16.mxu1 %v18788_v61 }
 0x11e   : > { %v20779_v13 = vadd.f32 %v16718_v34, %v20699_v36  ;;  %v16742_v23 = vpop.f32.mrf.mxu1  ;;  %17092 = vmatpush3.bf16.msra.mxu0 %v18767_v56  ;;  %v20902_v56 = vld [vmem:[%s19849_s12 + $0x1b8] sm:$0xff] }
 0x11f   : > { %17116 = vmatpush3.bf16.msra.mxu1 %v18760_v35  ;;  %v20804_v21 = vadd.f32 %v16742_v23, %v16741_v17  ;;  %17093 = vmatprep.subr.bf16.mxu0 %v18771_v26  ;;  %v18793_v35 = vld [vmem:[%s23873_s1 + $0x970] sm:$0xff]  }
 0x120   : > { %17117 = vmatprep.subr.bf16.mxu1 %v18762_v18  ;;  %v20819_v36 = vpop.f32.mrf.mxu1 }
 0x122   : > { %v20835_v29 = vpop.f32.mrf.mxu1  ;;  %17094 = vmatpush3.bf16.msra.mxu0 %v18773_v28  ;;  %v18800_v28 = vld [vmem:[%s23873_s1 + $0x9e8] sm:$0xff]  }
 0x123   : > { %17118 = vmatpush3.bf16.msra.mxu1 %v18764_v19  ;;  %17095 = vmatprep.subr.bf16.mxu0 %v18775_v30  ;;  %v16746_v23 = vadd.f32 %v20835_v29, %v20819_v36  ;;  %v18795_v19 = vld [vmem:[%s23873_s1 + $0x930] sm:$0xff]   ;;  %v20917_v30 = vld [vmem:[%s19849_s12 + $0x1c0] sm:$0xff] }
 0x124   : > { %17119 = vmatprep.subr.bf16.mxu1 %v18766_v54 }
 0x126   : > { %17096 = vmatpush3.bf16.msra.mxu0 %v18777_v63 }
 0x127   : > { %17120 = vmatpush3.bf16.msra.mxu1 %v18768_v24  ;;  %17097 = vmatprep.subr.bf16.mxu0 %v18779_v45  ;;  %v14047_v24 = vld [vmem:[%s19849_s12 + $0x1d0] sm:$0xff]  ;;  %v18807_v45 = vld [vmem:[%s23873_s1 + $0x920] sm:$0xff]  }
 0x128   : > { %17121 = vmatprep.subr.bf16.mxu1 %v18772_v27  ;;  %v14154_v36 = vcombine.high %v20902_v56, %v14047_v24  ;;  %v14153_v53 = vcombine.low %v20902_v56, %v14047_v24  ;;  %v18836_v24 = vld [vmem:[%s23873_s1 + $0xaf0] sm:$0xff]  }
 0x12a   : > { %17098 = vmatpush3.bf16.msra.mxu0 %v18781_v1  ;;  %v18814_v1 = vld [vmem:[%s23873_s1 + $0x9d0] sm:$0xff]  }
 0x12b   : > { %17122 = vmatpush3.bf16.msra.mxu1 %v18774_v37  ;;  %17139 = vmatprep.subr.bf16.mxu0 %v18789_v9 }
 0x12c   : > { %17123 = vmatprep.subr.bf16.mxu1 %v18776_v39 }
 0x12d   : > { %v16763_v33 = vpop.f32.mrf.mxu0 }
 0x12e   : > { %v16791_v60 = vpop.f32.mrf.mxu1 }
 0x12f   : > { %v16764_v6 = vpop.f32.mrf.mxu0  ;;  %17124 = vmatpush3.bf16.msra.mxu1 %v18778_v40  ;;  %v18805_v40 = vld [vmem:[%s23873_s1 + $0x960] sm:$0xff]  }
 0x130   : > { %v16765_v55 = vadd.f32 %v16764_v6, %v16763_v33  ;;  %v16792_v42 = vpop.f32.mrf.mxu1  ;;  %17125 = vmatprep.subr.bf16.mxu1 %v18780_v50  ;;  %v14048_v33 = vld [vmem:[%s19849_s12 + $0x1d8] sm:$0xff] }
 0x131   : > { %v16793_v48 = vadd.f32 %v16792_v42, %v16791_v60  ;;  %v16766_v59 = vpop.f32.mrf.mxu0  ;;  %v14156_v39 = vcombine.high %v20917_v30, %v14048_v33  ;;  %v18802_v60 = vld [vmem:[%s23873_s1 + $0x928] sm:$0xff]   ;;  %v14155_v63 = vcombine.low %v20917_v30, %v14048_v33  ;;  %v18806_v42 = vld [vmem:[%s23873_s1 + $0x9e0] sm:$0xff]   ;;  %v18811_v50 = vld [vmem:[%s23873_s1 + $0x918] sm:$0xff]  }
 0x132   : > { %v1411_v51 = vadd.f32 %v16765_v55, %v20722_v31  ;;  %v16794_v62 = vpop.f32.mrf.mxu1  ;;  %v18783_v31 = vld [vmem:[%s19849_s12 + $0x188] ss:$24 sps:$4 sm:$0xff]  }
 0x133   : > { %v16767_v3 = vpop.f32.mrf.mxu0  ;;  %17126 = vmatpush3.bf16.msra.mxu1 %v18782_v5  ;;  %3873 = vmatmul.mubr.bf16.vlgmr.msra.gmra.mxu0 %v18783_v31  ;;  %v18816_v5 = vld [vmem:[%s23873_s1 + $0x990] sm:$0xff]   ;;  %v18818_v31 = vld [vmem:[%s23873_s1 + $0x9c8] sm:$0xff]  }
 0x134   : > { %v1460_v15 = vadd.f32 %v16793_v48, %v1411_v51  ;;  %v16768_v32 = vadd.f32 %v16767_v3, %v16766_v59  ;;  %v16795_v49 = vpop.f32.mrf.mxu1  ;;  %17167 = vmatprep.subr.bf16.mxu1 %v18790_v10  ;;  %3880 = vmatprep.mubr.bf16.mxu0 %v14154_v36  ;;  %v18808_v48 = vld [vmem:[%s23873_s1 + $0x9a0] sm:$0xff]   ;;  %v18810_v59 = vld [vmem:[%s23873_s1 + $0x9d8] sm:$0xff]   ;;  %v18815_v3 = vld [vmem:[%s23873_s1 + $0x910] sm:$0xff]  }
 0x135   : > { %v16796_v8 = vadd.f32 %v16795_v49, %v16794_v62  ;;  %v16769_v0 = vpop.f32.mrf.mxu0  ;;  %v18812_v51 = vld [vmem:[%s23873_s1 + $0x998] sm:$0xff]   ;;  %v18813_v62 = vld [vmem:[%s23873_s1 + $0x950] sm:$0xff]  }
 0x136   : > { %v20868_v46 = vadd.f32 %v1460_v15, %v20731_v44  ;;  %v1414_v52 = vadd.f32 %v16768_v32, %v16740_v4  ;;  %3922 = vmatmul.mubr.bf16.vlgmr.msra.gmra.mxu1 %v18786_v38  ;;  %v18791_v44 = vld [vmem:[%s23873_s1 + $0x938] sm:$0xff]   ;;  %v18817_v32 = vld [vmem:[%s23873_s1 + $0x948] sm:$0xff]   ;;  %v18838_v36 = vld [vmem:[%s23873_s1 + $0xab0] sm:$0xff]  }
 0x137   : > { %v16770_v11 = vpop.f32.mrf.mxu0  ;;  %17140 = vmatpush3.bf16.msra.mxu0 %v18791_v44  ;;  %17168 = vmatpush3.bf16.msra.mxu1 %v18792_v57  ;;  %v18822_v44 = vld [vmem:[%s23873_s1 + $0x9c0] sm:$0xff]  }
 0x138   : > { %v1463_v34 = vadd.f32 %v16796_v8, %v1414_v52  ;;  %v16771_v47 = vadd.f32 %v16770_v11, %v16769_v0  ;;  %v16797_v43 = vpop.f32.mrf.mxu1  ;;  %17141 = vmatprep.subr.bf16.mxu0 %v18793_v35  ;;  %3929 = vmatprep.mubr.bf16.mxu1 %v14156_v39  ;;  %v18819_v52 = vld [vmem:[%s23873_s1 + $0x908] sm:$0xff]   ;;  %v18823_v57 = vld [vmem:[%s23873_s1 + $0x900] sm:$0xff]  }
 0x139   : > { %v16772_v14 = vpop.f32.mrf.mxu0  ;;  %v18820_v0 = vld [vmem:[%s23873_s1 + $0x988] sm:$0xff]   ;;  %v18824_v35 = vld [vmem:[%s23873_s1 + $0x980] sm:$0xff]  }
 0x13a   : > { %v20881_v12 = vadd.f32 %v1463_v34, %v20744_v2  ;;  %v1419_v16 = vadd.f32 %v16771_v47, %v20804_v21  ;;  %v16798_v17 = vpop.f32.mrf.mxu1  ;;  %v18794_v2 = vld [vmem:[%s23873_s1 + $0x9f0] sm:$0xff]   ;;  %v18821_v34 = vld [vmem:[%s23873_s1 + $0x940] sm:$0xff]   ;;  %v18842_v39 = vld [vmem:[%s23873_s1 + $0xaa8] sm:$0xff]  }
 0x13b   : > { %v16799_v18 = vadd.f32 %v16798_v17, %v16797_v43  ;;  %v16773_v22 = vpop.f32.mrf.mxu0  ;;  %17169 = vmatprep.subr.bf16.mxu1 %v18794_v2  ;;  %v18796_v21 = vld [vmem:[%s23873_s1 + $0x9b0] sm:$0xff]   ;;  %17142 = vmatpush3.bf16.msra.mxu0 %v18795_v19  ;;  %v18827_v17 = vld [vmem:[%s19849_s12 + $0x4c] ss:$24 sps:$4 sm:$0xff]   ;;  %v18832_v19 = vld [vmem:[%s23873_s1 + $0xaf8] sm:$0xff]  }
 0x13c   : > { %v16774_v41 = vadd.f32 %v16773_v22, %v16772_v14  ;;  %v16800_v54 = vpop.f32.mrf.mxu1  ;;  %17170 = vmatpush3.bf16.msra.mxu1 %v18796_v21  ;;  %17143 = vmatprep.subr.bf16.mxu0 %v18799_v58  ;;  %v18830_v22 = vld [vmem:[%s19849_s12 + $0x54] ss:$24 sps:$4 sm:$0xff]  }
 0x13d   : > { %v1468_v25 = vadd.f32 %v16799_v18, %v1419_v16  ;;  %3881 = vmatmul.mubr.bf16.gmra.mxu0 %v14153_v53  ;;  %17171 = vmatprep.subr.bf16.mxu1 %v18800_v28  ;;  %v18825_v16 = vld [vmem:[%s19849_s12 + $0x48] ss:$24 sps:$4 sm:$0xff]   ;;  %v18835_v21 = vld [vmem:[%s23873_s1 + $0xa70] sm:$0xff]  }
 0x13e   : > { %v1422_v26 = vadd.f32 %v16774_v41, %v16746_v23  ;;  %v16801_v27 = vpop.f32.mrf.mxu1  ;;  %3930 = vmatmul.mubr.bf16.gmra.mxu1 %v14155_v63  ;;  %v18828_v18 = vld [vmem:[%s19849_s12 + $0x50] ss:$24 sps:$4 sm:$0xff]   ;;  %4439 = vmatprep.mubr.bf16.mxu0 %v18827_v17  ;;  %v18831_v23 = vld [vmem:[%s23873_s1 + $0xa78] sm:$0xff]  }
 0x13f   : > { %v20914_v37 = vadd.f32 %v1468_v25, %v20762_v7  ;;  %v16802_v29 = vadd.f32 %v16801_v27, %v16800_v54  ;;  %v18803_v7 = vld [vmem:[%s23873_s1 + $0x9a8] sm:$0xff]   ;;  %17144 = vmatpush3.bf16.msra.mxu0 %v18802_v60  ;;  %4488 = vmatprep.mubr.bf16.mxu1 %v18830_v22  ;;  %v18833_v41 = vld [vmem:[%s23873_s1 + $0xa38] sm:$0xff]   ;;  %v18837_v25 = vld [vmem:[%s23873_s1 + $0xa30] sm:$0xff]  }
 0x140   : > { %17172 = vmatpush3.bf16.msra.mxu1 %v18803_v7  ;;  %17145 = vmatprep.subr.bf16.mxu0 %v18805_v40  ;;  %v18834_v54 = vld [vmem:[%s23873_s1 + $0xab8] sm:$0xff]   ;;  %v18839_v53 = vld [vmem:[%s23873_s1 + $0xa68] sm:$0xff]  }
 0x141   : > { %v1471_v6 = vadd.f32 %v16802_v29, %v1422_v26  ;;  %17173 = vmatprep.subr.bf16.mxu1 %v18806_v42  ;;  %v18840_v27 = vld [vmem:[%s23873_s1 + $0xae8] sm:$0xff]   ;;  %v18844_v42 = vld [vmem:[%s23873_s1 + $0xae0] sm:$0xff]  }
 0x142   : > { %v18841_v28 = vld [vmem:[%s23873_s1 + $0xa28] sm:$0xff]  }
 0x143   : > { %v20932_v55 = vadd.f32 %v1471_v6, %v20779_v13  ;;  %17146 = vmatpush3.bf16.msra.mxu0 %v18807_v45  ;;  %v18809_v13 = vld [vmem:[%s23873_s1 + $0x958] sm:$0xff]   ;;  %v18843_v6 = vld [vmem:[%s23873_s1 + $0xa60] sm:$0xff]  }
 0x144   : > { %17174 = vmatpush3.bf16.msra.mxu1 %v18808_v48  ;;  %17147 = vmatprep.subr.bf16.mxu0 %v18809_v13  ;;  %v18845_v48 = vld [vmem:[%s23873_s1 + $0xa20] sm:$0xff]  }
 0x145   : > { %17175 = vmatprep.subr.bf16.mxu1 %v18810_v59 }
 0x147   : > { %17148 = vmatpush3.bf16.msra.mxu0 %v18811_v50  ;;  %v18846_v50 = vld [vmem:[%s23873_s1 + $0xaa0] sm:$0xff]  }
 0x148   : > { %17176 = vmatpush3.bf16.msra.mxu1 %v18812_v51  ;;  %17149 = vmatprep.subr.bf16.mxu0 %v18813_v62 }
 0x149   : > { %17177 = vmatprep.subr.bf16.mxu1 %v18814_v1  ;;  %v18847_v1 = vld [vmem:[%s23873_s1 + $0xa58] sm:$0xff]  }
 0x14b   : > { %17150 = vmatpush3.bf16.msra.mxu0 %v18815_v3  ;;  %v18848_v3 = vld [vmem:[%s23873_s1 + $0xad8] sm:$0xff]  }
 0x14c   : > { %17178 = vmatpush3.bf16.msra.mxu1 %v18816_v5  ;;  %17151 = vmatprep.subr.bf16.mxu0 %v18817_v32  ;;  %v18849_v5 = vld [vmem:[%s23873_s1 + $0xa18] sm:$0xff]  }
 0x14d   : > { %v16819_v4 = vpop.f32.mrf.mxu0  ;;  %17179 = vmatprep.subr.bf16.mxu1 %v18818_v31  ;;  %v21064_v32 = vld [vmem:[%s19849_s12 + $0x78] sm:$0xff] }
 0x14e   : > { %v16847_v15 = vpop.f32.mrf.mxu1 }
 0x14f   : > { %v16820_v49 = vpop.f32.mrf.mxu0  ;;  %17152 = vmatpush3.bf16.msra.mxu0 %v18819_v52 }
 0x150   : > { %v16821_v20 = vadd.f32 %v16820_v49, %v16819_v4  ;;  %v16848_v38 = vpop.f32.mrf.mxu1  ;;  %17180 = vmatpush3.bf16.msra.mxu1 %v18820_v0  ;;  %17153 = vmatprep.subr.bf16.mxu0 %v18821_v34  ;;  %v3955_v49 = vld [vmem:[%s19849_s12 + $0x90] sm:$0xff] }
 0x151   : > { %v16849_v8 = vadd.f32 %v16848_v38, %v16847_v15  ;;  %v16822_v61 = vpop.f32.mrf.mxu0  ;;  %17181 = vmatprep.subr.bf16.mxu1 %v18822_v44  ;;  %v18850_v15 = vld [vmem:[%s23873_s1 + $0xa98] sm:$0xff]   ;;  %v14308_v31 = vcombine.high %v21064_v32, %v3955_v49  ;;  %v14307_v52 = vcombine.low %v21064_v32, %v3955_v49  ;;  %v18855_v0 = vld [vmem:[%s23873_s1 + $0xa50] sm:$0xff]  }
 0x152   : > { %v16850_v9 = vpop.f32.mrf.mxu1  ;;  %v3956_v38 = vld [vmem:[%s19849_s12 + $0x98] sm:$0xff]  ;;  %v18857_v44 = vld [vmem:[%s23873_s1 + $0xa10] sm:$0xff]  }
 0x153   : > { %v20982_v10 = vadd.f32 %v16849_v8, %v16821_v20  ;;  %v16823_v11 = vpop.f32.mrf.mxu0  ;;  %17154 = vmatpush3.bf16.msra.mxu0 %v18823_v57  ;;  %v21069_v20 = vld [vmem:[%s19849_s12 + $0x80] sm:$0xff]  ;;  %v18858_v57 = vld [vmem:[%s23873_s1 + $0xa90] sm:$0xff]  }
 0x154   : > { %v16824_v47 = vadd.f32 %v16823_v11, %v16822_v61  ;;  %v16851_v43 = vpop.f32.mrf.mxu1  ;;  %17182 = vmatpush3.bf16.msra.mxu1 %v18824_v35  ;;  %17195 = vmatprep.subr.bf16.mxu0 %v18831_v23  ;;  %v14310_v8 = vcombine.high %v21069_v20, %v3956_v38  ;;  %v14309_v61 = vcombine.low %v21069_v20, %v3956_v38  ;;  %v18856_v11 = vld [vmem:[%s23873_s1 + $0xad0] sm:$0xff]   ;;  %v18861_v23 = vld [vmem:[%s23873_s1 + $0xa08] sm:$0xff]  }
 0x155   : > { %v16852_v14 = vadd.f32 %v16851_v43, %v16850_v9  ;;  %17223 = vmatprep.subr.bf16.mxu1 %v18832_v19  ;;  %v16825_v58 = vpop.f32.mrf.mxu0 }
 0x156   : > { %4440 = vmatmul.mubr.bf16.vlgmr.msra.gmra.mxu0 %v18825_v16  ;;  %v16853_v26 = vpop.f32.mrf.mxu1  ;;  %v18859_v16 = vld [vmem:[%s23873_s1 + $0xa48] sm:$0xff]  }
 0x157   : > { %v20995_v2 = vadd.f32 %v16852_v14, %v16824_v47  ;;  %4489 = vmatmul.mubr.bf16.vlgmr.msra.gmra.mxu1 %v18828_v18  ;;  %17196 = vmatpush3.bf16.msra.mxu0 %v18833_v41  ;;  %v16826_v29 = vpop.f32.mrf.mxu0  ;;  %v18860_v18 = vld [vmem:[%s23873_s1 + $0xac8] sm:$0xff]  }
 0x158   : > { %17224 = vmatpush3.bf16.msra.mxu1 %v18834_v54  ;;  %17197 = vmatprep.subr.bf16.mxu0 %v18835_v21  ;;  %v16854_v33 = vpop.f32.mrf.mxu1  ;;  %v16827_v60 = vadd.f32 %v16826_v29, %v16825_v58  ;;  %v18862_v41 = vld [vmem:[%s23873_s1 + $0xa88] sm:$0xff]   ;;  %v18866_v58 = vld [vmem:[%s23873_s1 + $0xa80] sm:$0xff]   ;;  %v18869_v29 = vld [vmem:[%s19849_s12 + $0x5c] ss:$24 sps:$4 sm:$0xff]  }
 0x159   : > { %17225 = vmatprep.subr.bf16.mxu1 %v18836_v24  ;;  %v16855_v63 = vadd.f32 %v16854_v33, %v16853_v26  ;;  %v16828_v7 = vpop.f32.mrf.mxu0  ;;  %4447 = vmatprep.mubr.bf16.mxu0 %v14308_v31  ;;  %v18870_v33 = vld [vmem:[%s19849_s12 + $0x198] ss:$24 sps:$4 sm:$0xff]   ;;  %v18883_v31 = vld [vmem:[%s23873_s1 + $0xb68] sm:$0xff]  }
 0x15a   : > { %v16856_v40 = vpop.f32.mrf.mxu1  ;;  %4496 = vmatprep.mubr.bf16.mxu1 %v14310_v8  ;;  %v18885_v8 = vld [vmem:[%s23873_s1 + $0xb28] sm:$0xff]  }
 0x15b   : > { %17198 = vmatpush3.bf16.msra.mxu0 %v18837_v25  ;;  %v21041_v45 = vadd.f32 %v16855_v63, %v16827_v60  ;;  %v16829_v13 = vpop.f32.mrf.mxu0  ;;  %v18864_v25 = vld [vmem:[%s23873_s1 + $0xac0] sm:$0xff]   ;;  %v18872_v60 = vld [vmem:[%s19849_s12 + $0x19c] ss:$24 sps:$4 sm:$0xff]  }
 0x15c   : > { %17226 = vmatpush3.bf16.msra.mxu1 %v18838_v36  ;;  %17199 = vmatprep.subr.bf16.mxu0 %v18839_v53  ;;  %v16857_v59 = vpop.f32.mrf.mxu1  ;;  %v16830_v51 = vadd.f32 %v16829_v13, %v16828_v7 }
 0x15d   : > { %17227 = vmatprep.subr.bf16.mxu1 %v18840_v27  ;;  %v16858_v62 = vadd.f32 %v16857_v59, %v16856_v40  ;;  %v18877_v59 = vld [vmem:[%s23873_s1 + $0xb70] sm:$0xff]  }
 0x15e   : > { %4448 = vmatmul.mubr.bf16.gmra.mxu0 %v14307_v52  ;;  %v18884_v52 = vld [vmem:[%s23873_s1 + $0xbe8] sm:$0xff]  }
 0x15f   : > { %17200 = vmatpush3.bf16.msra.mxu0 %v18841_v28  ;;  %v21055_v4 = vadd.f32 %v16858_v62, %v16830_v51  ;;  %4497 = vmatmul.mubr.bf16.gmra.mxu1 %v14309_v61  ;;  %v18867_v28 = vld [vmem:[%s19849_s12 + $0x58] ss:$24 sps:$4 sm:$0xff]   ;;  %v18886_v61 = vld [vmem:[%s23873_s1 + $0xba8] sm:$0xff]  }
 0x160   : > { %17228 = vmatpush3.bf16.msra.mxu1 %v18842_v39  ;;  %17201 = vmatprep.subr.bf16.mxu0 %v18843_v6  ;;  %v18878_v51 = vld [vmem:[%s23873_s1 + $0xbf0] sm:$0xff]  }
 0x161   : > { %17229 = vmatprep.subr.bf16.mxu1 %v18844_v42  ;;  %4537 = vmatprep.mubr.bf16.mxu0 %v18869_v29  ;;  %v18874_v42 = vld [vmem:[%s23873_s1 + $0xbf8] sm:$0xff]  }
 0x162   : > { %5055 = vmatprep.mubr.bf16.mxu1 %v18872_v60 }
 0x163   : > { %17202 = vmatpush3.bf16.msra.mxu0 %v18845_v48 }
 0x164   : > { %17230 = vmatpush3.bf16.msra.mxu1 %v18846_v50  ;;  %17203 = vmatprep.subr.bf16.mxu0 %v18847_v1  ;;  %v18879_v1 = vld [vmem:[%s23873_s1 + $0xb30] sm:$0xff]  }
 0x165   : > { %17231 = vmatprep.subr.bf16.mxu1 %v18848_v3  ;;  %v18880_v3 = vld [vmem:[%s23873_s1 + $0xbb0] sm:$0xff]  }
 0x167   : > { %17204 = vmatpush3.bf16.msra.mxu0 %v18849_v5 }
 0x168   : > { %17232 = vmatpush3.bf16.msra.mxu1 %v18850_v15  ;;  %17205 = vmatprep.subr.bf16.mxu0 %v18855_v0  ;;  %v18887_v0 = vld [vmem:[%s23873_s1 + $0xb60] sm:$0xff]  }
 0x169   : > { %17233 = vmatprep.subr.bf16.mxu1 %v18856_v11  ;;  %v18889_v11 = vld [vmem:[%s23873_s1 + $0xb20] sm:$0xff]  }
 0x16b   : > { %17206 = vmatpush3.bf16.msra.mxu0 %v18857_v44  ;;  %v18890_v44 = vld [vmem:[%s23873_s1 + $0xba0] sm:$0xff]  }
 0x16c   : > { %17234 = vmatpush3.bf16.msra.mxu1 %v18858_v57  ;;  %17207 = vmatprep.subr.bf16.mxu0 %v18859_v16  ;;  %v18892_v57 = vld [vmem:[%s23873_s1 + $0xbd8] sm:$0xff]  }
 0x16d   : > { %v16875_v9 = vpop.f32.mrf.mxu0  ;;  %17235 = vmatprep.subr.bf16.mxu1 %v18860_v18  ;;  %v18893_v16 = vld [vmem:[%s23873_s1 + $0xb18] sm:$0xff]  }
 0x16e   : > { %v16903_v34 = vpop.f32.mrf.mxu1  ;;  %v18894_v18 = vld [vmem:[%s23873_s1 + $0xb98] sm:$0xff]  }
 0x16f   : > { %v16876_v47 = vpop.f32.mrf.mxu0  ;;  %17208 = vmatpush3.bf16.msra.mxu0 %v18861_v23  ;;  %v21210_v23 = vld [vmem:[%s19849_s12 + $0x1c8] sm:$0xff] }
 0x170   : > { %v16904_v43 = vpop.f32.mrf.mxu1  ;;  %v16877_v14 = vadd.f32 %v16876_v47, %v16875_v9  ;;  %17236 = vmatpush3.bf16.msra.mxu1 %v18862_v41  ;;  %v18891_v47 = vld [vmem:[%s23873_s1 + $0xb58] sm:$0xff]  }
 0x171   : > { %v21087_v35 = vadd.f32 %v16904_v43, %v16903_v34  ;;  %v16878_v17 = vpop.f32.mrf.mxu0  ;;  %17237 = vmatprep.subr.bf16.mxu1 %v18864_v25  ;;  %v18888_v34 = vld [vmem:[%s23873_s1 + $0xbe0] sm:$0xff]   ;;  %v18897_v25 = vld [vmem:[%s23873_s1 + $0xb50] sm:$0xff]  }
 0x172   : > { %v2076_v22 = vadd.f32 %v16877_v14, %v20982_v10  ;;  %v18863_v10 = vld [vmem:[%s23873_s1 + $0xa40] sm:$0xff]   ;;  %v21126_v63 = vpop.f32.mrf.mxu1 }
 0x173   : > { %v16879_v19 = vpop.f32.mrf.mxu0  ;;  %17209 = vmatprep.subr.bf16.mxu0 %v18863_v10 }
 0x174   : > { %v21103_v54 = vadd.f32 %v2076_v22, %v20868_v46  ;;  %v16880_v21 = vadd.f32 %v16879_v19, %v16878_v17  ;;  %v18865_v46 = vld [vmem:[%s23873_s1 + $0xa00] sm:$0xff]   ;;  %17238 = vmatpush3.bf16.msra.mxu1 %v18866_v58  ;;  %v21144_v13 = vpop.f32.mrf.mxu1 }
 0x175   : > { %v16881_v24 = vpop.f32.mrf.mxu0  ;;  %17210 = vmatpush3.bf16.msra.mxu0 %v18865_v46  ;;  %17279 = vmatprep.subr.bf16.mxu1 %v18874_v42  ;;  %v14370_v19 = vld [vmem:[%s19849_s12 + $0x1e0] sm:$0xff] }
 0x176   : > { %v2079_v36 = vadd.f32 %v16880_v21, %v20995_v2  ;;  %v14476_v10 = vcombine.high %v21210_v23, %v14370_v19 }
 0x177   : > { %v16882_v53 = vpop.f32.mrf.mxu0  ;;  %5056 = vmatmul.mubr.bf16.vlgmr.msra.gmra.mxu1 %v18870_v33  ;;  %v18900_v33 = vld [vmem:[%s23873_s1 + $0xb90] sm:$0xff]  }
 0x178   : > { %v21119_v26 = vadd.f32 %v2079_v36, %v20881_v12  ;;  %v16883_v27 = vadd.f32 %v16882_v53, %v16881_v24  ;;  %4538 = vmatmul.mubr.bf16.vlgmr.msra.gmra.mxu0 %v18867_v28  ;;  %v18873_v12 = vld [vmem:[%s23873_s1 + $0xb78] sm:$0xff]   ;;  %v16909_v62 = vpop.f32.mrf.mxu1  ;;  %v14475_v24 = vcombine.low %v21210_v23, %v14370_v19  ;;  %v18898_v53 = vld [vmem:[%s23873_s1 + $0xbd0] sm:$0xff]   ;;  %5063 = vmatprep.mubr.bf16.mxu1 %v14476_v10 }
 0x179   : > { %v16884_v2 = vpop.f32.mrf.mxu0  ;;  %17251 = vmatprep.subr.bf16.mxu0 %v18873_v12  ;;  %v18899_v28 = vld [vmem:[%s23873_s1 + $0xb10] sm:$0xff]  }
 0x17a   : > { %v2084_v39 = vadd.f32 %v16883_v27, %v21041_v45  ;;  %v18875_v45 = vld [vmem:[%s23873_s1 + $0xb38] sm:$0xff]   ;;  %v16910_v5 = vpop.f32.mrf.mxu1  ;;  %v18919_v10 = vld [vmem:[%s23873_s1 + $0xc30] sm:$0xff]  }
 0x17b   : > { %v16885_v6 = vpop.f32.mrf.mxu0  ;;  %17252 = vmatpush3.bf16.msra.mxu0 %v18875_v45  ;;  %v21170_v38 = vadd.f32 %v16910_v5, %v16909_v62 }
 0x17c   : > { %v21132_v7 = vadd.f32 %v2084_v39, %v20914_v37  ;;  %v16886_v40 = vadd.f32 %v16885_v6, %v16884_v2  ;;  %v18876_v37 = vld [vmem:[%s23873_s1 + $0xbb8] sm:$0xff]   ;;  %17253 = vmatprep.subr.bf16.mxu0 %v18877_v59  ;;  %v21184_v9 = vpop.f32.mrf.mxu1  ;;  %v16908_v2 = vadd.f32 %v21144_v13, %v21126_v63  ;;  %v18901_v6 = vld [vmem:[%s23873_s1 + $0xb48] sm:$0xff]  }
 0x17d   : > { %17280 = vmatpush3.bf16.msra.mxu1 %v18876_v37  ;;  %v18902_v63 = vld [vmem:[%s23873_s1 + $0xbc8] sm:$0xff]  }
 0x17e   : > { %v2087_v48 = vadd.f32 %v16886_v40, %v21055_v4  ;;  %17281 = vmatprep.subr.bf16.mxu1 %v18878_v51  ;;  %v21162_v4 = vld [vmem:[%s19849_s12 + $0x88] sm:$0xff]  ;;  %v21198_v43 = vpop.f32.mrf.mxu1 }
 0x17f   : > { %17254 = vmatpush3.bf16.msra.mxu0 %v18879_v1  ;;  %5064 = vmatmul.mubr.bf16.gmra.mxu1 %v14475_v24  ;;  %v18904_v13 = vld [vmem:[%s23873_s1 + $0xb88] sm:$0xff]   ;;  %v18920_v24 = vld [vmem:[%s23873_s1 + $0xcb0] sm:$0xff]  }
 0x180   : > { %v21150_v50 = vadd.f32 %v2087_v48, %v20932_v55  ;;  %v3957_v55 = vld [vmem:[%s19849_s12 + $0xa0] sm:$0xff]  ;;  %17255 = vmatprep.subr.bf16.mxu0 %v18883_v31  ;;  %v18903_v48 = vld [vmem:[%s23873_s1 + $0xb08] sm:$0xff]  }
 0x181   : > { %v14312_v15 = vcombine.high %v21162_v4, %v3957_v55  ;;  %v14311_v49 = vcombine.low %v21162_v4, %v3957_v55  ;;  %17282 = vmatpush3.bf16.msra.mxu1 %v18880_v3  ;;  %v18906_v3 = vld [vmem:[%s23873_s1 + $0xbc0] sm:$0xff]  }
 0x182   : > { %17283 = vmatprep.subr.bf16.mxu1 %v18884_v52 }
 0x183   : > { %4545 = vmatprep.mubr.bf16.mxu0 %v14312_v15  ;;  %17256 = vmatpush3.bf16.msra.mxu0 %v18885_v8  ;;  %v16914_v8 = vadd.f32 %v21198_v43, %v21184_v9  ;;  %v18913_v43 = vld [vmem:[%s23873_s1 + $0xc78] sm:$0xff]  }
 0x184   : > { %4546 = vmatmul.mubr.bf16.gmra.mxu0 %v14311_v49  ;;  %17257 = vmatprep.subr.bf16.mxu0 %v18887_v0  ;;  %v18907_v49 = vld [vmem:[%s23873_s1 + $0xb00] sm:$0xff]  }
 0x185   : > { %17284 = vmatpush3.bf16.msra.mxu1 %v18886_v61  ;;  %v14362_v61 = vld [vmem:[%s19849_s12 + $0x1a0] sm:$0xff] }
 0x186   : > { %17285 = vmatprep.subr.bf16.mxu1 %v18888_v34 }
 0x187   : > { %17258 = vmatpush3.bf16.msra.mxu0 %v18889_v11  ;;  %v14472_v11 = vcombine.high %v14362_v61, %v20902_v56 }
 0x188   : > { %17259 = vmatprep.subr.bf16.mxu0 %v18891_v47 }
 0x189   : > { %17286 = vmatpush3.bf16.msra.mxu1 %v18890_v44  ;;  %v14363_v44 = vld [vmem:[%s19849_s12 + $0x1a8] sm:$0xff]  ;;  %5104 = vmatprep.mubr.bf16.mxu0 %v14472_v11 }
 0x18a   : > { %17287 = vmatprep.subr.bf16.mxu1 %v18892_v57  ;;  %v14473_v57 = vcombine.low %v14363_v44, %v20917_v30  ;;  %v14474_v9 = vcombine.high %v14363_v44, %v20917_v30  ;;  %v18915_v30 = vld [vmem:[%s23873_s1 + $0xc38] sm:$0xff]   ;;  %v18943_v44 = vld [vmem:[%s23873_s1 + $0xc08] sm:$0xff]  }
 0x18b   : > { %17260 = vmatpush3.bf16.msra.mxu0 %v18893_v16 }
 0x18c   : > { %17261 = vmatprep.subr.bf16.mxu0 %v18897_v25  ;;  %5153 = vmatprep.mubr.bf16.mxu1 %v14474_v9  ;;  %v21300_v25 = vld [vmem:[%s19849_s12 + $0x1d0] sm:$0xff]  ;;  %v18946_v9 = vld [vmem:[%s23873_s1 + $0xcc0] sm:$0xff]  }
 0x18d   : > { %v16931_v14 = vpop.f32.mrf.mxu0  ;;  %17288 = vmatpush3.bf16.msra.mxu1 %v18894_v18 }
 0x18e   : > { %v16959_v17 = vpop.f32.mrf.mxu1  ;;  %17289 = vmatprep.subr.bf16.mxu1 %v18898_v53  ;;  %v18923_v53 = vld [vmem:[%s23873_s1 + $0xc68] sm:$0xff]  }
 0x18f   : > { %v16932_v22 = vpop.f32.mrf.mxu0  ;;  %17262 = vmatpush3.bf16.msra.mxu0 %v18899_v28  ;;  %v14372_v28 = vld [vmem:[%s19849_s12 + $0x1f0] sm:$0xff] }
 0x190   : > { %v16933_v41 = vadd.f32 %v16932_v22, %v16931_v14  ;;  %v16960_v21 = vpop.f32.mrf.mxu1  ;;  %17263 = vmatprep.subr.bf16.mxu0 %v18901_v6  ;;  %v18916_v22 = vld [vmem:[%s23873_s1 + $0xcb8] sm:$0xff]   ;;  %v18931_v6 = vld [vmem:[%s23873_s1 + $0xc20] sm:$0xff]  }
 0x191   : > { %v16961_v36 = vadd.f32 %v16960_v21, %v16959_v17  ;;  %v16934_v46 = vpop.f32.mrf.mxu0  ;;  %17290 = vmatpush3.bf16.msra.mxu1 %v18900_v33  ;;  %v18914_v17 = vld [vmem:[%s23873_s1 + $0xcf8] sm:$0xff]  }
 0x192   : > { %v2643_v58 = vadd.f32 %v16933_v41, %v21087_v35  ;;  %v16962_v27 = vpop.f32.mrf.mxu1  ;;  %17291 = vmatprep.subr.bf16.mxu1 %v18902_v63  ;;  %v18918_v41 = vld [vmem:[%s23873_s1 + $0xcf0] sm:$0xff]  }
 0x193   : > { %v16935_v29 = vpop.f32.mrf.mxu0  ;;  %17264 = vmatpush3.bf16.msra.mxu0 %v18903_v48  ;;  %v18934_v48 = vld [vmem:[%s23873_s1 + $0xcd8] sm:$0xff]  }
 0x194   : > { %v2692_v39 = vadd.f32 %v16961_v36, %v2643_v58  ;;  %v16936_v60 = vadd.f32 %v16935_v29, %v16934_v46  ;;  %v16963_v35 = vpop.f32.mrf.mxu1  ;;  %v14371_v36 = vld [vmem:[%s19849_s12 + $0x1e8] sm:$0xff] }
 0x195   : > { %v16937_v12 = vpop.f32.mrf.mxu0  ;;  %v16964_v45 = vadd.f32 %v16963_v35, %v16962_v27  ;;  %17292 = vmatpush3.bf16.msra.mxu1 %v18904_v13  ;;  %v14478_v46 = vcombine.high %v21300_v25, %v14371_v36  ;;  %v18924_v58 = vld [vmem:[%s23873_s1 + $0xce8] sm:$0xff]   ;;  %v21312_v27 = vld [vmem:[%s19849_s12 + $0x1d8] sm:$0xff]  ;;  %v18930_v35 = vld [vmem:[%s23873_s1 + $0xce0] sm:$0xff]  }
 0x196   : > { %v21237_v40 = vadd.f32 %v2692_v39, %v21103_v54  ;;  %v2646_v42 = vadd.f32 %v16936_v60, %v16908_v2  ;;  %v16965_v62 = vpop.f32.mrf.mxu1  ;;  %v18905_v54 = vld [vmem:[%s23873_s1 + $0xb40] sm:$0xff]   ;;  %17293 = vmatprep.subr.bf16.mxu1 %v18906_v3  ;;  %v14480_v29 = vcombine.high %v21312_v27, %v14372_v28  ;;  %v18926_v2 = vld [vmem:[%s23873_s1 + $0xc28] sm:$0xff]   ;;  %v14479_v33 = vcombine.low %v21312_v27, %v14372_v28  ;;  %v18935_v13 = vld [vmem:[%s23873_s1 + $0xc18] sm:$0xff]  }
 0x197   : > { %v16938_v37 = vpop.f32.mrf.mxu0  ;;  %17265 = vmatprep.subr.bf16.mxu0 %v18905_v54  ;;  %v18927_v39 = vld [vmem:[%s23873_s1 + $0xca8] sm:$0xff]   ;;  %v18929_v60 = vld [vmem:[%s23873_s1 + $0xc60] sm:$0xff]   ;;  %v18937_v3 = vld [vmem:[%s23873_s1 + $0xc50] sm:$0xff]  }
 0x198   : > { %v2695_v59 = vadd.f32 %v16964_v45, %v2646_v42  ;;  %v16939_v51 = vadd.f32 %v16938_v37, %v16937_v12  ;;  %v16966_v15 = vpop.f32.mrf.mxu1  ;;  %17266 = vmatpush3.bf16.msra.mxu0 %v18907_v49  ;;  %v18932_v12 = vld [vmem:[%s23873_s1 + $0xca0] sm:$0xff]   ;;  %v18933_v42 = vld [vmem:[%s23873_s1 + $0xc58] sm:$0xff]  }
 0x199   : > { %v16940_v1 = vpop.f32.mrf.mxu0  ;;  %v16967_v31 = vadd.f32 %v16966_v15, %v16965_v62  ;;  %17307 = vmatprep.subr.bf16.mxu0 %v18913_v43  ;;  %v18936_v62 = vld [vmem:[%s23873_s1 + $0xc98] sm:$0xff]   ;;  %v18938_v15 = vld [vmem:[%s23873_s1 + $0xcd0] sm:$0xff]   ;;  %v18947_v43 = vld [vmem:[%s23873_s1 + $0xc00] sm:$0xff]  }
 0x19a   : > { %v21252_v55 = vadd.f32 %v2695_v59, %v21119_v26  ;;  %v2651_v5 = vadd.f32 %v16939_v51, %v21170_v38  ;;  %v18908_v26 = vld [vmem:[%s23873_s1 + $0xb80] sm:$0xff]   ;;  %v16968_v34 = vpop.f32.mrf.mxu1  ;;  %v14471_v38 = vcombine.low %v14362_v61, %v20902_v56  ;;  %v18940_v61 = vld [vmem:[%s23873_s1 + $0xc90] sm:$0xff]  }
 0x19b   : > { %v16941_v52 = vpop.f32.mrf.mxu0  ;;  %17294 = vmatpush3.bf16.msra.mxu1 %v18908_v26 }
 0x19c   : > { %v16942_v0 = vadd.f32 %v16941_v52, %v16940_v1  ;;  %v2700_v47 = vadd.f32 %v16967_v31, %v2651_v5  ;;  %v16969_v16 = vpop.f32.mrf.mxu1  ;;  %5105 = vmatmul.mubr.bf16.vlgmr.msra.gmra.mxu0 %v14471_v38  ;;  %17335 = vmatprep.subr.bf16.mxu1 %v18914_v17  ;;  %v18939_v52 = vld [vmem:[%s23873_s1 + $0xc10] sm:$0xff]   ;;  %v18942_v38 = vld [vmem:[%s23873_s1 + $0xcc8] sm:$0xff]  }
 0x19d   : > { %v16970_v18 = vadd.f32 %v16969_v16, %v16968_v34  ;;  %17308 = vmatpush3.bf16.msra.mxu0 %v18915_v30  ;;  %5112 = vmatprep.mubr.bf16.mxu0 %v14478_v46  ;;  %v18941_v34 = vld [vmem:[%s23873_s1 + $0xc48] sm:$0xff]   ;;  %v5178_v16 = vld [vmem:[%s19849_s12 + $0x60] sm:$0xff] }
 0x19e   : > { %v2654_v14 = vadd.f32 %v16942_v0, %v16914_v8  ;;  %v21276_v56 = vadd.f32 %v2700_v47, %v21132_v7  ;;  %5154 = vmatmul.mubr.bf16.vlgmr.msra.gmra.mxu1 %v14473_v57  ;;  %v18917_v7 = vld [vmem:[%s23873_s1 + $0xc70] sm:$0xff]   ;;  %v18944_v47 = vld [vmem:[%s23873_s1 + $0xc88] sm:$0xff]   ;;  %v18945_v57 = vld [vmem:[%s23873_s1 + $0xc40] sm:$0xff]   ;;  %v14625_v17 = vcombine.low %v5178_v16, %v21064_v32 }
 0x19f   : > { %17336 = vmatpush3.bf16.msra.mxu1 %v18916_v22  ;;  %17309 = vmatprep.subr.bf16.mxu0 %v18917_v7  ;;  %v5179_v30 = vld [vmem:[%s19849_s12 + $0x68] sm:$0xff]  ;;  %v18953_v7 = vld [vmem:[%s23873_s1 + $0xd78] sm:$0xff]  }
 0x1a0   : > { %v2703_v19 = vadd.f32 %v16970_v18, %v2654_v14  ;;  %17337 = vmatprep.subr.bf16.mxu1 %v18918_v41  ;;  %5161 = vmatprep.mubr.bf16.mxu1 %v14480_v29  ;;  %v18948_v14 = vld [vmem:[%s23873_s1 + $0xc80] sm:$0xff]   ;;  %v14626_v18 = vcombine.high %v5178_v16, %v21064_v32  ;;  %v14627_v22 = vcombine.low %v5179_v30, %v21069_v20  ;;  %v18954_v41 = vld [vmem:[%s23873_s1 + $0xdf8] sm:$0xff]  }
 0x1a1   : > { %17310 = vmatpush3.bf16.msra.mxu0 %v18919_v10  ;;  %v18955_v32 = vld [vmem:[%s23873_s1 + $0xd38] sm:$0xff]   ;;  %v18957_v10 = vld [vmem:[%s23873_s1 + $0xd70] sm:$0xff]  }
 0x1a2   : > { %v21291_v21 = vadd.f32 %v2703_v19, %v21150_v50  ;;  %v14477_v50 = vcombine.low %v21300_v25, %v14371_v36  ;;  %17311 = vmatprep.subr.bf16.mxu0 %v18923_v53  ;;  %v14628_v19 = vcombine.high %v5179_v30, %v21069_v20  ;;  %v18956_v20 = vld [vmem:[%s23873_s1 + $0xdb8] sm:$0xff]   ;;  %v18958_v36 = vld [vmem:[%s23873_s1 + $0xdf0] sm:$0xff]  }
 0x1a3   : > { %17338 = vmatpush3.bf16.msra.mxu1 %v18920_v24 }
 0x1a4   : > { %5113 = vmatmul.mubr.bf16.gmra.mxu0 %v14477_v50  ;;  %17339 = vmatprep.subr.bf16.mxu1 %v18924_v58  ;;  %v18959_v50 = vld [vmem:[%s23873_s1 + $0xd30] sm:$0xff]  }
 0x1a5   : > { %17312 = vmatpush3.bf16.msra.mxu0 %v18926_v2  ;;  %5671 = vmatprep.mubr.bf16.mxu0 %v14626_v18  ;;  %v18960_v58 = vld [vmem:[%s23873_s1 + $0xdb0] sm:$0xff]   ;;  %v18961_v2 = vld [vmem:[%s23873_s1 + $0xd68] sm:$0xff]  }
 0x1a6   : > { %5162 = vmatmul.mubr.bf16.gmra.mxu1 %v14479_v33  ;;  %17313 = vmatprep.subr.bf16.mxu0 %v18929_v60  ;;  %v18962_v60 = vld [vmem:[%s23873_s1 + $0xde8] sm:$0xff]   ;;  %v18978_v18 = vld [vmem:[%s23873_s1 + $0xdd0] sm:$0xff]  }
 0x1a7   : > { %17340 = vmatpush3.bf16.msra.mxu1 %v18927_v39  ;;  %5720 = vmatprep.mubr.bf16.mxu1 %v14628_v19 }
 0x1a8   : > { %17341 = vmatprep.subr.bf16.mxu1 %v18930_v35 }
 0x1a9   : > { %17314 = vmatpush3.bf16.msra.mxu0 %v18931_v6  ;;  %v18963_v6 = vld [vmem:[%s23873_s1 + $0xd28] sm:$0xff]  }
 0x1aa   : > { %17315 = vmatprep.subr.bf16.mxu0 %v18933_v42  ;;  %v18964_v42 = vld [vmem:[%s23873_s1 + $0xda8] sm:$0xff]  }
 0x1ab   : > { %17342 = vmatpush3.bf16.msra.mxu1 %v18932_v12 }
 0x1ac   : > { %17343 = vmatprep.subr.bf16.mxu1 %v18934_v48 }
 0x1ad   : > { %v16987_v63 = vpop.f32.mrf.mxu0  ;;  %17316 = vmatpush3.bf16.msra.mxu0 %v18935_v13 }
 0x1ae   : > { %v17015_v45 = vpop.f32.mrf.mxu1  ;;  %17317 = vmatprep.subr.bf16.mxu0 %v18937_v3  ;;  %v18970_v3 = vld [vmem:[%s23873_s1 + $0xdd8] sm:$0xff]  }
 0x1af   : > { %v16988_v37 = vpop.f32.mrf.mxu0  ;;  %17344 = vmatpush3.bf16.msra.mxu1 %v18936_v62 }
 0x1b0   : > { %v16989_v59 = vadd.f32 %v16988_v37, %v16987_v63  ;;  %v17016_v51 = vpop.f32.mrf.mxu1  ;;  %17345 = vmatprep.subr.bf16.mxu1 %v18938_v15  ;;  %v18965_v37 = vld [vmem:[%s23873_s1 + $0xd60] sm:$0xff]   ;;  %v18971_v15 = vld [vmem:[%s23873_s1 + $0xd18] sm:$0xff]  }
 0x1b1   : > { %v17017_v54 = vadd.f32 %v17016_v51, %v17015_v45  ;;  %v16990_v1 = vpop.f32.mrf.mxu0  ;;  %17318 = vmatpush3.bf16.msra.mxu0 %v18939_v52  ;;  %v18967_v51 = vld [vmem:[%s23873_s1 + $0xd20] sm:$0xff]   ;;  %v18972_v52 = vld [vmem:[%s23873_s1 + $0xd98] sm:$0xff]  }
 0x1b2   : > { %v17018_v5 = vpop.f32.mrf.mxu1  ;;  %17319 = vmatprep.subr.bf16.mxu0 %v18941_v34  ;;  %v21463_v34 = vld [vmem:[%s19849_s12 + $0x98] sm:$0xff] }
 0x1b3   : > { %v21353_v49 = vadd.f32 %v17017_v54, %v16989_v59  ;;  %v16991_v31 = vpop.f32.mrf.mxu0  ;;  %17346 = vmatpush3.bf16.msra.mxu1 %v18940_v61  ;;  %v18966_v59 = vld [vmem:[%s23873_s1 + $0xde0] sm:$0xff]  }
 0x1b4   : > { %v16992_v8 = vadd.f32 %v16991_v31, %v16990_v1  ;;  %v17019_v26 = vpop.f32.mrf.mxu1  ;;  %17347 = vmatprep.subr.bf16.mxu1 %v18942_v38  ;;  %v18968_v54 = vld [vmem:[%s23873_s1 + $0xda0] sm:$0xff]   ;;  %v18969_v1 = vld [vmem:[%s23873_s1 + $0xd58] sm:$0xff]   ;;  %v5188_v38 = vld [vmem:[%s19849_s12 + $0xb0] sm:$0xff] }
 0x1b5   : > { %v17020_v0 = vadd.f32 %v17019_v26, %v17018_v5  ;;  %17320 = vmatpush3.bf16.msra.mxu0 %v18943_v44  ;;  %v16993_v24 = vpop.f32.mrf.mxu0  ;;  %v5187_v26 = vld [vmem:[%s19849_s12 + $0xa8] sm:$0xff] }
 0x1b6   : > { %17321 = vmatprep.subr.bf16.mxu0 %v18945_v57  ;;  %v17021_v46 = vpop.f32.mrf.mxu1 }
 0x1b7   : > { %v21367_v11 = vadd.f32 %v17020_v0, %v16992_v8  ;;  %17348 = vmatpush3.bf16.msra.mxu1 %v18944_v47  ;;  %v16994_v53 = vpop.f32.mrf.mxu0  ;;  %v21458_v8 = vld [vmem:[%s19849_s12 + $0x90] sm:$0xff] }
 0x1b8   : > { %17349 = vmatprep.subr.bf16.mxu1 %v18946_v9  ;;  %v16995_v28 = vadd.f32 %v16994_v53, %v16993_v24  ;;  %v17022_v29 = vpop.f32.mrf.mxu1  ;;  %v14632_v0 = vcombine.high %v21458_v8, %v5187_v26  ;;  %v14631_v44 = vcombine.low %v21458_v8, %v5187_v26  ;;  %v14634_v9 = vcombine.high %v21463_v34, %v5188_v38  ;;  %v18984_v24 = vld [vmem:[%s23873_s1 + $0xd88] sm:$0xff]  }
 0x1b9   : > { %17322 = vmatpush3.bf16.msra.mxu0 %v18947_v43  ;;  %v17023_v33 = vadd.f32 %v17022_v29, %v17021_v46  ;;  %v16996_v39 = vpop.f32.mrf.mxu0  ;;  %v14633_v43 = vcombine.low %v21463_v34, %v5188_v38  ;;  %v5180_v29 = vld [vmem:[%s19849_s12 + $0x70] sm:$0xff]  ;;  %v19003_v26 = vld [vmem:[%s23873_s1 + $0xe68] sm:$0xff]  }
 0x1ba   : > { %17363 = vmatprep.subr.bf16.mxu0 %v18953_v7  ;;  %v17024_v35 = vpop.f32.mrf.mxu1  ;;  %v18980_v7 = vld [vmem:[%s23873_s1 + $0xd90] sm:$0xff]  }
 0x1bb   : > { %17350 = vmatpush3.bf16.msra.mxu1 %v18948_v14  ;;  %v21426_v12 = vadd.f32 %v17023_v33, %v16995_v28  ;;  %v16997_v63 = vpop.f32.mrf.mxu0  ;;  %v18977_v14 = vld [vmem:[%s23873_s1 + $0xd50] sm:$0xff]   ;;  %v18988_v28 = vld [vmem:[%s23873_s1 + $0xd80] sm:$0xff]   ;;  %v14629_v33 = vcombine.low %v5180_v29, %v21162_v4 }
 0x1bc   : > { %5672 = vmatmul.mubr.bf16.vlgmr.msra.gmra.mxu0 %v14625_v17  ;;  %17391 = vmatprep.subr.bf16.mxu1 %v18954_v41  ;;  %v16998_v45 = vadd.f32 %v16997_v63, %v16996_v39  ;;  %v17025_v48 = vpop.f32.mrf.mxu1  ;;  %v14630_v39 = vcombine.high %v5180_v29, %v21162_v4  ;;  %v18994_v4 = vld [vmem:[%s23873_s1 + $0xef8] sm:$0xff]  }
 0x1bd   : > { %17364 = vmatpush3.bf16.msra.mxu0 %v18955_v32  ;;  %v17026_v13 = vadd.f32 %v17025_v48, %v17024_v35  ;;  %5679 = vmatprep.mubr.bf16.mxu0 %v14632_v0  ;;  %v19004_v0 = vld [vmem:[%s23873_s1 + $0xee8] sm:$0xff]  }
 0x1be   : > { %5721 = vmatmul.mubr.bf16.vlgmr.msra.gmra.mxu1 %v14627_v22  ;;  %17365 = vmatprep.subr.bf16.mxu0 %v18957_v10  ;;  %v18979_v22 = vld [vmem:[%s23873_s1 + $0xd10] sm:$0xff]  }
 0x1bf   : > { %17392 = vmatpush3.bf16.msra.mxu1 %v18956_v20  ;;  %v21440_v62 = vadd.f32 %v17026_v13, %v16998_v45  ;;  %5728 = vmatprep.mubr.bf16.mxu1 %v14634_v9  ;;  %v18982_v20 = vld [vmem:[%s23873_s1 + $0xdc8] sm:$0xff]   ;;  %v18996_v13 = vld [vmem:[%s23873_s1 + $0xeb8] sm:$0xff]   ;;  %v19008_v9 = vld [vmem:[%s23873_s1 + $0xee0] sm:$0xff]  }
 0x1c0   : > { %17393 = vmatprep.subr.bf16.mxu1 %v18958_v36 }
 0x1c1   : > { %17366 = vmatpush3.bf16.msra.mxu0 %v18959_v50  ;;  %v18986_v50 = vld [vmem:[%s23873_s1 + $0xdc0] sm:$0xff]  }
 0x1c2   : > { %17367 = vmatprep.subr.bf16.mxu0 %v18961_v2 }
 0x1c3   : > { %17394 = vmatpush3.bf16.msra.mxu1 %v18960_v58  ;;  %v18987_v58 = vld [vmem:[%s23873_s1 + $0xd00] sm:$0xff]  }
 0x1c4   : > { %17395 = vmatprep.subr.bf16.mxu1 %v18962_v60  ;;  %5680 = vmatmul.mubr.bf16.gmra.mxu0 %v14631_v44  ;;  %v14685_v60 = vld [vmem:[%s19849_s12 + $0x1b0] sm:$0xff]  ;;  %v19005_v44 = vld [vmem:[%s23873_s1 + $0xe28] sm:$0xff]  }
 0x1c5   : > { %17368 = vmatpush3.bf16.msra.mxu0 %v18963_v6  ;;  %v14793_v6 = vcombine.low %v14685_v60, %v21210_v23  ;;  %v14794_v63 = vcombine.high %v14685_v60, %v21210_v23  ;;  %5769 = vmatprep.mubr.bf16.mxu0 %v14630_v39  ;;  %v18995_v23 = vld [vmem:[%s23873_s1 + $0xe38] sm:$0xff]  }
 0x1c6   : > { %17369 = vmatprep.subr.bf16.mxu0 %v18965_v37  ;;  %5729 = vmatmul.mubr.bf16.gmra.mxu1 %v14633_v43  ;;  %v19009_v43 = vld [vmem:[%s23873_s1 + $0xe20] sm:$0xff]  }
 0x1c7   : > { %17396 = vmatpush3.bf16.msra.mxu1 %v18964_v42  ;;  %v18993_v42 = vld [vmem:[%s23873_s1 + $0xe78] sm:$0xff]   ;;  %6287 = vmatprep.mubr.bf16.mxu1 %v14794_v63 }
 0x1c8   : > { %17397 = vmatprep.subr.bf16.mxu1 %v18966_v59 }
 0x1c9   : > { %17370 = vmatpush3.bf16.msra.mxu0 %v18967_v51 }
 0x1ca   : > { %17371 = vmatprep.subr.bf16.mxu0 %v18969_v1 }
 0x1cb   : > { %17398 = vmatpush3.bf16.msra.mxu1 %v18968_v54  ;;  %v18998_v54 = vld [vmem:[%s23873_s1 + $0xef0] sm:$0xff]  }
 0x1cc   : > { %17399 = vmatprep.subr.bf16.mxu1 %v18970_v3 }
 0x1cd   : > { %v17043_v5 = vpop.f32.mrf.mxu0  ;;  %17372 = vmatpush3.bf16.msra.mxu0 %v18971_v15  ;;  %v21558_v15 = vld [vmem:[%s19849_s12 + $0xa0] sm:$0xff] }
 0x1ce   : > { %v17071_v31 = vpop.f32.mrf.mxu1  ;;  %17373 = vmatprep.subr.bf16.mxu0 %v18977_v14 }
 0x1cf   : > { %v17044_v61 = vpop.f32.mrf.mxu0  ;;  %17400 = vmatpush3.bf16.msra.mxu1 %v18972_v52 }
 0x1d0   : > { %v17045_v47 = vadd.f32 %v17044_v61, %v17043_v5  ;;  %v17072_v57 = vpop.f32.mrf.mxu1  ;;  %17401 = vmatprep.subr.bf16.mxu1 %v18978_v18  ;;  %v19000_v5 = vld [vmem:[%s23873_s1 + $0xeb0] sm:$0xff]   ;;  %v19011_v18 = vld [vmem:[%s23873_s1 + $0xe58] sm:$0xff]  }
 0x1d1   : > { %v21472_v16 = vadd.f32 %v17072_v57, %v17071_v31  ;;  %v17046_v17 = vpop.f32.mrf.mxu0  ;;  %17374 = vmatpush3.bf16.msra.mxu0 %v18979_v22  ;;  %v5189_v31 = vld [vmem:[%s19849_s12 + $0xb8] sm:$0xff]  ;;  %v19007_v57 = vld [vmem:[%s23873_s1 + $0xe60] sm:$0xff]  }
 0x1d2   : > { %v3308_v30 = vadd.f32 %v17045_v47, %v21353_v49  ;;  %v18981_v49 = vld [vmem:[%s23873_s1 + $0xd48] sm:$0xff]   ;;  %v21525_v45 = vpop.f32.mrf.mxu1  ;;  %v14636_v52 = vcombine.high %v21558_v15, %v5189_v31  ;;  %v19013_v22 = vld [vmem:[%s23873_s1 + $0xe18] sm:$0xff]  }
 0x1d3   : > { %v17047_v19 = vpop.f32.mrf.mxu0  ;;  %17402 = vmatpush3.bf16.msra.mxu1 %v18980_v7  ;;  %17375 = vmatprep.subr.bf16.mxu0 %v18981_v49  ;;  %v19006_v47 = vld [vmem:[%s23873_s1 + $0xea8] sm:$0xff]   ;;  %v21606_v49 = vld [vmem:[%s19849_s12 + $0x1e0] sm:$0xff] }
 0x1d4   : > { %v21485_v41 = vadd.f32 %v3308_v30, %v21237_v40  ;;  %v17048_v32 = vadd.f32 %v17047_v19, %v17046_v17  ;;  %v18983_v40 = vld [vmem:[%s23873_s1 + $0xd08] sm:$0xff]   ;;  %17403 = vmatprep.subr.bf16.mxu1 %v18982_v20  ;;  %v21543_v51 = vpop.f32.mrf.mxu1  ;;  %v19010_v17 = vld [vmem:[%s23873_s1 + $0xea0] sm:$0xff]   ;;  %v19012_v30 = vld [vmem:[%s23873_s1 + $0xed8] sm:$0xff]  }
 0x1d5   : > { %v17049_v46 = vpop.f32.mrf.mxu0  ;;  %17376 = vmatpush3.bf16.msra.mxu0 %v18983_v40  ;;  %v14694_v20 = vld [vmem:[%s19849_s12 + $0x1f8] sm:$0xff] }
 0x1d6   : > { %v3311_v10 = vadd.f32 %v17048_v32, %v21367_v11  ;;  %v18985_v11 = vld [vmem:[%s23873_s1 + $0xd40] sm:$0xff]   ;;  %v17077_v3 = vpop.f32.mrf.mxu1  ;;  %v19014_v32 = vld [vmem:[%s23873_s1 + $0xe98] sm:$0xff]  }
 0x1d7   : > { %17404 = vmatpush3.bf16.msra.mxu1 %v18984_v24  ;;  %v17050_v53 = vpop.f32.mrf.mxu0  ;;  %17377 = vmatprep.subr.bf16.mxu0 %v18985_v11  ;;  %v14800_v24 = vcombine.high %v21606_v49, %v14694_v20  ;;  %v19017_v11 = vld [vmem:[%s23873_s1 + $0xe50] sm:$0xff]  }
 0x1d8   : > { %v21501_v36 = vadd.f32 %v3311_v10, %v21252_v55  ;;  %v17051_v55 = vadd.f32 %v17050_v53, %v17049_v46  ;;  %17405 = vmatprep.subr.bf16.mxu1 %v18986_v50  ;;  %v17078_v61 = vpop.f32.mrf.mxu1  ;;  %v14799_v46 = vcombine.low %v21606_v49, %v14694_v20  ;;  %v19018_v53 = vld [vmem:[%s23873_s1 + $0xed0] sm:$0xff]  }
 0x1d9   : > { %v17052_v2 = vpop.f32.mrf.mxu0  ;;  %17378 = vmatpush3.bf16.msra.mxu0 %v18987_v58  ;;  %v21569_v38 = vadd.f32 %v17078_v61, %v17077_v3  ;;  %v14687_v61 = vld [vmem:[%s19849_s12 + $0x1c0] sm:$0xff]  ;;  %v19038_v20 = vld [vmem:[%s23873_s1 + $0xff0] sm:$0xff]  }
 0x1da   : > { %v3316_v35 = vadd.f32 %v17051_v55, %v21426_v12  ;;  %17419 = vmatprep.subr.bf16.mxu0 %v18993_v42  ;;  %v21586_v14 = vpop.f32.mrf.mxu1 }
 0x1db   : > { %17406 = vmatpush3.bf16.msra.mxu1 %v18988_v28  ;;  %v17053_v48 = vpop.f32.mrf.mxu0  ;;  %v19019_v28 = vld [vmem:[%s23873_s1 + $0xe10] sm:$0xff]  }
 0x1dc   : > { %v21531_v37 = vadd.f32 %v3316_v35, %v21276_v56  ;;  %v17054_v12 = vadd.f32 %v17053_v48, %v17052_v2  ;;  %5770 = vmatmul.mubr.bf16.vlgmr.msra.gmra.mxu0 %v14629_v33  ;;  %17447 = vmatprep.subr.bf16.mxu1 %v18994_v4  ;;  %v18997_v56 = vld [vmem:[%s23873_s1 + $0xe70] sm:$0xff]   ;;  %v21600_v19 = vpop.f32.mrf.mxu1  ;;  %v17076_v35 = vadd.f32 %v21543_v51, %v21525_v45  ;;  %v19023_v4 = vld [vmem:[%s23873_s1 + $0xe08] sm:$0xff]  }
 0x1dd   : > { %17420 = vmatpush3.bf16.msra.mxu0 %v18995_v23  ;;  %5777 = vmatprep.mubr.bf16.mxu0 %v14636_v52  ;;  %v19020_v33 = vld [vmem:[%s23873_s1 + $0xe90] sm:$0xff]  }
 0x1de   : > { %6288 = vmatmul.mubr.bf16.vlgmr.msra.gmra.mxu1 %v14793_v6  ;;  %v3319_v59 = vadd.f32 %v17054_v12, %v21440_v62  ;;  %17421 = vmatprep.subr.bf16.mxu0 %v18997_v56  ;;  %v18999_v62 = vld [vmem:[%s23873_s1 + $0xe30] sm:$0xff]   ;;  %v19021_v6 = vld [vmem:[%s23873_s1 + $0xe48] sm:$0xff]  }
 0x1df   : > { %17448 = vmatpush3.bf16.msra.mxu1 %v18996_v13  ;;  %6295 = vmatprep.mubr.bf16.mxu1 %v14800_v24  ;;  %v19024_v13 = vld [vmem:[%s23873_s1 + $0xe88] sm:$0xff]  }
 0x1e0   : > { %v21549_v1 = vadd.f32 %v3319_v59, %v21291_v21  ;;  %17449 = vmatprep.subr.bf16.mxu1 %v18998_v54  ;;  %v14635_v21 = vcombine.low %v21558_v15, %v5189_v31  ;;  %v19025_v59 = vld [vmem:[%s23873_s1 + $0xe40] sm:$0xff]   ;;  %v14686_v31 = vld [vmem:[%s19849_s12 + $0x1b8] sm:$0xff] }
 0x1e1   : > { %17422 = vmatpush3.bf16.msra.mxu0 %v18999_v62  ;;  %v19027_v54 = vld [vmem:[%s23873_s1 + $0xe00] sm:$0xff]  }
 0x1e2   : > { %17423 = vmatprep.subr.bf16.mxu0 %v19003_v26  ;;  %v14796_v26 = vcombine.high %v14686_v31, %v21300_v25 }
 0x1e3   : > { %17450 = vmatpush3.bf16.msra.mxu1 %v19000_v5  ;;  %v19028_v5 = vld [vmem:[%s23873_s1 + $0xe80] sm:$0xff]  }
 0x1e4   : > { %5778 = vmatmul.mubr.bf16.gmra.mxu0 %v14635_v21  ;;  %17451 = vmatprep.subr.bf16.mxu1 %v19004_v0  ;;  %v14795_v21 = vcombine.low %v14686_v31, %v21300_v25  ;;  %v19060_v31 = vld [vmem:[%s23873_s1 + $0xf90] sm:$0xff]  }
 0x1e5   : > { %17424 = vmatpush3.bf16.msra.mxu0 %v19005_v44  ;;  %6336 = vmatprep.mubr.bf16.mxu0 %v14796_v26  ;;  %v19061_v26 = vld [vmem:[%s23873_s1 + $0xf48] sm:$0xff]  }
 0x1e6   : > { %17425 = vmatprep.subr.bf16.mxu0 %v19007_v57  ;;  %6296 = vmatmul.mubr.bf16.gmra.mxu1 %v14799_v46  ;;  %v19033_v57 = vld [vmem:[%s23873_s1 + $0xf78] sm:$0xff]  }
 0x1e7   : > { %17452 = vmatpush3.bf16.msra.mxu1 %v19006_v47  ;;  %v14798_v47 = vcombine.high %v14687_v61, %v21312_v27 }
 0x1e8   : > { %17453 = vmatprep.subr.bf16.mxu1 %v19008_v9 }
 0x1e9   : > { %17426 = vmatpush3.bf16.msra.mxu0 %v19009_v43  ;;  %v19034_v43 = vld [vmem:[%s23873_s1 + $0xff8] sm:$0xff]   ;;  %6385 = vmatprep.mubr.bf16.mxu1 %v14798_v47  ;;  %v19063_v47 = vld [vmem:[%s23873_s1 + $0xf08] sm:$0xff]  }
 0x1ea   : > { %17427 = vmatprep.subr.bf16.mxu0 %v19011_v18  ;;  %v17082_v18 = vadd.f32 %v21600_v19, %v21586_v14  ;;  %v19037_v14 = vld [vmem:[%s23873_s1 + $0xf70] sm:$0xff]  }
 0x1eb   : > { %17454 = vmatpush3.bf16.msra.mxu1 %v19010_v17 }
 0x1ec   : > { %17455 = vmatprep.subr.bf16.mxu1 %v19012_v30 }
 0x1ed   : > { %17428 = vmatpush3.bf16.msra.mxu0 %v19013_v22 }
 0x1ee   : > { %17429 = vmatprep.subr.bf16.mxu0 %v19017_v11  ;;  %v19040_v11 = vld [vmem:[%s23873_s1 + $0xfb0] sm:$0xff]  }
 0x1ef   : > { %17456 = vmatpush3.bf16.msra.mxu1 %v19014_v32 }
 0x1f0   : > { %17457 = vmatprep.subr.bf16.mxu1 %v19018_v53  ;;  %v14695_v53 = vld [vmem:[%s19849_s12 + $0x200] sm:$0xff] }
 0x1f1   : > { %17430 = vmatpush3.bf16.msra.mxu0 %v19019_v28 }
 0x1f2   : > { %17431 = vmatprep.subr.bf16.mxu0 %v19021_v6  ;;  %v19047_v6 = vld [vmem:[%s23873_s1 + $0xf28] sm:$0xff]  }
 0x1f3   : > { %v17099_v7 = vpop.f32.mrf.mxu0  ;;  %17458 = vmatpush3.bf16.msra.mxu1 %v19020_v33  ;;  %v14696_v33 = vld [vmem:[%s19849_s12 + $0x208] sm:$0xff] }
 0x1f5   : > { %v17100_v40 = vpop.f32.mrf.mxu0  ;;  %17432 = vmatpush3.bf16.msra.mxu0 %v19023_v4  ;;  %v19053_v4 = vld [vmem:[%s23873_s1 + $0xf58] sm:$0xff]  }
 0x1f6   : > { %v17127_v10 = vpop.f32.mrf.mxu1  ;;  %v17101_v50 = vadd.f32 %v17100_v40, %v17099_v7  ;;  %17433 = vmatprep.subr.bf16.mxu0 %v19025_v59  ;;  %v19039_v40 = vld [vmem:[%s23873_s1 + $0xf30] sm:$0xff]  }
 0x1f7   : > { %v17102_v55 = vpop.f32.mrf.mxu0 }
 0x1f8   : > { %v17128_v58 = vpop.f32.mrf.mxu1  ;;  %v3875_v29 = vadd.f32 %v17101_v50, %v21472_v16  ;;  %v19022_v16 = vld [vmem:[%s23873_s1 + $0xec8] sm:$0xff]  }
 0x1f9   : > { %v17129_v2 = vadd.f32 %v17128_v58, %v17127_v10  ;;  %v17103_v60 = vpop.f32.mrf.mxu0  ;;  %17459 = vmatprep.subr.bf16.mxu1 %v19022_v16  ;;  %17434 = vmatpush3.bf16.msra.mxu0 %v19027_v54  ;;  %v21693_v50 = vld [vmem:[%s19849_s12 + $0x1e8] sm:$0xff]  ;;  %v19051_v16 = vld [vmem:[%s23873_s1 + $0xf20] sm:$0xff]  }
 0x1fa   : > { %v17130_v39 = vpop.f32.mrf.mxu1  ;;  %v17104_v42 = vadd.f32 %v17103_v60, %v17102_v55  ;;  %17460 = vmatpush3.bf16.msra.mxu1 %v19024_v13  ;;  %17475 = vmatprep.subr.bf16.mxu0 %v19033_v57  ;;  %v14801_v58 = vcombine.low %v21693_v50, %v14695_v53  ;;  %v14802_v55 = vcombine.high %v21693_v50, %v14695_v53  ;;  %v19056_v13 = vld [vmem:[%s23873_s1 + $0xf98] sm:$0xff]   ;;  %v19078_v53 = vld [vmem:[%s23873_s1 + $0x10f0] sm:$0xff]  }
 0x1fb   : > { %v3924_v63 = vadd.f32 %v17129_v2, %v3875_v29  ;;  %v19044_v29 = vld [vmem:[%s23873_s1 + $0xfe8] sm:$0xff]   ;;  %v21705_v2 = vld [vmem:[%s19849_s12 + $0x1f0] sm:$0xff] }
 0x1fc   : > { %v17131_v48 = vpop.f32.mrf.mxu1  ;;  %v3878_v12 = vadd.f32 %v17104_v42, %v17076_v35  ;;  %6337 = vmatmul.mubr.bf16.vlgmr.msra.gmra.mxu0 %v14795_v21  ;;  %v14803_v60 = vcombine.low %v21705_v2, %v14696_v33  ;;  %v14804_v35 = vcombine.high %v21705_v2, %v14696_v33  ;;  %v19050_v42 = vld [vmem:[%s23873_s1 + $0xfe0] sm:$0xff]   ;;  %v19083_v33 = vld [vmem:[%s23873_s1 + $0x1028] sm:$0xff]  }
 0x1fd   : > { %v21636_v45 = vadd.f32 %v3924_v63, %v21485_v41  ;;  %v17132_v23 = vadd.f32 %v17131_v48, %v17130_v39  ;;  %v17105_v51 = vpop.f32.mrf.mxu0  ;;  %v19026_v41 = vld [vmem:[%s23873_s1 + $0xec0] sm:$0xff]   ;;  %6344 = vmatprep.mubr.bf16.mxu0 %v14802_v55  ;;  %v19048_v63 = vld [vmem:[%s23873_s1 + $0xfa8] sm:$0xff]   ;;  %v19080_v55 = vld [vmem:[%s23873_s1 + $0x10b0] sm:$0xff]  }
 0x1fe   : > { %17461 = vmatprep.subr.bf16.mxu1 %v19026_v41  ;;  %v17133_v0 = vpop.f32.mrf.mxu1  ;;  %v19052_v48 = vld [vmem:[%s23873_s1 + $0xfa0] sm:$0xff]  }
 0x1ff   : > { %v3927_v56 = vadd.f32 %v17132_v23, %v3878_v12  ;;  %v17106_v3 = vpop.f32.mrf.mxu0  ;;  %17462 = vmatpush3.bf16.msra.mxu1 %v19028_v5  ;;  %v19054_v12 = vld [vmem:[%s23873_s1 + $0xfd8] sm:$0xff]  }
 0x200   : > { %v17107_v52 = vadd.f32 %v17106_v3, %v17105_v51  ;;  %v17134_v25 = vpop.f32.mrf.mxu1  ;;  %17503 = vmatprep.subr.bf16.mxu1 %v19034_v43  ;;  %v19055_v23 = vld [vmem:[%s23873_s1 + $0xf18] sm:$0xff]   ;;  %v19058_v51 = vld [vmem:[%s23873_s1 + $0xfd0] sm:$0xff]   ;;  %v19064_v43 = vld [vmem:[%s23873_s1 + $0xf88] sm:$0xff]  }
 0x201   : > { %v21651_v62 = vadd.f32 %v3927_v56, %v21501_v36  ;;  %v17108_v44 = vpop.f32.mrf.mxu0  ;;  %v14797_v36 = vcombine.low %v14687_v61, %v21312_v27  ;;  %v19035_v27 = vld [vmem:[%s23873_s1 + $0xf38] sm:$0xff]   ;;  %v17135_v30 = vadd.f32 %v17134_v25, %v17133_v0  ;;  %v19057_v56 = vld [vmem:[%s23873_s1 + $0xf50] sm:$0xff]   ;;  %v19062_v0 = vld [vmem:[%s23873_s1 + $0xfc8] sm:$0xff]  }
 0x202   : > { %v3883_v9 = vadd.f32 %v17107_v52, %v21569_v38  ;;  %v19036_v38 = vld [vmem:[%s23873_s1 + $0xfb8] sm:$0xff]   ;;  %v17136_v7 = vpop.f32.mrf.mxu1  ;;  %17476 = vmatpush3.bf16.msra.mxu0 %v19035_v27  ;;  %v19059_v3 = vld [vmem:[%s23873_s1 + $0xf10] sm:$0xff]   ;;  %v19066_v27 = vld [vmem:[%s23873_s1 + $0xfc0] sm:$0xff]  }
 0x203   : > { %v17109_v17 = vpop.f32.mrf.mxu0  ;;  %6386 = vmatmul.mubr.bf16.vlgmr.msra.gmra.mxu1 %v14797_v36  ;;  %17477 = vmatprep.subr.bf16.mxu0 %v19037_v14 }
 0x204   : > { %v17110_v22 = vadd.f32 %v17109_v17, %v17108_v44  ;;  %v3932_v19 = vadd.f32 %v17135_v30, %v3883_v9  ;;  %17504 = vmatpush3.bf16.msra.mxu1 %v19036_v38  ;;  %v17137_v10 = vpop.f32.mrf.mxu1  ;;  %6345 = vmatmul.mubr.bf16.gmra.mxu0 %v14801_v58  ;;  %v19065_v17 = vld [vmem:[%s23873_s1 + $0xf40] sm:$0xff]   ;;  %v19079_v58 = vld [vmem:[%s23873_s1 + $0x1030] sm:$0xff]  }
 0x205   : > { %v17138_v46 = vadd.f32 %v17137_v10, %v17136_v7  ;;  %17505 = vmatprep.subr.bf16.mxu1 %v19038_v20  ;;  %6393 = vmatprep.mubr.bf16.mxu1 %v14804_v35  ;;  %v19067_v30 = vld [vmem:[%s23873_s1 + $0xf00] sm:$0xff]   ;;  %v6410_v7 = vld [vmem:[%s19849_s12 + $0x78] sm:$0xff]  ;;  %v19084_v35 = vld [vmem:[%s23873_s1 + $0x10a8] sm:$0xff]  }
 0x206   : > { %v3886_v32 = vadd.f32 %v17110_v22, %v17082_v18  ;;  %v21687_v24 = vadd.f32 %v3932_v19, %v21531_v37  ;;  %17478 = vmatpush3.bf16.msra.mxu0 %v19039_v40  ;;  %v19043_v37 = vld [vmem:[%s23873_s1 + $0xf68] sm:$0xff]   ;;  %v19068_v38 = vld [vmem:[%s23873_s1 + $0xf80] sm:$0xff]   ;;  %v14949_v14 = vcombine.low %v6410_v7, %v21458_v8  ;;  %v14950_v19 = vcombine.high %v6410_v7, %v21458_v8  ;;  %v19073_v40 = vld [vmem:[%s23873_s1 + $0x1078] sm:$0xff]  }
 0x207   : > { %17479 = vmatprep.subr.bf16.mxu0 %v19043_v37  ;;  %v19075_v8 = vld [vmem:[%s23873_s1 + $0x1038] sm:$0xff]   ;;  %v19081_v37 = vld [vmem:[%s23873_s1 + $0x1068] sm:$0xff]  }
 0x208   : > { %v3935_v28 = vadd.f32 %v17138_v46, %v3886_v32  ;;  %17506 = vmatpush3.bf16.msra.mxu1 %v19040_v11  ;;  %v6411_v32 = vld [vmem:[%s19849_s12 + $0x80] sm:$0xff]  ;;  %6903 = vmatprep.mubr.bf16.mxu0 %v14950_v19  ;;  %v19074_v46 = vld [vmem:[%s23873_s1 + $0x10f8] sm:$0xff]   ;;  %v19077_v11 = vld [vmem:[%s23873_s1 + $0x1070] sm:$0xff]  }
 0x209   : > { %17507 = vmatprep.subr.bf16.mxu1 %v19044_v29  ;;  %v14951_v20 = vcombine.low %v6411_v32, %v21463_v34  ;;  %v14952_v10 = vcombine.high %v6411_v32, %v21463_v34  ;;  %v19076_v34 = vld [vmem:[%s23873_s1 + $0x10b8] sm:$0xff]   ;;  %v19102_v32 = vld [vmem:[%s23873_s1 + $0x10c8] sm:$0xff]  }
 0x20a   : > { %v21709_v39 = vadd.f32 %v3935_v28, %v21549_v1  ;;  %17480 = vmatpush3.bf16.msra.mxu0 %v19047_v6  ;;  %v19049_v1 = vld [vmem:[%s23873_s1 + $0xf60] sm:$0xff]   ;;  %v19082_v28 = vld [vmem:[%s23873_s1 + $0x10e8] sm:$0xff]  }
 0x20b   : > { %6394 = vmatmul.mubr.bf16.gmra.mxu1 %v14803_v60  ;;  %17481 = vmatprep.subr.bf16.mxu0 %v19049_v1 }
 0x20c   : > { %17508 = vmatpush3.bf16.msra.mxu1 %v19048_v63  ;;  %6952 = vmatprep.mubr.bf16.mxu1 %v14952_v10  ;;  %v19085_v63 = vld [vmem:[%s23873_s1 + $0x1060] sm:$0xff]  }
 0x20d   : > { %17509 = vmatprep.subr.bf16.mxu1 %v19050_v42 }
 0x20e   : > { %17482 = vmatpush3.bf16.msra.mxu0 %v19051_v16  ;;  %v19086_v16 = vld [vmem:[%s23873_s1 + $0x10e0] sm:$0xff]  }
 0x20f   : > { %17483 = vmatprep.subr.bf16.mxu0 %v19053_v4 }
 0x210   : > { %17510 = vmatpush3.bf16.msra.mxu1 %v19052_v48 }
 0x211   : > { %17511 = vmatprep.subr.bf16.mxu1 %v19054_v12  ;;  %v19087_v12 = vld [vmem:[%s23873_s1 + $0x1020] sm:$0xff]  }
 0x212   : > { %17484 = vmatpush3.bf16.msra.mxu0 %v19055_v23 }
 0x213   : > { %17485 = vmatprep.subr.bf16.mxu0 %v19057_v56 }
 0x214   : > { %17512 = vmatpush3.bf16.msra.mxu1 %v19056_v13  ;;  %v19088_v13 = vld [vmem:[%s23873_s1 + $0x10a0] sm:$0xff]  }
 0x215   : > { %17513 = vmatprep.subr.bf16.mxu1 %v19058_v51  ;;  %v19089_v51 = vld [vmem:[%s23873_s1 + $0x1058] sm:$0xff]  }
 0x216   : > { %v17155_v59 = vpop.f32.mrf.mxu0  ;;  %17486 = vmatpush3.bf16.msra.mxu0 %v19059_v3  ;;  %v19090_v3 = vld [vmem:[%s23873_s1 + $0x10d8] sm:$0xff]  }
 0x217   : > { %v17183_v41 = vpop.f32.mrf.mxu1  ;;  %17487 = vmatprep.subr.bf16.mxu0 %v19061_v26  ;;  %v6419_v26 = vld [vmem:[%s19849_s12 + $0xc0] sm:$0xff] }
 0x218   : > { %v17156_v54 = vpop.f32.mrf.mxu0  ;;  %17514 = vmatpush3.bf16.msra.mxu1 %v19060_v31  ;;  %v19091_v31 = vld [vmem:[%s23873_s1 + $0x1018] sm:$0xff]  }
 0x219   : > { %v17157_v5 = vadd.f32 %v17156_v54, %v17155_v59  ;;  %v17184_v52 = vpop.f32.mrf.mxu1  ;;  %17515 = vmatprep.subr.bf16.mxu1 %v19062_v0 }
 0x21a   : > { %v17158_v21 = vpop.f32.mrf.mxu0  ;;  %v17185_v61 = vadd.f32 %v17184_v52, %v17183_v41  ;;  %17488 = vmatpush3.bf16.msra.mxu0 %v19063_v47  ;;  %v19092_v52 = vld [vmem:[%s23873_s1 + $0x1098] sm:$0xff]   ;;  %v6420_v47 = vld [vmem:[%s19849_s12 + $0xc8] sm:$0xff] }
 0x21b   : > { %v17186_v44 = vpop.f32.mrf.mxu1  ;;  %17489 = vmatprep.subr.bf16.mxu0 %v19065_v17  ;;  %v19098_v17 = vld [vmem:[%s23873_s1 + $0x10d0] sm:$0xff]  }
 0x21c   : > { %v17159_v36 = vpop.f32.mrf.mxu0  ;;  %v21764_v57 = vadd.f32 %v17185_v61, %v17157_v5  ;;  %17516 = vmatpush3.bf16.msra.mxu1 %v19064_v43 }
 0x21d   : > { %v17160_v9 = vadd.f32 %v17159_v36, %v17158_v21  ;;  %v17187_v25 = vpop.f32.mrf.mxu1  ;;  %17517 = vmatprep.subr.bf16.mxu1 %v19066_v27  ;;  %v21852_v21 = vld [vmem:[%s19849_s12 + $0xa8] sm:$0xff]  ;;  %v21860_v36 = vld [vmem:[%s19849_s12 + $0xb0] sm:$0xff] }
 0x21e   : > { %v17188_v18 = vadd.f32 %v17187_v25, %v17186_v44  ;;  %17490 = vmatpush3.bf16.msra.mxu0 %v19067_v30  ;;  %v17161_v29 = vpop.f32.mrf.mxu0  ;;  %v14955_v0 = vcombine.low %v21852_v21, %v6419_v26  ;;  %v14956_v44 = vcombine.high %v21852_v21, %v6419_v26  ;;  %v14958_v43 = vcombine.high %v21860_v36, %v6420_v47  ;;  %v19097_v25 = vld [vmem:[%s23873_s1 + $0x1050] sm:$0xff]  }
 0x21f   : > { %17531 = vmatprep.subr.bf16.mxu0 %v19073_v40  ;;  %v17189_v60 = vpop.f32.mrf.mxu1  ;;  %v19099_v27 = vld [vmem:[%s23873_s1 + $0x1010] sm:$0xff]   ;;  %v19103_v40 = vld [vmem:[%s23873_s1 + $0x1008] sm:$0xff]  }
 0x220   : > { %v21778_v22 = vadd.f32 %v17188_v18, %v17160_v9  ;;  %17518 = vmatpush3.bf16.msra.mxu1 %v19068_v38  ;;  %v17162_v6 = vpop.f32.mrf.mxu0  ;;  %v14957_v9 = vcombine.low %v21860_v36, %v6420_v47  ;;  %v19100_v30 = vld [vmem:[%s23873_s1 + $0x1090] sm:$0xff]  }
 0x221   : > { %6904 = vmatmul.mubr.bf16.vlgmr.msra.gmra.mxu0 %v14949_v14  ;;  %17559 = vmatprep.subr.bf16.mxu1 %v19074_v46  ;;  %v17163_v1 = vadd.f32 %v17162_v6, %v17161_v29  ;;  %v17190_v42 = vpop.f32.mrf.mxu1  ;;  %v19101_v14 = vld [vmem:[%s23873_s1 + $0x1048] sm:$0xff]   ;;  %v19108_v29 = vld [vmem:[%s23873_s1 + $0x1080] sm:$0xff]  }
 0x222   : > { %17532 = vmatpush3.bf16.msra.mxu0 %v19075_v8  ;;  %v17191_v48 = vadd.f32 %v17190_v42, %v17189_v60  ;;  %v17164_v4 = vpop.f32.mrf.mxu0  ;;  %6911 = vmatprep.mubr.bf16.mxu0 %v14956_v44  ;;  %v19113_v42 = vld [vmem:[%s23873_s1 + $0x1178] sm:$0xff]   ;;  %v19124_v44 = vld [vmem:[%s23873_s1 + $0x11e8] sm:$0xff]  }
 0x223   : > { %6953 = vmatmul.mubr.bf16.vlgmr.msra.gmra.mxu1 %v14951_v20  ;;  %17533 = vmatprep.subr.bf16.mxu0 %v19077_v11  ;;  %v17192_v23 = vpop.f32.mrf.mxu1 }
 0x224   : > { %17560 = vmatpush3.bf16.msra.mxu1 %v19076_v34  ;;  %v21837_v59 = vadd.f32 %v17191_v48, %v17163_v1  ;;  %v17165_v56 = vpop.f32.mrf.mxu0  ;;  %6960 = vmatprep.mubr.bf16.mxu1 %v14958_v43  ;;  %v19104_v34 = vld [vmem:[%s23873_s1 + $0x1088] sm:$0xff]  }
 0x225   : > { %17561 = vmatprep.subr.bf16.mxu1 %v19078_v53  ;;  %v17166_v41 = vadd.f32 %v17165_v56, %v17164_v4  ;;  %v17193_v54 = vpop.f32.mrf.mxu1  ;;  %v19105_v53 = vld [vmem:[%s23873_s1 + $0x1040] sm:$0xff]  }
 0x226   : > { %17534 = vmatpush3.bf16.msra.mxu0 %v19079_v58  ;;  %v17194_v5 = vadd.f32 %v17193_v54, %v17192_v23 }
 0x227   : > { %17535 = vmatprep.subr.bf16.mxu0 %v19081_v37  ;;  %v19107_v37 = vld [vmem:[%s23873_s1 + $0x1000] sm:$0xff]  }
 0x228   : > { %17562 = vmatpush3.bf16.msra.mxu1 %v19080_v55  ;;  %v21855_v61 = vadd.f32 %v17194_v5, %v17166_v41  ;;  %v19119_v41 = vld [vmem:[%s23873_s1 + $0x1130] sm:$0xff]   ;;  %v21948_v5 = vld [vmem:[%s19849_s12 + $0xb8] sm:$0xff] }
 0x229   : > { %17563 = vmatprep.subr.bf16.mxu1 %v19082_v28  ;;  %6912 = vmatmul.mubr.bf16.gmra.mxu0 %v14955_v0  ;;  %v19123_v0 = vld [vmem:[%s23873_s1 + $0x1168] sm:$0xff]  }
 0x22a   : > { %17536 = vmatpush3.bf16.msra.mxu0 %v19083_v33 }
 0x22b   : > { %17537 = vmatprep.subr.bf16.mxu0 %v19085_v63  ;;  %6961 = vmatmul.mubr.bf16.gmra.mxu1 %v14957_v9  ;;  %v19125_v9 = vld [vmem:[%s23873_s1 + $0x1128] sm:$0xff]  }
 0x22c   : > { %17564 = vmatpush3.bf16.msra.mxu1 %v19084_v35  ;;  %v15009_v35 = vld [vmem:[%s19849_s12 + $0x1c8] sm:$0xff] }
 0x22d   : > { %17565 = vmatprep.subr.bf16.mxu1 %v19086_v16  ;;  %v15117_v1 = vcombine.low %v15009_v35, %v21606_v49  ;;  %v19114_v16 = vld [vmem:[%s23873_s1 + $0x11f8] sm:$0xff]  }
 0x22e   : > { %17538 = vmatpush3.bf16.msra.mxu0 %v19087_v12  ;;  %v19117_v12 = vld [vmem:[%s23873_s1 + $0x1170] sm:$0xff]  }
 0x22f   : > { %17539 = vmatprep.subr.bf16.mxu0 %v19089_v51 }
 0x230   : > { %17566 = vmatpush3.bf16.msra.mxu1 %v19088_v13  ;;  %v19118_v13 = vld [vmem:[%s23873_s1 + $0x11f0] sm:$0xff]  }
 0x231   : > { %17567 = vmatprep.subr.bf16.mxu1 %v19090_v3 }
 0x232   : > { %17540 = vmatpush3.bf16.msra.mxu0 %v19091_v31  ;;  %v6421_v31 = vld [vmem:[%s19849_s12 + $0xd0] sm:$0xff] }
 0x233   : > { %17541 = vmatprep.subr.bf16.mxu0 %v19097_v25  ;;  %v14960_v26 = vcombine.high %v21948_v5, %v6421_v31  ;;  %v19127_v25 = vld [vmem:[%s23873_s1 + $0x1160] sm:$0xff]  }
 0x234   : > { %17568 = vmatpush3.bf16.msra.mxu1 %v19092_v52  ;;  %v14959_v52 = vcombine.low %v21948_v5, %v6421_v31 }
 0x235   : > { %17569 = vmatprep.subr.bf16.mxu1 %v19098_v17 }
 0x236   : > { %17542 = vmatpush3.bf16.msra.mxu0 %v19099_v27 }
 0x237   : > { %v17239_v38 = vpop.f32.mrf.mxu1  ;;  %17543 = vmatprep.subr.bf16.mxu0 %v19101_v14  ;;  %v19132_v14 = vld [vmem:[%s23873_s1 + $0x11d8] sm:$0xff]  }
 0x238   : > { %v17211_v18 = vpop.f32.mrf.mxu0  ;;  %17570 = vmatpush3.bf16.msra.mxu1 %v19100_v30  ;;  %v19130_v30 = vld [vmem:[%s23873_s1 + $0x11a0] sm:$0xff]  }
 0x239   : > { %v17240_v20 = vpop.f32.mrf.mxu1  ;;  %17571 = vmatprep.subr.bf16.mxu1 %v19102_v32  ;;  %v19134_v32 = vld [vmem:[%s23873_s1 + $0x1198] sm:$0xff]  }
 0x23a   : > { %v17212_v7 = vpop.f32.mrf.mxu0  ;;  %v21887_v8 = vadd.f32 %v17240_v20, %v17239_v38  ;;  %17544 = vmatpush3.bf16.msra.mxu0 %v19103_v40  ;;  %v15018_v40 = vld [vmem:[%s19849_s12 + $0x210] sm:$0xff] }
 0x23b   : > { %v17213_v19 = vadd.f32 %v17212_v7, %v17211_v18  ;;  %17545 = vmatprep.subr.bf16.mxu0 %v19105_v53  ;;  %v21936_v51 = vpop.f32.mrf.mxu1  ;;  %v19128_v18 = vld [vmem:[%s23873_s1 + $0x11e0] sm:$0xff]   ;;  %v19131_v7 = vld [vmem:[%s23873_s1 + $0x1158] sm:$0xff]   ;;  %v19138_v53 = vld [vmem:[%s23873_s1 + $0x11d0] sm:$0xff]  }
 0x23c   : > { %v17214_v10 = vpop.f32.mrf.mxu0  ;;  %17572 = vmatpush3.bf16.msra.mxu1 %v19104_v34 }
 0x23d   : > { %v4540_v46 = vadd.f32 %v17213_v19, %v21764_v57  ;;  %v19106_v57 = vld [vmem:[%s23873_s1 + $0x10c0] sm:$0xff]   ;;  %v21960_v47 = vpop.f32.mrf.mxu1  ;;  %v19133_v19 = vld [vmem:[%s23873_s1 + $0x1118] sm:$0xff]  }
 0x23e   : > { %v17215_v11 = vpop.f32.mrf.mxu0  ;;  %17573 = vmatprep.subr.bf16.mxu1 %v19106_v57  ;;  %17546 = vmatpush3.bf16.msra.mxu0 %v19107_v37  ;;  %v19140_v37 = vld [vmem:[%s23873_s1 + $0x1190] sm:$0xff]  }
 0x23f   : > { %v21896_v58 = vadd.f32 %v4540_v46, %v21636_v45  ;;  %v17216_v55 = vadd.f32 %v17215_v11, %v17214_v10  ;;  %v6412_v45 = vld [vmem:[%s19849_s12 + $0x88] sm:$0xff]  ;;  %17587 = vmatprep.subr.bf16.mxu0 %v19113_v42  ;;  %v17245_v17 = vpop.f32.mrf.mxu1  ;;  %v22000_v10 = vld [vmem:[%s19849_s12 + $0x1f8] sm:$0xff]  ;;  %v19137_v11 = vld [vmem:[%s23873_s1 + $0x1150] sm:$0xff]  }
 0x240   : > { %v14953_v33 = vcombine.low %v6412_v45, %v21558_v15  ;;  %v14954_v60 = vcombine.high %v6412_v45, %v21558_v15  ;;  %17574 = vmatpush3.bf16.msra.mxu1 %v19108_v29  ;;  %v15123_v46 = vcombine.low %v22000_v10, %v15018_v40  ;;  %v15124_v34 = vcombine.high %v22000_v10, %v15018_v40  ;;  %v19141_v29 = vld [vmem:[%s23873_s1 + $0x1148] sm:$0xff]   ;;  %v19159_v40 = vld [vmem:[%s23873_s1 + $0x1230] sm:$0xff]  }
 0x241   : > { %v4543_v28 = vadd.f32 %v17216_v55, %v21778_v22  ;;  %v15118_v22 = vcombine.high %v15009_v35, %v21606_v49  ;;  %v19116_v49 = vld [vmem:[%s23873_s1 + $0x11b8] sm:$0xff]   ;;  %17615 = vmatprep.subr.bf16.mxu1 %v19114_v16  ;;  %v17246_v27 = vpop.f32.mrf.mxu1  ;;  %v19139_v55 = vld [vmem:[%s23873_s1 + $0x1110] sm:$0xff]   ;;  %v19143_v35 = vld [vmem:[%s23873_s1 + $0x1108] sm:$0xff]  }
 0x242   : > { %7001 = vmatprep.mubr.bf16.mxu0 %v14954_v60  ;;  %v21983_v38 = vadd.f32 %v17246_v27, %v17245_v17 }
 0x243   : > { %v21913_v6 = vadd.f32 %v4543_v28, %v21651_v62  ;;  %7519 = vmatprep.mubr.bf16.mxu1 %v15118_v22  ;;  %7002 = vmatmul.mubr.bf16.vlgmr.msra.gmra.mxu0 %v14953_v33  ;;  %v19115_v62 = vld [vmem:[%s23873_s1 + $0x1138] sm:$0xff]   ;;  %v21997_v20 = vpop.f32.mrf.mxu1  ;;  %v19142_v33 = vld [vmem:[%s23873_s1 + $0x11c8] sm:$0xff]  }
 0x244   : > { %v17217_v63 = vpop.f32.mrf.mxu0  ;;  %7520 = vmatmul.mubr.bf16.vlgmr.msra.gmra.mxu1 %v15117_v1  ;;  %17588 = vmatpush3.bf16.msra.mxu0 %v19115_v62  ;;  %v19144_v22 = vld [vmem:[%s23873_s1 + $0x1188] sm:$0xff]  }
 0x245   : > { %17616 = vmatpush3.bf16.msra.mxu1 %v19116_v49  ;;  %17589 = vmatprep.subr.bf16.mxu0 %v19117_v12  ;;  %v22014_v57 = vpop.f32.mrf.mxu1  ;;  %v19146_v49 = vld [vmem:[%s23873_s1 + $0x11c0] sm:$0xff]   ;;  %v17244_v12 = vadd.f32 %v21960_v47, %v21936_v51 }
 0x246   : > { %v17218_v15 = vpop.f32.mrf.mxu0  ;;  %17617 = vmatprep.subr.bf16.mxu1 %v19118_v13  ;;  %7009 = vmatprep.mubr.bf16.mxu0 %v14960_v26 }
 0x247   : > { %v17219_v48 = vadd.f32 %v17218_v15, %v17217_v63  ;;  %7527 = vmatprep.mubr.bf16.mxu1 %v15124_v34  ;;  %v19145_v15 = vld [vmem:[%s23873_s1 + $0x1140] sm:$0xff]  }
 0x248   : > { %v17220_v4 = vpop.f32.mrf.mxu0  ;;  %17590 = vmatpush3.bf16.msra.mxu0 %v19119_v41 }
 0x249   : > { %v4548_v23 = vadd.f32 %v17219_v48, %v21837_v59  ;;  %v19120_v59 = vld [vmem:[%s23873_s1 + $0x11b0] sm:$0xff]   ;;  %17591 = vmatprep.subr.bf16.mxu0 %v19123_v0 }
 0x24a   : > { %v17221_v56 = vpop.f32.mrf.mxu0  ;;  %17618 = vmatpush3.bf16.msra.mxu1 %v19120_v59 }
 0x24b   : > { %v21942_v54 = vadd.f32 %v4548_v23, %v21687_v24  ;;  %v17222_v3 = vadd.f32 %v17221_v56, %v17220_v4  ;;  %7010 = vmatmul.mubr.bf16.gmra.mxu0 %v14959_v52  ;;  %17619 = vmatprep.subr.bf16.mxu1 %v19124_v44  ;;  %v19147_v23 = vld [vmem:[%s23873_s1 + $0x1100] sm:$0xff]   ;;  %v15011_v52 = vld [vmem:[%s19849_s12 + $0x1d8] sm:$0xff] }
 0x24c   : > { %17592 = vmatpush3.bf16.msra.mxu0 %v19125_v9  ;;  %7528 = vmatmul.mubr.bf16.gmra.mxu1 %v15123_v46  ;;  %v15121_v44 = vcombine.low %v15011_v52, %v21705_v2  ;;  %v15122_v47 = vcombine.high %v15011_v52, %v21705_v2  ;;  %v19153_v9 = vld [vmem:[%s23873_s1 + $0x1278] sm:$0xff]  }
 0x24d   : > { %v4551_v24 = vadd.f32 %v17222_v3, %v21855_v61  ;;  %v19126_v61 = vld [vmem:[%s23873_s1 + $0x11a8] sm:$0xff]   ;;  %17593 = vmatprep.subr.bf16.mxu0 %v19127_v25  ;;  %v15010_v3 = vld [vmem:[%s19849_s12 + $0x1d0] sm:$0xff]  ;;  %v19156_v2 = vld [vmem:[%s23873_s1 + $0x12b8] sm:$0xff]  }
 0x24e   : > { %17620 = vmatpush3.bf16.msra.mxu1 %v19126_v61  ;;  %v15119_v31 = vcombine.low %v15010_v3, %v21693_v50  ;;  %v15120_v51 = vcombine.high %v15010_v3, %v21693_v50  ;;  %v19154_v50 = vld [vmem:[%s23873_s1 + $0x12f8] sm:$0xff]   ;;  %7617 = vmatprep.mubr.bf16.mxu1 %v15122_v47  ;;  %v19179_v3 = vld [vmem:[%s23873_s1 + $0x1210] sm:$0xff]  }
 0x24f   : > { %v21966_v43 = vadd.f32 %v4551_v24, %v21709_v39  ;;  %v19129_v39 = vld [vmem:[%s23873_s1 + $0x1120] sm:$0xff]   ;;  %17621 = vmatprep.subr.bf16.mxu1 %v19128_v18 }
 0x250   : > { %17594 = vmatpush3.bf16.msra.mxu0 %v19129_v39  ;;  %7568 = vmatprep.mubr.bf16.mxu0 %v15120_v51  ;;  %v19181_v51 = vld [vmem:[%s23873_s1 + $0x1248] sm:$0xff]  }
 0x251   : > { %17595 = vmatprep.subr.bf16.mxu0 %v19131_v7 }
 0x252   : > { %17622 = vmatpush3.bf16.msra.mxu1 %v19130_v30  ;;  %v19157_v30 = vld [vmem:[%s23873_s1 + $0x1270] sm:$0xff]  }
 0x253   : > { %17623 = vmatprep.subr.bf16.mxu1 %v19132_v14  ;;  %v19158_v14 = vld [vmem:[%s23873_s1 + $0x12f0] sm:$0xff]  }
 0x254   : > { %17596 = vmatpush3.bf16.msra.mxu0 %v19133_v19 }
 0x255   : > { %17597 = vmatprep.subr.bf16.mxu0 %v19137_v11  ;;  %v22086_v11 = vld [vmem:[%s19849_s12 + $0x200] sm:$0xff] }
 0x256   : > { %17624 = vmatpush3.bf16.msra.mxu1 %v19134_v32  ;;  %v17250_v32 = vadd.f32 %v22014_v57, %v21997_v20 }
 0x257   : > { %17625 = vmatprep.subr.bf16.mxu1 %v19138_v53  ;;  %v15019_v53 = vld [vmem:[%s19849_s12 + $0x218] sm:$0xff] }
 0x258   : > { %17598 = vmatpush3.bf16.msra.mxu0 %v19139_v55  ;;  %v15125_v20 = vcombine.low %v22086_v11, %v15019_v53  ;;  %v15126_v57 = vcombine.high %v22086_v11, %v15019_v53 }
 0x259   : > { %17599 = vmatprep.subr.bf16.mxu0 %v19141_v29 }
 0x25a   : > { %17626 = vmatpush3.bf16.msra.mxu1 %v19140_v37  ;;  %v19163_v37 = vld [vmem:[%s23873_s1 + $0x1268] sm:$0xff]  }
 0x25b   : > { %17627 = vmatprep.subr.bf16.mxu1 %v19142_v33 }
 0x25c   : > { %v17267_v28 = vpop.f32.mrf.mxu0  ;;  %17600 = vmatpush3.bf16.msra.mxu0 %v19143_v35  ;;  %v15020_v35 = vld [vmem:[%s19849_s12 + $0x220] sm:$0xff] }
 0x25d   : > { %17601 = vmatprep.subr.bf16.mxu0 %v19145_v15  ;;  %v19168_v15 = vld [vmem:[%s23873_s1 + $0x12a8] sm:$0xff]  }
 0x25e   : > { %v17295_v45 = vpop.f32.mrf.mxu1  ;;  %v17268_v60 = vpop.f32.mrf.mxu0  ;;  %17628 = vmatpush3.bf16.msra.mxu1 %v19144_v22 }
 0x25f   : > { %v17269_v63 = vadd.f32 %v17268_v60, %v17267_v28  ;;  %17629 = vmatprep.subr.bf16.mxu1 %v19146_v49  ;;  %v22098_v60 = vld [vmem:[%s19849_s12 + $0x208] sm:$0xff] }
 0x260   : > { %v17296_v1 = vpop.f32.mrf.mxu1  ;;  %v17270_v16 = vpop.f32.mrf.mxu0  ;;  %17602 = vmatpush3.bf16.msra.mxu0 %v19147_v23  ;;  %v15127_v22 = vcombine.low %v22098_v60, %v15020_v35  ;;  %v19173_v23 = vld [vmem:[%s23873_s1 + $0x1258] sm:$0xff]  }
 0x261   : > { %v17297_v42 = vadd.f32 %v17296_v1, %v17295_v45  ;;  %v5107_v62 = vadd.f32 %v17269_v63, %v21887_v8  ;;  %v19148_v8 = vld [vmem:[%s23873_s1 + $0x1180] sm:$0xff]   ;;  %17643 = vmatprep.subr.bf16.mxu0 %v19153_v9  ;;  %v19164_v45 = vld [vmem:[%s23873_s1 + $0x12e8] sm:$0xff]  }
 0x262   : > { %v17298_v48 = vpop.f32.mrf.mxu1  ;;  %v17271_v4 = vpop.f32.mrf.mxu0  ;;  %17630 = vmatpush3.bf16.msra.mxu1 %v19148_v8  ;;  %v19178_v8 = vld [vmem:[%s23873_s1 + $0x12d0] sm:$0xff]  }
 0x263   : > { %v5156_v13 = vadd.f32 %v17297_v42, %v5107_v62  ;;  %v17272_v56 = vadd.f32 %v17271_v4, %v17270_v16  ;;  %7569 = vmatmul.mubr.bf16.vlgmr.msra.gmra.mxu0 %v15119_v31  ;;  %17671 = vmatprep.subr.bf16.mxu1 %v19154_v50  ;;  %v15128_v42 = vcombine.high %v22098_v60, %v15020_v35  ;;  %v19167_v16 = vld [vmem:[%s23873_s1 + $0x1228] sm:$0xff]   ;;  %v19171_v4 = vld [vmem:[%s23873_s1 + $0x1220] sm:$0xff]  }
 0x264   : > { %v17299_v41 = vpop.f32.mrf.mxu1  ;;  %v17273_v24 = vpop.f32.mrf.mxu0  ;;  %7576 = vmatprep.mubr.bf16.mxu0 %v15126_v57  ;;  %v19184_v50 = vld [vmem:[%s23873_s1 + $0x1288] sm:$0xff]   ;;  %v19194_v57 = vld [vmem:[%s23873_s1 + $0x13f8] sm:$0xff]  }
 0x265   : > { %v17300_v59 = vadd.f32 %v17299_v41, %v17298_v48  ;;  %v22051_v26 = vadd.f32 %v5156_v13, %v21896_v58  ;;  %v5110_v0 = vadd.f32 %v17272_v56, %v17244_v12  ;;  %v19155_v58 = vld [vmem:[%s23873_s1 + $0x1238] sm:$0xff]   ;;  %7618 = vmatmul.mubr.bf16.vlgmr.msra.gmra.mxu1 %v15121_v44  ;;  %v19170_v48 = vld [vmem:[%s23873_s1 + $0x12e0] sm:$0xff]   ;;  %v19177_v41 = vld [vmem:[%s23873_s1 + $0x1250] sm:$0xff]  }
 0x266   : > { %v17274_v25 = vpop.f32.mrf.mxu0  ;;  %v17301_v39 = vpop.f32.mrf.mxu1  ;;  %17644 = vmatpush3.bf16.msra.mxu0 %v19155_v58  ;;  %17672 = vmatpush3.bf16.msra.mxu1 %v19156_v2  ;;  %v19172_v12 = vld [vmem:[%s23873_s1 + $0x12a0] sm:$0xff]   ;;  %v19175_v13 = vld [vmem:[%s23873_s1 + $0x1218] sm:$0xff]   ;;  %v19183_v44 = vld [vmem:[%s23873_s1 + $0x1208] sm:$0xff]  }
 0x267   : > { %v5159_v61 = vadd.f32 %v17300_v59, %v5110_v0  ;;  %v17275_v17 = vadd.f32 %v17274_v25, %v17273_v24  ;;  %17645 = vmatprep.subr.bf16.mxu0 %v19157_v30  ;;  %17673 = vmatprep.subr.bf16.mxu1 %v19158_v14  ;;  %v19176_v56 = vld [vmem:[%s23873_s1 + $0x1298] sm:$0xff]   ;;  %v19180_v59 = vld [vmem:[%s23873_s1 + $0x1290] sm:$0xff]   ;;  %v19182_v0 = vld [vmem:[%s23873_s1 + $0x12c8] sm:$0xff]  }
 0x268   : > { %v17276_v27 = vpop.f32.mrf.mxu0  ;;  %v17302_v19 = vpop.f32.mrf.mxu1  ;;  %7625 = vmatprep.mubr.bf16.mxu1 %v15128_v42  ;;  %v19185_v58 = vld [vmem:[%s23873_s1 + $0x1240] sm:$0xff]   ;;  %v19202_v35 = vld [vmem:[%s23873_s1 + $0x13e8] sm:$0xff]  }
 0x269   : > { %v22068_v18 = vadd.f32 %v5159_v61, %v21913_v6  ;;  %v5115_v7 = vadd.f32 %v17275_v17, %v21983_v38  ;;  %v17303_v46 = vadd.f32 %v17302_v19, %v17301_v39  ;;  %v19160_v38 = vld [vmem:[%s23873_s1 + $0x12b0] sm:$0xff]   ;;  %v19186_v2 = vld [vmem:[%s23873_s1 + $0x12c0] sm:$0xff]  }
 0x26a   : > { %v17277_v6 = vpop.f32.mrf.mxu0  ;;  %v17304_v55 = vpop.f32.mrf.mxu1  ;;  %17646 = vmatpush3.bf16.msra.mxu0 %v19159_v40  ;;  %17674 = vmatpush3.bf16.msra.mxu1 %v19160_v38  ;;  %v19187_v30 = vld [vmem:[%s23873_s1 + $0x1200] sm:$0xff]  }
 0x26b   : > { %v17278_v34 = vadd.f32 %v17277_v6, %v17276_v27  ;;  %v5164_v28 = vadd.f32 %v17303_v46, %v5115_v7  ;;  %17647 = vmatprep.subr.bf16.mxu0 %v19163_v37  ;;  %7577 = vmatmul.mubr.bf16.gmra.mxu0 %v15125_v20  ;;  %v19188_v19 = vld [vmem:[%s23873_s1 + $0x1280] sm:$0xff]   ;;  %v7642_v6 = vld [vmem:[%s19849_s12 + $0x90] sm:$0xff] }
 0x26c   : > { %v17305_v33 = vpop.f32.mrf.mxu1  ;;  %17675 = vmatprep.subr.bf16.mxu1 %v19164_v45  ;;  %v15273_v40 = vcombine.low %v7642_v6, %v21852_v21  ;;  %v15274_v46 = vcombine.high %v7642_v6, %v21852_v21  ;;  %v19195_v21 = vld [vmem:[%s23873_s1 + $0x1338] sm:$0xff]   ;;  %v19197_v37 = vld [vmem:[%s23873_s1 + $0x1370] sm:$0xff]   ;;  %v19221_v6 = vld [vmem:[%s23873_s1 + $0x1348] sm:$0xff]  }
 0x26d   : > { %v5118_v29 = vadd.f32 %v17278_v34, %v17250_v32  ;;  %v22102_v63 = vadd.f32 %v5164_v28, %v21942_v54  ;;  %v17306_v1 = vadd.f32 %v17305_v33, %v17304_v55  ;;  %v19169_v54 = vld [vmem:[%s23873_s1 + $0x1260] sm:$0xff]   ;;  %7626 = vmatmul.mubr.bf16.gmra.mxu1 %v15127_v22  ;;  %v7643_v34 = vld [vmem:[%s19849_s12 + $0x98] sm:$0xff]  ;;  %v19198_v28 = vld [vmem:[%s23873_s1 + $0x13f0] sm:$0xff]  }
 0x26e   : > { %17648 = vmatpush3.bf16.msra.mxu0 %v19167_v16  ;;  %17676 = vmatpush3.bf16.msra.mxu1 %v19168_v15  ;;  %v15275_v38 = vcombine.low %v7643_v34, %v21860_v36  ;;  %v15276_v53 = vcombine.high %v7643_v34, %v21860_v36  ;;  %v19193_v55 = vld [vmem:[%s23873_s1 + $0x1378] sm:$0xff]   ;;  %v19200_v45 = vld [vmem:[%s23873_s1 + $0x13b0] sm:$0xff]   ;;  %v19201_v33 = vld [vmem:[%s23873_s1 + $0x1368] sm:$0xff]  }
 0x26f   : > { %v5167_v62 = vadd.f32 %v17306_v1, %v5118_v29  ;;  %17649 = vmatprep.subr.bf16.mxu0 %v19169_v54  ;;  %17677 = vmatprep.subr.bf16.mxu1 %v19170_v48  ;;  %v19196_v36 = vld [vmem:[%s23873_s1 + $0x13b8] sm:$0xff]   ;;  %v19199_v29 = vld [vmem:[%s23873_s1 + $0x1330] sm:$0xff]   ;;  %v19203_v1 = vld [vmem:[%s23873_s1 + $0x1328] sm:$0xff]  }
 0x270   : > { %8135 = vmatprep.mubr.bf16.mxu0 %v15274_v46  ;;  %8184 = vmatprep.mubr.bf16.mxu1 %v15276_v53  ;;  %v19204_v22 = vld [vmem:[%s23873_s1 + $0x13a8] sm:$0xff]   ;;  %v19205_v16 = vld [vmem:[%s23873_s1 + $0x1360] sm:$0xff]  }
 0x271   : > { %v22119_v49 = vadd.f32 %v5167_v62, %v21966_v43  ;;  %v19174_v43 = vld [vmem:[%s23873_s1 + $0x12d8] sm:$0xff]   ;;  %v19206_v62 = vld [vmem:[%s23873_s1 + $0x13e0] sm:$0xff]   ;;  %v19223_v34 = vld [vmem:[%s23873_s1 + $0x1308] sm:$0xff]  }
 0x272   : > { %17650 = vmatpush3.bf16.msra.mxu0 %v19171_v4  ;;  %17678 = vmatpush3.bf16.msra.mxu1 %v19172_v12  ;;  %v19207_v48 = vld [vmem:[%s23873_s1 + $0x1320] sm:$0xff]  }
 0x273   : > { %17651 = vmatprep.subr.bf16.mxu0 %v19173_v23  ;;  %17679 = vmatprep.subr.bf16.mxu1 %v19174_v43  ;;  %v19208_v23 = vld [vmem:[%s23873_s1 + $0x13a0] sm:$0xff]  }
 0x276   : > { %17652 = vmatpush3.bf16.msra.mxu0 %v19175_v13  ;;  %17680 = vmatpush3.bf16.msra.mxu1 %v19176_v56  ;;  %v19209_v56 = vld [vmem:[%s23873_s1 + $0x1358] sm:$0xff]  }
 0x277   : > { %17653 = vmatprep.subr.bf16.mxu0 %v19177_v41  ;;  %17681 = vmatprep.subr.bf16.mxu1 %v19178_v8  ;;  %v19210_v8 = vld [vmem:[%s23873_s1 + $0x13d8] sm:$0xff]  }
 0x27a   : > { %17654 = vmatpush3.bf16.msra.mxu0 %v19179_v3  ;;  %17682 = vmatpush3.bf16.msra.mxu1 %v19180_v59 }
 0x27b   : > { %17655 = vmatprep.subr.bf16.mxu0 %v19181_v51  ;;  %17683 = vmatprep.subr.bf16.mxu1 %v19182_v0  ;;  %v19212_v0 = vld [vmem:[%s23873_s1 + $0x1398] sm:$0xff]  }
 0x27c   : > { %v17323_v31 = vpop.f32.mrf.mxu0 }
 0x27e   : > { %v17351_v52 = vpop.f32.mrf.mxu1  ;;  %v17324_v24 = vpop.f32.mrf.mxu0  ;;  %17656 = vmatpush3.bf16.msra.mxu0 %v19183_v44  ;;  %17684 = vmatpush3.bf16.msra.mxu1 %v19184_v50  ;;  %v7651_v44 = vld [vmem:[%s19849_s12 + $0xd8] sm:$0xff] }
 0x27f   : > { %v17325_v47 = vadd.f32 %v17324_v24, %v17323_v31  ;;  %17657 = vmatprep.subr.bf16.mxu0 %v19185_v58  ;;  %17685 = vmatprep.subr.bf16.mxu1 %v19186_v2  ;;  %v19211_v31 = vld [vmem:[%s23873_s1 + $0x1318] sm:$0xff]   ;;  %v22248_v24 = vld [vmem:[%s19849_s12 + $0xc0] sm:$0xff]  ;;  %v19217_v2 = vld [vmem:[%s23873_s1 + $0x1350] sm:$0xff]  }
 0x280   : > { %v17352_v9 = vpop.f32.mrf.mxu1  ;;  %v17326_v25 = vpop.f32.mrf.mxu0  ;;  %v15280_v50 = vcombine.high %v22248_v24, %v7651_v44 }
 0x281   : > { %v17353_v61 = vadd.f32 %v17352_v9, %v17351_v52  ;;  %v15279_v9 = vcombine.low %v22248_v24, %v7651_v44 }
 0x282   : > { %v17354_v17 = vpop.f32.mrf.mxu1  ;;  %v17327_v27 = vpop.f32.mrf.mxu0  ;;  %17658 = vmatpush3.bf16.msra.mxu0 %v19187_v30  ;;  %17686 = vmatpush3.bf16.msra.mxu1 %v19188_v19  ;;  %v19218_v30 = vld [vmem:[%s23873_s1 + $0x13d0] sm:$0xff]  }
 0x283   : > { %v22169_v39 = vadd.f32 %v17353_v61, %v17325_v47  ;;  %v17328_v7 = vadd.f32 %v17327_v27, %v17326_v25  ;;  %17699 = vmatprep.subr.bf16.mxu0 %v19193_v55  ;;  %17727 = vmatprep.subr.bf16.mxu1 %v19194_v57  ;;  %v22254_v61 = vld [vmem:[%s19849_s12 + $0xc8] sm:$0xff]  ;;  %v7652_v25 = vld [vmem:[%s19849_s12 + $0xe0] sm:$0xff] }
 0x284   : > { %v17355_v14 = vpop.f32.mrf.mxu1  ;;  %v17329_v42 = vpop.f32.mrf.mxu0  ;;  %v15281_v58 = vcombine.low %v22254_v61, %v7652_v25  ;;  %v19224_v55 = vld [vmem:[%s23873_s1 + $0x1388] sm:$0xff]  }
 0x285   : > { %v17356_v32 = vadd.f32 %v17355_v14, %v17354_v17  ;;  %8136 = vmatmul.mubr.bf16.vlgmr.msra.gmra.mxu0 %v15273_v40  ;;  %8185 = vmatmul.mubr.bf16.vlgmr.msra.gmra.mxu1 %v15275_v38  ;;  %v15282_v17 = vcombine.high %v22254_v61, %v7652_v25  ;;  %v19220_v14 = vld [vmem:[%s23873_s1 + $0x1390] sm:$0xff]   ;;  %v19222_v40 = vld [vmem:[%s23873_s1 + $0x13c8] sm:$0xff]  }
 0x286   : > { %17700 = vmatpush3.bf16.msra.mxu0 %v19195_v21  ;;  %17728 = vmatpush3.bf16.msra.mxu1 %v19196_v36  ;;  %v17357_v15 = vpop.f32.mrf.mxu1  ;;  %v17330_v54 = vpop.f32.mrf.mxu0  ;;  %v19225_v36 = vld [vmem:[%s23873_s1 + $0x1340] sm:$0xff]  }
 0x287   : > { %v22186_v20 = vadd.f32 %v17356_v32, %v17328_v7  ;;  %17701 = vmatprep.subr.bf16.mxu0 %v19197_v37  ;;  %17729 = vmatprep.subr.bf16.mxu1 %v19198_v28  ;;  %v17331_v4 = vadd.f32 %v17330_v54, %v17329_v42  ;;  %v19219_v7 = vld [vmem:[%s23873_s1 + $0x1310] sm:$0xff]   ;;  %v19226_v28 = vld [vmem:[%s23873_s1 + $0x13c0] sm:$0xff]  }
 0x288   : > { %v17358_v12 = vpop.f32.mrf.mxu1  ;;  %v17332_v13 = vpop.f32.mrf.mxu0  ;;  %8143 = vmatprep.mubr.bf16.mxu0 %v15280_v50  ;;  %8192 = vmatprep.mubr.bf16.mxu1 %v15282_v17  ;;  %v19244_v50 = vld [vmem:[%s23873_s1 + $0x14e8] sm:$0xff]  }
 0x289   : > { %v17359_v43 = vadd.f32 %v17358_v12, %v17357_v15 }
 0x28a   : > { %17702 = vmatpush3.bf16.msra.mxu0 %v19199_v29  ;;  %17730 = vmatpush3.bf16.msra.mxu1 %v19200_v45  ;;  %v17360_v41 = vpop.f32.mrf.mxu1  ;;  %v17333_v59 = vpop.f32.mrf.mxu0  ;;  %v19227_v45 = vld [vmem:[%s23873_s1 + $0x1300] sm:$0xff]  }
 0x28b   : > { %17703 = vmatprep.subr.bf16.mxu0 %v19201_v33  ;;  %17731 = vmatprep.subr.bf16.mxu1 %v19202_v35  ;;  %v22239_v3 = vadd.f32 %v17359_v43, %v17331_v4  ;;  %v17334_v51 = vadd.f32 %v17333_v59, %v17332_v13  ;;  %v19234_v4 = vld [vmem:[%s23873_s1 + $0x14f8] sm:$0xff]   ;;  %v19239_v59 = vld [vmem:[%s23873_s1 + $0x1430] sm:$0xff]  }
 0x28c   : > { %v17361_v52 = vpop.f32.mrf.mxu1 }
 0x28d   : > { %v17362_v47 = vadd.f32 %v17361_v52, %v17360_v41  ;;  %8144 = vmatmul.mubr.bf16.gmra.mxu0 %v15279_v9  ;;  %8193 = vmatmul.mubr.bf16.gmra.mxu1 %v15281_v58  ;;  %v22344_v52 = vld [vmem:[%s19849_s12 + $0xd0] sm:$0xff]  ;;  %v19243_v9 = vld [vmem:[%s23873_s1 + $0x1468] sm:$0xff]  }
 0x28e   : > { %17704 = vmatpush3.bf16.msra.mxu0 %v19203_v1  ;;  %17732 = vmatpush3.bf16.msra.mxu1 %v19204_v22  ;;  %v7644_v1 = vld [vmem:[%s19849_s12 + $0xa0] sm:$0xff]  ;;  %v19245_v58 = vld [vmem:[%s23873_s1 + $0x1428] sm:$0xff]  }
 0x28f   : > { %17705 = vmatprep.subr.bf16.mxu0 %v19205_v16  ;;  %17733 = vmatprep.subr.bf16.mxu1 %v19206_v62  ;;  %v22262_v27 = vadd.f32 %v17362_v47, %v17334_v51  ;;  %v15277_v22 = vcombine.low %v7644_v1, %v21948_v5  ;;  %v15278_v42 = vcombine.high %v7644_v1, %v21948_v5  ;;  %v15333_v16 = vld [vmem:[%s19849_s12 + $0x1e0] sm:$0xff]  ;;  %v19261_v1 = vld [vmem:[%s23873_s1 + $0x1448] sm:$0xff]  }
 0x290   : > { %v15442_v54 = vcombine.high %v15333_v16, %v22000_v10 }
 0x291   : > { %8233 = vmatprep.mubr.bf16.mxu0 %v15278_v42  ;;  %v19262_v42 = vld [vmem:[%s23873_s1 + $0x14c8] sm:$0xff]  }
 0x292   : > { %17706 = vmatpush3.bf16.msra.mxu0 %v19207_v48  ;;  %17734 = vmatpush3.bf16.msra.mxu1 %v19208_v23  ;;  %v19233_v48 = vld [vmem:[%s23873_s1 + $0x1478] sm:$0xff]  }
 0x293   : > { %17707 = vmatprep.subr.bf16.mxu0 %v19209_v56  ;;  %17735 = vmatprep.subr.bf16.mxu1 %v19210_v8  ;;  %v19236_v23 = vld [vmem:[%s23873_s1 + $0x14b8] sm:$0xff]   ;;  %v19238_v56 = vld [vmem:[%s23873_s1 + $0x14f0] sm:$0xff]  }
 0x294   : > { %8751 = vmatprep.mubr.bf16.mxu1 %v15442_v54  ;;  %v19264_v54 = vld [vmem:[%s23873_s1 + $0x1488] sm:$0xff]  }
 0x296   : > { %17708 = vmatpush3.bf16.msra.mxu0 %v19211_v31  ;;  %17736 = vmatpush3.bf16.msra.mxu1 %v19212_v0  ;;  %v7653_v0 = vld [vmem:[%s19849_s12 + $0xe8] sm:$0xff] }
 0x297   : > { %17709 = vmatprep.subr.bf16.mxu0 %v19217_v2  ;;  %17737 = vmatprep.subr.bf16.mxu1 %v19218_v30  ;;  %v15283_v44 = vcombine.low %v22344_v52, %v7653_v0  ;;  %v15284_v47 = vcombine.high %v22344_v52, %v7653_v0  ;;  %v19246_v2 = vld [vmem:[%s23873_s1 + $0x14a8] sm:$0xff]  }
 0x29a   : > { %17710 = vmatpush3.bf16.msra.mxu0 %v19219_v7  ;;  %17738 = vmatpush3.bf16.msra.mxu1 %v19220_v14  ;;  %v19248_v7 = vld [vmem:[%s23873_s1 + $0x14e0] sm:$0xff]  }
 0x29b   : > { %17711 = vmatprep.subr.bf16.mxu0 %v19221_v6  ;;  %17739 = vmatprep.subr.bf16.mxu1 %v19222_v40  ;;  %v19252_v40 = vld [vmem:[%s23873_s1 + $0x14d8] sm:$0xff]  }
 0x29c   : > { %v17379_v19 = vpop.f32.mrf.mxu0 }
 0x29e   : > { %v17407_v32 = vpop.f32.mrf.mxu1  ;;  %v17380_v46 = vpop.f32.mrf.mxu0  ;;  %17712 = vmatpush3.bf16.msra.mxu0 %v19223_v34  ;;  %17740 = vmatpush3.bf16.msra.mxu1 %v19224_v55  ;;  %v19254_v34 = vld [vmem:[%s23873_s1 + $0x1498] sm:$0xff]   ;;  %v15342_v55 = vld [vmem:[%s19849_s12 + $0x228] sm:$0xff] }
 0x29f   : > { %v17381_v38 = vadd.f32 %v17380_v46, %v17379_v19  ;;  %17713 = vmatprep.subr.bf16.mxu0 %v19225_v36  ;;  %17741 = vmatprep.subr.bf16.mxu1 %v19226_v28  ;;  %v19250_v19 = vld [vmem:[%s23873_s1 + $0x14a0] sm:$0xff]   ;;  %v19253_v46 = vld [vmem:[%s23873_s1 + $0x1418] sm:$0xff]   ;;  %v19258_v28 = vld [vmem:[%s23873_s1 + $0x14d0] sm:$0xff]  }
 0x2a0   : > { %v17408_v53 = vpop.f32.mrf.mxu1  ;;  %v17382_v21 = vpop.f32.mrf.mxu0 }
 0x2a1   : > { %v22285_v57 = vadd.f32 %v17408_v53, %v17407_v32  ;;  %v5772_v37 = vadd.f32 %v17381_v38, %v22169_v39  ;;  %v19228_v39 = vld [vmem:[%s23873_s1 + $0x1380] sm:$0xff]   ;;  %v19251_v32 = vld [vmem:[%s23873_s1 + $0x1458] sm:$0xff]   ;;  %v22396_v53 = vld [vmem:[%s19849_s12 + $0x210] sm:$0xff] }
 0x2a2   : > { %v17383_v29 = vpop.f32.mrf.mxu0  ;;  %17714 = vmatpush3.bf16.msra.mxu0 %v19227_v45  ;;  %17742 = vmatpush3.bf16.msra.mxu1 %v19228_v39  ;;  %v22332_v8 = vpop.f32.mrf.mxu1  ;;  %v15448_v36 = vcombine.high %v22396_v53, %v15342_v55 }
 0x2a3   : > { %v22298_v33 = vadd.f32 %v5772_v37, %v22051_v26  ;;  %v17384_v35 = vadd.f32 %v17383_v29, %v17382_v21  ;;  %v15441_v26 = vcombine.low %v15333_v16, %v22000_v10  ;;  %17755 = vmatprep.subr.bf16.mxu0 %v19233_v48  ;;  %17783 = vmatprep.subr.bf16.mxu1 %v19234_v4  ;;  %v19257_v37 = vld [vmem:[%s23873_s1 + $0x1450] sm:$0xff]  }
 0x2a4   : > { %v17385_v62 = vpop.f32.mrf.mxu0  ;;  %v22356_v25 = vpop.f32.mrf.mxu1  ;;  %v15447_v21 = vcombine.low %v22396_v53, %v15342_v55  ;;  %v19259_v29 = vld [vmem:[%s23873_s1 + $0x1410] sm:$0xff]  }
 0x2a5   : > { %v5775_v15 = vadd.f32 %v17384_v35, %v22186_v20  ;;  %8234 = vmatmul.mubr.bf16.vlgmr.msra.gmra.mxu0 %v15277_v22  ;;  %v19235_v20 = vld [vmem:[%s23873_s1 + $0x1438] sm:$0xff]   ;;  %8752 = vmatmul.mubr.bf16.vlgmr.msra.gmra.mxu1 %v15441_v26  ;;  %v19260_v35 = vld [vmem:[%s23873_s1 + $0x1490] sm:$0xff]  }
 0x2a6   : > { %v17386_v12 = vpop.f32.mrf.mxu0  ;;  %17756 = vmatpush3.bf16.msra.mxu0 %v19235_v20  ;;  %17784 = vmatpush3.bf16.msra.mxu1 %v19236_v23  ;;  %v17413_v30 = vpop.f32.mrf.mxu1  ;;  %v19266_v23 = vld [vmem:[%s23873_s1 + $0x14c0] sm:$0xff]   ;;  %v19279_v55 = vld [vmem:[%s23873_s1 + $0x1530] sm:$0xff]  }
 0x2a7   : > { %v22317_v5 = vadd.f32 %v5775_v15, %v22068_v18  ;;  %v17387_v10 = vadd.f32 %v17386_v12, %v17385_v62  ;;  %v19237_v18 = vld [vmem:[%s23873_s1 + $0x1470] sm:$0xff]   ;;  %17785 = vmatprep.subr.bf16.mxu1 %v19238_v56  ;;  %8241 = vmatprep.mubr.bf16.mxu0 %v15284_v47  ;;  %v19263_v15 = vld [vmem:[%s23873_s1 + $0x1408] sm:$0xff]   ;;  %v19265_v12 = vld [vmem:[%s23873_s1 + $0x1440] sm:$0xff]  }
 0x2a8   : > { %v17388_v43 = vpop.f32.mrf.mxu0  ;;  %17757 = vmatprep.subr.bf16.mxu0 %v19237_v18  ;;  %v17414_v14 = vpop.f32.mrf.mxu1  ;;  %8759 = vmatprep.mubr.bf16.mxu1 %v15448_v36  ;;  %v17412_v18 = vadd.f32 %v22356_v25, %v22332_v8 }
 0x2a9   : > { %v5780_v13 = vadd.f32 %v17387_v10, %v22239_v3  ;;  %v19240_v3 = vld [vmem:[%s23873_s1 + $0x14b0] sm:$0xff]   ;;  %v22379_v6 = vadd.f32 %v17414_v14, %v17413_v30 }
 0x2aa   : > { %v17389_v41 = vpop.f32.mrf.mxu0  ;;  %17758 = vmatpush3.bf16.msra.mxu0 %v19239_v59  ;;  %17786 = vmatpush3.bf16.msra.mxu1 %v19240_v3  ;;  %v22393_v38 = vpop.f32.mrf.mxu1 }
 0x2ab   : > { %v22338_v31 = vadd.f32 %v5780_v13, %v22102_v63  ;;  %v17390_v51 = vadd.f32 %v17389_v41, %v17388_v43  ;;  %17759 = vmatprep.subr.bf16.mxu0 %v19243_v9  ;;  %17787 = vmatprep.subr.bf16.mxu1 %v19244_v50  ;;  %v19267_v13 = vld [vmem:[%s23873_s1 + $0x1400] sm:$0xff]  }
 0x2ac   : > { %v22410_v45 = vpop.f32.mrf.mxu1 }
 0x2ad   : > { %v5783_v63 = vadd.f32 %v17390_v51, %v22262_v27  ;;  %8242 = vmatmul.mubr.bf16.gmra.mxu0 %v15283_v44  ;;  %v19247_v27 = vld [vmem:[%s23873_s1 + $0x1460] sm:$0xff]   ;;  %8760 = vmatmul.mubr.bf16.gmra.mxu1 %v15447_v21  ;;  %v15334_v51 = vld [vmem:[%s19849_s12 + $0x1e8] sm:$0xff]  ;;  %v15335_v44 = vld [vmem:[%s19849_s12 + $0x1f0] sm:$0xff] }
 0x2ae   : > { %17760 = vmatpush3.bf16.msra.mxu0 %v19245_v58  ;;  %17788 = vmatpush3.bf16.msra.mxu1 %v19246_v2  ;;  %v15443_v0 = vcombine.low %v15334_v51, %v22086_v11  ;;  %v15444_v8 = vcombine.high %v15334_v51, %v22086_v11  ;;  %v15445_v50 = vcombine.low %v15335_v44, %v22098_v60  ;;  %v19273_v58 = vld [vmem:[%s23873_s1 + $0x1578] sm:$0xff]   ;;  %v19299_v51 = vld [vmem:[%s23873_s1 + $0x1510] sm:$0xff]  }
 0x2af   : > { %v22362_v17 = vadd.f32 %v5783_v63, %v22119_v49  ;;  %17761 = vmatprep.subr.bf16.mxu0 %v19247_v27  ;;  %v19249_v49 = vld [vmem:[%s23873_s1 + $0x1420] sm:$0xff]   ;;  %17789 = vmatprep.subr.bf16.mxu1 %v19248_v7  ;;  %v15446_v25 = vcombine.high %v15335_v44, %v22098_v60  ;;  %v19274_v11 = vld [vmem:[%s23873_s1 + $0x15f8] sm:$0xff]  }
 0x2b0   : > { %8800 = vmatprep.mubr.bf16.mxu0 %v15444_v8  ;;  %v19276_v60 = vld [vmem:[%s23873_s1 + $0x15b8] sm:$0xff]   ;;  %v19301_v8 = vld [vmem:[%s23873_s1 + $0x1548] sm:$0xff]  }
 0x2b1   : > { %8849 = vmatprep.mubr.bf16.mxu1 %v15446_v25 }
 0x2b2   : > { %17762 = vmatpush3.bf16.msra.mxu0 %v19249_v49  ;;  %17790 = vmatpush3.bf16.msra.mxu1 %v19250_v19  ;;  %v19277_v19 = vld [vmem:[%s23873_s1 + $0x1570] sm:$0xff]  }
 0x2b3   : > { %17763 = vmatprep.subr.bf16.mxu0 %v19251_v32  ;;  %17791 = vmatprep.subr.bf16.mxu1 %v19252_v40  ;;  %v19278_v40 = vld [vmem:[%s23873_s1 + $0x15f0] sm:$0xff]  }
 0x2b6   : > { %17764 = vmatpush3.bf16.msra.mxu0 %v19253_v46  ;;  %17792 = vmatpush3.bf16.msra.mxu1 %v19254_v34  ;;  %v17418_v34 = vadd.f32 %v22410_v45, %v22393_v38 }
 0x2b7   : > { %17765 = vmatprep.subr.bf16.mxu0 %v19257_v37  ;;  %17793 = vmatprep.subr.bf16.mxu1 %v19258_v28  ;;  %v22482_v37 = vld [vmem:[%s19849_s12 + $0x218] sm:$0xff]  ;;  %v15343_v28 = vld [vmem:[%s19849_s12 + $0x230] sm:$0xff] }
 0x2b8   : > { %v15449_v38 = vcombine.low %v22482_v37, %v15343_v28  ;;  %v15450_v45 = vcombine.high %v22482_v37, %v15343_v28 }
 0x2ba   : > { %17766 = vmatpush3.bf16.msra.mxu0 %v19259_v29  ;;  %17794 = vmatpush3.bf16.msra.mxu1 %v19260_v35  ;;  %v19283_v35 = vld [vmem:[%s23873_s1 + $0x1568] sm:$0xff]  }
 0x2bb   : > { %17767 = vmatprep.subr.bf16.mxu0 %v19261_v1  ;;  %17795 = vmatprep.subr.bf16.mxu1 %v19262_v42 }
 0x2bc   : > { %v17435_v39 = vpop.f32.mrf.mxu0 }
 0x2be   : > { %v17436_v16 = vpop.f32.mrf.mxu0  ;;  %17768 = vmatpush3.bf16.msra.mxu0 %v19263_v15  ;;  %17796 = vmatpush3.bf16.msra.mxu1 %v19264_v54  ;;  %v15344_v15 = vld [vmem:[%s19849_s12 + $0x238] sm:$0xff] }
 0x2bf   : > { %v17437_v62 = vadd.f32 %v17436_v16, %v17435_v39  ;;  %17769 = vmatprep.subr.bf16.mxu0 %v19265_v12  ;;  %17797 = vmatprep.subr.bf16.mxu1 %v19266_v23  ;;  %v22494_v16 = vld [vmem:[%s19849_s12 + $0x220] sm:$0xff]  ;;  %v19288_v12 = vld [vmem:[%s23873_s1 + $0x15a8] sm:$0xff]  }
 0x2c0   : > { %v17438_v4 = vpop.f32.mrf.mxu0  ;;  %v15451_v54 = vcombine.low %v22494_v16, %v15344_v15 }
 0x2c1   : > { %v6339_v20 = vadd.f32 %v17437_v62, %v22285_v57  ;;  %v19268_v57 = vld [vmem:[%s23873_s1 + $0x1480] sm:$0xff]  }
 0x2c2   : > { %v17439_v43 = vpop.f32.mrf.mxu0  ;;  %17770 = vmatpush3.bf16.msra.mxu0 %v19267_v13  ;;  %17798 = vmatpush3.bf16.msra.mxu1 %v19268_v57  ;;  %v19293_v13 = vld [vmem:[%s23873_s1 + $0x1558] sm:$0xff]   ;;  %v19298_v57 = vld [vmem:[%s23873_s1 + $0x15d0] sm:$0xff]  }
 0x2c3   : > { %v17463_v22 = vpop.f32.mrf.mxu1  ;;  %v17440_v41 = vadd.f32 %v17439_v43, %v17438_v4  ;;  %17811 = vmatprep.subr.bf16.mxu0 %v19273_v58  ;;  %17839 = vmatprep.subr.bf16.mxu1 %v19274_v11  ;;  %v19287_v4 = vld [vmem:[%s23873_s1 + $0x1528] sm:$0xff]   ;;  %v19291_v43 = vld [vmem:[%s23873_s1 + $0x1520] sm:$0xff]  }
 0x2c4   : > { %v17441_v63 = vpop.f32.mrf.mxu0  ;;  %v19304_v11 = vld [vmem:[%s23873_s1 + $0x1588] sm:$0xff]  }
 0x2c5   : > { %v17464_v26 = vpop.f32.mrf.mxu1  ;;  %v6342_v9 = vadd.f32 %v17440_v41, %v17412_v18  ;;  %8801 = vmatmul.mubr.bf16.vlgmr.msra.gmra.mxu0 %v15443_v0  ;;  %8850 = vmatmul.mubr.bf16.vlgmr.msra.gmra.mxu1 %v15445_v50  ;;  %v19292_v18 = vld [vmem:[%s23873_s1 + $0x15a0] sm:$0xff]   ;;  %v19296_v41 = vld [vmem:[%s23873_s1 + $0x1598] sm:$0xff]   ;;  %v19303_v50 = vld [vmem:[%s23873_s1 + $0x1508] sm:$0xff]  }
 0x2c6   : > { %v17465_v48 = vadd.f32 %v17464_v26, %v17463_v22  ;;  %v17442_v27 = vpop.f32.mrf.mxu0  ;;  %17840 = vmatpush3.bf16.msra.mxu1 %v19276_v60  ;;  %v19284_v22 = vld [vmem:[%s23873_s1 + $0x15e8] sm:$0xff]   ;;  %8808 = vmatprep.mubr.bf16.mxu0 %v15450_v45  ;;  %v19306_v60 = vld [vmem:[%s23873_s1 + $0x15c0] sm:$0xff]   ;;  %v19314_v45 = vld [vmem:[%s23873_s1 + $0x16f8] sm:$0xff]  }
 0x2c7   : > { %v17466_v10 = vpop.f32.mrf.mxu1  ;;  %v17443_v30 = vadd.f32 %v17442_v27, %v17441_v63  ;;  %17841 = vmatprep.subr.bf16.mxu1 %v19278_v40 }
 0x2c8   : > { %v6388_v56 = vadd.f32 %v17465_v48, %v6339_v20  ;;  %v17444_v14 = vpop.f32.mrf.mxu0  ;;  %v15452_v48 = vcombine.high %v22494_v16, %v15344_v15  ;;  %v19322_v15 = vld [vmem:[%s23873_s1 + $0x16e8] sm:$0xff]  }
 0x2c9   : > { %v17467_v59 = vpop.f32.mrf.mxu1  ;;  %v6347_v32 = vadd.f32 %v17443_v30, %v22379_v6  ;;  %v19280_v6 = vld [vmem:[%s23873_s1 + $0x15b0] sm:$0xff]  }
 0x2ca   : > { %v17468_v3 = vadd.f32 %v17467_v59, %v17466_v10  ;;  %v22447_v47 = vadd.f32 %v6388_v56, %v22298_v33  ;;  %v19275_v33 = vld [vmem:[%s23873_s1 + $0x1538] sm:$0xff]   ;;  %17842 = vmatpush3.bf16.msra.mxu1 %v19280_v6  ;;  %8857 = vmatprep.mubr.bf16.mxu1 %v15452_v48  ;;  %v19290_v10 = vld [vmem:[%s23873_s1 + $0x15e0] sm:$0xff]   ;;  %v19297_v59 = vld [vmem:[%s23873_s1 + $0x1550] sm:$0xff]  }
 0x2cb   : > { %v17469_v49 = vpop.f32.mrf.mxu1  ;;  %17812 = vmatpush3.bf16.msra.mxu0 %v19275_v33  ;;  %17843 = vmatprep.subr.bf16.mxu1 %v19284_v22  ;;  %v19295_v56 = vld [vmem:[%s23873_s1 + $0x1518] sm:$0xff]   ;;  %v19305_v33 = vld [vmem:[%s23873_s1 + $0x1540] sm:$0xff]   ;;  %v19320_v22 = vld [vmem:[%s23873_s1 + $0x16b0] sm:$0xff]  }
 0x2cc   : > { %v6391_v2 = vadd.f32 %v17468_v3, %v6342_v9  ;;  %17813 = vmatprep.subr.bf16.mxu0 %v19277_v19  ;;  %v19300_v3 = vld [vmem:[%s23873_s1 + $0x1590] sm:$0xff]   ;;  %v19302_v9 = vld [vmem:[%s23873_s1 + $0x15c8] sm:$0xff]   ;;  %v19307_v19 = vld [vmem:[%s23873_s1 + $0x1500] sm:$0xff]  }
 0x2cd   : > { %v17470_v46 = vpop.f32.mrf.mxu1  ;;  %8809 = vmatmul.mubr.bf16.gmra.mxu0 %v15449_v38  ;;  %8858 = vmatmul.mubr.bf16.gmra.mxu1 %v15451_v54  ;;  %v19324_v54 = vld [vmem:[%s23873_s1 + $0x16a8] sm:$0xff]  }
 0x2ce   : > { %v22464_v7 = vadd.f32 %v6391_v2, %v22317_v5  ;;  %v17445_v5 = vpop.f32.mrf.mxu0  ;;  %v17471_v21 = vadd.f32 %v17470_v46, %v17469_v49  ;;  %17844 = vmatpush3.bf16.msra.mxu1 %v19288_v12  ;;  %v19308_v46 = vld [vmem:[%s23873_s1 + $0x1580] sm:$0xff]  }
 0x2cf   : > { %v17446_v36 = vadd.f32 %v17445_v5, %v17444_v14  ;;  %v17472_v29 = vpop.f32.mrf.mxu1  ;;  %17814 = vmatpush3.bf16.msra.mxu0 %v19279_v55  ;;  %17845 = vmatprep.subr.bf16.mxu1 %v19290_v10  ;;  %v8874_v5 = vld [vmem:[%s19849_s12 + $0xa8] sm:$0xff]  ;;  %v19327_v10 = vld [vmem:[%s23873_s1 + $0x1620] sm:$0xff]  }
 0x2d0   : > { %v6396_v39 = vadd.f32 %v17471_v21, %v6347_v32  ;;  %17815 = vmatprep.subr.bf16.mxu0 %v19283_v35  ;;  %v15597_v55 = vcombine.low %v8874_v5, %v22248_v24  ;;  %v15598_v21 = vcombine.high %v8874_v5, %v22248_v24  ;;  %v19315_v24 = vld [vmem:[%s23873_s1 + $0x1638] sm:$0xff]   ;;  %v19317_v35 = vld [vmem:[%s23873_s1 + $0x1670] sm:$0xff]   ;;  %v19341_v5 = vld [vmem:[%s23873_s1 + $0x1648] sm:$0xff]  }
 0x2d1   : > { %v6350_v1 = vadd.f32 %v17446_v36, %v17418_v34  ;;  %v17473_v42 = vpop.f32.mrf.mxu1  ;;  %v8875_v36 = vld [vmem:[%s19849_s12 + $0xb0] sm:$0xff] }
 0x2d2   : > { %v22498_v62 = vadd.f32 %v6396_v39, %v22338_v31  ;;  %v17474_v26 = vadd.f32 %v17473_v42, %v17472_v29  ;;  %v19289_v31 = vld [vmem:[%s23873_s1 + $0x1560] sm:$0xff]   ;;  %17846 = vmatpush3.bf16.msra.mxu1 %v19292_v18  ;;  %v15599_v6 = vcombine.low %v8875_v36, %v22254_v61  ;;  %v15600_v28 = vcombine.high %v8875_v36, %v22254_v61  ;;  %v19313_v29 = vld [vmem:[%s23873_s1 + $0x1678] sm:$0xff]   ;;  %v19318_v39 = vld [vmem:[%s23873_s1 + $0x16f0] sm:$0xff]  }
 0x2d3   : > { %17816 = vmatpush3.bf16.msra.mxu0 %v19287_v4  ;;  %9367 = vmatprep.mubr.bf16.mxu0 %v15598_v21  ;;  %v19316_v61 = vld [vmem:[%s23873_s1 + $0x16b8] sm:$0xff]   ;;  %v19321_v42 = vld [vmem:[%s23873_s1 + $0x1668] sm:$0xff]   ;;  %v19325_v4 = vld [vmem:[%s23873_s1 + $0x1660] sm:$0xff]  }
 0x2d4   : > { %v6399_v20 = vadd.f32 %v17474_v26, %v6350_v1  ;;  %17817 = vmatprep.subr.bf16.mxu0 %v19289_v31  ;;  %9416 = vmatprep.mubr.bf16.mxu1 %v15600_v28  ;;  %v19319_v1 = vld [vmem:[%s23873_s1 + $0x1630] sm:$0xff]   ;;  %v19323_v26 = vld [vmem:[%s23873_s1 + $0x1628] sm:$0xff]  }
 0x2d5   : > { %v19343_v36 = vld [vmem:[%s23873_s1 + $0x1608] sm:$0xff]  }
 0x2d6   : > { %v22515_v23 = vadd.f32 %v6399_v20, %v22362_v17  ;;  %v19294_v17 = vld [vmem:[%s23873_s1 + $0x15d8] sm:$0xff]   ;;  %v19326_v20 = vld [vmem:[%s23873_s1 + $0x16e0] sm:$0xff]  }
 0x2d7   : > { %17818 = vmatpush3.bf16.msra.mxu0 %v19291_v43  ;;  %17847 = vmatprep.subr.bf16.mxu1 %v19294_v17 }
 0x2d8   : > { %17819 = vmatprep.subr.bf16.mxu0 %v19293_v13  ;;  %17848 = vmatpush3.bf16.msra.mxu1 %v19296_v41  ;;  %v19328_v13 = vld [vmem:[%s23873_s1 + $0x16a0] sm:$0xff]   ;;  %v19329_v41 = vld [vmem:[%s23873_s1 + $0x1658] sm:$0xff]  }
 0x2d9   : > { %17849 = vmatprep.subr.bf16.mxu1 %v19298_v57  ;;  %v19330_v57 = vld [vmem:[%s23873_s1 + $0x16d8] sm:$0xff]  }
 0x2db   : > { %17820 = vmatpush3.bf16.msra.mxu0 %v19295_v56 }
 0x2dc   : > { %17821 = vmatprep.subr.bf16.mxu0 %v19297_v59  ;;  %17850 = vmatpush3.bf16.msra.mxu1 %v19300_v3 }
 0x2dd   : > { %17851 = vmatprep.subr.bf16.mxu1 %v19302_v9  ;;  %v19332_v9 = vld [vmem:[%s23873_s1 + $0x1698] sm:$0xff]  }
 0x2df   : > { %17822 = vmatpush3.bf16.msra.mxu0 %v19299_v51 }
 0x2e0   : > { %17823 = vmatprep.subr.bf16.mxu0 %v19301_v8  ;;  %17852 = vmatpush3.bf16.msra.mxu1 %v19304_v11 }
 0x2e1   : > { %v17491_v0 = vpop.f32.mrf.mxu0  ;;  %17853 = vmatprep.subr.bf16.mxu1 %v19306_v60  ;;  %v19337_v60 = vld [vmem:[%s23873_s1 + $0x1650] sm:$0xff]  }
 0x2e3   : > { %v17519_v44 = vpop.f32.mrf.mxu1  ;;  %v17492_v63 = vpop.f32.mrf.mxu0  ;;  %17824 = vmatpush3.bf16.msra.mxu0 %v19303_v50  ;;  %v8883_v50 = vld [vmem:[%s19849_s12 + $0xf0] sm:$0xff] }
 0x2e4   : > { %v17493_v25 = vadd.f32 %v17492_v63, %v17491_v0  ;;  %17825 = vmatprep.subr.bf16.mxu0 %v19305_v33  ;;  %17854 = vmatpush3.bf16.msra.mxu1 %v19308_v46  ;;  %v19331_v0 = vld [vmem:[%s23873_s1 + $0x1618] sm:$0xff]  }
 0x2e5   : > { %v17520_v58 = vpop.f32.mrf.mxu1  ;;  %v17494_v27 = vpop.f32.mrf.mxu0  ;;  %17895 = vmatprep.subr.bf16.mxu1 %v19314_v45  ;;  %v22644_v63 = vld [vmem:[%s19849_s12 + $0xd8] sm:$0xff] }
 0x2e6   : > { %v17521_v2 = vadd.f32 %v17520_v58, %v17519_v44  ;;  %v15603_v58 = vcombine.low %v22644_v63, %v8883_v50  ;;  %v15604_v11 = vcombine.high %v22644_v63, %v8883_v50 }
 0x2e7   : > { %v17522_v30 = vpop.f32.mrf.mxu1  ;;  %v17495_v14 = vpop.f32.mrf.mxu0  ;;  %17826 = vmatpush3.bf16.msra.mxu0 %v19307_v19  ;;  %9417 = vmatmul.mubr.bf16.vlgmr.msra.gmra.mxu1 %v15599_v6  ;;  %v19338_v19 = vld [vmem:[%s23873_s1 + $0x16d0] sm:$0xff]  }
 0x2e8   : > { %v22565_v49 = vadd.f32 %v17521_v2, %v17493_v25  ;;  %v17496_v32 = vadd.f32 %v17495_v14, %v17494_v27  ;;  %17867 = vmatprep.subr.bf16.mxu0 %v19313_v29  ;;  %17896 = vmatpush3.bf16.msra.mxu1 %v19316_v61  ;;  %v22650_v2 = vld [vmem:[%s19849_s12 + $0xe0] sm:$0xff]  ;;  %v8884_v27 = vld [vmem:[%s19849_s12 + $0xf8] sm:$0xff]  ;;  %v19344_v29 = vld [vmem:[%s23873_s1 + $0x1688] sm:$0xff]  }
 0x2e9   : > { %v17523_v40 = vpop.f32.mrf.mxu1  ;;  %17897 = vmatprep.subr.bf16.mxu1 %v19318_v39  ;;  %v17497_v48 = vpop.f32.mrf.mxu0  ;;  %v15605_v33 = vcombine.low %v22650_v2, %v8884_v27  ;;  %v19345_v61 = vld [vmem:[%s23873_s1 + $0x1640] sm:$0xff]  }
 0x2ea   : > { %v17524_v34 = vadd.f32 %v17523_v40, %v17522_v30  ;;  %9368 = vmatmul.mubr.bf16.vlgmr.msra.gmra.mxu0 %v15597_v55  ;;  %v15606_v30 = vcombine.high %v22650_v2, %v8884_v27  ;;  %v19340_v40 = vld [vmem:[%s23873_s1 + $0x1690] sm:$0xff]   ;;  %v19342_v55 = vld [vmem:[%s23873_s1 + $0x16c8] sm:$0xff]   ;;  %v19346_v39 = vld [vmem:[%s23873_s1 + $0x16c0] sm:$0xff]  }
 0x2eb   : > { %17868 = vmatpush3.bf16.msra.mxu0 %v19315_v24  ;;  %v17525_v12 = vpop.f32.mrf.mxu1  ;;  %v17498_v31 = vpop.f32.mrf.mxu0  ;;  %9375 = vmatprep.mubr.bf16.mxu0 %v15604_v11  ;;  %v19364_v11 = vld [vmem:[%s23873_s1 + $0x17e8] sm:$0xff]  }
 0x2ec   : > { %v22582_v38 = vadd.f32 %v17524_v34, %v17496_v32  ;;  %17869 = vmatprep.subr.bf16.mxu0 %v19317_v35  ;;  %17898 = vmatpush3.bf16.msra.mxu1 %v19320_v22  ;;  %v17499_v43 = vadd.f32 %v17498_v31, %v17497_v48  ;;  %v19339_v32 = vld [vmem:[%s23873_s1 + $0x1610] sm:$0xff]   ;;  %v19347_v22 = vld [vmem:[%s23873_s1 + $0x1600] sm:$0xff]  }
 0x2ed   : > { %17899 = vmatprep.subr.bf16.mxu1 %v19322_v15  ;;  %v17526_v18 = vpop.f32.mrf.mxu1  ;;  %v17500_v56 = vpop.f32.mrf.mxu0  ;;  %9424 = vmatprep.mubr.bf16.mxu1 %v15606_v30 }
 0x2ee   : > { %v17527_v17 = vadd.f32 %v17526_v18, %v17525_v12 }
 0x2ef   : > { %17870 = vmatpush3.bf16.msra.mxu0 %v19319_v1  ;;  %v17528_v59 = vpop.f32.mrf.mxu1  ;;  %v17501_v3 = vpop.f32.mrf.mxu0  ;;  %9425 = vmatmul.mubr.bf16.gmra.mxu1 %v15605_v33  ;;  %v19365_v33 = vld [vmem:[%s23873_s1 + $0x1728] sm:$0xff]  }
 0x2f0   : > { %17871 = vmatprep.subr.bf16.mxu0 %v19321_v42  ;;  %17900 = vmatpush3.bf16.msra.mxu1 %v19324_v54  ;;  %v22635_v51 = vadd.f32 %v17527_v17, %v17499_v43  ;;  %v17502_v8 = vadd.f32 %v17501_v3, %v17500_v56  ;;  %v19354_v43 = vld [vmem:[%s23873_s1 + $0x17f8] sm:$0xff]   ;;  %v19359_v3 = vld [vmem:[%s23873_s1 + $0x1730] sm:$0xff]  }
 0x2f1   : > { %17901 = vmatprep.subr.bf16.mxu1 %v19326_v20  ;;  %v17529_v44 = vpop.f32.mrf.mxu1 }
 0x2f2   : > { %v17530_v25 = vadd.f32 %v17529_v44, %v17528_v59  ;;  %9376 = vmatmul.mubr.bf16.gmra.mxu0 %v15603_v58  ;;  %v22740_v44 = vld [vmem:[%s19849_s12 + $0xe8] sm:$0xff] }
 0x2f3   : > { %17872 = vmatpush3.bf16.msra.mxu0 %v19323_v26  ;;  %v8876_v26 = vld [vmem:[%s19849_s12 + $0xb8] sm:$0xff]  ;;  %v19363_v58 = vld [vmem:[%s23873_s1 + $0x1768] sm:$0xff]  }
 0x2f4   : > { %17873 = vmatprep.subr.bf16.mxu0 %v19325_v4  ;;  %17902 = vmatpush3.bf16.msra.mxu1 %v19328_v13  ;;  %v22658_v14 = vadd.f32 %v17530_v25, %v17502_v8  ;;  %v15601_v54 = vcombine.low %v8876_v26, %v22344_v52  ;;  %v15602_v48 = vcombine.high %v8876_v26, %v22344_v52  ;;  %v15657_v4 = vld [vmem:[%s19849_s12 + $0x1f8] sm:$0xff]  ;;  %v19381_v26 = vld [vmem:[%s23873_s1 + $0x1748] sm:$0xff]  }
 0x2f5   : > { %17903 = vmatprep.subr.bf16.mxu1 %v19330_v57  ;;  %v15766_v31 = vcombine.high %v15657_v4, %v22396_v53  ;;  %v19356_v13 = vld [vmem:[%s23873_s1 + $0x17b8] sm:$0xff]  }
 0x2f6   : > { %9465 = vmatprep.mubr.bf16.mxu0 %v15602_v48  ;;  %v19382_v48 = vld [vmem:[%s23873_s1 + $0x17c8] sm:$0xff]  }
 0x2f7   : > { %17874 = vmatpush3.bf16.msra.mxu0 %v19327_v10  ;;  %v19353_v10 = vld [vmem:[%s23873_s1 + $0x1778] sm:$0xff]   ;;  %9983 = vmatprep.mubr.bf16.mxu1 %v15766_v31  ;;  %v19384_v31 = vld [vmem:[%s23873_s1 + $0x1788] sm:$0xff]  }
 0x2f8   : > { %17875 = vmatprep.subr.bf16.mxu0 %v19329_v41  ;;  %17904 = vmatpush3.bf16.msra.mxu1 %v19332_v9  ;;  %v19358_v41 = vld [vmem:[%s23873_s1 + $0x17f0] sm:$0xff]   ;;  %v8885_v9 = vld [vmem:[%s19849_s12 + $0x100] sm:$0xff] }
 0x2f9   : > { %17905 = vmatprep.subr.bf16.mxu1 %v19338_v19  ;;  %v15607_v50 = vcombine.low %v22740_v44, %v8885_v9  ;;  %v15608_v25 = vcombine.high %v22740_v44, %v8885_v9 }
 0x2fb   : > { %17876 = vmatpush3.bf16.msra.mxu0 %v19331_v0 }
 0x2fc   : > { %17877 = vmatprep.subr.bf16.mxu0 %v19337_v60  ;;  %17906 = vmatpush3.bf16.msra.mxu1 %v19340_v40  ;;  %v19366_v60 = vld [vmem:[%s23873_s1 + $0x17a8] sm:$0xff]  }
 0x2fd   : > { %17907 = vmatprep.subr.bf16.mxu1 %v19342_v55  ;;  %v19372_v55 = vld [vmem:[%s23873_s1 + $0x17d8] sm:$0xff]  }
 0x2ff   : > { %17878 = vmatpush3.bf16.msra.mxu0 %v19339_v32  ;;  %v19368_v32 = vld [vmem:[%s23873_s1 + $0x17e0] sm:$0xff]  }
 0x300   : > { %17879 = vmatprep.subr.bf16.mxu0 %v19341_v5  ;;  %17908 = vmatpush3.bf16.msra.mxu1 %v19344_v29  ;;  %v15666_v29 = vld [vmem:[%s19849_s12 + $0x240] sm:$0xff] }
 0x301   : > { %17909 = vmatprep.subr.bf16.mxu1 %v19346_v39  ;;  %v19378_v39 = vld [vmem:[%s23873_s1 + $0x17d0] sm:$0xff]  }
 0x303   : > { %v17547_v46 = vpop.f32.mrf.mxu0  ;;  %17880 = vmatpush3.bf16.msra.mxu0 %v19343_v36  ;;  %v19374_v36 = vld [vmem:[%s23873_s1 + $0x1798] sm:$0xff]  }
 0x304   : > { %v17575_v34 = vpop.f32.mrf.mxu1  ;;  %17881 = vmatprep.subr.bf16.mxu0 %v19345_v61 }
 0x305   : > { %v17548_v21 = vpop.f32.mrf.mxu0 }
 0x306   : > { %v17549_v6 = vadd.f32 %v17548_v21, %v17547_v46  ;;  %v17576_v28 = vpop.f32.mrf.mxu1  ;;  %v19370_v46 = vld [vmem:[%s23873_s1 + $0x17a0] sm:$0xff]   ;;  %v19373_v21 = vld [vmem:[%s23873_s1 + $0x1718] sm:$0xff]  }
 0x307   : > { %v22681_v45 = vadd.f32 %v17576_v28, %v17575_v34  ;;  %v17550_v24 = vpop.f32.mrf.mxu0  ;;  %17882 = vmatpush3.bf16.msra.mxu0 %v19347_v22  ;;  %v19371_v34 = vld [vmem:[%s23873_s1 + $0x1758] sm:$0xff]   ;;  %v22792_v28 = vld [vmem:[%s19849_s12 + $0x228] sm:$0xff] }
 0x308   : > { %v7004_v35 = vadd.f32 %v17549_v6, %v22565_v49  ;;  %v19348_v49 = vld [vmem:[%s23873_s1 + $0x1680] sm:$0xff]   ;;  %17923 = vmatprep.subr.bf16.mxu0 %v19353_v10  ;;  %v22728_v57 = vpop.f32.mrf.mxu1  ;;  %v15772_v61 = vcombine.high %v22792_v28, %v15666_v29 }
 0x309   : > { %v17551_v1 = vpop.f32.mrf.mxu0  ;;  %17910 = vmatpush3.bf16.msra.mxu1 %v19348_v49 }
 0x30a   : > { %v22694_v42 = vadd.f32 %v7004_v35, %v22447_v47  ;;  %v17552_v15 = vadd.f32 %v17551_v1, %v17550_v24  ;;  %v15765_v47 = vcombine.low %v15657_v4, %v22396_v53  ;;  %9466 = vmatmul.mubr.bf16.vlgmr.msra.gmra.mxu0 %v15601_v54  ;;  %17951 = vmatprep.subr.bf16.mxu1 %v19354_v43  ;;  %v22752_v27 = vpop.f32.mrf.mxu1  ;;  %v19377_v35 = vld [vmem:[%s23873_s1 + $0x1750] sm:$0xff]  }
 0x30b   : > { %v17553_v20 = vpop.f32.mrf.mxu0  ;;  %9473 = vmatprep.mubr.bf16.mxu0 %v15608_v25  ;;  %v15771_v24 = vcombine.low %v22792_v28, %v15666_v29  ;;  %v19379_v1 = vld [vmem:[%s23873_s1 + $0x1710] sm:$0xff]  }
 0x30c   : > { %v7007_v12 = vadd.f32 %v17552_v15, %v22582_v38  ;;  %v19355_v38 = vld [vmem:[%s23873_s1 + $0x1738] sm:$0xff]   ;;  %9984 = vmatmul.mubr.bf16.vlgmr.msra.gmra.mxu1 %v15765_v47  ;;  %v17581_v19 = vpop.f32.mrf.mxu1  ;;  %v19380_v15 = vld [vmem:[%s23873_s1 + $0x1790] sm:$0xff]  }
 0x30d   : > { %v17554_v18 = vpop.f32.mrf.mxu0  ;;  %17924 = vmatpush3.bf16.msra.mxu0 %v19355_v38  ;;  %17952 = vmatpush3.bf16.msra.mxu1 %v19356_v13  ;;  %v19386_v13 = vld [vmem:[%s23873_s1 + $0x17c0] sm:$0xff]   ;;  %v19399_v29 = vld [vmem:[%s23873_s1 + $0x1830] sm:$0xff]  }
 0x30e   : > { %v22713_v52 = vadd.f32 %v7007_v12, %v22464_v7  ;;  %v17555_v53 = vadd.f32 %v17554_v18, %v17553_v20  ;;  %v19357_v7 = vld [vmem:[%s23873_s1 + $0x1770] sm:$0xff]   ;;  %17953 = vmatprep.subr.bf16.mxu1 %v19358_v41  ;;  %v17582_v40 = vpop.f32.mrf.mxu1  ;;  %9991 = vmatprep.mubr.bf16.mxu1 %v15772_v61  ;;  %v19383_v12 = vld [vmem:[%s23873_s1 + $0x1708] sm:$0xff]   ;;  %v19385_v18 = vld [vmem:[%s23873_s1 + $0x1740] sm:$0xff]  }
 0x30f   : > { %v17556_v17 = vpop.f32.mrf.mxu0  ;;  %17925 = vmatprep.subr.bf16.mxu0 %v19357_v7  ;;  %v22775_v5 = vadd.f32 %v17582_v40, %v17581_v19  ;;  %v17580_v7 = vadd.f32 %v22752_v27, %v22728_v57 }
 0x310   : > { %v7012_v56 = vadd.f32 %v17555_v53, %v22635_v51  ;;  %v19360_v51 = vld [vmem:[%s23873_s1 + $0x17b0] sm:$0xff]   ;;  %v22789_v6 = vpop.f32.mrf.mxu1 }
 0x311   : > { %v17557_v59 = vpop.f32.mrf.mxu0  ;;  %17926 = vmatpush3.bf16.msra.mxu0 %v19359_v3  ;;  %17954 = vmatpush3.bf16.msra.mxu1 %v19360_v51 }
 0x312   : > { %v22734_v0 = vadd.f32 %v7012_v56, %v22498_v62  ;;  %v17558_v8 = vadd.f32 %v17557_v59, %v17556_v17  ;;  %17927 = vmatprep.subr.bf16.mxu0 %v19363_v58  ;;  %9474 = vmatmul.mubr.bf16.gmra.mxu0 %v15607_v50  ;;  %v22806_v22 = vpop.f32.mrf.mxu1  ;;  %v19387_v56 = vld [vmem:[%s23873_s1 + $0x1700] sm:$0xff]   ;;  %v15659_v50 = vld [vmem:[%s19849_s12 + $0x208] sm:$0xff] }
 0x313   : > { %17955 = vmatprep.subr.bf16.mxu1 %v19364_v11  ;;  %v15769_v11 = vcombine.low %v15659_v50, %v22494_v16  ;;  %v15770_v27 = vcombine.high %v15659_v50, %v22494_v16  ;;  %v19396_v16 = vld [vmem:[%s23873_s1 + $0x18b8] sm:$0xff]  }
 0x314   : > { %v7015_v62 = vadd.f32 %v17558_v8, %v22658_v14  ;;  %v19367_v14 = vld [vmem:[%s23873_s1 + $0x1760] sm:$0xff]   ;;  %9992 = vmatmul.mubr.bf16.gmra.mxu1 %v15771_v24 }
 0x315   : > { %17928 = vmatpush3.bf16.msra.mxu0 %v19365_v33  ;;  %17956 = vmatpush3.bf16.msra.mxu1 %v19366_v60  ;;  %v15658_v8 = vld [vmem:[%s19849_s12 + $0x200] sm:$0xff]  ;;  %v19393_v33 = vld [vmem:[%s23873_s1 + $0x1878] sm:$0xff]  }
 0x316   : > { %v22758_v30 = vadd.f32 %v7015_v62, %v22515_v23  ;;  %17929 = vmatprep.subr.bf16.mxu0 %v19367_v14  ;;  %v19369_v23 = vld [vmem:[%s23873_s1 + $0x1720] sm:$0xff]   ;;  %17957 = vmatprep.subr.bf16.mxu1 %v19368_v32  ;;  %v15767_v9 = vcombine.low %v15658_v8, %v22482_v37  ;;  %v15768_v57 = vcombine.high %v15658_v8, %v22482_v37  ;;  %v19394_v37 = vld [vmem:[%s23873_s1 + $0x18f8] sm:$0xff]   ;;  %v19419_v8 = vld [vmem:[%s23873_s1 + $0x1810] sm:$0xff]  }
 0x317   : > { %10081 = vmatprep.mubr.bf16.mxu1 %v15770_v27 }
 0x318   : > { %10032 = vmatprep.mubr.bf16.mxu0 %v15768_v57  ;;  %v19421_v57 = vld [vmem:[%s23873_s1 + $0x1848] sm:$0xff]  }
 0x319   : > { %17930 = vmatpush3.bf16.msra.mxu0 %v19369_v23  ;;  %17958 = vmatpush3.bf16.msra.mxu1 %v19370_v46  ;;  %v19397_v46 = vld [vmem:[%s23873_s1 + $0x1870] sm:$0xff]  }
 0x31a   : > { %17931 = vmatprep.subr.bf16.mxu0 %v19371_v34  ;;  %17959 = vmatprep.subr.bf16.mxu1 %v19372_v55  ;;  %v19398_v55 = vld [vmem:[%s23873_s1 + $0x18f0] sm:$0xff]  }
 0x31d   : > { %17932 = vmatpush3.bf16.msra.mxu0 %v19373_v21  ;;  %17960 = vmatpush3.bf16.msra.mxu1 %v19374_v36  ;;  %v17586_v36 = vadd.f32 %v22806_v22, %v22789_v6 }
 0x31e   : > { %17933 = vmatprep.subr.bf16.mxu0 %v19377_v35  ;;  %17961 = vmatprep.subr.bf16.mxu1 %v19378_v39  ;;  %v22878_v35 = vld [vmem:[%s19849_s12 + $0x230] sm:$0xff]  ;;  %v15667_v39 = vld [vmem:[%s19849_s12 + $0x248] sm:$0xff] }
 0x31f   : > { %v15773_v6 = vcombine.low %v22878_v35, %v15667_v39  ;;  %v15774_v22 = vcombine.high %v22878_v35, %v15667_v39 }
 0x321   : > { %17934 = vmatpush3.bf16.msra.mxu0 %v19379_v1  ;;  %17962 = vmatpush3.bf16.msra.mxu1 %v19380_v15  ;;  %v19403_v15 = vld [vmem:[%s23873_s1 + $0x1868] sm:$0xff]  }
 0x322   : > { %17935 = vmatprep.subr.bf16.mxu0 %v19381_v26  ;;  %17963 = vmatprep.subr.bf16.mxu1 %v19382_v48 }
 0x323   : > { %v17603_v49 = vpop.f32.mrf.mxu0 }
 0x325   : > { %v17631_v54 = vpop.f32.mrf.mxu1  ;;  %v17604_v4 = vpop.f32.mrf.mxu0  ;;  %17936 = vmatpush3.bf16.msra.mxu0 %v19383_v12  ;;  %17964 = vmatpush3.bf16.msra.mxu1 %v19384_v31  ;;  %v15668_v12 = vld [vmem:[%s19849_s12 + $0x250] sm:$0xff] }
 0x326   : > { %v17605_v20 = vadd.f32 %v17604_v4, %v17603_v49  ;;  %17937 = vmatprep.subr.bf16.mxu0 %v19385_v18  ;;  %17965 = vmatprep.subr.bf16.mxu1 %v19386_v13  ;;  %v22890_v4 = vld [vmem:[%s19849_s12 + $0x238] sm:$0xff]  ;;  %v19408_v18 = vld [vmem:[%s23873_s1 + $0x18a8] sm:$0xff]  }
 0x327   : > { %v17632_v47 = vpop.f32.mrf.mxu1  ;;  %v17606_v43 = vpop.f32.mrf.mxu0  ;;  %v15775_v31 = vcombine.low %v22890_v4, %v15668_v12 }
 0x328   : > { %v17633_v10 = vadd.f32 %v17632_v47, %v17631_v54  ;;  %v7571_v38 = vadd.f32 %v17605_v20, %v22681_v45  ;;  %v19388_v45 = vld [vmem:[%s23873_s1 + $0x1780] sm:$0xff]   ;;  %v19404_v54 = vld [vmem:[%s23873_s1 + $0x18e8] sm:$0xff]  }
 0x329   : > { %v17634_v53 = vpop.f32.mrf.mxu1  ;;  %v17607_v17 = vpop.f32.mrf.mxu0  ;;  %17938 = vmatpush3.bf16.msra.mxu0 %v19387_v56  ;;  %17966 = vmatpush3.bf16.msra.mxu1 %v19388_v45  ;;  %v19413_v56 = vld [vmem:[%s23873_s1 + $0x1858] sm:$0xff]   ;;  %v19418_v45 = vld [vmem:[%s23873_s1 + $0x18d0] sm:$0xff]  }
 0x32a   : > { %v7620_v41 = vadd.f32 %v17633_v10, %v7571_v38  ;;  %v17608_v59 = vadd.f32 %v17607_v17, %v17606_v43  ;;  %17979 = vmatprep.subr.bf16.mxu0 %v19393_v33  ;;  %18007 = vmatprep.subr.bf16.mxu1 %v19394_v37  ;;  %v15776_v10 = vcombine.high %v22890_v4, %v15668_v12  ;;  %v19407_v43 = vld [vmem:[%s23873_s1 + $0x1828] sm:$0xff]   ;;  %v19411_v17 = vld [vmem:[%s23873_s1 + $0x1820] sm:$0xff]  }
 0x32b   : > { %v17635_v3 = vpop.f32.mrf.mxu1  ;;  %v17609_v62 = vpop.f32.mrf.mxu0  ;;  %v19424_v37 = vld [vmem:[%s23873_s1 + $0x1888] sm:$0xff]  }
 0x32c   : > { %v17636_v51 = vadd.f32 %v17635_v3, %v17634_v53  ;;  %v22843_v25 = vadd.f32 %v7620_v41, %v22694_v42  ;;  %v7574_v58 = vadd.f32 %v17608_v59, %v17580_v7  ;;  %10033 = vmatmul.mubr.bf16.vlgmr.msra.gmra.mxu0 %v15767_v9  ;;  %v19395_v42 = vld [vmem:[%s23873_s1 + $0x1838] sm:$0xff]   ;;  %10082 = vmatmul.mubr.bf16.vlgmr.msra.gmra.mxu1 %v15769_v11  ;;  %v19410_v53 = vld [vmem:[%s23873_s1 + $0x18e0] sm:$0xff]   ;;  %v19417_v3 = vld [vmem:[%s23873_s1 + $0x1850] sm:$0xff]  }
 0x32d   : > { %v17610_v14 = vpop.f32.mrf.mxu0  ;;  %v17637_v23 = vpop.f32.mrf.mxu1  ;;  %17980 = vmatpush3.bf16.msra.mxu0 %v19395_v42  ;;  %18008 = vmatpush3.bf16.msra.mxu1 %v19396_v16  ;;  %v19412_v7 = vld [vmem:[%s23873_s1 + $0x18a0] sm:$0xff]   ;;  %v19415_v41 = vld [vmem:[%s23873_s1 + $0x1818] sm:$0xff]   ;;  %v19423_v11 = vld [vmem:[%s23873_s1 + $0x1808] sm:$0xff]  }
 0x32e   : > { %v7623_v60 = vadd.f32 %v17636_v51, %v7574_v58  ;;  %v17611_v19 = vadd.f32 %v17610_v14, %v17609_v62  ;;  %17981 = vmatprep.subr.bf16.mxu0 %v19397_v46  ;;  %18009 = vmatprep.subr.bf16.mxu1 %v19398_v55  ;;  %v19416_v59 = vld [vmem:[%s23873_s1 + $0x1898] sm:$0xff]   ;;  %v19420_v51 = vld [vmem:[%s23873_s1 + $0x1890] sm:$0xff]   ;;  %v19422_v58 = vld [vmem:[%s23873_s1 + $0x18c8] sm:$0xff]  }
 0x32f   : > { %v17612_v40 = vpop.f32.mrf.mxu0  ;;  %v17638_v21 = vpop.f32.mrf.mxu1  ;;  %10040 = vmatprep.mubr.bf16.mxu0 %v15774_v22  ;;  %10089 = vmatprep.mubr.bf16.mxu1 %v15776_v10  ;;  %v19425_v42 = vld [vmem:[%s23873_s1 + $0x1840] sm:$0xff]   ;;  %v19434_v22 = vld [vmem:[%s23873_s1 + $0x19f8] sm:$0xff]   ;;  %v19442_v12 = vld [vmem:[%s23873_s1 + $0x19e8] sm:$0xff]  }
 0x330   : > { %v22860_v32 = vadd.f32 %v7623_v60, %v22713_v52  ;;  %v7579_v34 = vadd.f32 %v17611_v19, %v22775_v5  ;;  %v17639_v24 = vadd.f32 %v17638_v21, %v17637_v23  ;;  %v19400_v5 = vld [vmem:[%s23873_s1 + $0x18b0] sm:$0xff]   ;;  %v19426_v16 = vld [vmem:[%s23873_s1 + $0x18c0] sm:$0xff]  }
 0x331   : > { %v17613_v52 = vpop.f32.mrf.mxu0  ;;  %v17640_v1 = vpop.f32.mrf.mxu1  ;;  %17982 = vmatpush3.bf16.msra.mxu0 %v19399_v29  ;;  %18010 = vmatpush3.bf16.msra.mxu1 %v19400_v5  ;;  %v19427_v46 = vld [vmem:[%s23873_s1 + $0x1800] sm:$0xff]  }
 0x332   : > { %v17614_v61 = vadd.f32 %v17613_v52, %v17612_v40  ;;  %v7628_v49 = vadd.f32 %v17639_v24, %v7579_v34  ;;  %17983 = vmatprep.subr.bf16.mxu0 %v19403_v15  ;;  %18011 = vmatprep.subr.bf16.mxu1 %v19404_v54  ;;  %v19428_v21 = vld [vmem:[%s23873_s1 + $0x1880] sm:$0xff]   ;;  %v19437_v15 = vld [vmem:[%s23873_s1 + $0x1970] sm:$0xff]  }
 0x333   : > { %v17641_v48 = vpop.f32.mrf.mxu1  ;;  %v10106_v52 = vld [vmem:[%s19849_s12 + $0xc0] sm:$0xff]  ;;  %v19440_v54 = vld [vmem:[%s23873_s1 + $0x19b0] sm:$0xff]  }
 0x334   : > { %v7582_v26 = vadd.f32 %v17614_v61, %v17586_v36  ;;  %v22894_v20 = vadd.f32 %v7628_v49, %v22734_v0  ;;  %v17642_v47 = vadd.f32 %v17641_v48, %v17640_v1  ;;  %10041 = vmatmul.mubr.bf16.gmra.mxu0 %v15773_v6  ;;  %v19409_v0 = vld [vmem:[%s23873_s1 + $0x1860] sm:$0xff]   ;;  %10090 = vmatmul.mubr.bf16.gmra.mxu1 %v15775_v31  ;;  %v10107_v61 = vld [vmem:[%s19849_s12 + $0xc8] sm:$0xff]  ;;  %v19433_v1 = vld [vmem:[%s23873_s1 + $0x1978] sm:$0xff]  }
 0x335   : > { %17984 = vmatpush3.bf16.msra.mxu0 %v19407_v43  ;;  %18012 = vmatpush3.bf16.msra.mxu1 %v19408_v18  ;;  %v15921_v29 = vcombine.low %v10106_v52, %v22644_v63  ;;  %v15922_v24 = vcombine.high %v10106_v52, %v22644_v63  ;;  %v15923_v5 = vcombine.low %v10107_v61, %v22650_v2  ;;  %v19435_v63 = vld [vmem:[%s23873_s1 + $0x1938] sm:$0xff]   ;;  %v19438_v49 = vld [vmem:[%s23873_s1 + $0x19f0] sm:$0xff]   ;;  %v19441_v48 = vld [vmem:[%s23873_s1 + $0x1968] sm:$0xff]  }
 0x336   : > { %v7631_v38 = vadd.f32 %v17642_v47, %v7582_v26  ;;  %17985 = vmatprep.subr.bf16.mxu0 %v19409_v0  ;;  %18013 = vmatprep.subr.bf16.mxu1 %v19410_v53  ;;  %v15924_v39 = vcombine.high %v10107_v61, %v22650_v2  ;;  %v19436_v2 = vld [vmem:[%s23873_s1 + $0x19b8] sm:$0xff]   ;;  %v19439_v26 = vld [vmem:[%s23873_s1 + $0x1930] sm:$0xff]   ;;  %v19443_v47 = vld [vmem:[%s23873_s1 + $0x1928] sm:$0xff]  }
 0x337   : > { %10599 = vmatprep.mubr.bf16.mxu0 %v15922_v24  ;;  %v19444_v31 = vld [vmem:[%s23873_s1 + $0x19a8] sm:$0xff]   ;;  %v19445_v43 = vld [vmem:[%s23873_s1 + $0x1960] sm:$0xff]  }
 0x338   : > { %v22911_v13 = vadd.f32 %v7631_v38, %v22758_v30  ;;  %v19414_v30 = vld [vmem:[%s23873_s1 + $0x18d8] sm:$0xff]   ;;  %10648 = vmatprep.mubr.bf16.mxu1 %v15924_v39  ;;  %v19446_v38 = vld [vmem:[%s23873_s1 + $0x19e0] sm:$0xff]   ;;  %v19461_v52 = vld [vmem:[%s23873_s1 + $0x1948] sm:$0xff]  }
 0x339   : > { %17986 = vmatpush3.bf16.msra.mxu0 %v19411_v17  ;;  %18014 = vmatpush3.bf16.msra.mxu1 %v19412_v7  ;;  %v19447_v53 = vld [vmem:[%s23873_s1 + $0x1920] sm:$0xff]   ;;  %v19463_v61 = vld [vmem:[%s23873_s1 + $0x1908] sm:$0xff]  }
 0x33a   : > { %17987 = vmatprep.subr.bf16.mxu0 %v19413_v56  ;;  %18015 = vmatprep.subr.bf16.mxu1 %v19414_v30  ;;  %v19448_v56 = vld [vmem:[%s23873_s1 + $0x19a0] sm:$0xff]  }
 0x33d   : > { %17988 = vmatpush3.bf16.msra.mxu0 %v19415_v41  ;;  %18016 = vmatpush3.bf16.msra.mxu1 %v19416_v59  ;;  %v19449_v59 = vld [vmem:[%s23873_s1 + $0x1958] sm:$0xff]  }
 0x33e   : > { %17989 = vmatprep.subr.bf16.mxu0 %v19417_v3  ;;  %18017 = vmatprep.subr.bf16.mxu1 %v19418_v45  ;;  %v19450_v45 = vld [vmem:[%s23873_s1 + $0x19d8] sm:$0xff]  }
 0x341   : > { %17990 = vmatpush3.bf16.msra.mxu0 %v19419_v8  ;;  %18018 = vmatpush3.bf16.msra.mxu1 %v19420_v51 }
 0x342   : > { %17991 = vmatprep.subr.bf16.mxu0 %v19421_v57  ;;  %18019 = vmatprep.subr.bf16.mxu1 %v19422_v58  ;;  %v19452_v58 = vld [vmem:[%s23873_s1 + $0x1998] sm:$0xff]  }
 0x345   : > { %v17659_v9 = vpop.f32.mrf.mxu0  ;;  %v17687_v50 = vpop.f32.mrf.mxu1  ;;  %17992 = vmatpush3.bf16.msra.mxu0 %v19423_v11  ;;  %18020 = vmatpush3.bf16.msra.mxu1 %v19424_v37  ;;  %v10115_v11 = vld [vmem:[%s19849_s12 + $0x108] sm:$0xff] }
 0x346   : > { %17993 = vmatprep.subr.bf16.mxu0 %v19425_v42  ;;  %18021 = vmatprep.subr.bf16.mxu1 %v19426_v16  ;;  %v19457_v16 = vld [vmem:[%s23873_s1 + $0x1950] sm:$0xff]  }
 0x347   : > { %v17660_v62 = vpop.f32.mrf.mxu0  ;;  %v17688_v33 = vpop.f32.mrf.mxu1 }
 0x348   : > { %v17661_v27 = vadd.f32 %v17660_v62, %v17659_v9  ;;  %v17689_v60 = vadd.f32 %v17688_v33, %v17687_v50  ;;  %v19451_v9 = vld [vmem:[%s23873_s1 + $0x1918] sm:$0xff]   ;;  %v23040_v62 = vld [vmem:[%s19849_s12 + $0xf0] sm:$0xff] }
 0x349   : > { %v17662_v14 = vpop.f32.mrf.mxu0  ;;  %v17690_v19 = vpop.f32.mrf.mxu1  ;;  %17994 = vmatpush3.bf16.msra.mxu0 %v19427_v46  ;;  %18022 = vmatpush3.bf16.msra.mxu1 %v19428_v21  ;;  %v15927_v33 = vcombine.low %v23040_v62, %v10115_v11  ;;  %v15928_v37 = vcombine.high %v23040_v62, %v10115_v11  ;;  %v19458_v46 = vld [vmem:[%s23873_s1 + $0x19d0] sm:$0xff]   ;;  %v23136_v11 = vld [vmem:[%s19849_s12 + $0x100] sm:$0xff] }
 0x34a   : > { %v22961_v23 = vadd.f32 %v17689_v60, %v17661_v27  ;;  %18035 = vmatprep.subr.bf16.mxu0 %v19433_v1  ;;  %18063 = vmatprep.subr.bf16.mxu1 %v19434_v22  ;;  %v23046_v60 = vld [vmem:[%s19849_s12 + $0xf8] sm:$0xff]  ;;  %v19464_v1 = vld [vmem:[%s23873_s1 + $0x1988] sm:$0xff]  }
 0x34b   : > { %v17663_v40 = vpop.f32.mrf.mxu0  ;;  %v17691_v55 = vpop.f32.mrf.mxu1 }
 0x34c   : > { %v17664_v34 = vadd.f32 %v17663_v40, %v17662_v14  ;;  %v17692_v36 = vadd.f32 %v17691_v55, %v17690_v19  ;;  %10600 = vmatmul.mubr.bf16.vlgmr.msra.gmra.mxu0 %v15921_v29  ;;  %10649 = vmatmul.mubr.bf16.vlgmr.msra.gmra.mxu1 %v15923_v5  ;;  %v10116_v14 = vld [vmem:[%s19849_s12 + $0x110] sm:$0xff]  ;;  %v19462_v29 = vld [vmem:[%s23873_s1 + $0x19c8] sm:$0xff]  }
 0x34d   : > { %18036 = vmatpush3.bf16.msra.mxu0 %v19435_v63  ;;  %18064 = vmatpush3.bf16.msra.mxu1 %v19436_v2  ;;  %v17665_v10 = vpop.f32.mrf.mxu0  ;;  %v17693_v18 = vpop.f32.mrf.mxu1  ;;  %v15929_v42 = vcombine.low %v23046_v60, %v10116_v14  ;;  %v15930_v19 = vcombine.high %v23046_v60, %v10116_v14  ;;  %v19460_v55 = vld [vmem:[%s23873_s1 + $0x1990] sm:$0xff]   ;;  %v19465_v2 = vld [vmem:[%s23873_s1 + $0x1940] sm:$0xff]   ;;  %v19483_v14 = vld [vmem:[%s23873_s1 + $0x1a68] sm:$0xff]  }
 0x34e   : > { %v22978_v6 = vadd.f32 %v17692_v36, %v17664_v34  ;;  %18037 = vmatprep.subr.bf16.mxu0 %v19437_v15  ;;  %18065 = vmatprep.subr.bf16.mxu1 %v19438_v49  ;;  %v19459_v34 = vld [vmem:[%s23873_s1 + $0x1910] sm:$0xff]  }
 0x34f   : > { %v17666_v0 = vpop.f32.mrf.mxu0  ;;  %v17694_v7 = vpop.f32.mrf.mxu1  ;;  %10607 = vmatprep.mubr.bf16.mxu0 %v15928_v37  ;;  %10656 = vmatprep.mubr.bf16.mxu1 %v15930_v19  ;;  %v19485_v19 = vld [vmem:[%s23873_s1 + $0x1a28] sm:$0xff]  }
 0x350   : > { %v17667_v17 = vadd.f32 %v17666_v0, %v17665_v10  ;;  %v17695_v30 = vadd.f32 %v17694_v7, %v17693_v18  ;;  %v10108_v10 = vld [vmem:[%s19849_s12 + $0xd0] sm:$0xff] }
 0x351   : > { %18038 = vmatpush3.bf16.msra.mxu0 %v19439_v26  ;;  %18066 = vmatpush3.bf16.msra.mxu1 %v19440_v54  ;;  %v17668_v41 = vpop.f32.mrf.mxu0  ;;  %v17696_v3 = vpop.f32.mrf.mxu1  ;;  %v19466_v26 = vld [vmem:[%s23873_s1 + $0x19c0] sm:$0xff]   ;;  %v15925_v18 = vcombine.low %v10108_v10, %v22740_v44  ;;  %v15981_v0 = vld [vmem:[%s19849_s12 + $0x210] sm:$0xff] }
 0x352   : > { %18039 = vmatprep.subr.bf16.mxu0 %v19441_v48  ;;  %18067 = vmatprep.subr.bf16.mxu1 %v19442_v12  ;;  %v23031_v8 = vadd.f32 %v17695_v30, %v17667_v17  ;;  %v19467_v48 = vld [vmem:[%s23873_s1 + $0x1900] sm:$0xff]   ;;  %v16089_v17 = vcombine.low %v15981_v0, %v22792_v28  ;;  %v16090_v7 = vcombine.high %v15981_v0, %v22792_v28  ;;  %v19474_v30 = vld [vmem:[%s23873_s1 + $0x1af8] sm:$0xff]  }
 0x353   : > { %v17669_v51 = vpop.f32.mrf.mxu0  ;;  %v17697_v50 = vpop.f32.mrf.mxu1 }
 0x354   : > { %v17670_v57 = vadd.f32 %v17669_v51, %v17668_v41  ;;  %v17698_v27 = vadd.f32 %v17697_v50, %v17696_v3  ;;  %10608 = vmatmul.mubr.bf16.gmra.mxu0 %v15927_v33  ;;  %10657 = vmatmul.mubr.bf16.gmra.mxu1 %v15929_v42  ;;  %v19478_v51 = vld [vmem:[%s23873_s1 + $0x1af0] sm:$0xff]   ;;  %v19484_v42 = vld [vmem:[%s23873_s1 + $0x1ae8] sm:$0xff]  }
 0x355   : > { %18040 = vmatpush3.bf16.msra.mxu0 %v19443_v47  ;;  %18068 = vmatpush3.bf16.msra.mxu1 %v19444_v31 }
 0x356   : > { %18041 = vmatprep.subr.bf16.mxu0 %v19445_v43  ;;  %18069 = vmatprep.subr.bf16.mxu1 %v19446_v38  ;;  %v23054_v40 = vadd.f32 %v17698_v27, %v17670_v57  ;;  %v15926_v38 = vcombine.high %v10108_v10, %v22740_v44  ;;  %v19479_v57 = vld [vmem:[%s23873_s1 + $0x1a30] sm:$0xff]   ;;  %v10117_v27 = vld [vmem:[%s19849_s12 + $0x118] sm:$0xff]  ;;  %v19501_v10 = vld [vmem:[%s23873_s1 + $0x1a48] sm:$0xff]  }
 0x357   : > { %11215 = vmatprep.mubr.bf16.mxu1 %v16090_v7  ;;  %v15931_v33 = vcombine.low %v23136_v11, %v10117_v27  ;;  %v15932_v37 = vcombine.high %v23136_v11, %v10117_v27  ;;  %v19504_v7 = vld [vmem:[%s23873_s1 + $0x1a88] sm:$0xff]  }
 0x358   : > { %10697 = vmatprep.mubr.bf16.mxu0 %v15926_v38  ;;  %v19502_v38 = vld [vmem:[%s23873_s1 + $0x1ac8] sm:$0xff]  }
 0x359   : > { %18042 = vmatpush3.bf16.msra.mxu0 %v19447_v53  ;;  %18070 = vmatpush3.bf16.msra.mxu1 %v19448_v56  ;;  %v19473_v56 = vld [vmem:[%s23873_s1 + $0x1a78] sm:$0xff]  }
 0x35a   : > { %18043 = vmatprep.subr.bf16.mxu0 %v19449_v59  ;;  %18071 = vmatprep.subr.bf16.mxu1 %v19450_v45  ;;  %v19476_v59 = vld [vmem:[%s23873_s1 + $0x1ab8] sm:$0xff]  }
 0x35d   : > { %18044 = vmatpush3.bf16.msra.mxu0 %v19451_v9  ;;  %18072 = vmatpush3.bf16.msra.mxu1 %v19452_v58 }
 0x35e   : > { %18045 = vmatprep.subr.bf16.mxu0 %v19457_v16  ;;  %18073 = vmatprep.subr.bf16.mxu1 %v19458_v46  ;;  %v19487_v46 = vld [vmem:[%s23873_s1 + $0x1a60] sm:$0xff]  }
 0x361   : > { %18046 = vmatpush3.bf16.msra.mxu0 %v19459_v34  ;;  %18074 = vmatpush3.bf16.msra.mxu1 %v19460_v55  ;;  %v19488_v55 = vld [vmem:[%s23873_s1 + $0x1ae0] sm:$0xff]  }
 0x362   : > { %18047 = vmatprep.subr.bf16.mxu0 %v19461_v52  ;;  %18075 = vmatprep.subr.bf16.mxu1 %v19462_v29  ;;  %v19490_v52 = vld [vmem:[%s23873_s1 + $0x1aa0] sm:$0xff]   ;;  %v19491_v29 = vld [vmem:[%s23873_s1 + $0x1a58] sm:$0xff]  }
 0x365   : > { %v17715_v21 = vpop.f32.mrf.mxu0  ;;  %v17743_v36 = vpop.f32.mrf.mxu1  ;;  %18048 = vmatpush3.bf16.msra.mxu0 %v19463_v61  ;;  %18076 = vmatpush3.bf16.msra.mxu1 %v19464_v1  ;;  %v19492_v61 = vld [vmem:[%s23873_s1 + $0x1ad8] sm:$0xff]  }
 0x366   : > { %18049 = vmatprep.subr.bf16.mxu0 %v19465_v2  ;;  %18077 = vmatprep.subr.bf16.mxu1 %v19466_v26  ;;  %v19494_v1 = vld [vmem:[%s23873_s1 + $0x1a98] sm:$0xff]   ;;  %v23186_v2 = vld [vmem:[%s19849_s12 + $0x240] sm:$0xff] }
 0x367   : > { %v17716_v24 = vpop.f32.mrf.mxu0  ;;  %v17744_v39 = vpop.f32.mrf.mxu1 }
 0x368   : > { %v17717_v5 = vadd.f32 %v17716_v24, %v17715_v21  ;;  %v23077_v22 = vadd.f32 %v17744_v39, %v17743_v36 }
 0x369   : > { %v17718_v63 = vpop.f32.mrf.mxu0  ;;  %v17746_v49 = vpop.f32.mrf.mxu1  ;;  %18050 = vmatpush3.bf16.msra.mxu0 %v19467_v48  ;;  %v19498_v48 = vld [vmem:[%s23873_s1 + $0x1ad0] sm:$0xff]  }
 0x36a   : > { %v8236_v15 = vadd.f32 %v17717_v5, %v22961_v23  ;;  %v19468_v23 = vld [vmem:[%s23873_s1 + $0x1980] sm:$0xff]   ;;  %18091 = vmatprep.subr.bf16.mxu0 %v19473_v56  ;;  %v19493_v5 = vld [vmem:[%s23873_s1 + $0x1a18] sm:$0xff]  }
 0x36b   : > { %v17719_v54 = vpop.f32.mrf.mxu0  ;;  %v17747_v31 = vpop.f32.mrf.mxu1  ;;  %18078 = vmatpush3.bf16.msra.mxu1 %v19468_v23 }
 0x36c   : > { %v23090_v12 = vadd.f32 %v8236_v15, %v22843_v25  ;;  %v17720_v47 = vadd.f32 %v17719_v54, %v17718_v63  ;;  %v23096_v43 = vadd.f32 %v17747_v31, %v17746_v49  ;;  %10698 = vmatmul.mubr.bf16.vlgmr.msra.gmra.mxu0 %v15925_v18  ;;  %18119 = vmatprep.subr.bf16.mxu1 %v19474_v30  ;;  %v15990_v15 = vld [vmem:[%s19849_s12 + $0x258] sm:$0xff]  ;;  %v19497_v54 = vld [vmem:[%s23873_s1 + $0x1a50] sm:$0xff]  }
 0x36d   : > { %v17721_v25 = vpop.f32.mrf.mxu0  ;;  %10705 = vmatprep.mubr.bf16.mxu0 %v15932_v37  ;;  %v17749_v34 = vpop.f32.mrf.mxu1  ;;  %v16095_v49 = vcombine.low %v23186_v2, %v15990_v15  ;;  %v16096_v26 = vcombine.high %v23186_v2, %v15990_v15  ;;  %v19500_v31 = vld [vmem:[%s23873_s1 + $0x1a90] sm:$0xff]   ;;  %v23267_v15 = vld [vmem:[%s19849_s12 + $0x248] sm:$0xff] }
 0x36e   : > { %v8239_v53 = vadd.f32 %v17720_v47, %v22978_v6  ;;  %v19475_v6 = vld [vmem:[%s23873_s1 + $0x1a38] sm:$0xff]   ;;  %11216 = vmatmul.mubr.bf16.vlgmr.msra.gmra.mxu1 %v16089_v17  ;;  %v19499_v47 = vld [vmem:[%s23873_s1 + $0x1a10] sm:$0xff]  }
 0x36f   : > { %v17722_v41 = vpop.f32.mrf.mxu0  ;;  %18092 = vmatpush3.bf16.msra.mxu0 %v19475_v6  ;;  %18120 = vmatpush3.bf16.msra.mxu1 %v19476_v59  ;;  %v17750_v21 = vpop.f32.mrf.mxu1  ;;  %v19506_v59 = vld [vmem:[%s23873_s1 + $0x1ac0] sm:$0xff]  }
 0x370   : > { %v23111_v44 = vadd.f32 %v8239_v53, %v22860_v32  ;;  %v17723_v28 = vadd.f32 %v17722_v41, %v17721_v25  ;;  %v19477_v32 = vld [vmem:[%s23873_s1 + $0x1a70] sm:$0xff]   ;;  %18121 = vmatprep.subr.bf16.mxu1 %v19478_v51  ;;  %v23169_v36 = vadd.f32 %v17750_v21, %v17749_v34  ;;  %11223 = vmatprep.mubr.bf16.mxu1 %v16096_v26  ;;  %v19503_v53 = vld [vmem:[%s23873_s1 + $0x1a08] sm:$0xff]   ;;  %v19505_v41 = vld [vmem:[%s23873_s1 + $0x1a40] sm:$0xff]  }
 0x371   : > { %v17724_v3 = vpop.f32.mrf.mxu0  ;;  %18093 = vmatprep.subr.bf16.mxu0 %v19477_v32  ;;  %v17752_v24 = vpop.f32.mrf.mxu1  ;;  %v19507_v32 = vld [vmem:[%s23873_s1 + $0x1a00] sm:$0xff]  }
 0x372   : > { %v8244_v45 = vadd.f32 %v17723_v28, %v23031_v8  ;;  %v19480_v8 = vld [vmem:[%s23873_s1 + $0x1ab0] sm:$0xff]  }
 0x373   : > { %v17725_v9 = vpop.f32.mrf.mxu0  ;;  %18094 = vmatpush3.bf16.msra.mxu0 %v19479_v57  ;;  %18122 = vmatpush3.bf16.msra.mxu1 %v19480_v8  ;;  %v17753_v39 = vpop.f32.mrf.mxu1  ;;  %v15982_v57 = vld [vmem:[%s19849_s12 + $0x218] sm:$0xff] }
 0x374   : > { %v23130_v50 = vadd.f32 %v8244_v45, %v22894_v20  ;;  %v17726_v58 = vadd.f32 %v17725_v9, %v17724_v3  ;;  %18095 = vmatprep.subr.bf16.mxu0 %v19483_v14  ;;  %10706 = vmatmul.mubr.bf16.gmra.mxu0 %v15931_v33  ;;  %v23183_v63 = vadd.f32 %v17753_v39, %v17752_v24  ;;  %v15983_v33 = vld [vmem:[%s19849_s12 + $0x220] sm:$0xff]  ;;  %v19518_v24 = vld [vmem:[%s23873_s1 + $0x1bf0] sm:$0xff]  }
 0x375   : > { %18123 = vmatprep.subr.bf16.mxu1 %v19484_v42  ;;  %v16091_v8 = vcombine.low %v15982_v57, %v22878_v35  ;;  %v16092_v27 = vcombine.high %v15982_v57, %v22878_v35  ;;  %v16093_v42 = vcombine.low %v15983_v33, %v22890_v4  ;;  %v19514_v35 = vld [vmem:[%s23873_s1 + $0x1bf8] sm:$0xff]   ;;  %v19540_v57 = vld [vmem:[%s23873_s1 + $0x1b90] sm:$0xff]  }
 0x376   : > { %v8247_v20 = vadd.f32 %v17726_v58, %v23054_v40  ;;  %v19486_v40 = vld [vmem:[%s23873_s1 + $0x1aa8] sm:$0xff]   ;;  %11224 = vmatmul.mubr.bf16.gmra.mxu1 %v16095_v49  ;;  %v15991_v49 = vld [vmem:[%s19849_s12 + $0x260] sm:$0xff] }
 0x377   : > { %18096 = vmatpush3.bf16.msra.mxu0 %v19485_v19  ;;  %18124 = vmatpush3.bf16.msra.mxu1 %v19486_v40  ;;  %v16094_v19 = vcombine.high %v15983_v33, %v22890_v4  ;;  %v19513_v40 = vld [vmem:[%s23873_s1 + $0x1b78] sm:$0xff]   ;;  %v19542_v33 = vld [vmem:[%s23873_s1 + $0x1bc8] sm:$0xff]  }
 0x378   : > { %v23152_v16 = vadd.f32 %v8247_v20, %v22911_v13  ;;  %18097 = vmatprep.subr.bf16.mxu0 %v19487_v46  ;;  %v19489_v13 = vld [vmem:[%s23873_s1 + $0x1a20] sm:$0xff]   ;;  %18125 = vmatprep.subr.bf16.mxu1 %v19488_v55  ;;  %v19516_v4 = vld [vmem:[%s23873_s1 + $0x1bb8] sm:$0xff]  }
 0x379   : > { %11264 = vmatprep.mubr.bf16.mxu0 %v16092_v27  ;;  %11313 = vmatprep.mubr.bf16.mxu1 %v16094_v19 }
 0x37b   : > { %18098 = vmatpush3.bf16.msra.mxu0 %v19489_v13  ;;  %18126 = vmatpush3.bf16.msra.mxu1 %v19490_v52  ;;  %v19517_v52 = vld [vmem:[%s23873_s1 + $0x1b70] sm:$0xff]  }
 0x37c   : > { %18099 = vmatprep.subr.bf16.mxu0 %v19491_v29  ;;  %18127 = vmatprep.subr.bf16.mxu1 %v19492_v61 }
 0x37f   : > { %18100 = vmatpush3.bf16.msra.mxu0 %v19493_v5  ;;  %18128 = vmatpush3.bf16.msra.mxu1 %v19494_v1  ;;  %v19519_v5 = vld [vmem:[%s23873_s1 + $0x1b30] sm:$0xff]  }
 0x380   : > { %18101 = vmatprep.subr.bf16.mxu0 %v19497_v54  ;;  %18129 = vmatprep.subr.bf16.mxu1 %v19498_v48  ;;  %v16097_v54 = vcombine.low %v23267_v15, %v15991_v49  ;;  %v16098_v48 = vcombine.high %v23267_v15, %v15991_v49 }
 0x383   : > { %18102 = vmatpush3.bf16.msra.mxu0 %v19499_v47  ;;  %18130 = vmatpush3.bf16.msra.mxu1 %v19500_v31  ;;  %v19523_v47 = vld [vmem:[%s23873_s1 + $0x1b68] sm:$0xff]  }
 0x384   : > { %18103 = vmatprep.subr.bf16.mxu0 %v19501_v10  ;;  %18131 = vmatprep.subr.bf16.mxu1 %v19502_v38  ;;  %v19524_v10 = vld [vmem:[%s23873_s1 + $0x1be8] sm:$0xff]   ;;  %v23280_v38 = vld [vmem:[%s19849_s12 + $0x250] sm:$0xff] }
 0x385   : > { %v17771_v23 = vpop.f32.mrf.mxu0  ;;  %v17799_v18 = vpop.f32.mrf.mxu1 }
 0x387   : > { %v17772_v0 = vpop.f32.mrf.mxu0  ;;  %v17800_v17 = vpop.f32.mrf.mxu1  ;;  %18104 = vmatpush3.bf16.msra.mxu0 %v19503_v53  ;;  %18132 = vmatpush3.bf16.msra.mxu1 %v19504_v7  ;;  %v19527_v7 = vld [vmem:[%s23873_s1 + $0x1b28] sm:$0xff]  }
 0x388   : > { %v17773_v25 = vadd.f32 %v17772_v0, %v17771_v23  ;;  %v17801_v56 = vadd.f32 %v17800_v17, %v17799_v18  ;;  %18105 = vmatprep.subr.bf16.mxu0 %v19505_v41  ;;  %18133 = vmatprep.subr.bf16.mxu1 %v19506_v59  ;;  %v15992_v0 = vld [vmem:[%s19849_s12 + $0x268] sm:$0xff]  ;;  %v19530_v41 = vld [vmem:[%s23873_s1 + $0x1be0] sm:$0xff]  }
 0x389   : > { %v17774_v30 = vpop.f32.mrf.mxu0  ;;  %v17802_v28 = vpop.f32.mrf.mxu1  ;;  %v16099_v17 = vcombine.low %v23280_v38, %v15992_v0  ;;  %v19532_v59 = vld [vmem:[%s23873_s1 + $0x1ba0] sm:$0xff]  }
 0x38a   : > { %v8803_v6 = vadd.f32 %v17773_v25, %v23077_v22  ;;  %v19508_v22 = vld [vmem:[%s23873_s1 + $0x1a80] sm:$0xff]  }
 0x38b   : > { %v17775_v3 = vpop.f32.mrf.mxu0  ;;  %v17803_v9 = vpop.f32.mrf.mxu1  ;;  %18106 = vmatpush3.bf16.msra.mxu0 %v19507_v32  ;;  %18134 = vmatpush3.bf16.msra.mxu1 %v19508_v22  ;;  %v19535_v32 = vld [vmem:[%s23873_s1 + $0x1b18] sm:$0xff]   ;;  %v19539_v22 = vld [vmem:[%s23873_s1 + $0x1b10] sm:$0xff]  }
 0x38c   : > { %v8852_v45 = vadd.f32 %v17801_v56, %v8803_v6  ;;  %v17776_v51 = vadd.f32 %v17775_v3, %v17774_v30  ;;  %v17804_v58 = vadd.f32 %v17803_v9, %v17802_v28  ;;  %18147 = vmatprep.subr.bf16.mxu0 %v19513_v40  ;;  %18175 = vmatprep.subr.bf16.mxu1 %v19514_v35  ;;  %v19528_v56 = vld [vmem:[%s23873_s1 + $0x1ba8] sm:$0xff]   ;;  %v19531_v28 = vld [vmem:[%s23873_s1 + $0x1b20] sm:$0xff]   ;;  %v19533_v3 = vld [vmem:[%s23873_s1 + $0x1b58] sm:$0xff]  }
 0x38d   : > { %v17777_v20 = vpop.f32.mrf.mxu0  ;;  %v17805_v13 = vpop.f32.mrf.mxu1  ;;  %v19538_v9 = vld [vmem:[%s23873_s1 + $0x1bd0] sm:$0xff]   ;;  %v19544_v40 = vld [vmem:[%s23873_s1 + $0x1b88] sm:$0xff]  }
 0x38e   : > { %v23233_v37 = vadd.f32 %v8852_v45, %v23090_v12  ;;  %v8806_v14 = vadd.f32 %v17776_v51, %v23096_v43  ;;  %11265 = vmatmul.mubr.bf16.vlgmr.msra.gmra.mxu0 %v16091_v8  ;;  %v19515_v43 = vld [vmem:[%s23873_s1 + $0x1b38] sm:$0xff]   ;;  %11314 = vmatmul.mubr.bf16.vlgmr.msra.gmra.mxu1 %v16093_v42  ;;  %v19537_v51 = vld [vmem:[%s23873_s1 + $0x1b50] sm:$0xff]   ;;  %v19541_v8 = vld [vmem:[%s23873_s1 + $0x1b48] sm:$0xff]  }
 0x38f   : > { %v17778_v12 = vpop.f32.mrf.mxu0  ;;  %18148 = vmatpush3.bf16.msra.mxu0 %v19515_v43  ;;  %18176 = vmatpush3.bf16.msra.mxu1 %v19516_v4  ;;  %v17806_v61 = vpop.f32.mrf.mxu1  ;;  %v19536_v45 = vld [vmem:[%s23873_s1 + $0x1b98] sm:$0xff]  }
 0x390   : > { %v8855_v46 = vadd.f32 %v17804_v58, %v8806_v14  ;;  %v17779_v34 = vadd.f32 %v17778_v12, %v17777_v20  ;;  %18149 = vmatprep.subr.bf16.mxu0 %v19517_v52  ;;  %v17807_v39 = vadd.f32 %v17806_v61, %v17805_v13  ;;  %18177 = vmatprep.subr.bf16.mxu1 %v19518_v24  ;;  %v19543_v20 = vld [vmem:[%s23873_s1 + $0x1b08] sm:$0xff]   ;;  %v19545_v12 = vld [vmem:[%s23873_s1 + $0x1b40] sm:$0xff]   ;;  %v11338_v61 = vld [vmem:[%s19849_s12 + $0xd8] sm:$0xff] }
 0x391   : > { %v17780_v21 = vpop.f32.mrf.mxu0  ;;  %v17808_v26 = vpop.f32.mrf.mxu1  ;;  %11272 = vmatprep.mubr.bf16.mxu0 %v16098_v48  ;;  %v19548_v24 = vld [vmem:[%s23873_s1 + $0x1b80] sm:$0xff]   ;;  %v19554_v48 = vld [vmem:[%s23873_s1 + $0x1cf8] sm:$0xff]  }
 0x392   : > { %v23251_v55 = vadd.f32 %v8855_v46, %v23111_v44  ;;  %v8811_v29 = vadd.f32 %v17779_v34, %v23169_v36  ;;  %v19520_v36 = vld [vmem:[%s23873_s1 + $0x1bb0] sm:$0xff]   ;;  %v19546_v34 = vld [vmem:[%s23873_s1 + $0x1bc0] sm:$0xff]  }
 0x393   : > { %v17781_v44 = vpop.f32.mrf.mxu0  ;;  %18150 = vmatpush3.bf16.msra.mxu0 %v19519_v5  ;;  %18178 = vmatpush3.bf16.msra.mxu1 %v19520_v36  ;;  %v17809_v18 = vpop.f32.mrf.mxu1  ;;  %v16245_v5 = vcombine.low %v11338_v61, %v23040_v62 }
 0x394   : > { %v17782_v1 = vadd.f32 %v17781_v44, %v17780_v21  ;;  %v8860_v31 = vadd.f32 %v17807_v39, %v8811_v29  ;;  %18151 = vmatprep.subr.bf16.mxu0 %v19523_v47  ;;  %v17810_v25 = vadd.f32 %v17809_v18, %v17808_v26  ;;  %18179 = vmatprep.subr.bf16.mxu1 %v19524_v10  ;;  %v19547_v21 = vld [vmem:[%s23873_s1 + $0x1b00] sm:$0xff]   ;;  %v19553_v26 = vld [vmem:[%s23873_s1 + $0x1c78] sm:$0xff]   ;;  %v19557_v47 = vld [vmem:[%s23873_s1 + $0x1c70] sm:$0xff]  }
 0x395   : > { %v16246_v39 = vcombine.high %v11338_v61, %v23040_v62  ;;  %v19555_v62 = vld [vmem:[%s23873_s1 + $0x1c38] sm:$0xff]   ;;  %v19560_v10 = vld [vmem:[%s23873_s1 + $0x1cb0] sm:$0xff]   ;;  %v19561_v18 = vld [vmem:[%s23873_s1 + $0x1c68] sm:$0xff]  }
 0x396   : > { %v8814_v23 = vadd.f32 %v17782_v1, %v23183_v63  ;;  %v23284_v53 = vadd.f32 %v8860_v31, %v23130_v50  ;;  %11273 = vmatmul.mubr.bf16.gmra.mxu0 %v16097_v54  ;;  %v16100_v63 = vcombine.high %v23280_v38, %v15992_v0  ;;  %v19529_v50 = vld [vmem:[%s23873_s1 + $0x1b60] sm:$0xff]   ;;  %v19558_v31 = vld [vmem:[%s23873_s1 + $0x1cf0] sm:$0xff]   ;;  %v19562_v0 = vld [vmem:[%s23873_s1 + $0x1ce8] sm:$0xff]  }
 0x397   : > { %18152 = vmatpush3.bf16.msra.mxu0 %v19527_v7  ;;  %18180 = vmatpush3.bf16.msra.mxu1 %v19528_v56  ;;  %v11339_v1 = vld [vmem:[%s19849_s12 + $0xe0] sm:$0xff]  ;;  %v19581_v61 = vld [vmem:[%s23873_s1 + $0x1c48] sm:$0xff]  }
 0x398   : > { %v8863_v30 = vadd.f32 %v17810_v25, %v8814_v23  ;;  %11321 = vmatprep.mubr.bf16.mxu1 %v16100_v63  ;;  %18153 = vmatprep.subr.bf16.mxu0 %v19529_v50  ;;  %v16247_v36 = vcombine.low %v11339_v1, %v23046_v60  ;;  %v16248_v49 = vcombine.high %v11339_v1, %v23046_v60  ;;  %v19556_v60 = vld [vmem:[%s23873_s1 + $0x1cb8] sm:$0xff]   ;;  %v19559_v23 = vld [vmem:[%s23873_s1 + $0x1c30] sm:$0xff]   ;;  %v19563_v25 = vld [vmem:[%s23873_s1 + $0x1c28] sm:$0xff]  }
 0x399   : > { %11322 = vmatmul.mubr.bf16.gmra.mxu1 %v16099_v17  ;;  %18181 = vmatprep.subr.bf16.mxu1 %v19530_v41  ;;  %v19564_v17 = vld [vmem:[%s23873_s1 + $0x1ca8] sm:$0xff]   ;;  %v19565_v7 = vld [vmem:[%s23873_s1 + $0x1c60] sm:$0xff]  }
 0x39a   : > { %v23301_v6 = vadd.f32 %v8863_v30, %v23152_v16  ;;  %v19534_v16 = vld [vmem:[%s23873_s1 + $0x1bd8] sm:$0xff]   ;;  %11831 = vmatprep.mubr.bf16.mxu0 %v16246_v39  ;;  %11880 = vmatprep.mubr.bf16.mxu1 %v16248_v49  ;;  %v19566_v30 = vld [vmem:[%s23873_s1 + $0x1ce0] sm:$0xff]   ;;  %v19583_v1 = vld [vmem:[%s23873_s1 + $0x1c08] sm:$0xff]  }
 0x39b   : > { %18154 = vmatpush3.bf16.msra.mxu0 %v19531_v28  ;;  %18182 = vmatpush3.bf16.msra.mxu1 %v19532_v59  ;;  %v19567_v41 = vld [vmem:[%s23873_s1 + $0x1c20] sm:$0xff]  }
 0x39c   : > { %18155 = vmatprep.subr.bf16.mxu0 %v19533_v3  ;;  %18183 = vmatprep.subr.bf16.mxu1 %v19534_v16  ;;  %v19568_v3 = vld [vmem:[%s23873_s1 + $0x1ca0] sm:$0xff]  }
 0x39f   : > { %18156 = vmatpush3.bf16.msra.mxu0 %v19535_v32  ;;  %18184 = vmatpush3.bf16.msra.mxu1 %v19536_v45  ;;  %v19569_v45 = vld [vmem:[%s23873_s1 + $0x1c58] sm:$0xff]  }
 0x3a0   : > { %18157 = vmatprep.subr.bf16.mxu0 %v19537_v51  ;;  %18185 = vmatprep.subr.bf16.mxu1 %v19538_v9  ;;  %v19570_v9 = vld [vmem:[%s23873_s1 + $0x1cd8] sm:$0xff]  }
 0x3a3   : > { %18158 = vmatpush3.bf16.msra.mxu0 %v19539_v22  ;;  %18186 = vmatpush3.bf16.msra.mxu1 %v19540_v57 }
 0x3a4   : > { %18159 = vmatprep.subr.bf16.mxu0 %v19541_v8  ;;  %18187 = vmatprep.subr.bf16.mxu1 %v19542_v33  ;;  %v19572_v33 = vld [vmem:[%s23873_s1 + $0x1c98] sm:$0xff]  }
 0x3a7   : > { %v17855_v27 = vpop.f32.mrf.mxu1  ;;  %18160 = vmatpush3.bf16.msra.mxu0 %v19543_v20  ;;  %18188 = vmatpush3.bf16.msra.mxu1 %v19544_v40  ;;  %v11347_v20 = vld [vmem:[%s19849_s12 + $0x120] sm:$0xff] }
 0x3a8   : > { %18161 = vmatprep.subr.bf16.mxu0 %v19545_v12  ;;  %18189 = vmatprep.subr.bf16.mxu1 %v19546_v34  ;;  %v19577_v34 = vld [vmem:[%s23873_s1 + $0x1c50] sm:$0xff]  }
 0x3a9   : > { %v17856_v19 = vpop.f32.mrf.mxu1 }
 0x3aa   : > { %v17827_v58 = vpop.f32.mrf.mxu0  ;;  %v17857_v35 = vadd.f32 %v17856_v19, %v17855_v27 }
 0x3ab   : > { %v17858_v43 = vpop.f32.mrf.mxu1  ;;  %18162 = vmatpush3.bf16.msra.mxu0 %v19547_v21  ;;  %18190 = vmatpush3.bf16.msra.mxu1 %v19548_v24  ;;  %v19578_v21 = vld [vmem:[%s23873_s1 + $0x1cd0] sm:$0xff]  }
 0x3ac   : > { %v17828_v14 = vpop.f32.mrf.mxu0  ;;  %18203 = vmatprep.subr.bf16.mxu0 %v19553_v26  ;;  %18231 = vmatprep.subr.bf16.mxu1 %v19554_v48  ;;  %v19584_v26 = vld [vmem:[%s23873_s1 + $0x1c88] sm:$0xff]  }
 0x3ad   : > { %v17829_v42 = vadd.f32 %v17828_v14, %v17827_v58  ;;  %v17859_v29 = vpop.f32.mrf.mxu1  ;;  %v19571_v58 = vld [vmem:[%s23873_s1 + $0x1c18] sm:$0xff]   ;;  %v23430_v14 = vld [vmem:[%s19849_s12 + $0x108] sm:$0xff] }
 0x3ae   : > { %v17830_v46 = vpop.f32.mrf.mxu0  ;;  %v17860_v44 = vadd.f32 %v17859_v29, %v17858_v43  ;;  %11832 = vmatmul.mubr.bf16.vlgmr.msra.gmra.mxu0 %v16245_v5  ;;  %11881 = vmatmul.mubr.bf16.vlgmr.msra.gmra.mxu1 %v16247_v36  ;;  %v16251_v19 = vcombine.low %v23430_v14, %v11347_v20  ;;  %v16252_v40 = vcombine.high %v23430_v14, %v11347_v20  ;;  %v19580_v29 = vld [vmem:[%s23873_s1 + $0x1c90] sm:$0xff]   ;;  %v19582_v5 = vld [vmem:[%s23873_s1 + $0x1cc8] sm:$0xff]   ;;  %v23526_v20 = vld [vmem:[%s19849_s12 + $0x118] sm:$0xff] }
 0x3af   : > { %v23351_v4 = vadd.f32 %v17857_v35, %v17829_v42  ;;  %18204 = vmatpush3.bf16.msra.mxu0 %v19555_v62  ;;  %18232 = vmatpush3.bf16.msra.mxu1 %v19556_v60  ;;  %v17861_v56 = vpop.f32.mrf.mxu1  ;;  %v23436_v35 = vld [vmem:[%s19849_s12 + $0x110] sm:$0xff]  ;;  %v19585_v60 = vld [vmem:[%s23873_s1 + $0x1c40] sm:$0xff]  }
 0x3b0   : > { %v17831_v13 = vpop.f32.mrf.mxu0  ;;  %18205 = vmatprep.subr.bf16.mxu0 %v19557_v47  ;;  %18233 = vmatprep.subr.bf16.mxu1 %v19558_v31 }
 0x3b1   : > { %v17832_v52 = vadd.f32 %v17831_v13, %v17830_v46  ;;  %v17862_v59 = vpop.f32.mrf.mxu1  ;;  %v11348_v46 = vld [vmem:[%s19849_s12 + $0x128] sm:$0xff]  ;;  %11839 = vmatprep.mubr.bf16.mxu0 %v16252_v40 }
 0x3b2   : > { %v17833_v63 = vpop.f32.mrf.mxu0  ;;  %v17863_v16 = vadd.f32 %v17862_v59, %v17861_v56  ;;  %v16253_v12 = vcombine.low %v23436_v35, %v11348_v46  ;;  %v16254_v43 = vcombine.high %v23436_v35, %v11348_v46 }
 0x3b3   : > { %v23368_v54 = vadd.f32 %v17860_v44, %v17832_v52  ;;  %18206 = vmatpush3.bf16.msra.mxu0 %v19559_v23  ;;  %18234 = vmatpush3.bf16.msra.mxu1 %v19560_v10  ;;  %v17864_v51 = vpop.f32.mrf.mxu1  ;;  %v19579_v52 = vld [vmem:[%s23873_s1 + $0x1c10] sm:$0xff]   ;;  %v19586_v23 = vld [vmem:[%s23873_s1 + $0x1cc0] sm:$0xff]  }
 0x3b4   : > { %18207 = vmatprep.subr.bf16.mxu0 %v19561_v18  ;;  %18235 = vmatprep.subr.bf16.mxu1 %v19562_v0  ;;  %v17834_v50 = vpop.f32.mrf.mxu0  ;;  %v19587_v18 = vld [vmem:[%s23873_s1 + $0x1c00] sm:$0xff]  }
 0x3b5   : > { %v17835_v28 = vadd.f32 %v17834_v50, %v17833_v63  ;;  %v17865_v27 = vpop.f32.mrf.mxu1  ;;  %11888 = vmatprep.mubr.bf16.mxu1 %v16254_v43  ;;  %v11340_v63 = vld [vmem:[%s19849_s12 + $0xe8] sm:$0xff] }
 0x3b6   : > { %v17836_v32 = vpop.f32.mrf.mxu0  ;;  %v17866_v42 = vadd.f32 %v17865_v27, %v17864_v51  ;;  %11840 = vmatmul.mubr.bf16.gmra.mxu0 %v16251_v19  ;;  %11889 = vmatmul.mubr.bf16.gmra.mxu1 %v16253_v12  ;;  %v16249_v56 = vcombine.low %v11340_v63, %v23136_v11  ;;  %v16305_v50 = vld [vmem:[%s19849_s12 + $0x228] sm:$0xff] }
 0x3b7   : > { %18208 = vmatpush3.bf16.msra.mxu0 %v19563_v25  ;;  %18236 = vmatpush3.bf16.msra.mxu1 %v19564_v17  ;;  %v23421_v22 = vadd.f32 %v17863_v16, %v17835_v28  ;;  %v16413_v28 = vcombine.low %v16305_v50, %v23186_v2  ;;  %v16414_v59 = vcombine.high %v16305_v50, %v23186_v2  ;;  %v19594_v16 = vld [vmem:[%s23873_s1 + $0x1df8] sm:$0xff]   ;;  %v19604_v12 = vld [vmem:[%s23873_s1 + $0x1de8] sm:$0xff]  }
 0x3b8   : > { %18209 = vmatprep.subr.bf16.mxu0 %v19565_v7  ;;  %18237 = vmatprep.subr.bf16.mxu1 %v19566_v30  ;;  %v17837_v57 = vpop.f32.mrf.mxu0  ;;  %v16250_v30 = vcombine.high %v11340_v63, %v23136_v11  ;;  %v19605_v43 = vld [vmem:[%s23873_s1 + $0x1d28] sm:$0xff]  }
 0x3b9   : > { %v17838_v8 = vadd.f32 %v17837_v57, %v17836_v32  ;;  %12447 = vmatprep.mubr.bf16.mxu1 %v16414_v59  ;;  %v19598_v57 = vld [vmem:[%s23873_s1 + $0x1df0] sm:$0xff]   ;;  %v19625_v59 = vld [vmem:[%s23873_s1 + $0x1d88] sm:$0xff]  }
 0x3ba   : > { %11929 = vmatprep.mubr.bf16.mxu0 %v16250_v30 }
 0x3bb   : > { %18210 = vmatpush3.bf16.msra.mxu0 %v19567_v41  ;;  %18238 = vmatpush3.bf16.msra.mxu1 %v19568_v3  ;;  %v23444_v13 = vadd.f32 %v17866_v42, %v17838_v8  ;;  %v19593_v3 = vld [vmem:[%s23873_s1 + $0x1d78] sm:$0xff]   ;;  %v19599_v8 = vld [vmem:[%s23873_s1 + $0x1d30] sm:$0xff]  }
 0x3bc   : > { %18211 = vmatprep.subr.bf16.mxu0 %v19569_v45  ;;  %18239 = vmatprep.subr.bf16.mxu1 %v19570_v9  ;;  %v19596_v45 = vld [vmem:[%s23873_s1 + $0x1db8] sm:$0xff]   ;;  %v23529_v42 = vld [vmem:[%s19849_s12 + $0x130] sm:$0xff] }
 0x3bd   : > { %v16255_v19 = vcombine.low %v23526_v20, %v23529_v42  ;;  %v16256_v40 = vcombine.high %v23526_v20, %v23529_v42 }
 0x3bf   : > { %18212 = vmatpush3.bf16.msra.mxu0 %v19571_v58  ;;  %18240 = vmatpush3.bf16.msra.mxu1 %v19572_v33 }
 0x3c0   : > { %18213 = vmatprep.subr.bf16.mxu0 %v19577_v34  ;;  %18241 = vmatprep.subr.bf16.mxu1 %v19578_v21  ;;  %v19607_v21 = vld [vmem:[%s23873_s1 + $0x1d60] sm:$0xff]  }
 0x3c3   : > { %18214 = vmatpush3.bf16.msra.mxu0 %v19579_v52  ;;  %18242 = vmatpush3.bf16.msra.mxu1 %v19580_v29  ;;  %v19608_v29 = vld [vmem:[%s23873_s1 + $0x1de0] sm:$0xff]  }
 0x3c4   : > { %18215 = vmatprep.subr.bf16.mxu0 %v19581_v61  ;;  %18243 = vmatprep.subr.bf16.mxu1 %v19582_v5  ;;  %v19610_v61 = vld [vmem:[%s23873_s1 + $0x1da0] sm:$0xff]   ;;  %v19611_v5 = vld [vmem:[%s23873_s1 + $0x1d58] sm:$0xff]  }
 0x3c7   : > { %18216 = vmatpush3.bf16.msra.mxu0 %v19583_v1  ;;  %18244 = vmatpush3.bf16.msra.mxu1 %v19584_v26  ;;  %v19612_v1 = vld [vmem:[%s23873_s1 + $0x1dd8] sm:$0xff]  }
 0x3c8   : > { %18217 = vmatprep.subr.bf16.mxu0 %v19585_v60  ;;  %18245 = vmatprep.subr.bf16.mxu1 %v19586_v23  ;;  %v19614_v26 = vld [vmem:[%s23873_s1 + $0x1d98] sm:$0xff]   ;;  %v19619_v23 = vld [vmem:[%s23873_s1 + $0x1dd0] sm:$0xff]  }
 0x3c9   : > { %v19615_v60 = vld [vmem:[%s19849_s12 + $0x258] ss:$24 sps:$4 sm:$0xff]  }
 0x3ca   : > { %v17883_v24 = vpop.f32.mrf.mxu0 }
 0x3cb   : > { %18218 = vmatpush3.bf16.msra.mxu0 %v19587_v18 }
 0x3cc   : > { %v17911_v44 = vpop.f32.mrf.mxu1  ;;  %v17884_v39 = vpop.f32.mrf.mxu0  ;;  %18259 = vmatprep.subr.bf16.mxu0 %v19593_v3 }
 0x3cd   : > { %v17885_v36 = vadd.f32 %v17884_v39, %v17883_v24 }
 0x3ce   : > { %v17912_v49 = vpop.f32.mrf.mxu1  ;;  %v17886_v62 = vpop.f32.mrf.mxu0  ;;  %11930 = vmatmul.mubr.bf16.vlgmr.msra.gmra.mxu0 %v16249_v56  ;;  %v19623_v56 = vld [vmem:[%s23873_s1 + $0x1dc8] sm:$0xff]  }
 0x3cf   : > { %v23467_v48 = vadd.f32 %v17912_v49, %v17911_v44  ;;  %v9468_v47 = vadd.f32 %v17885_v36, %v23351_v4  ;;  %v19588_v4 = vld [vmem:[%s23873_s1 + $0x1c80] sm:$0xff]   ;;  %11937 = vmatprep.mubr.bf16.mxu0 %v16256_v40  ;;  %v19613_v36 = vld [vmem:[%s23873_s1 + $0x1d18] sm:$0xff]  }
 0x3d0   : > { %v17914_v31 = vpop.f32.mrf.mxu1  ;;  %v17887_v10 = vpop.f32.mrf.mxu0  ;;  %18246 = vmatpush3.bf16.msra.mxu1 %v19588_v4  ;;  %v19622_v4 = vld [vmem:[%s23873_s1 + $0x1d48] sm:$0xff]  }
 0x3d1   : > { %v23480_v0 = vadd.f32 %v9468_v47, %v23233_v37  ;;  %v17888_v25 = vadd.f32 %v17887_v10, %v17886_v62  ;;  %18287 = vmatprep.subr.bf16.mxu1 %v19594_v16  ;;  %v19617_v47 = vld [vmem:[%s19849_s12 + $0x25c] ss:$24 sps:$4 sm:$0xff]  }
 0x3d2   : > { %v17915_v17 = vpop.f32.mrf.mxu1  ;;  %v17889_v37 = vpop.f32.mrf.mxu0  ;;  %v19620_v10 = vld [vmem:[%s23873_s1 + $0x1d10] sm:$0xff]  }
 0x3d3   : > { %v23486_v7 = vadd.f32 %v17915_v17, %v17914_v31  ;;  %v9471_v41 = vadd.f32 %v17888_v25, %v23368_v54  ;;  %v19595_v54 = vld [vmem:[%s23873_s1 + $0x1d38] sm:$0xff]   ;;  %12448 = vmatmul.mubr.bf16.vlgmr.msra.gmra.mxu1 %v16413_v28  ;;  %v19618_v31 = vld [vmem:[%s23873_s1 + $0x1d50] sm:$0xff]  }
 0x3d4   : > { %v17890_v32 = vpop.f32.mrf.mxu0  ;;  %18260 = vmatpush3.bf16.msra.mxu0 %v19595_v54  ;;  %18288 = vmatpush3.bf16.msra.mxu1 %v19596_v45  ;;  %v17917_v52 = vpop.f32.mrf.mxu1  ;;  %v19621_v25 = vld [vmem:[%s23873_s1 + $0x1d90] sm:$0xff]  }
 0x3d5   : > { %v23501_v11 = vadd.f32 %v9471_v41, %v23251_v55  ;;  %v17891_v2 = vadd.f32 %v17890_v32, %v17889_v37  ;;  %v19597_v55 = vld [vmem:[%s23873_s1 + $0x1d70] sm:$0xff]   ;;  %18289 = vmatprep.subr.bf16.mxu1 %v19598_v57  ;;  %12455 = vmatprep.mubr.bf16.mxu1 %v19617_v47  ;;  %v19624_v41 = vld [vmem:[%s23873_s1 + $0x1d08] sm:$0xff]   ;;  %v19626_v32 = vld [vmem:[%s23873_s1 + $0x1d40] sm:$0xff]  }
 0x3d6   : > { %v17892_v51 = vpop.f32.mrf.mxu0  ;;  %18261 = vmatprep.subr.bf16.mxu0 %v19597_v55  ;;  %11938 = vmatmul.mubr.bf16.gmra.mxu0 %v16255_v19  ;;  %v17918_v24 = vpop.f32.mrf.mxu1  ;;  %v19629_v57 = vld [vmem:[%s23873_s1 + $0x1d80] sm:$0xff]  }
 0x3d7   : > { %v9476_v9 = vadd.f32 %v17891_v2, %v23421_v22  ;;  %v19600_v22 = vld [vmem:[%s23873_s1 + $0x1db0] sm:$0xff]   ;;  %v23563_v44 = vadd.f32 %v17918_v24, %v17917_v52  ;;  %v19627_v2 = vld [vmem:[%s23873_s1 + $0x1dc0] sm:$0xff]  }
 0x3d8   : > { %v17893_v58 = vpop.f32.mrf.mxu0  ;;  %18262 = vmatpush3.bf16.msra.mxu0 %v19599_v8  ;;  %18290 = vmatpush3.bf16.msra.mxu1 %v19600_v22  ;;  %v17920_v39 = vpop.f32.mrf.mxu1  ;;  %v16307_v8 = vld [vmem:[%s19849_s12 + $0x238] sm:$0xff]  ;;  %v19638_v24 = vld [vmem:[%s23873_s1 + $0x1e70] sm:$0xff]  }
 0x3d9   : > { %v23520_v27 = vadd.f32 %v9476_v9, %v23284_v53  ;;  %v17894_v33 = vadd.f32 %v17893_v58, %v17892_v51  ;;  %v19603_v53 = vld [vmem:[%s23873_s1 + $0x1d68] sm:$0xff]   ;;  %18291 = vmatprep.subr.bf16.mxu1 %v19604_v12  ;;  %v16306_v58 = vld [vmem:[%s19849_s12 + $0x230] sm:$0xff]  ;;  %v16418_v12 = vcombine.high %v16307_v8, %v23280_v38 }
 0x3da   : > { %18263 = vmatprep.subr.bf16.mxu0 %v19603_v53  ;;  %v17921_v49 = vpop.f32.mrf.mxu1  ;;  %v16415_v40 = vcombine.low %v16306_v58, %v23267_v15  ;;  %v16416_v53 = vcombine.high %v16306_v58, %v23267_v15  ;;  %v19636_v15 = vld [vmem:[%s23873_s1 + $0x1e38] sm:$0xff]   ;;  %v19664_v58 = vld [vmem:[%s23873_s1 + $0x1e48] sm:$0xff]  }
 0x3db   : > { %v9479_v46 = vadd.f32 %v17894_v33, %v23444_v13  ;;  %v19606_v13 = vld [vmem:[%s23873_s1 + $0x1da8] sm:$0xff]   ;;  %v23577_v62 = vadd.f32 %v17921_v49, %v17920_v39  ;;  %12456 = vmatmul.mubr.bf16.gmra.mxu1 %v19615_v60  ;;  %v19642_v60 = vld [vmem:[%s19849_s12 + $0x260] ss:$24 sps:$4 sm:$0xff]  }
 0x3dc   : > { %18264 = vmatpush3.bf16.msra.mxu0 %v19605_v43  ;;  %18292 = vmatpush3.bf16.msra.mxu1 %v19606_v13  ;;  %v19634_v43 = vld [vmem:[%s23873_s1 + $0x1e78] sm:$0xff]  }
 0x3dd   : > { %v23546_v34 = vadd.f32 %v9479_v46, %v23301_v6  ;;  %18265 = vmatprep.subr.bf16.mxu0 %v19607_v21  ;;  %v19609_v6 = vld [vmem:[%s23873_s1 + $0x1d20] sm:$0xff]   ;;  %18293 = vmatprep.subr.bf16.mxu1 %v19608_v29  ;;  %v16417_v46 = vcombine.low %v16307_v8, %v23280_v38  ;;  %v19637_v38 = vld [vmem:[%s23873_s1 + $0x1eb8] sm:$0xff]  }
 0x3de   : > { %12496 = vmatprep.mubr.bf16.mxu0 %v16416_v53  ;;  %12545 = vmatprep.mubr.bf16.mxu1 %v16418_v12 }
 0x3e0   : > { %18266 = vmatpush3.bf16.msra.mxu0 %v19609_v6  ;;  %18294 = vmatpush3.bf16.msra.mxu1 %v19610_v61 }
 0x3e1   : > { %18267 = vmatprep.subr.bf16.mxu0 %v19611_v5  ;;  %18295 = vmatprep.subr.bf16.mxu1 %v19612_v1  ;;  %v19639_v5 = vld [vmem:[%s23873_s1 + $0x1ef0] sm:$0xff]  }
 0x3e2   : > { %v19640_v1 = vld [vmem:[%s23873_s1 + $0x1e30] sm:$0xff]  }
 0x3e4   : > { %18268 = vmatpush3.bf16.msra.mxu0 %v19613_v36  ;;  %18296 = vmatpush3.bf16.msra.mxu1 %v19614_v26 }
 0x3e5   : > { %18269 = vmatprep.subr.bf16.mxu0 %v19618_v31  ;;  %18297 = vmatprep.subr.bf16.mxu1 %v19619_v23  ;;  %v19644_v23 = vld [vmem:[%s19849_s12 + $0x264] ss:$24 sps:$4 sm:$0xff]  }
 0x3e8   : > { %18270 = vmatpush3.bf16.msra.mxu0 %v19620_v10  ;;  %18298 = vmatpush3.bf16.msra.mxu1 %v19621_v25 }
 0x3e9   : > { %18271 = vmatprep.subr.bf16.mxu0 %v19622_v4  ;;  %18299 = vmatprep.subr.bf16.mxu1 %v19623_v56  ;;  %v19710_v4 = vmov 0   ;;  %v19649_v56 = vld [vmem:[%s19849_s12 + $0x26c] ss:$24 sps:$4 sm:$0xff]  }
 0x3ea   : > { %18426 = vset.pattern.permute.xlu1 %v19710_v4  ;;  %18425 = vset.pattern.permute.xlu0 %v19710_v4 }
 0x3ec   : > { %v17939_v18 = vpop.f32.mrf.mxu0  ;;  %v17967_v17 = vpop.f32.mrf.mxu1  ;;  %18272 = vmatpush3.bf16.msra.mxu0 %v19624_v41  ;;  %18300 = vmatpush3.bf16.msra.mxu1 %v19625_v59  ;;  %v19654_v59 = vld [vmem:[%s23873_s1 + $0x1e20] sm:$0xff]  }
 0x3ed   : > { %18273 = vmatprep.subr.bf16.mxu0 %v19626_v32  ;;  %18301 = vmatprep.subr.bf16.mxu1 %v19627_v2  ;;  %v19658_v32 = vld [vmem:[%s23873_s1 + $0x1e18] sm:$0xff]   ;;  %v19660_v2 = vld [vmem:[%s23873_s1 + $0x1e50] sm:$0xff]  }
 0x3ee   : > { %v17940_v63 = vpop.f32.mrf.mxu0  ;;  %v17968_v50 = vpop.f32.mrf.mxu1 }
 0x3ef   : > { %v17941_v30 = vadd.f32 %v17940_v63, %v17939_v18  ;;  %v17969_v37 = vadd.f32 %v17968_v50, %v17967_v17  ;;  %v19645_v18 = vld [vmem:[%s23873_s1 + $0x1e68] sm:$0xff]  }
 0x3f0   : > { %v17942_v28 = vpop.f32.mrf.mxu0  ;;  %v17970_v16 = vpop.f32.mrf.mxu1  ;;  %18302 = vmatpush3.bf16.msra.mxu1 %v19629_v57  ;;  %v19647_v63 = vld [vmem:[%s19849_s12 + $0x268] ss:$24 sps:$4 sm:$0xff]  }
 0x3f1   : > { %v10035_v3 = vadd.f32 %v17941_v30, %v23467_v48  ;;  %v19628_v48 = vld [vmem:[%s23873_s1 + $0x1d00] sm:$0xff]   ;;  %v19651_v50 = vld [vmem:[%s23873_s1 + $0x1ea8] sm:$0xff]  }
 0x3f2   : > { %v17943_v54 = vpop.f32.mrf.mxu0  ;;  %v17971_v55 = vpop.f32.mrf.mxu1  ;;  %18274 = vmatpush3.bf16.msra.mxu0 %v19628_v48 }
 0x3f3   : > { %v10084_v45 = vadd.f32 %v17969_v37, %v10035_v3  ;;  %v17944_v51 = vadd.f32 %v17943_v54, %v17942_v28  ;;  %v17972_v9 = vadd.f32 %v17971_v55, %v17970_v16  ;;  %18315 = vmatprep.subr.bf16.mxu0 %v19634_v43  ;;  %12546 = vmatmul.mubr.bf16.vlgmr.msra.gmra.mxu1 %v16417_v46  ;;  %v19652_v37 = vld [vmem:[%s23873_s1 + $0x1e60] sm:$0xff]   ;;  %v19656_v3 = vld [vmem:[%s23873_s1 + $0x1e58] sm:$0xff]   ;;  %v19662_v55 = vld [vmem:[%s23873_s1 + $0x1e10] sm:$0xff]  }
 0x3f4   : > { %v17945_v19 = vpop.f32.mrf.mxu0  ;;  %v17973_v29 = vpop.f32.mrf.mxu1  ;;  %12553 = vmatprep.mubr.bf16.mxu1 %v19649_v56  ;;  %v19653_v28 = vld [vmem:[%s23873_s1 + $0x1ee0] sm:$0xff]   ;;  %v19657_v16 = vld [vmem:[%s23873_s1 + $0x1ed8] sm:$0xff]   ;;  %v19666_v46 = vld [vmem:[%s23873_s1 + $0x1e08] sm:$0xff]  }
 0x3f5   : > { %v23621_v33 = vadd.f32 %v10084_v45, %v23480_v0  ;;  %v10038_v22 = vadd.f32 %v17944_v51, %v23486_v7  ;;  %v19635_v0 = vld [vmem:[%s23873_s1 + $0x1ef8] sm:$0xff]   ;;  %12497 = vmatmul.mubr.bf16.vlgmr.msra.gmra.mxu0 %v16415_v40  ;;  %v19661_v45 = vld [vmem:[%s23873_s1 + $0x1ed0] sm:$0xff]   ;;  %v19667_v43 = vld [vmem:[%s23873_s1 + $0x1e88] sm:$0xff]  }
 0x3f6   : > { %v17946_v13 = vpop.f32.mrf.mxu0  ;;  %18343 = vmatprep.subr.bf16.mxu1 %v19635_v0  ;;  %18316 = vmatpush3.bf16.msra.mxu0 %v19636_v15  ;;  %v19659_v54 = vld [vmem:[%s23873_s1 + $0x1e98] sm:$0xff]   ;;  %v19683_v56 = vld [vmem:[%s23873_s1 + $0x1f20] sm:$0xff]  }
 0x3f7   : > { %v10087_v7 = vadd.f32 %v17972_v9, %v10038_v22  ;;  %v17947_v21 = vadd.f32 %v17946_v13, %v17945_v19  ;;  %18344 = vmatpush3.bf16.msra.mxu1 %v19637_v38  ;;  %18317 = vmatprep.subr.bf16.mxu0 %v19638_v24  ;;  %v19663_v9 = vld [vmem:[%s23873_s1 + $0x1e90] sm:$0xff]   ;;  %v19665_v19 = vld [vmem:[%s23873_s1 + $0x1ec8] sm:$0xff]   ;;  %v19668_v13 = vld [vmem:[%s23873_s1 + $0x1e40] sm:$0xff]  }
 0x3f8   : > { %v17948_v6 = vpop.f32.mrf.mxu0  ;;  %18345 = vmatprep.subr.bf16.mxu1 %v19639_v5  ;;  %12504 = vmatprep.mubr.bf16.mxu0 %v19644_v23  ;;  %v19669_v38 = vld [vmem:[%s23873_s1 + $0x1ec0] sm:$0xff]  }
 0x3f9   : > { %v23641_v52 = vadd.f32 %v10087_v7, %v23501_v11  ;;  %v10043_v61 = vadd.f32 %v17947_v21, %v23563_v44  ;;  %v17974_v11 = vpop.f32.mrf.mxu1  ;;  %v19641_v44 = vld [vmem:[%s23873_s1 + $0x1eb0] sm:$0xff]   ;;  %v19671_v24 = vld [vmem:[%s23873_s1 + $0x1e80] sm:$0xff]  }
 0x3fa   : > { %v17949_v39 = vpop.f32.mrf.mxu0  ;;  %v17975_v36 = vadd.f32 %v17974_v11, %v17973_v29  ;;  %18318 = vmatpush3.bf16.msra.mxu0 %v19640_v1  ;;  %v12571_v1 = vld [vmem:[%s19849_s12 + $0xf8] sm:$0xff] }
 0x3fb   : > { %v17950_v49 = vadd.f32 %v17949_v39, %v17948_v6  ;;  %v17976_v26 = vpop.f32.mrf.mxu1  ;;  %18346 = vmatpush3.bf16.msra.mxu1 %v19641_v44  ;;  %18319 = vmatprep.subr.bf16.mxu0 %v19645_v18  ;;  %v19670_v6 = vld [vmem:[%s23873_s1 + $0x1e00] sm:$0xff]   ;;  %v19676_v44 = vld [vmem:[%s23873_s1 + $0x1f78] sm:$0xff]  }
 0x3fc   : > { %v10092_v47 = vadd.f32 %v17975_v36, %v10043_v61  ;;  %12554 = vmatmul.mubr.bf16.gmra.mxu1 %v19647_v63  ;;  %v12570_v61 = vld [vmem:[%s19849_s12 + $0xf0] sm:$0xff]  ;;  %v16571_v36 = vcombine.low %v12571_v1, %v23436_v35  ;;  %v19687_v23 = vld [vmem:[%s19849_s12 + $0x124] ss:$24 sps:$4 sm:$0xff]   ;;  %v19685_v18 = vld [vmem:[%s19849_s12 + $0x120] ss:$24 sps:$4 sm:$0xff]  }
 0x3fd   : > { %v10046_v31 = vadd.f32 %v17950_v49, %v23577_v62  ;;  %v17977_v10 = vpop.f32.mrf.mxu1  ;;  %v19646_v62 = vld [vmem:[%s23873_s1 + $0x1ee8] sm:$0xff]   ;;  %12505 = vmatmul.mubr.bf16.gmra.mxu0 %v19642_v60  ;;  %v16569_v11 = vcombine.low %v12570_v61, %v23430_v14  ;;  %v16570_v39 = vcombine.high %v12570_v61, %v23430_v14  ;;  %v16572_v49 = vcombine.high %v12571_v1, %v23436_v35  ;;  %v19678_v14 = vld [vmem:[%s23873_s1 + $0x1f70] sm:$0xff]   ;;  %v19697_v61 = vld [vmem:[%s23873_s1 + $0x1f00] sm:$0xff]  }
 0x3fe   : > { %v23663_v25 = vadd.f32 %v10092_v47, %v23520_v27  ;;  %v17978_v17 = vadd.f32 %v17977_v10, %v17976_v26  ;;  %18347 = vmatprep.subr.bf16.mxu1 %v19646_v62  ;;  %v19650_v27 = vld [vmem:[%s23873_s1 + $0x1e28] sm:$0xff]   ;;  %v19677_v26 = vld [vmem:[%s23873_s1 + $0x1f38] sm:$0xff]   ;;  %v19679_v35 = vld [vmem:[%s23873_s1 + $0x1f30] sm:$0xff]  }
 0x3ff   : > { %18320 = vmatpush3.bf16.msra.mxu0 %v19650_v27  ;;  %18348 = vmatpush3.bf16.msra.mxu1 %v19651_v50  ;;  %v19680_v60 = vld [vmem:[%s23873_s1 + $0x1f68] sm:$0xff]   ;;  %v19684_v50 = vld [vmem:[%s23873_s1 + $0x1f58] sm:$0xff]  }
 0x400   : > { %v10095_v30 = vadd.f32 %v17978_v17, %v10046_v31  ;;  %18321 = vmatprep.subr.bf16.mxu0 %v19652_v37  ;;  %18349 = vmatprep.subr.bf16.mxu1 %v19653_v28  ;;  %v19681_v47 = vld [vmem:[%s23873_s1 + $0x1f28] sm:$0xff]   ;;  %v19682_v31 = vld [vmem:[%s23873_s1 + $0x1f60] sm:$0xff]  }
 0x401   : > { %13063 = vmatprep.mubr.bf16.mxu0 %v16570_v39  ;;  %13112 = vmatprep.mubr.bf16.mxu1 %v16572_v49  ;;  %v19690_v17 = vld [vmem:[%s19849_s12 + $0x12c] ss:$24 sps:$4 sm:$0xff]   ;;  %v19688_v62 = vld [vmem:[%s19849_s12 + $0x128] ss:$24 sps:$4 sm:$0xff]  }
 0x402   : > { %v23677_v41 = vadd.f32 %v10095_v30, %v23546_v34  ;;  %v19655_v34 = vld [vmem:[%s23873_s1 + $0x1ea0] sm:$0xff]  }
 0x403   : > { %18322 = vmatpush3.bf16.msra.mxu0 %v19654_v59  ;;  %18350 = vmatpush3.bf16.msra.mxu1 %v19655_v34 }
 0x404   : > { %18323 = vmatprep.subr.bf16.mxu0 %v19656_v3  ;;  %18351 = vmatprep.subr.bf16.mxu1 %v19657_v16  ;;  %v19691_v16 = vld [vmem:[%s23873_s1 + $0x1f18] sm:$0xff]  }
 0x407   : > { %18324 = vmatpush3.bf16.msra.mxu0 %v19658_v32  ;;  %18352 = vmatpush3.bf16.msra.mxu1 %v19659_v54 }
 0x408   : > { %18325 = vmatprep.subr.bf16.mxu0 %v19660_v2  ;;  %18353 = vmatprep.subr.bf16.mxu1 %v19661_v45  ;;  %v19692_v2 = vld [vmem:[%s23873_s1 + $0x1f50] sm:$0xff]  }
 0x40b   : > { %18326 = vmatpush3.bf16.msra.mxu0 %v19662_v55  ;;  %18354 = vmatpush3.bf16.msra.mxu1 %v19663_v9  ;;  %v12581_v55 = vld [vmem:[%s19849_s12 + $0x148] sm:$0xff] }
 0x40c   : > { %v17995_v51 = vpop.f32.mrf.mxu0  ;;  %v18023_v48 = vpop.f32.mrf.mxu1  ;;  %18327 = vmatprep.subr.bf16.mxu0 %v19664_v58  ;;  %18355 = vmatprep.subr.bf16.mxu1 %v19665_v19  ;;  %v13220_v58 = vld [vmem:[%s239_s24] sm:$0xff]  ;;  %v13223_v19 = vld [vmem:[%s239_s24 + $0x18] sm:$0xff] }
 0x40d   : > { %13226 = vperm.xlu0 %18425, %v13220_v58  }
 0x40e   : > { %v17996_v57 = vpop.f32.mrf.mxu0  ;;  %v18024_v22 = vpop.f32.mrf.mxu1 }
 0x40f   : > { %v17997_v8 = vadd.f32 %v17996_v57, %v17995_v51  ;;  %v18025_v40 = vadd.f32 %v18024_v22, %v18023_v48  ;;  %18328 = vmatpush3.bf16.msra.mxu0 %v19666_v46  ;;  %18356 = vmatpush3.bf16.msra.mxu1 %v19667_v43  ;;  %v12572_v51 = vld [vmem:[%s19849_s12 + $0x100] sm:$0xff]  ;;  %v13222_v48 = vld [vmem:[%s239_s24 + $0x10] sm:$0xff]  ;;  %v16580_v22 = vcombine.high %v23529_v42, %v12581_v55  ;;  %v19695_v43 = vld [vmem:[%s23873_s1 + $0x1f08] sm:$0xff]  }
 0x410   : > { %v17998_v53 = vpop.f32.mrf.mxu0  ;;  %v18026_v12 = vpop.f32.mrf.mxu1  ;;  %18329 = vmatprep.subr.bf16.mxu0 %v19668_v13  ;;  %18357 = vmatprep.subr.bf16.mxu1 %v19669_v38  ;;  %v16574_v57 = vcombine.high %v12572_v51, %v23526_v20  ;;  %v19696_v13 = vld [vmem:[%s23873_s1 + $0x1f40] sm:$0xff]  }
 0x411   : > { %v23727_v0 = vadd.f32 %v18025_v40, %v17997_v8  ;;  %13236 = vperm.xlu1 %18426, %v13222_v48   ;;  %v19693_v8 = vld [vmem:[%s23873_s1 + $0x1f10] sm:$0xff]   ;;  %v19694_v40 = vld [vmem:[%s23873_s1 + $0x1f48] sm:$0xff]  }
 0x412   : > { %v17999_v7 = vpop.f32.mrf.mxu0  ;;  %v18027_v21 = vpop.f32.mrf.mxu1 }
 0x413   : > { %v18000_v15 = vadd.f32 %v17999_v7, %v17998_v53  ;;  %v18028_v29 = vadd.f32 %v18027_v21, %v18026_v12  ;;  %18330 = vmatpush3.bf16.msra.mxu0 %v19670_v6  ;;  %18358 = vmatpush3.bf16.msra.mxu1 %v19671_v24  ;;  %v13221_v53 = vld [vmem:[%s239_s24 + $0x8] sm:$0xff] }
 0x414   : > { %18371 = vmatprep.subr.bf16.mxu0 %v19676_v44  ;;  %18399 = vmatprep.subr.bf16.mxu1 %v19676_v44  ;;  %v18001_v10 = vpop.f32.mrf.mxu0  ;;  %v18029_v4 = vpop.f32.mrf.mxu1  ;;  %v16573_v44 = vcombine.low %v12572_v51, %v23526_v20 }
 0x415   : > { %v23742_v5 = vadd.f32 %v18028_v29, %v18000_v15  ;;  %13241 = vperm.xlu1 %18426, %v13223_v19   ;;  %13231 = vperm.xlu0 %18425, %v13221_v53  }
 0x416   : > { %13064 = vmatmul.mubr.bf16.vlgmr.msra.gmra.mxu0 %v16569_v11  ;;  %13113 = vmatmul.mubr.bf16.vlgmr.msra.gmra.mxu1 %v16571_v36  ;;  %v18002_v63 = vpop.f32.mrf.mxu0  ;;  %v18030_v27 = vpop.f32.mrf.mxu1 }
 0x417   : > { %18372 = vmatpush3.bf16.msra.mxu0 %v19677_v26  ;;  %18407 = vmatpush3.bf16.msra.mxu1 %v19677_v26  ;;  %v18003_v30 = vadd.f32 %v18002_v63, %v18001_v10  ;;  %v18031_v37 = vadd.f32 %v18030_v27, %v18029_v4 }
 0x418   : > { %18373 = vmatprep.subr.bf16.mxu0 %v19678_v14  ;;  %18400 = vmatprep.subr.bf16.mxu1 %v19678_v14  ;;  %v18004_v28 = vpop.f32.mrf.mxu0  ;;  %v18032_v59 = vpop.f32.mrf.mxu1  ;;  %v16579_v14 = vcombine.low %v23529_v42, %v12581_v55 }
 0x419   : > { %13071 = vmatprep.mubr.bf16.mxu0 %v19687_v23  ;;  %13120 = vmatprep.mubr.bf16.mxu1 %v19690_v17  ;;  %v23781_v34 = vadd.f32 %v18031_v37, %v18003_v30 }
 0x41a   : > { %v18005_v3 = vpop.f32.mrf.mxu0  ;;  %v18033_v54 = vpop.f32.mrf.mxu1 }
 0x41b   : > { %18374 = vmatpush3.bf16.msra.mxu0 %v19679_v35  ;;  %18408 = vmatpush3.bf16.msra.mxu1 %v19679_v35  ;;  %v18006_v32 = vadd.f32 %v18005_v3, %v18004_v28  ;;  %v18034_v45 = vadd.f32 %v18033_v54, %v18032_v59 }
 0x41c   : > { %18375 = vmatprep.subr.bf16.mxu0 %v19680_v60  ;;  %18401 = vmatprep.subr.bf16.mxu1 %v19680_v60 }
 0x41d   : > { %v10662_v9 = vadd.f32 %v18034_v45, %v18006_v32 }
 0x41e   : > { %13072 = vmatmul.mubr.bf16.gmra.mxu0 %v19685_v18  ;;  %13121 = vmatmul.mubr.bf16.gmra.mxu1 %v19688_v62 }
 0x41f   : > { %18376 = vmatpush3.bf16.msra.mxu0 %v19681_v47  ;;  %18409 = vmatpush3.bf16.msra.mxu1 %v19681_v47 }
 0x420   : > { %18377 = vmatprep.subr.bf16.mxu0 %v19682_v31  ;;  %18402 = vmatprep.subr.bf16.mxu1 %v19682_v31 }
 0x421   : > { %13161 = vmatprep.mubr.bf16.mxu0 %v16574_v57  ;;  %13169 = vmatprep.mubr.bf16.mxu1 %v16580_v22 }
 0x423   : > { %18378 = vmatpush3.bf16.msra.mxu0 %v19683_v56  ;;  %18410 = vmatpush3.bf16.msra.mxu1 %v19683_v56 }
 0x424   : > { %18379 = vmatprep.subr.bf16.mxu0 %v19684_v50  ;;  %18403 = vmatprep.subr.bf16.mxu1 %v19684_v50 }
 0x427   : > { %18380 = vmatpush3.bf16.msra.mxu0 %v19691_v16  ;;  %18411 = vmatpush3.bf16.msra.mxu1 %v19691_v16 }
 0x428   : > { %18381 = vmatprep.subr.bf16.mxu0 %v19692_v2  ;;  %18404 = vmatprep.subr.bf16.mxu1 %v19692_v2 }
 0x42b   : > { %18382 = vmatpush3.bf16.msra.mxu0 %v19693_v8  ;;  %18412 = vmatpush3.bf16.msra.mxu1 %v19693_v8 }
 0x42c   : > { %v18051_v46 = vpop.f32.mrf.mxu0  ;;  %18383 = vmatprep.subr.bf16.mxu0 %v19694_v40  ;;  %18405 = vmatprep.subr.bf16.mxu1 %v19694_v40 }
 0x42e   : > { %v18079_v12 = vpop.f32.mrf.mxu1  ;;  %v18052_v7 = vpop.f32.mrf.mxu0 }
 0x42f   : > { %v18053_v15 = vadd.f32 %v18052_v7, %v18051_v46  ;;  %18384 = vmatpush3.bf16.msra.mxu0 %v19695_v43  ;;  %18413 = vmatpush3.bf16.msra.mxu1 %v19695_v43 }
 0x430   : > { %v18080_v21 = vpop.f32.mrf.mxu1  ;;  %v18054_v29 = vpop.f32.mrf.mxu0  ;;  %18385 = vmatprep.subr.bf16.mxu0 %v19696_v13  ;;  %18406 = vmatprep.subr.bf16.mxu1 %v19696_v13 }
 0x431   : > { %v18081_v38 = vadd.f32 %v18080_v21, %v18079_v12  ;;  %v10700_v6 = vadd.f32 %v18053_v15, %v23727_v0 }
 0x432   : > { %v18082_v24 = vpop.f32.mrf.mxu1  ;;  %v18055_v11 = vpop.f32.mrf.mxu0 }
 0x433   : > { %v10714_v39 = vadd.f32 %v10700_v6, %v23621_v33  ;;  %v18056_v1 = vadd.f32 %v18055_v11, %v18054_v29  ;;  %18386 = vmatpush3.bf16.msra.mxu0 %v19697_v61  ;;  %18414 = vmatpush3.bf16.msra.mxu1 %v19697_v61 }
 0x434   : > { %v18083_v36 = vpop.f32.mrf.mxu1  ;;  %v18057_v0 = vpop.f32.mrf.mxu0 }
 0x435   : > { %v18084_v49 = vadd.f32 %v18083_v36, %v18082_v24  ;;  %v10703_v26 = vadd.f32 %v18056_v1, %v23742_v5 }
 0x436   : > { %v18058_v60 = vpop.f32.mrf.mxu0  ;;  %13162 = vmatmul.mubr.bf16.vlgmr.msra.gmra.mxu0 %v16573_v44  ;;  %13170 = vmatmul.mubr.bf16.vlgmr.msra.gmra.mxu1 %v16579_v14  ;;  %v18085_v17 = vpop.f32.mrf.mxu1 }
 0x437   : > { %v10715_v35 = vadd.f32 %v10703_v26, %v23641_v52  ;;  %v18059_v47 = vadd.f32 %v18058_v60, %v18057_v0 }
 0x438   : > { %v18060_v31 = vpop.f32.mrf.mxu0  ;;  %v18086_v4 = vpop.f32.mrf.mxu1 }
 0x439   : > { %v10708_v33 = vadd.f32 %v18059_v47, %v23781_v34  ;;  %v18087_v42 = vadd.f32 %v18086_v4, %v18085_v17 }
 0x43a   : > { %v18061_v23 = vpop.f32.mrf.mxu0  ;;  %v18088_v62 = vpop.f32.mrf.mxu1 }
 0x43b   : > { %v10716_v10 = vadd.f32 %v10708_v33, %v23663_v25  ;;  %v18062_v20 = vadd.f32 %v18061_v23, %v18060_v31 }
 0x43c   : > { %v18089_v63 = vpop.f32.mrf.mxu1 }
 0x43d   : > { %v10711_v18 = vadd.f32 %v18062_v20, %v10662_v9  ;;  %v18090_v52 = vadd.f32 %v18089_v63, %v18088_v62 }
 0x43f   : > { %v10717_v5 = vadd.f32 %v10711_v18, %v23677_v41 }
 0x44e   : > { %v18107_v56 = vpop.f32.mrf.mxu0  ;;  %v18135_v30 = vpop.f32.mrf.mxu1 }
 0x450   : > { %v18108_v27 = vpop.f32.mrf.mxu0  ;;  %v18136_v37 = vpop.f32.mrf.mxu1 }
 0x451   : > { %v18109_v50 = vadd.f32 %v18108_v27, %v18107_v56  ;;  %v18137_v28 = vadd.f32 %v18136_v37, %v18135_v30 }
 0x452   : > { %v18110_v59 = vpop.f32.mrf.mxu0  ;;  %v18138_v3 = vpop.f32.mrf.mxu1 }
 0x453   : > { %v11267_v34 = vadd.f32 %v18109_v50, %v18081_v38 }
 0x454   : > { %v18111_v25 = vpop.f32.mrf.mxu0  ;;  %v18139_v54 = vpop.f32.mrf.mxu1 }
 0x455   : > { %v11316_v16 = vadd.f32 %v18137_v28, %v11267_v34  ;;  %v18112_v32 = vadd.f32 %v18111_v25, %v18110_v59  ;;  %v18140_v41 = vadd.f32 %v18139_v54, %v18138_v3 }
 0x456   : > { %v18113_v51 = vpop.f32.mrf.mxu0 }
 0x457   : > { %v23822_v2 = vadd.f32 %v11316_v16, %v10714_v39  ;;  %v11270_v45 = vadd.f32 %v18112_v32, %v18084_v49 }
 0x458   : > { %v18114_v48 = vpop.f32.mrf.mxu0 }
 0x459   : > { %23878 = vst [vmem:[#allocation3_spill] sm:$0xff] %v23822_v2  ;;  %v11319_v55 = vadd.f32 %v18140_v41, %v11270_v45  ;;  %v18115_v9 = vadd.f32 %v18114_v48, %v18113_v51  ;;  %v18141_v58 = vpop.f32.mrf.mxu1 }
 0x45a   : > { %v18116_v8 = vpop.f32.mrf.mxu0 }
 0x45b   : > { %v23824_v57 = vadd.f32 %v11319_v55, %v10715_v35  ;;  %v11275_v22 = vadd.f32 %v18115_v9, %v18087_v42  ;;  %v18142_v19 = vpop.f32.mrf.mxu1 }
 0x45c   : > { %v18117_v40 = vpop.f32.mrf.mxu0  ;;  %v18143_v53 = vadd.f32 %v18142_v19, %v18141_v58 }
 0x45d   : > { %23879 = vst [vmem:[#allocation4_spill] sm:$0xff] %v23824_v57  ;;  %v18118_v46 = vadd.f32 %v18117_v40, %v18116_v8  ;;  %v18144_v12 = vpop.f32.mrf.mxu1 }
 0x45e   : > { %v11324_v43 = vadd.f32 %v18143_v53, %v11275_v22 }
 0x45f   : > { %v11278_v7 = vadd.f32 %v18118_v46, %v18090_v52  ;;  %v18145_v13 = vpop.f32.mrf.mxu1 }
 0x460   : > { %v23826_v15 = vadd.f32 %v11324_v43, %v10716_v10  ;;  %v18146_v21 = vadd.f32 %v18145_v13, %v18144_v12 }
 0x462   : > { %23880 = vst [vmem:[#allocation5_spill] sm:$0xff] %v23826_v15  ;;  %v11327_v38 = vadd.f32 %v18146_v21, %v11278_v7 }
 0x464   : > { %v23828_v29 = vadd.f32 %v11327_v38, %v10717_v5 }
 0x466   : > { %23881 = vst [vmem:[#allocation6_spill] sm:$0xff] %v23828_v29 }
 0x46e   : > { %v18163_v6 = vpop.f32.mrf.mxu0  ;;  %v18191_v61 = vpop.f32.mrf.mxu1 }
 0x470   : > { %v18164_v24 = vpop.f32.mrf.mxu0  ;;  %v18192_v39 = vpop.f32.mrf.mxu1 }
 0x471   : > { %v18165_v13 = vadd.f32 %v18164_v24, %v18163_v6  ;;  %v18193_v21 = vadd.f32 %v18192_v39, %v18191_v61 }
 0x472   : > { %v23830_v11 = vpop.f32.mrf.mxu0  ;;  %v18194_v36 = vpop.f32.mrf.mxu1 }
 0x474   : > { %v18167_v1 = vpop.f32.mrf.mxu0  ;;  %v18195_v44 = vpop.f32.mrf.mxu1 }
 0x476   : > { %v18169_v49 = vpop.f32.mrf.mxu0  ;;  %v18197_v0 = vpop.f32.mrf.mxu1 }
 0x478   : > { %v18170_v26 = vpop.f32.mrf.mxu0  ;;  %v18198_v35 = vpop.f32.mrf.mxu1 }
 0x479   : > { %v18199_v15 = vadd.f32 %v18198_v35, %v18197_v0 }
 0x47a   : > { %v18172_v14 = vpop.f32.mrf.mxu0  ;;  %v18200_v47 = vpop.f32.mrf.mxu1 }
 0x47c   : > { %v18173_v60 = vpop.f32.mrf.mxu0  ;;  %v18201_v33 = vpop.f32.mrf.mxu1 }
 0x48e   : > { %v18219_v31 = vpop.f32.mrf.mxu0 }
 0x490   : > { %v18220_v23 = vpop.f32.mrf.mxu0 }
 0x491   : > { %v18221_v29 = vadd.f32 %v18220_v23, %v18219_v31 }
 0x492   : > { %v18222_v20 = vpop.f32.mrf.mxu0 }
 0x493   : > { %v18247_v10 = vpop.f32.mrf.mxu1 }
 0x494   : > { %v18223_v5 = vpop.f32.mrf.mxu0 }
 0x495   : > { %v18248_v18 = vpop.f32.mrf.mxu1 }
 0x496   : > { %v18225_v4 = vpop.f32.mrf.mxu0  ;;  %v18249_v31 = vadd.f32 %v18248_v18, %v18247_v10 }
 0x497   : > { %v23832_v17 = vpop.f32.mrf.mxu1 }
 0x498   : > { %23882 = vst [vmem:[#allocation7_spill] sm:$0xff] %v23832_v17  ;;  %v18226_v63 = vpop.f32.mrf.mxu0  ;;  %v18202_v17 = vadd.f32 %v18201_v33, %v18200_v47 }
 0x499   : > { %v23834_v42 = vpop.f32.mrf.mxu1  ;;  %v18227_v2 = vadd.f32 %v18226_v63, %v18225_v4 }
 0x49a   : > { %23883 = vst [vmem:[#allocation8_spill] sm:$0xff] %v23834_v42  ;;  %v18228_v56 = vpop.f32.mrf.mxu0  ;;  %v18174_v42 = vadd.f32 %v18173_v60, %v18172_v14 }
 0x49b   : > { %v18253_v62 = vpop.f32.mrf.mxu1 }
 0x49c   : > { %v18229_v27 = vpop.f32.mrf.mxu0 }
 0x49d   : > { %v18254_v52 = vpop.f32.mrf.mxu1 }
 0x49e   : > { %v18255_v0 = vadd.f32 %v18254_v52, %v18253_v62 }
 0x49f   : > { %v23836_v30 = vpop.f32.mrf.mxu1 }
 0x4a0   : > { %23884 = vst [vmem:[#allocation9_spill] sm:$0xff] %v23836_v30  ;;  %v18196_v30 = vadd.f32 %v18195_v44, %v18194_v36  ;;  %v23889_v44 = vld [vmem:[#allocation3_spill] sm:$0xff] }
 0x4a1   : > { %v23838_v37 = vpop.f32.mrf.mxu1  ;;  %v23891_v63 = vld [vmem:[#allocation8_spill] sm:$0xff] }
 0x4a2   : > { %23885 = vst [vmem:[#allocation10_spill] sm:$0xff] %v23838_v37  ;;  %v18168_v37 = vadd.f32 %v18167_v1, %v23830_v11  ;;  %v18230_v1 = vadd.f32 %v18229_v27, %v18228_v56  ;;  %v23894_v56 = vld [vmem:[#allocation5_spill] sm:$0xff] }
 0x4b3   : > { %v18303_v28 = vpop.f32.mrf.mxu1 }
 0x4b5   : > { %v18275_v50 = vpop.f32.mrf.mxu0  ;;  %v18304_v34 = vpop.f32.mrf.mxu1 }
 0x4b7   : > { %v18276_v59 = vpop.f32.mrf.mxu0  ;;  %v23840_v25 = vpop.f32.mrf.mxu1 }
 0x4b8   : > { %23886 = vst [vmem:[#allocation11_spill] sm:$0xff] %v23840_v25  ;;  %v18171_v25 = vadd.f32 %v18170_v26, %v18169_v49  ;;  %v18277_v6 = vadd.f32 %v18276_v59, %v18275_v50  ;;  %v11894_v26 = vadd.f32 %v18202_v17, %v18174_v42  ;;  %v18224_v49 = vadd.f32 %v18223_v5, %v18222_v20  ;;  %v23892_v20 = vld [vmem:[#allocation9_spill] sm:$0xff]  ;;  %v23893_v5 = vld [vmem:[#allocation10_spill] sm:$0xff] }
 0x4b9   : > { %v18278_v3 = vpop.f32.mrf.mxu0  ;;  %v23842_v32 = vpop.f32.mrf.mxu1 }
 0x4ba   : > { %23887 = vst [vmem:[#allocation12_spill] sm:$0xff] %v23842_v32  ;;  %v11883_v32 = vadd.f32 %v18193_v21, %v18165_v13  ;;  %v11891_v23 = vadd.f32 %v18199_v15, %v18171_v25  ;;  %v11886_v21 = vadd.f32 %v18196_v30, %v18168_v37  ;;  %v12499_v11 = vadd.f32 %v18277_v6, %v18249_v31 }
 0x4bb   : > { %v18279_v16 = vpop.f32.mrf.mxu0  ;;  %v18305_v15 = vadd.f32 %v18304_v34, %v18303_v28  ;;  %v11943_v37 = vadd.f32 %v18230_v1, %v11894_v26 }
 0x4bc   : > { %v18309_v41 = vpop.f32.mrf.mxu1  ;;  %v11932_v24 = vadd.f32 %v18221_v29, %v11883_v32  ;;  %v11940_v35 = vadd.f32 %v18227_v2, %v11891_v23  ;;  %v18280_v36 = vadd.f32 %v18279_v16, %v18278_v3  ;;  %v23890_v29 = vld [vmem:[#allocation7_spill] sm:$0xff]  ;;  %v11935_v17 = vadd.f32 %v18224_v49, %v11886_v21 }
 0x4bd   : > { %v18281_v54 = vpop.f32.mrf.mxu0  ;;  %v18252_v50 = vadd.f32 %v23891_v63, %v23890_v29  ;;  %v18258_v2 = vadd.f32 %v23893_v5, %v23892_v20  ;;  %v12548_v59 = vadd.f32 %v18305_v15, %v12499_v11  ;;  %v13227_v20 = vpop.permute.xlu0 %13226 }
 0x4be   : > { %v18310_v51 = vpop.f32.mrf.mxu1  ;;  %v11946_v14 = vadd.f32 %v11932_v24, %v23889_v44  ;;  %v11948_v27 = vadd.f32 %v11940_v35, %v23894_v56  ;;  %v16630_v44 = vld [vmem:[%s23875_s3] ss:$0 sm:$0xff] }
 0x4bf   : > { %v18282_v45 = vpop.f32.mrf.mxu0  ;;  %v18311_v47 = vadd.f32 %v18310_v51, %v18309_v41  ;;  %v12502_v3 = vadd.f32 %v18280_v36, %v18252_v50  ;;  %v23895_v16 = vld [vmem:[#allocation11_spill] sm:$0xff] }
 0x4c0   : > { %v23844_v48 = vpop.f32.mrf.mxu1  ;;  %v18283_v39 = vadd.f32 %v18282_v45, %v18281_v54  ;;  %v12562_v6 = vadd.f32 %v12548_v59, %v11946_v14 }
 0x4c1   : > { %v18284_v55 = vpop.f32.mrf.mxu0  ;;  %23888 = vst [vmem:[#allocation13_spill] sm:$0xff] %v23844_v48  ;;  %v23896_v32 = vld [vmem:[#allocation12_spill] sm:$0xff] }
 0x4c2   : > { %v18313_v58 = vpop.f32.mrf.mxu1  ;;  %v12507_v60 = vadd.f32 %v18283_v39, %v18255_v0  ;;  %v18308_v54 = vadd.f32 %v23896_v32, %v23895_v16  ;;  %v23899_v0 = vld [vmem:[#allocation6_spill] sm:$0xff]  ;;  %v13232_v32 = vpop.permute.xlu0 %13231 }
 0x4c3   : > { %v18285_v9 = vpop.f32.mrf.mxu0  ;;  %v11949_v35 = vadd.f32 %v11943_v37, %v23899_v0 }
 0x4c4   : > { %v18286_v33 = vadd.f32 %v18285_v9, %v18284_v55  ;;  %v12556_v28 = vadd.f32 %v18311_v47, %v12507_v60  ;;  %v12551_v24 = vadd.f32 %v18308_v54, %v12502_v3 }
 0x4c6   : > { %v12510_v34 = vadd.f32 %v18286_v33, %v18258_v2  ;;  %v12564_v31 = vadd.f32 %v12556_v28, %v11948_v27  ;;  %v13237_v2 = vpop.permute.xlu1 %13236 }
 0x4c8   : > { %v23897_v41 = vld [vmem:[#allocation13_spill] sm:$0xff] }
 0x4c9   : > { %v18314_v45 = vadd.f32 %v18313_v58, %v23897_v41  ;;  %v16629_v58 = vld [vmem:[%s23874_s2] ss:$0 sm:$0xff] }
 0x4ca   : > { %v13242_v54 = vpop.permute.xlu1 %13241 }
 0x4cb   : > { %v12559_v21 = vadd.f32 %v18314_v45, %v12510_v34 }
 0x4cd   : > { %v12565_v33 = vadd.f32 %v12559_v21, %v11949_v35 }
 0x4d6   : > { %v18331_v8 = vpop.f32.mrf.mxu0  ;;  %v18359_v22 = vpop.f32.mrf.mxu1 }
 0x4d8   : > { %v18332_v19 = vpop.f32.mrf.mxu0  ;;  %v18360_v40 = vpop.f32.mrf.mxu1 }
 0x4d9   : > { %v18333_v10 = vadd.f32 %v18332_v19, %v18331_v8  ;;  %v18361_v18 = vadd.f32 %v18360_v40, %v18359_v22 }
 0x4da   : > { %v18334_v53 = vpop.f32.mrf.mxu0  ;;  %v18362_v46 = vpop.f32.mrf.mxu1 }
 0x4db   : > { %v13115_v55 = vadd.f32 %v18361_v18, %v18333_v10 }
 0x4dc   : > { %v18335_v12 = vpop.f32.mrf.mxu0  ;;  %v18363_v43 = vpop.f32.mrf.mxu1 }
 0x4dd   : > { %v18336_v9 = vadd.f32 %v18335_v12, %v18334_v53  ;;  %v18364_v8 = vadd.f32 %v18363_v43, %v18362_v46  ;;  %v23898_v53 = vld [vmem:[#allocation4_spill] sm:$0xff] }
 0x4de   : > { %v18337_v7 = vpop.f32.mrf.mxu0  ;;  %v18365_v38 = vpop.f32.mrf.mxu1  ;;  %v11947_v46 = vadd.f32 %v11935_v17, %v23898_v53 }
 0x4df   : > { %v13118_v12 = vadd.f32 %v18364_v8, %v18336_v9 }
 0x4e0   : > { %v18338_v57 = vpop.f32.mrf.mxu0  ;;  %v18366_v48 = vpop.f32.mrf.mxu1  ;;  %v12563_v14 = vadd.f32 %v12551_v24, %v11947_v46 }
 0x4e1   : > { %v18339_v42 = vadd.f32 %v18338_v57, %v18337_v7  ;;  %v18367_v62 = vadd.f32 %v18366_v48, %v18365_v38 }
 0x4e2   : > { %v18340_v61 = vpop.f32.mrf.mxu0  ;;  %v18368_v13 = vpop.f32.mrf.mxu1 }
 0x4e3   : > { %v13123_v22 = vadd.f32 %v18367_v62, %v18339_v42 }
 0x4e4   : > { %v18341_v4 = vpop.f32.mrf.mxu0  ;;  %v18369_v30 = vpop.f32.mrf.mxu1 }
 0x4e5   : > { %v18342_v19 = vadd.f32 %v18341_v4, %v18340_v61  ;;  %v18370_v40 = vadd.f32 %v18369_v30, %v18368_v13 }
 0x4e7   : > { %v13126_v1 = vadd.f32 %v18370_v40, %v18342_v19 }
 0x4f6   : > { %v18387_v52 = vpop.f32.mrf.mxu0  ;;  %v18393_v25 = vpop.f32.mrf.mxu1 }
 0x4f8   : > { %v18388_v51 = vpop.f32.mrf.mxu0  ;;  %v18394_v48 = vpop.f32.mrf.mxu1 }
 0x4f9   : > { %v18389_v57 = vadd.f32 %v18388_v51, %v18387_v52  ;;  %v18395_v7 = vadd.f32 %v18394_v48, %v18393_v25 }
 0x4fa   : > { %v18390_v38 = vpop.f32.mrf.mxu0  ;;  %v18396_v23 = vpop.f32.mrf.mxu1 }
 0x4fb   : > { %v13164_v39 = vadd.f32 %v18389_v57, %v13115_v55  ;;  %v13172_v26 = vadd.f32 %v18395_v7, %v13123_v22 }
 0x4fc   : > { %v18391_v49 = vpop.f32.mrf.mxu0  ;;  %v18397_v13 = vpop.f32.mrf.mxu1 }
 0x4fd   : > { %v13178_v43 = vadd.f32 %v13164_v39, %v12562_v6  ;;  %v18392_v61 = vadd.f32 %v18391_v49, %v18390_v38  ;;  %v13180_v11 = vadd.f32 %v13172_v26, %v12564_v31  ;;  %v18398_v36 = vadd.f32 %v18397_v13, %v18396_v23 }
 0x4ff   : > { %v13167_v60 = vadd.f32 %v18392_v61, %v13118_v12  ;;  %v13197_v47 = vmul.f32 %v16629_v58, %v13178_v43  ;;  %v13175_v4 = vadd.f32 %v18398_v36, %v13126_v1  ;;  %v13199_v29 = vmul.f32 %v16629_v58, %v13180_v11 }
 0x501   : > { %v13179_v63 = vadd.f32 %v13167_v60, %v12563_v14  ;;  %v13208_v50 = vadd.f32 %v16630_v44, %v13197_v47  ;;  %v13181_v15 = vadd.f32 %v13175_v4, %v12565_v33  ;;  %v13210_v10 = vadd.f32 %v16630_v44, %v13199_v29 }
 0x503   : > { %v13212_v18 = vmax.f32 %v13208_v50, 0.0  ;;  %v13198_v30 = vmul.f32 %v16629_v58, %v13179_v63  ;;  %v13214_v17 = vmax.f32 %v13210_v10, 0.0  ;;  %v13200_v5 = vmul.f32 %v16629_v58, %v13181_v15 }
 0x505   : > { %v13216_v42 = vmin.f32 %v13212_v18, 20.0  ;;  %v13209_v62 = vadd.f32 %v16630_v44, %v13198_v30  ;;  %v13218_v52 = vmin.f32 %v13214_v17, 20.0  ;;  %v13211_v56 = vadd.f32 %v16630_v44, %v13200_v5 }
 0x507   : > { %v13244_v27 = vmul.f32 %v13227_v20, %v13216_v42  ;;  %v13213_v37 = vmax.f32 %v13209_v62, 0.0  ;;  %v13246_v59 = vmul.f32 %v13237_v2, %v13218_v52  ;;  %v13215_v3 = vmax.f32 %v13211_v56, 0.0 }
 0x509   : > { %13248 = vst [vmem:[%s244_s23] sm:$0xff] %v13244_v27  ;;  %v13217_v25 = vmin.f32 %v13213_v37, 20.0  ;;  %13250 = vst [vmem:[%s244_s23 + $0x10] sm:$0xff] %v13246_v59  ;;  %v13219_v16 = vmin.f32 %v13215_v3, 20.0 }
 0x50b   : > { %v13245_v28 = vmul.f32 %v13232_v32, %v13217_v25  ;;  %v13247_v34 = vmul.f32 %v13242_v54, %v13219_v16 }
 0x50d   : > { %13249 = vst [vmem:[%s244_s23 + $0x8] sm:$0xff] %v13245_v28  ;;  %13251 = vst [vmem:[%s244_s23 + $0x18] sm:$0xff] %v13247_v34 }
 0x50e PF: > { %s15_s18 = sadd.s32 1, %s19708_s18  }
 0x50f   : > { %p12_p4 = scmp.ge.s32.totalorder %s15_s18, 4  }
 0x511   :  { %14 = sbr.rel (!%p12_p4) target bundleno = 1 (0x1), region = 94 }

// kernel: deepspeech2_forward.9
= control target key start
LH: loop header
LB: loop body
LE: loop exit
PB: predicated region body
PF: predicated region fallthrough
CT: control target
= control target key end

     0   :  { %v27_v21 = vlaneseq  ;;  %s856_s3 = inlined_call_operand.vmem [shape: bf16[256,384], index: 3, kind: input, shape index: {}]   ;;  %s857_s0 = inlined_call_operand.vmem [shape: f32[16,256], index: 0, kind: input, shape index: {}]   ;;  %s858_s1 = inlined_call_operand.vmem [shape: f32[1,256], index: 1, kind: input, shape index: {}]   ;;  %s859_s2 = inlined_call_operand.vmem [shape: f32[1,256], index: 2, kind: input, shape index: {}]   ;;  %s860_s4 = inlined_call_operand.vmem [shape: f32[1,384], index: 4, kind: input, shape index: {}]   ;;  %s861_s5 = inlined_call_operand.vmem [shape: f32[16,384], index: 5, kind: output, shape index: {}]  }
   0x1   :  { %v564_v0 = vld [vmem:[%s856_s3 + $0xac] ss:$12 sps:$4 sm:$0xff]   ;;  %v566_v1 = vld [vmem:[%s856_s3 + $0xa8] ss:$12 sps:$4 sm:$0xff]   ;;  %v569_v3 = vld [vmem:[%s856_s3 + $0x90] ss:$12 sps:$4 sm:$0xff]  }
   0x2   :  { %400 = vmatprep.subr.bf16.mxu0 %v564_v0  ;;  %v567_v2 = vld [vmem:[%s856_s3 + $0x94] ss:$12 sps:$4 sm:$0xff]   ;;  %v570_v4 = vld [vmem:[%s856_s3 + $0x7c] ss:$12 sps:$4 sm:$0xff]   ;;  %v572_v5 = vld [vmem:[%s856_s3 + $0x78] ss:$12 sps:$4 sm:$0xff]  }
   0x3   :  { %401 = vmatpush1.bf16.msra.mxu0 %v566_v1  ;;  %v573_v6 = vld [vmem:[%s856_s3 + $0x64] ss:$12 sps:$4 sm:$0xff]   ;;  %v575_v8 = vld [vmem:[%s856_s3 + $0x60] ss:$12 sps:$4 sm:$0xff]   ;;  %v578_v13 = vld [vmem:[%s856_s3 + $0x48] ss:$12 sps:$4 sm:$0xff]  }
   0x4   :  { %402 = vmatprep.subr.bf16.mxu0 %v567_v2  ;;  %v584_v7 = vld [vmem:[%s856_s3 + $0x170] ss:$12 sps:$4 sm:$0xff]   ;;  %v576_v10 = vld [vmem:[%s856_s3 + $0x4c] ss:$12 sps:$4 sm:$0xff]   ;;  %v579_v14 = vld [vmem:[%s856_s3 + $0x34] ss:$12 sps:$4 sm:$0xff]  }
   0x5   :  { %542 = vmatprep.subr.bf16.mxu1 %v584_v7  ;;  %v586_v9 = vld [vmem:[%s856_s3 + $0xb0] ss:$12 sps:$4 sm:$0xff]   ;;  %v589_v11 = vld [vmem:[%s856_s3 + $0x158] ss:$12 sps:$4 sm:$0xff]   ;;  %v594_v15 = vld [vmem:[%s856_s3 + $0x140] ss:$12 sps:$4 sm:$0xff]  }
   0x6   :  { %543 = vmatpush3.bf16.msra.mxu1 %v586_v9  ;;  %v591_v12 = vld [vmem:[%s856_s3 + $0x98] ss:$12 sps:$4 sm:$0xff]   ;;  %v596_v16 = vld [vmem:[%s856_s3 + $0x80] ss:$12 sps:$4 sm:$0xff]   ;;  %v581_v17 = vld [vmem:[%s856_s3 + $0x30] ss:$12 sps:$4 sm:$0xff]  }
   0x7   :  { %403 = vmatpush1.bf16.msra.mxu0 %v569_v3  ;;  %544 = vmatprep.subr.bf16.mxu1 %v589_v11  ;;  %v599_v18 = vld [vmem:[%s856_s3 + $0x128] ss:$12 sps:$4 sm:$0xff]   ;;  %v585_v22 = vld [vmem:[%s856_s3 + $0x18] ss:$12 sps:$4 sm:$0xff]   ;;  %v604_v23 = vld [vmem:[%s856_s3 + $0x110] ss:$12 sps:$4 sm:$0xff]  }
   0x8   :  { %404 = vmatprep.subr.bf16.mxu0 %v570_v4  ;;  %v582_v19 = vld [vmem:[%s856_s3 + $0x1c] ss:$12 sps:$4 sm:$0xff]   ;;  %v587_v24 = vld [vmem:[%s856_s3 + $0x4] ss:$12 sps:$4 sm:$0xff]   ;;  %v736_v27 = vshrl.u32 %v27_v21, 7 }
   0x9   :  { %v601_v20 = vld [vmem:[%s856_s3 + $0x68] ss:$12 sps:$4 sm:$0xff]   ;;  %v606_v25 = vld [vmem:[%s856_s3 + $0x50] ss:$12 sps:$4 sm:$0xff]   ;;  %v609_v26 = vld [vmem:[%s856_s3 + $0xf8] ss:$12 sps:$4 sm:$0xff]  }
   0xa   :  { %545 = vmatpush3.bf16.msra.mxu1 %v591_v12  ;;  %v590_v28 = vld [vmem:[%s856_s3] ss:$12 sps:$4 sm:$0xff]   ;;  %v611_v30 = vld [vmem:[%s856_s3 + $0x38] ss:$12 sps:$4 sm:$0xff]   ;;  %v595_v32 = vld [vmem:[%s856_s3 + $0x168] ss:$12 sps:$4 sm:$0xff]  }
   0xb   :  { %405 = vmatpush1.bf16.msra.mxu0 %v572_v5  ;;  %546 = vmatprep.subr.bf16.mxu1 %v594_v15  ;;  %v592_v29 = vld [vmem:[%s856_s3 + $0x16c] ss:$12 sps:$4 sm:$0xff]   ;;  %v754_v33 = vsub.s32 0, %v736_v27  ;;  %v757_v34 = vsub.s32 1, %v736_v27  ;;  %v597_v35 = vld [vmem:[%s856_s3 + $0x154] ss:$12 sps:$4 sm:$0xff]  }
   0xc   :  { %406 = vmatprep.subr.bf16.mxu0 %v573_v6  ;;  %v614_v31 = vld [vmem:[%s856_s3 + $0xe0] ss:$12 sps:$4 sm:$0xff]   ;;  %v600_v36 = vld [vmem:[%s856_s3 + $0x150] ss:$12 sps:$4 sm:$0xff]   ;;  %v619_v38 = vld [vmem:[%s856_s3 + $0xc8] ss:$12 sps:$4 sm:$0xff]  }
   0xd   :  { %v616_v37 = vld [vmem:[%s856_s3 + $0x20] ss:$12 sps:$4 sm:$0xff]   ;;  %v24_v40 = vld [vmem:[%s857_s0 + $0x18] sm:$0xff]  ;;  %v621_v48 = vld [vmem:[%s856_s3 + $0x8] ss:$12 sps:$4 sm:$0xff]   ;;  %v139_v12 = vsub.s32 2, %v736_v27 }
   0xe   :  { %547 = vmatpush3.bf16.msra.mxu1 %v596_v16  ;;  %v22_v39 = vld [vmem:[%s857_s0 + $0x8] sm:$0xff]  ;;  %v25_v41 = vld [vmem:[%s858_s1] sm:$0x3]  ;;  %v23_v50 = vld [vmem:[%s857_s0 + $0x10] sm:$0xff] }
   0xf   :  { %407 = vmatpush1.bf16.msra.mxu0 %v575_v8  ;;  %548 = vmatprep.subr.bf16.mxu1 %v599_v18  ;;  %v41_v42 = vld [vmem:[%s859_s2] sm:$0x3]  ;;  %v602_v43 = vld [vmem:[%s856_s3 + $0x13c] ss:$12 sps:$4 sm:$0xff]   ;;  %v30_v44 = vrot.slane %v25_v41, %v754_v33  ;;  %v34_v45 = vrot.slane %v25_v41, %v757_v34  ;;  %v605_v55 = vld [vmem:[%s856_s3 + $0x138] ss:$12 sps:$4 sm:$0xff]  }
  0x10   :  { %408 = vmatprep.subr.bf16.mxu0 %v576_v10  ;;  %v46_v46 = vrot.slane %v41_v42, %v754_v33  ;;  %v50_v47 = vrot.slane %v41_v42, %v757_v34  ;;  %v21_v49 = vld [vmem:[%s857_s0] sm:$0xff]  ;;  %v612_v2 = vld [vmem:[%s856_s3 + $0x10c] ss:$12 sps:$4 sm:$0xff]   ;;  %v615_v5 = vld [vmem:[%s856_s3 + $0x108] ss:$12 sps:$4 sm:$0xff]  }
  0x11   :  { %v38_v51 = vmul.f32 %v34_v45, %v22_v39  ;;  %v40_v52 = vmul.f32 %v34_v45, %v24_v40  ;;  %v37_v53 = vmul.f32 %v30_v44, %v21_v49  ;;  %v39_v54 = vmul.f32 %v30_v44, %v23_v50  ;;  %v607_v56 = vld [vmem:[%s856_s3 + $0x124] ss:$12 sps:$4 sm:$0xff]   ;;  %v610_v1 = vld [vmem:[%s856_s3 + $0x120] ss:$12 sps:$4 sm:$0xff]   ;;  %v622_v8 = vld [vmem:[%s856_s3 + $0xdc] ss:$12 sps:$4 sm:$0xff]  }
  0x12   :  { %549 = vmatpush3.bf16.msra.mxu1 %v601_v20  ;;  %v617_v6 = vld [vmem:[%s856_s3 + $0xf4] ss:$12 sps:$4 sm:$0xff]   ;;  %v620_v7 = vld [vmem:[%s856_s3 + $0xf0] ss:$12 sps:$4 sm:$0xff]   ;;  %v624_v9 = vld [vmem:[%s856_s3 + $0xd8] ss:$12 sps:$4 sm:$0xff]  }
  0x13   :  { %409 = vmatpush1.bf16.msra.mxu0 %v578_v13  ;;  %550 = vmatprep.subr.bf16.mxu1 %v604_v23  ;;  %v54_v57 = vadd.f32 %v50_v47, %v38_v51  ;;  %v56_v58 = vadd.f32 %v50_v47, %v40_v52  ;;  %v53_v59 = vadd.f32 %v46_v46, %v37_v53  ;;  %v625_v10 = vld [vmem:[%s856_s3 + $0xc4] ss:$12 sps:$4 sm:$0xff]   ;;  %v627_v11 = vld [vmem:[%s856_s3 + $0xc0] ss:$12 sps:$4 sm:$0xff]  }
  0x14   :  { %410 = vmatprep.subr.bf16.mxu0 %v579_v14  ;;  %v55_v60 = vadd.f32 %v46_v46, %v39_v54  ;;  %v127_v13 = vld [vmem:[%s860_s4] sm:$0x7] }
  0x15   :  { %v58_v61 = vmax.f32 %v54_v57, 0.0  ;;  %v60_v62 = vmax.f32 %v56_v58, 0.0  ;;  %v57_v63 = vmax.f32 %v53_v59, 0.0  ;;  %v140_v15 = vrot.slane %v127_v13, %v139_v12 }
  0x16   :  { %551 = vmatpush3.bf16.msra.mxu1 %v606_v25  ;;  %v59_v0 = vmax.f32 %v55_v60, 0.0  ;;  %v132_v23 = vrot.slane %v127_v13, %v754_v33 }
  0x17   :  { %411 = vmatpush1.bf16.msra.mxu0 %v581_v17  ;;  %552 = vmatprep.subr.bf16.mxu1 %v609_v26  ;;  %v62_v3 = vpack.c.bf16 %v60_v62, %v58_v61 }
  0x18   :  { %412 = vmatprep.subr.bf16.mxu0 %v582_v19  ;;  %v61_v4 = vpack.c.bf16 %v59_v0, %v57_v63 }
  0x19   :  { %475 = vmatprep.mubr.bf16.mxu1 %v62_v3  ;;  %432 = vmatprep.mubr.bf16.mxu0 %v62_v3 }
  0x1a   :  { %553 = vmatpush3.bf16.msra.mxu1 %v611_v30 }
  0x1b   :  { %413 = vmatpush1.bf16.msra.mxu0 %v585_v22  ;;  %554 = vmatprep.subr.bf16.mxu1 %v614_v31 }
  0x1c   :  { %414 = vmatprep.subr.bf16.mxu0 %v587_v24  ;;  %v136_v24 = vrot.slane %v127_v13, %v757_v34 }
  0x1e   :  { %555 = vmatpush3.bf16.msra.mxu1 %v616_v37 }
  0x1f   :  { %415 = vmatpush1.bf16.msra.mxu0 %v590_v28  ;;  %556 = vmatprep.subr.bf16.mxu1 %v619_v38 }
  0x20   :  { %416 = vmatprep.subr.bf16.mxu0 %v592_v29 }
  0x22   :  { %557 = vmatpush3.bf16.msra.mxu1 %v621_v48 }
  0x23   :  { %417 = vmatpush2.bf16.msra.mxu0 %v595_v32 }
  0x24   :  { %418 = vmatprep.subr.bf16.mxu0 %v597_v35 }
  0x25   :  { %476 = vmatmul.mubr.bf16.vlgmr.msra.gmra.mxu1 %v61_v4 }
  0x27   :  { %419 = vmatpush2.bf16.msra.mxu0 %v600_v36 }
  0x28   :  { %420 = vmatprep.subr.bf16.mxu0 %v602_v43 }
  0x2b   :  { %421 = vmatpush2.bf16.msra.mxu0 %v605_v55 }
  0x2c   :  { %422 = vmatprep.subr.bf16.mxu0 %v607_v56 }
  0x2f   :  { %423 = vmatpush2.bf16.msra.mxu0 %v610_v1 }
  0x30   :  { %424 = vmatprep.subr.bf16.mxu0 %v612_v2 }
  0x33   :  { %425 = vmatpush2.bf16.msra.mxu0 %v615_v5 }
  0x34   :  { %426 = vmatprep.subr.bf16.mxu0 %v617_v6 }
  0x37   :  { %427 = vmatpush2.bf16.msra.mxu0 %v620_v7 }
  0x38   :  { %428 = vmatprep.subr.bf16.mxu0 %v622_v8 }
  0x3b   :  { %429 = vmatpush2.bf16.msra.mxu0 %v624_v9 }
  0x3c   :  { %430 = vmatprep.subr.bf16.mxu0 %v625_v10 }
  0x3f   :  { %431 = vmatpush2.bf16.msra.mxu0 %v627_v11 }
  0x42   :  { %433 = vmatmul.mubr.bf16.vlgmr.msra.gmra.mxu0 %v61_v4 }
  0xe5   :  { %v558_v14 = vpop.f32.mrf.mxu1 }
  0xe7   :  { %v559_v16 = vpop.f32.mrf.mxu1 }
  0xe8   :  { %v560_v17 = vadd.f32 %v559_v16, %v558_v14 }
  0xe9   :  { %v561_v18 = vpop.f32.mrf.mxu1 }
  0xea   :  { %v478_v19 = vadd.f32 %v560_v17, %v140_v15 }
  0xeb   :  { %v562_v20 = vpop.f32.mrf.mxu1 }
  0xec   :  { %486 = vst [vmem:[%s861_s5 + $0x10] sm:$0xff] %v478_v19  ;;  %v563_v21 = vadd.f32 %v562_v20, %v561_v18 }
  0xee   :  { %v481_v22 = vadd.f32 %v563_v21, %v140_v15 }
  0xf0   :  { %489 = vst [vmem:[%s861_s5 + $0x28] sm:$0xff] %v481_v22 }
 0x102   :  { %v434_v25 = vpop.f32.mrf.mxu0 }
 0x103   :  { %v435_v26 = vadd.f32 %v434_v25, %v132_v23 }
 0x104   :  { %v436_v27 = vpop.f32.mrf.mxu0 }
 0x105   :  { %484 = vst [vmem:[%s861_s5] sm:$0xff] %v435_v26  ;;  %v437_v28 = vadd.f32 %v436_v27, %v136_v24 }
 0x106   :  { %v438_v29 = vpop.f32.mrf.mxu0 }
 0x107   :  { %485 = vst [vmem:[%s861_s5 + $0x8] sm:$0xff] %v437_v28  ;;  %v439_v30 = vadd.f32 %v438_v29, %v132_v23 }
 0x108   :  { %v440_v31 = vpop.f32.mrf.mxu0 }
 0x109   :  { %487 = vst [vmem:[%s861_s5 + $0x18] sm:$0xff] %v439_v30  ;;  %v441_v32 = vadd.f32 %v440_v31, %v136_v24 }
 0x10b   :  { %488 = vst [vmem:[%s861_s5 + $0x20] sm:$0xff] %v441_v32 }

// kernel: deepspeech2_forward.10
= control target key start
LH: loop header
LB: loop body
LE: loop exit
PB: predicated region body
PF: predicated region fallthrough
CT: control target
= control target key end

     0   :  { %v3401_v1 = vmov 0.0   ;;  %v3402_v2 = vmov 0   ;;  %vm3403_vm0 = vmmov 0   ;;  %v92_v52 = vlaneseq  ;;  %s4315_s4 = inlined_call_operand.vmem [shape: bf16[128,384], index: 4, kind: input, shape index: {}]   ;;  %s4316_s2 = inlined_call_operand.vmem [shape: f32[8,2,1], index: 2, kind: input, shape index: {}, may-alias: {2,3}]   ;;  %s4317_s3 = inlined_call_operand.vmem [shape: f32[8,2,1], index: 3, kind: input, shape index: {}, may-alias: {2,3}]   ;;  %s4318_s0 = inlined_call_operand.vmem [shape: f32[8,2,384], index: 0, kind: input, shape index: {}, may-alias: {0,1}]   ;;  %s4319_s1 = inlined_call_operand.vmem [shape: f32[8,2,384], index: 1, kind: input, shape index: {}, may-alias: {0,1}]   ;;  %s4320_s5 = inlined_call_operand.vmem [shape: f32[1,384], index: 5, kind: input, shape index: {}]   ;;  %s4321_s6 = inlined_call_operand.vmem [shape: f32[8,2,128], index: 6, kind: output, shape index: {0}]   ;;  %s4322_s7 = inlined_call_operand.vmem [shape: f32[8,2,128], index: 7, kind: output, shape index: {1}]  }
   0x1   :  { %v3448_v0 = vld [vmem:[%s4315_s4 + $0xac] ss:$12 sps:$4 sm:$0xff]   ;;  %3019 = vmatprep.subr.bf16.mxu1 %v3401_v1  ;;  %91 = vst [vmem:[#allocation2] sm:$0x3] %v3401_v1  ;;  %375 = vmatprep.mubr.bf16.mxu0 %v3402_v2  ;;  %v3456_v3 = vld [vmem:[%s4315_s4 + $0xa8] ss:$12 sps:$4 sm:$0xff]  }
   0x2   :  { %3035 = vmatprep.mubr.msk.bf16.mxu1 %vm3403_vm0, %v3401_v1  ;;  %3184 = vset.pattern.permute.xlu1 %v3402_v2  ;;  %v3465_v4 = vld [vmem:[%s4315_s4 + $0x94] ss:$12 sps:$4 sm:$0xff]   ;;  %v3472_v5 = vld [vmem:[%s4315_s4 + $0x90] ss:$12 sps:$4 sm:$0xff]   ;;  %v3484_v7 = vld [vmem:[%s4315_s4 + $0x78] ss:$12 sps:$4 sm:$0xff]  }
   0x3   :  { %343 = vmatprep.subr.bf16.mxu0 %v3448_v0  ;;  %3183 = vset.pattern.permute.xlu0 %v3402_v2  ;;  %v3478_v6 = vld [vmem:[%s4315_s4 + $0x7c] ss:$12 sps:$4 sm:$0xff]   ;;  %v3490_v8 = vld [vmem:[%s4315_s4 + $0x64] ss:$12 sps:$4 sm:$0xff]   ;;  %v3496_v9 = vld [vmem:[%s4315_s4 + $0x60] ss:$12 sps:$4 sm:$0xff]  }
   0x4   :  { %344 = vmatpush1.bf16.msra.mxu0 %v3456_v3  ;;  %v3209_v10 = vld [vmem:[%s4315_s4 + $0xb0] ss:$12 sps:$4 sm:$0xff]   ;;  %v3505_v11 = vld [vmem:[%s4315_s4 + $0x4c] ss:$12 sps:$4 sm:$0xff]   ;;  %v3515_v13 = vld [vmem:[%s4315_s4 + $0x48] ss:$12 sps:$4 sm:$0xff]  }
   0x5   :  { %345 = vmatprep.subr.bf16.mxu0 %v3465_v4  ;;  %3020 = vmatpush3.bf16.msra.mxu1 %v3209_v10  ;;  %v3210_v12 = vld [vmem:[%s4315_s4 + $0x98] ss:$12 sps:$4 sm:$0xff]   ;;  %v3521_v14 = vld [vmem:[%s4315_s4 + $0x34] ss:$12 sps:$4 sm:$0xff]   ;;  %v3531_v16 = vld [vmem:[%s4315_s4 + $0x30] ss:$12 sps:$4 sm:$0xff]  }
   0x6   :  { %3021 = vmatprep.subr.bf16.mxu1 %v3401_v1  ;;  %v3211_v15 = vld [vmem:[%s4315_s4 + $0x80] ss:$12 sps:$4 sm:$0xff]   ;;  %v3543_v19 = vld [vmem:[%s4315_s4 + $0x1c] ss:$12 sps:$4 sm:$0xff]   ;;  %v3559_v23 = vld [vmem:[%s4315_s4 + $0x18] ss:$12 sps:$4 sm:$0xff]  }
   0x7   :  { %v2754_v17 = vld [vmem:[%s4316_s2 + $0x2] sm:$0x3]  ;;  %v496_v18 = vld [vmem:[%s4316_s2] sm:$0x3]  ;;  %v3212_v20 = vld [vmem:[%s4315_s4 + $0x68] ss:$12 sps:$4 sm:$0xff]  }
   0x8   :  { %346 = vmatpush1.bf16.msra.mxu0 %v3472_v5  ;;  %804 = vperm.xlu1 %3184, %v2754_v17   ;;  %v2755_v21 = vld [vmem:[%s4317_s3 + $0xc] sm:$0x3]  ;;  %v2724_v22 = vld [vmem:[%s4317_s3 + $0xe] sm:$0x3]  ;;  %v3565_v24 = vld [vmem:[%s4315_s4 + $0x4] ss:$12 sps:$4 sm:$0xff]  }
   0x9   :  { %347 = vmatprep.subr.bf16.mxu0 %v3478_v6  ;;  %3022 = vmatpush3.bf16.msra.mxu1 %v3210_v12  ;;  %v3570_v25 = vld [vmem:[%s4315_s4] ss:$12 sps:$4 sm:$0xff]   ;;  %v3213_v27 = vld [vmem:[%s4315_s4 + $0x50] ss:$12 sps:$4 sm:$0xff]   ;;  %v2787_v28 = vld [vmem:[%s4317_s3 + $0xa] sm:$0x3] }
   0xa   :  { %3023 = vmatprep.subr.bf16.mxu1 %v3401_v1  ;;  %501 = vperm.xlu0 %3183, %v496_v18   ;;  %v3572_v26 = vld [vmem:[#allocation2] sm:$0x3]  ;;  %v2786_v29 = vld [vmem:[%s4316_s2 + $0x4] sm:$0x3]  ;;  %v2819_v31 = vld [vmem:[%s4317_s3 + $0x8] sm:$0x3] }
   0xb   :  { %v3214_v30 = vld [vmem:[%s4315_s4 + $0x38] ss:$12 sps:$4 sm:$0xff]   ;;  %v166_v33 = vpack.c.bf16 %v3572_v26, %v3572_v26  ;;  %v3215_v34 = vld [vmem:[%s4315_s4 + $0x20] ss:$12 sps:$4 sm:$0xff]   ;;  %v2850_v36 = vld [vmem:[%s4316_s2 + $0x8] sm:$0x3] }
   0xc   :  { %348 = vmatpush1.bf16.msra.mxu0 %v3484_v7  ;;  %810 = vperm.xlu1 %3184, %v2755_v21   ;;  %v2818_v32 = vld [vmem:[%s4316_s2 + $0x6] sm:$0x3]  ;;  %v3216_v37 = vld [vmem:[%s4315_s4 + $0x8] ss:$12 sps:$4 sm:$0xff]   ;;  %v2883_v38 = vld [vmem:[%s4317_s3 + $0x4] sm:$0x3] }
   0xd   :  { %349 = vmatprep.subr.bf16.mxu0 %v3490_v8  ;;  %3024 = vmatpush3.bf16.msra.mxu1 %v3211_v15  ;;  %v2851_v35 = vld [vmem:[%s4317_s3 + $0x6] sm:$0x3]  ;;  %v2882_v39 = vld [vmem:[%s4316_s2 + $0xa] sm:$0x3]  ;;  %v2915_v40 = vld [vmem:[%s4317_s3 + $0x2] sm:$0x3] }
   0xe   :  { %3025 = vmatprep.subr.bf16.mxu1 %v3401_v1  ;;  %507 = vperm.xlu0 %3183, %v2724_v22   ;;  %v2914_v41 = vld [vmem:[%s4316_s2 + $0xc] sm:$0x3]  ;;  %v2623_v42 = vld [vmem:[%s4317_s3] sm:$0x3]  ;;  %v2945_v43 = vld [vmem:[%s4316_s2 + $0xe] sm:$0x3] }
   0xf   :  { %v3217_v44 = vld [vmem:[%s4315_s4 + $0xb0] ss:$12 sps:$4 sm:$0xff]   ;;  %v3218_v45 = vld [vmem:[%s4315_s4 + $0x98] ss:$12 sps:$4 sm:$0xff]   ;;  %v3219_v46 = vld [vmem:[%s4315_s4 + $0x80] ss:$12 sps:$4 sm:$0xff]  }
  0x10   :  { %350 = vmatpush1.bf16.msra.mxu0 %v3496_v9  ;;  %1114 = vperm.xlu1 %3184, %v2787_v28   ;;  %v3220_v47 = vld [vmem:[%s4315_s4 + $0x68] ss:$12 sps:$4 sm:$0xff]   ;;  %v3221_v48 = vld [vmem:[%s4315_s4 + $0x50] ss:$12 sps:$4 sm:$0xff]   ;;  %v3222_v49 = vld [vmem:[%s4315_s4 + $0x38] ss:$12 sps:$4 sm:$0xff]  }
  0x11   :  { %351 = vmatprep.subr.bf16.mxu0 %v3505_v11  ;;  %3026 = vmatpush3.bf16.msra.mxu1 %v3212_v20  ;;  %v3223_v50 = vld [vmem:[%s4315_s4 + $0x20] ss:$12 sps:$4 sm:$0xff]   ;;  %v3224_v51 = vld [vmem:[%s4315_s4 + $0x8] ss:$12 sps:$4 sm:$0xff]   ;;  %v93_v53 = vand.u32 127, %v92_v52  ;;  %v201_v60 = vshrl.u32 %v92_v52, 7 }
  0x12   :  { %3027 = vmatprep.subr.bf16.mxu1 %v3401_v1  ;;  %1108 = vperm.xlu0 %3183, %v2786_v29   ;;  %v3404_v58 = vmov 1983009808  }
  0x13   :  { %v102_v54 = vadd.s32 128, %v93_v53  ;;  %v103_v55 = vadd.s32 256, %v93_v53  ;;  %vm97_vm1 = vcmp.ge.s32.totalorder %v93_v53, 32  ;;  %vm98_vm2 = vcmp.lt.s32.totalorder %v93_v53, 64 }
  0x14   :  { %352 = vmatpush1.bf16.msra.mxu0 %v3515_v13  ;;  %1418 = vperm.xlu1 %3184, %v2819_v31   ;;  %v430_v59 = vunpack.c.l.s4 %v3404_v58  ;;  %vm99_vm5 = vmand %vm97_vm1, %vm98_vm2  ;;  %vm94_vm6 = vcmp.lt.s32.totalorder %v93_v53, 32  ;;  %v424_v31 = vld [vmem:[%s4318_s0] sm:$0x3f]  ;;  %v210_v58 = vsub.s32 2, %v201_v60 }
  0x15   :  { %353 = vmatprep.subr.bf16.mxu0 %v3521_v14  ;;  %3028 = vmatpush3.bf16.msra.mxu1 %v3213_v27  ;;  %v115_v56 = vand.u32 127, %v102_v54  ;;  %v122_v57 = vand.u32 127, %v103_v55  ;;  %v3685_v62 = vsel %vm94_vm6, 1.0, %v3401_v1  ;;  %v3688_v63 = vsel %vm99_vm5, 1.0, %v3401_v1 }
  0x16   :  { %3029 = vmatprep.subr.bf16.mxu1 %v3401_v1  ;;  %1412 = vperm.xlu0 %3183, %v2818_v32   ;;  %v431_v61 = vunpack.c.0.s8 %v430_v59  ;;  %v2721_v32 = vld [vmem:[%s4319_s1 + $0x2a] sm:$0x3f] }
  0x17   :  { %vm150_vm3 = vcmp.ge.s32.totalorder %v115_v56, 32  ;;  %vm153_vm4 = vcmp.lt.s32.totalorder %v115_v56, 64  ;;  %vm141_vm7 = vcmp.lt.s32.totalorder %v115_v56, 32  ;;  %vm151_vm9 = vcmp.ge.s32.totalorder %v122_v57, 32 }
  0x18   :  { %354 = vmatpush1.bf16.msra.mxu0 %v3531_v16  ;;  %1722 = vperm.xlu1 %3184, %v2851_v35   ;;  %vm156_vm8 = vmand %vm150_vm3, %vm153_vm4  ;;  %vm154_vm10 = vcmp.lt.s32.totalorder %v122_v57, 64  ;;  %vm142_vm11 = vcmp.lt.s32.totalorder %v122_v57, 32  ;;  %v434_v15 = vsub.s32 %v431_v61, %v201_v60 }
  0x19   :  { %355 = vmatprep.subr.bf16.mxu0 %v3543_v19  ;;  %3030 = vmatpush3.bf16.msra.mxu1 %v3214_v30  ;;  %v2695_v10 = vsel %vm156_vm8, 1.0, %v3401_v1  ;;  %vm157_vm12 = vmand %vm151_vm9, %vm154_vm10  ;;  %v2693_v18 = vsel %vm142_vm11, 1.0, %v3401_v1 }
  0x1a   :  { %3031 = vmatprep.subr.bf16.mxu1 %v3401_v1  ;;  %1716 = vperm.xlu0 %3183, %v2850_v36   ;;  %v451_v17 = vcombine.low %v3688_v63, %v2695_v10  ;;  %v2696_v20 = vsel %vm157_vm12, 1.0, %v3401_v1  ;;  %v442_v22 = vrot.slane %v2693_v18, %v434_v15 }
  0x1b   :  { %v465_v28 = vrot.slane %v2696_v20, %v434_v15 }
  0x1c   :  { %356 = vmatpush1.bf16.msra.mxu0 %v3559_v23  ;;  %2026 = vperm.xlu1 %3184, %v2883_v38   ;;  %v458_v27 = vrot.slane %v451_v17, %v434_v15  ;;  %v206_v38 = vsub.s32 1, %v201_v60 }
  0x1d   :  { %357 = vmatprep.subr.bf16.mxu0 %v3565_v24  ;;  %3032 = vmatpush3.bf16.msra.mxu1 %v3215_v34  ;;  %v164_v34 = vld [vmem:[%s4320_s5] sm:$0x7] }
  0x1e   :  { %3033 = vmatprep.subr.bf16.mxu1 %v3401_v1  ;;  %2020 = vperm.xlu0 %3183, %v2882_v39   ;;  %v3698_v30 = vcombine.low %v458_v27, %v465_v28  ;;  %v3717_v59 = vrot.slane %v164_v34, %v210_v58 }
  0x20   :  { %358 = vmatpush1.bf16.msra.mxu0 %v3570_v25  ;;  %2330 = vperm.xlu1 %3184, %v2915_v40   ;;  %v468_v36 = vmul.f32 %v2721_v32, %v3698_v30 }
  0x21   :  { %684 = vmatprep.subr.bf16.mxu0 %v3448_v0  ;;  %3034 = vmatpush3.bf16.msra.mxu1 %v3216_v37 }
  0x22   :  { %3039 = vmatprep.subr.bf16.mxu1 %v3401_v1  ;;  %2324 = vperm.xlu0 %3183, %v2914_v41  }
  0x23   :  { %376 = vmatmul.mubr.bf16.vlgmr.msra.gmra.mxu0 %v166_v33 }
  0x24   :  { %685 = vmatpush1.bf16.msra.mxu0 %v3456_v3  ;;  %716 = vmatprep.mubr.bf16.mxu0 %v3402_v2 }
  0x25   :  { %686 = vmatprep.subr.bf16.mxu0 %v3465_v4  ;;  %3036 = vmatmul.mubr.bf16.vlgmr.msra.gmra.mxu1 %v166_v33  ;;  %v202_v33 = vsub.s32 0, %v201_v60 }
  0x26   :  { %3055 = vmatprep.mubr.msk.bf16.mxu1 %vm3403_vm0, %v3401_v1  ;;  %2632 = vperm.xlu1 %3184, %v2623_v42   ;;  %v3714_v42 = vrot.slane %v164_v34, %v206_v38 }
  0x27   :  { %2626 = vperm.xlu0 %3183, %v2945_v43   ;;  %3040 = vmatpush3.bf16.msra.mxu1 %v3217_v44  ;;  %v3711_v37 = vrot.slane %v164_v34, %v202_v33 }
  0x28   :  { %687 = vmatpush1.bf16.msra.mxu0 %v3472_v5  ;;  %3041 = vmatprep.subr.bf16.mxu1 %v3401_v1 }
  0x29   :  { %688 = vmatprep.subr.bf16.mxu0 %v3478_v6 }
  0x2b   :  { %3042 = vmatpush3.bf16.msra.mxu1 %v3218_v45 }
  0x2c   :  { %689 = vmatpush1.bf16.msra.mxu0 %v3484_v7  ;;  %3043 = vmatprep.subr.bf16.mxu1 %v3401_v1 }
  0x2d   :  { %690 = vmatprep.subr.bf16.mxu0 %v3490_v8 }
  0x2f   :  { %3044 = vmatpush3.bf16.msra.mxu1 %v3219_v46 }
  0x30   :  { %691 = vmatpush1.bf16.msra.mxu0 %v3496_v9  ;;  %3045 = vmatprep.subr.bf16.mxu1 %v3401_v1 }
  0x31   :  { %692 = vmatprep.subr.bf16.mxu0 %v3505_v11 }
  0x33   :  { %3046 = vmatpush3.bf16.msra.mxu1 %v3220_v47 }
  0x34   :  { %693 = vmatpush1.bf16.msra.mxu0 %v3515_v13  ;;  %3047 = vmatprep.subr.bf16.mxu1 %v3401_v1 }
  0x35   :  { %694 = vmatprep.subr.bf16.mxu0 %v3521_v14 }
  0x37   :  { %3048 = vmatpush3.bf16.msra.mxu1 %v3221_v48 }
  0x38   :  { %695 = vmatpush1.bf16.msra.mxu0 %v3531_v16  ;;  %3049 = vmatprep.subr.bf16.mxu1 %v3401_v1 }
  0x39   :  { %696 = vmatprep.subr.bf16.mxu0 %v3543_v19 }
  0x3b   :  { %3050 = vmatpush3.bf16.msra.mxu1 %v3222_v49 }
  0x3c   :  { %697 = vmatpush1.bf16.msra.mxu0 %v3559_v23  ;;  %3051 = vmatprep.subr.bf16.mxu1 %v3401_v1 }
  0x3d   :  { %698 = vmatprep.subr.bf16.mxu0 %v3565_v24 }
  0x3f   :  { %3052 = vmatpush3.bf16.msra.mxu1 %v3223_v50 }
  0x40   :  { %699 = vmatpush1.bf16.msra.mxu0 %v3570_v25  ;;  %3053 = vmatprep.subr.bf16.mxu1 %v3401_v1 }
  0x41   :  { %988 = vmatprep.subr.bf16.mxu0 %v3448_v0  ;;  %v2692_v0 = vsel %vm141_vm7, 1.0, %v3401_v1 }
  0x42   :  { %v428_v12 = vcombine.low %v3685_v62, %v2692_v0 }
  0x43   :  { %3054 = vmatpush3.bf16.msra.mxu1 %v3224_v51 }
  0x44   :  { %3059 = vmatprep.subr.bf16.mxu1 %v3401_v1  ;;  %v435_v21 = vrot.slane %v428_v12, %v434_v15 }
  0x46   :  { %v3696_v29 = vcombine.low %v435_v21, %v442_v22 }
  0x48   :  { %v445_v35 = vmul.f32 %v3696_v29, %v424_v31 }
  0x4a   :  { %v469_v39 = vadd.f32 %v468_v36, %v445_v35 }
  0x4c   :  { %v478_v48 = vrot.slane %v469_v39, 2  ;;  %v488_v12 = vrot.slane %v469_v39, 4 }
  0x85   :  { %v502_v20 = vpop.permute.xlu0 %501 }
  0x86   :  { %v504_v22 = vmul.f32 %v3685_v62, %v502_v20 }
  0x89   :  { %v508_v21 = vpop.permute.xlu0 %507 }
  0x8a   :  { %v510_v27 = vmul.f32 %v3688_v63, %v508_v21  ;;  %v805_v21 = vpop.permute.xlu1 %804 }
  0x8c   :  { %v511_v60 = vadd.f32 %v510_v27, %v504_v22 }
  0x8e   :  { %v513_v34 = vsub.f32 1.0, %v511_v60 }
  0x90   :  { %v514_v38 = vmul.f32 %v513_v34, %v3572_v26 }
  0xe3   :  { %v377_v40 = vpop.f32.mrf.mxu0 }
  0xe4   :  { %v378_v41 = vadd.f32 %v377_v40, %v3711_v37 }
  0xe5   :  { %v379_v43 = vpop.f32.mrf.mxu0  ;;  %v418_v51 = vpop.f32.mrf.mxu1 }
  0xe6   :  { %v470_v44 = vadd.f32 %v469_v39, %v378_v41  ;;  %v380_v47 = vadd.f32 %v379_v43, %v3714_v42  ;;  %v419_v10 = vadd.f32 %v418_v51, %v3717_v59 }
  0xe7   :  { %v381_v45 = vpop.f32.mrf.mxu0  ;;  %v3037_v52 = vpop.f32.mrf.mxu1 }
  0xe8   :  { %v2722_v46 = vmul.f32 -1.442695, %v470_v44  ;;  %v480_v50 = vadd.f32 %v478_v48, %v380_v47 }
  0xe9   :  { %v382_v49 = vpop.f32.mrf.mxu0  ;;  %v421_v54 = vpop.f32.mrf.mxu1 }
  0xea   :  { %3321 = vpow2.f32 %v2722_v46  ;;  %v2723_v53 = vmul.f32 -1.442695, %v480_v50 }
  0xeb   :  { %v3038_v55 = vpop.f32.mrf.mxu1 }
  0xec   :  { %3323 = vpow2.f32 %v2723_v53 }
  0xf7   :  { %v3322_v56 = vpop.eup %3321 }
  0xf8   :  { %v474_v57 = vadd.f32 1.0, %v3322_v56 }
  0xf9   :  { %v3324_v61 = vpop.eup %3323 }
  0xfa   :  { %3325 = vrcp.f32 %v474_v57  ;;  %v484_v0 = vadd.f32 1.0, %v3324_v61 }
  0xfc   :  { %3327 = vrcp.f32 %v484_v0 }
 0x107   :  { %v3326_v15 = vpop.eup %3325 }
 0x108   :  { %v487_v17 = vmul.f32 %v3326_v15, %v419_v10 }
 0x109   :  { %v3328_v28 = vpop.eup %3327 }
 0x10a   :  { %v490_v18 = vadd.f32 %v488_v12, %v487_v17  ;;  %v492_v31 = vsub.f32 1.0, %v3328_v28  ;;  %v494_v33 = vmul.f32 %v3328_v28, %v3572_v26 }
 0x10c   :  { %3329 = vtanh.f32 %v490_v18 }
 0x119   :  { %v3330_v32 = vpop.eup %3329 }
 0x11a   :  { %v493_v35 = vmul.f32 %v3330_v32, %v492_v31 }
 0x11c   :  { %v495_v36 = vadd.f32 %v494_v33, %v493_v35 }
 0x11e   :  { %v512_v39 = vmul.f32 %v511_v60, %v495_v36  ;;  %v517_v40 = vmul.f32 %v504_v22, %v495_v36  ;;  %v519_v41 = vmul.f32 %v510_v27, %v495_v36  ;;  %v811_v22 = vpop.permute.xlu1 %810  ;;  %v807_v27 = vmul.f32 %v3685_v62, %v805_v21 }
 0x11f   :  { %v813_v28 = vmul.f32 %v3688_v63, %v811_v22 }
 0x120   :  { %v515_v43 = vadd.f32 %v514_v38, %v512_v39  ;;  %518 = vst [vmem:[%s4321_s6] sm:$0x3] %v517_v40  ;;  %2725 = vst [vmem:[%s4322_s7 + $0xe] sm:$0x3] %v519_v41 }
 0x121   :  { %v814_v31 = vadd.f32 %v813_v28, %v807_v27 }
 0x122   :  { %516 = vst [vmem:[#allocation2] sm:$0x3] %v515_v43 }
 0x123   :  { %v816_v34 = vsub.f32 1.0, %v814_v31 }
 0x129   :  { %v3730_v44 = vld [vmem:[#allocation2] sm:$0x3] }
 0x12a   :  { %v523_v45 = vpack.c.bf16 %v3730_v44, %v3730_v44  ;;  %v817_v40 = vmul.f32 %v816_v34, %v3730_v44 }
 0x12c   :  { %717 = vmatmul.mubr.bf16.vlgmr.msra.gmra.mxu0 %v523_v45  ;;  %3056 = vmatmul.mubr.bf16.vlgmr.msra.gmra.mxu1 %v523_v45 }
 0x12d   :  { %989 = vmatpush1.bf16.msra.mxu0 %v3456_v3  ;;  %1020 = vmatprep.mubr.bf16.mxu0 %v3402_v2  ;;  %v3225_v3 = vld [vmem:[%s4315_s4 + $0xb0] ss:$12 sps:$4 sm:$0xff]  }
 0x12e   :  { %990 = vmatprep.subr.bf16.mxu0 %v3465_v4  ;;  %3075 = vmatprep.mubr.msk.bf16.mxu1 %vm3403_vm0, %v3401_v1  ;;  %v3226_v4 = vld [vmem:[%s4315_s4 + $0x98] ss:$12 sps:$4 sm:$0xff]  }
 0x12f   :  { %3060 = vmatpush3.bf16.msra.mxu1 %v3225_v3 }
 0x130   :  { %3061 = vmatprep.subr.bf16.mxu1 %v3401_v1 }
 0x131   :  { %991 = vmatpush1.bf16.msra.mxu0 %v3472_v5  ;;  %v3227_v5 = vld [vmem:[%s4315_s4 + $0x80] ss:$12 sps:$4 sm:$0xff]  }
 0x132   :  { %992 = vmatprep.subr.bf16.mxu0 %v3478_v6  ;;  %v3228_v6 = vld [vmem:[%s4315_s4 + $0x68] ss:$12 sps:$4 sm:$0xff]  }
 0x133   :  { %3062 = vmatpush3.bf16.msra.mxu1 %v3226_v4 }
 0x134   :  { %3063 = vmatprep.subr.bf16.mxu1 %v3401_v1 }
 0x135   :  { %993 = vmatpush1.bf16.msra.mxu0 %v3484_v7  ;;  %v3229_v7 = vld [vmem:[%s4315_s4 + $0x50] ss:$12 sps:$4 sm:$0xff]  }
 0x136   :  { %994 = vmatprep.subr.bf16.mxu0 %v3490_v8  ;;  %v3230_v8 = vld [vmem:[%s4315_s4 + $0x38] ss:$12 sps:$4 sm:$0xff]  }
 0x137   :  { %3064 = vmatpush3.bf16.msra.mxu1 %v3227_v5  ;;  %v3820_v5 = vld [vmem:[%s4315_s4 + $0xa8] ss:$12 sps:$4 sm:$0xff]  }
 0x138   :  { %3065 = vmatprep.subr.bf16.mxu1 %v3401_v1 }
 0x139   :  { %995 = vmatpush1.bf16.msra.mxu0 %v3496_v9  ;;  %v3231_v9 = vld [vmem:[%s4315_s4 + $0x20] ss:$12 sps:$4 sm:$0xff]  }
 0x13a   :  { %996 = vmatprep.subr.bf16.mxu0 %v3505_v11  ;;  %v3232_v11 = vld [vmem:[%s4315_s4 + $0x8] ss:$12 sps:$4 sm:$0xff]  }
 0x13b   :  { %3066 = vmatpush3.bf16.msra.mxu1 %v3228_v6  ;;  %v3236_v6 = vld [vmem:[%s4315_s4 + $0xb0] ss:$12 sps:$4 sm:$0xff]  }
 0x13c   :  { %3067 = vmatprep.subr.bf16.mxu1 %v3401_v1 }
 0x13d   :  { %997 = vmatpush1.bf16.msra.mxu0 %v3515_v13  ;;  %v2750_v13 = vld [vmem:[%s4318_s0 + $0x6] sm:$0x3f] }
 0x13e   :  { %998 = vmatprep.subr.bf16.mxu0 %v3521_v14  ;;  %v2751_v14 = vld [vmem:[%s4319_s1 + $0x24] sm:$0x3f] }
 0x13f   :  { %3068 = vmatpush3.bf16.msra.mxu1 %v3229_v7  ;;  %v3830_v7 = vld [vmem:[%s4315_s4 + $0x94] ss:$12 sps:$4 sm:$0xff]  }
 0x140   :  { %3069 = vmatprep.subr.bf16.mxu1 %v3401_v1 }
 0x141   :  { %999 = vmatpush1.bf16.msra.mxu0 %v3531_v16  ;;  %v767_v16 = vmul.f32 %v2750_v13, %v3696_v29  ;;  %v3852_v13 = vld [vmem:[%s4315_s4 + $0x78] ss:$12 sps:$4 sm:$0xff]  }
 0x142   :  { %1000 = vmatprep.subr.bf16.mxu0 %v3543_v19  ;;  %v770_v19 = vmul.f32 %v2751_v14, %v3698_v30  ;;  %v3244_v14 = vld [vmem:[%s4315_s4 + $0x80] ss:$12 sps:$4 sm:$0xff]  }
 0x143   :  { %3070 = vmatpush3.bf16.msra.mxu1 %v3230_v8  ;;  %v3836_v8 = vld [vmem:[%s4315_s4 + $0x90] ss:$12 sps:$4 sm:$0xff]  }
 0x144   :  { %3071 = vmatprep.subr.bf16.mxu1 %v3401_v1 }
 0x145   :  { %1001 = vmatpush1.bf16.msra.mxu0 %v3559_v23  ;;  %v771_v23 = vadd.f32 %v770_v19, %v767_v16  ;;  %v3862_v16 = vld [vmem:[%s4315_s4 + $0x64] ss:$12 sps:$4 sm:$0xff]   ;;  %v3868_v19 = vld [vmem:[%s4315_s4 + $0x60] ss:$12 sps:$4 sm:$0xff]  }
 0x146   :  { %1002 = vmatprep.subr.bf16.mxu0 %v3565_v24 }
 0x147   :  { %3072 = vmatpush3.bf16.msra.mxu1 %v3231_v9  ;;  %v780_v53 = vrot.slane %v771_v23, 2  ;;  %v790_v15 = vrot.slane %v771_v23, 4  ;;  %v3240_v9 = vld [vmem:[%s4315_s4 + $0x98] ss:$12 sps:$4 sm:$0xff]  }
 0x148   :  { %3073 = vmatprep.subr.bf16.mxu1 %v3401_v1 }
 0x149   :  { %1003 = vmatpush1.bf16.msra.mxu0 %v3570_v25 }
 0x14b   :  { %3074 = vmatpush3.bf16.msra.mxu1 %v3232_v11  ;;  %v3846_v11 = vld [vmem:[%s4315_s4 + $0x7c] ss:$12 sps:$4 sm:$0xff]  }
 0x14c   :  { %3079 = vmatprep.subr.bf16.mxu1 %v3401_v1 }
 0x1ec   :  { %v718_v24 = vpop.f32.mrf.mxu0  ;;  %v759_v25 = vpop.f32.mrf.mxu1 }
 0x1ed   :  { %v719_v26 = vadd.f32 %v718_v24, %v3711_v37  ;;  %v760_v12 = vadd.f32 %v759_v25, %v3717_v59  ;;  %v3878_v24 = vld [vmem:[%s4315_s4 + $0x4c] ss:$12 sps:$4 sm:$0xff]   ;;  %v3884_v25 = vld [vmem:[%s4315_s4 + $0x48] ss:$12 sps:$4 sm:$0xff]  }
 0x1ee   :  { %v720_v46 = vpop.f32.mrf.mxu0  ;;  %v3057_v47 = vpop.f32.mrf.mxu1 }
 0x1ef   :  { %v772_v48 = vadd.f32 %v771_v23, %v719_v26  ;;  %v721_v52 = vadd.f32 %v720_v46, %v3714_v42  ;;  %v3248_v23 = vld [vmem:[%s4315_s4 + $0x68] ss:$12 sps:$4 sm:$0xff]   ;;  %v3252_v26 = vld [vmem:[%s4315_s4 + $0x50] ss:$12 sps:$4 sm:$0xff]  }
 0x1f0   :  { %v722_v49 = vpop.f32.mrf.mxu0  ;;  %v762_v50 = vpop.f32.mrf.mxu1  ;;  %v3894_v46 = vld [vmem:[%s4315_s4 + $0x34] ss:$12 sps:$4 sm:$0xff]   ;;  %v3900_v47 = vld [vmem:[%s4315_s4 + $0x30] ss:$12 sps:$4 sm:$0xff]  }
 0x1f1   :  { %v2752_v51 = vmul.f32 -1.442695, %v772_v48  ;;  %v782_v56 = vadd.f32 %v780_v53, %v721_v52  ;;  %v3256_v48 = vld [vmem:[%s4315_s4 + $0x38] ss:$12 sps:$4 sm:$0xff]   ;;  %v3915_v50 = vld [vmem:[%s4315_s4 + $0x1c] ss:$12 sps:$4 sm:$0xff]  }
 0x1f2   :  { %v723_v54 = vpop.f32.mrf.mxu0  ;;  %v3058_v55 = vpop.f32.mrf.mxu1  ;;  %v3910_v49 = vld [vmem:[%s4315_s4 + $0x18] ss:$12 sps:$4 sm:$0xff]   ;;  %v3931_v53 = vld [vmem:[%s4315_s4] ss:$12 sps:$4 sm:$0xff]  }
 0x1f3   :  { %3331 = vpow2.f32 %v2752_v51  ;;  %v2753_v57 = vmul.f32 -1.442695, %v782_v56  ;;  %v3260_v51 = vld [vmem:[%s4315_s4 + $0x20] ss:$12 sps:$4 sm:$0xff]   ;;  %v3924_v52 = vld [vmem:[%s4315_s4 + $0x4] ss:$12 sps:$4 sm:$0xff]  }
 0x1f4   :  { %v3264_v54 = vld [vmem:[%s4315_s4 + $0x8] ss:$12 sps:$4 sm:$0xff]   ;;  %v2782_v55 = vld [vmem:[%s4318_s0 + $0xc] sm:$0x3f]  ;;  %v2783_v56 = vld [vmem:[%s4319_s1 + $0x1e] sm:$0x3f] }
 0x1f5   :  { %3333 = vpow2.f32 %v2753_v57  ;;  %v1071_v57 = vmul.f32 %v2782_v55, %v3696_v29 }
 0x200   :  { %v3332_v58 = vpop.eup %3331 }
 0x201   :  { %v776_v61 = vadd.f32 1.0, %v3332_v58  ;;  %v1074_v58 = vmul.f32 %v2783_v56, %v3698_v30 }
 0x202   :  { %v3334_v0 = vpop.eup %3333 }
 0x203   :  { %3335 = vrcp.f32 %v776_v61  ;;  %v786_v10 = vadd.f32 1.0, %v3334_v0  ;;  %v1075_v61 = vadd.f32 %v1074_v58, %v1071_v57 }
 0x205   :  { %3337 = vrcp.f32 %v786_v10 }
 0x210   :  { %v3336_v17 = vpop.eup %3335 }
 0x211   :  { %v789_v18 = vmul.f32 %v3336_v17, %v760_v12 }
 0x212   :  { %v3338_v60 = vpop.eup %3337 }
 0x213   :  { %v792_v20 = vadd.f32 %v790_v15, %v789_v18  ;;  %v794_v32 = vsub.f32 1.0, %v3338_v60  ;;  %v796_v36 = vmul.f32 %v3338_v60, %v3730_v44  ;;  %v3815_v44 = vld [vmem:[%s4315_s4 + $0xac] ss:$12 sps:$4 sm:$0xff]  }
 0x214   :  { %1292 = vmatprep.subr.bf16.mxu0 %v3815_v44 }
 0x215   :  { %3339 = vtanh.f32 %v792_v20 }
 0x222   :  { %v3340_v33 = vpop.eup %3339 }
 0x223   :  { %v795_v35 = vmul.f32 %v3340_v33, %v794_v32 }
 0x225   :  { %v797_v38 = vadd.f32 %v796_v36, %v795_v35 }
 0x227   :  { %v815_v39 = vmul.f32 %v814_v31, %v797_v38  ;;  %v820_v41 = vmul.f32 %v807_v27, %v797_v38  ;;  %v823_v43 = vmul.f32 %v813_v28, %v797_v38  ;;  %v1084_v28 = vrot.slane %v1075_v61, 2 }
 0x229   :  { %v818_v45 = vadd.f32 %v817_v40, %v815_v39  ;;  %2756 = vst [vmem:[%s4321_s6 + $0x2] sm:$0x3] %v820_v41  ;;  %2757 = vst [vmem:[%s4322_s7 + $0xc] sm:$0x3] %v823_v43  ;;  %v1094_v40 = vrot.slane %v1075_v61, 4 }
 0x22b   :  { %819 = vst [vmem:[#allocation2] sm:$0x3] %v818_v45 }
 0x232   :  { %v3805_v3 = vld [vmem:[#allocation2] sm:$0x3] }
 0x233   :  { %v827_v4 = vpack.c.bf16 %v3805_v3, %v3805_v3 }
 0x235   :  { %1021 = vmatmul.mubr.bf16.vlgmr.msra.gmra.mxu0 %v827_v4  ;;  %3076 = vmatmul.mubr.bf16.vlgmr.msra.gmra.mxu1 %v827_v4  ;;  %v1115_v4 = vpop.permute.xlu1 %1114 }
 0x236   :  { %1324 = vmatprep.mubr.bf16.mxu0 %v3402_v2  ;;  %3095 = vmatprep.mubr.msk.bf16.mxu1 %vm3403_vm0, %v3401_v1 }
 0x237   :  { %1293 = vmatpush1.bf16.msra.mxu0 %v3820_v5  ;;  %3080 = vmatpush3.bf16.msra.mxu1 %v3236_v6  ;;  %v1109_v6 = vpop.permute.xlu0 %1108 }
 0x238   :  { %3081 = vmatprep.subr.bf16.mxu1 %v3401_v1  ;;  %1294 = vmatprep.subr.bf16.mxu0 %v3830_v7 }
 0x23b   :  { %1295 = vmatpush1.bf16.msra.mxu0 %v3836_v8  ;;  %3082 = vmatpush3.bf16.msra.mxu1 %v3240_v9  ;;  %v1117_v9 = vmul.f32 %v3688_v63, %v1115_v4 }
 0x23c   :  { %3083 = vmatprep.subr.bf16.mxu1 %v3401_v1  ;;  %1296 = vmatprep.subr.bf16.mxu0 %v3846_v11 }
 0x23f   :  { %1297 = vmatpush1.bf16.msra.mxu0 %v3852_v13  ;;  %3084 = vmatpush3.bf16.msra.mxu1 %v3244_v14  ;;  %v1111_v14 = vmul.f32 %v3685_v62, %v1109_v6 }
 0x240   :  { %3085 = vmatprep.subr.bf16.mxu1 %v3401_v1  ;;  %1298 = vmatprep.subr.bf16.mxu0 %v3862_v16 }
 0x243   :  { %1299 = vmatpush1.bf16.msra.mxu0 %v3868_v19  ;;  %3086 = vmatpush3.bf16.msra.mxu1 %v3248_v23 }
 0x244   :  { %3087 = vmatprep.subr.bf16.mxu1 %v3401_v1  ;;  %1300 = vmatprep.subr.bf16.mxu0 %v3878_v24 }
 0x247   :  { %1301 = vmatpush1.bf16.msra.mxu0 %v3884_v25  ;;  %3088 = vmatpush3.bf16.msra.mxu1 %v3252_v26  ;;  %v1118_v26 = vadd.f32 %v1117_v9, %v1111_v14 }
 0x248   :  { %3089 = vmatprep.subr.bf16.mxu1 %v3401_v1  ;;  %1302 = vmatprep.subr.bf16.mxu0 %v3894_v46 }
 0x249   :  { %v1120_v56 = vsub.f32 1.0, %v1118_v26 }
 0x24b   :  { %1303 = vmatpush1.bf16.msra.mxu0 %v3900_v47  ;;  %3090 = vmatpush3.bf16.msra.mxu1 %v3256_v48 }
 0x24c   :  { %3091 = vmatprep.subr.bf16.mxu1 %v3401_v1  ;;  %1304 = vmatprep.subr.bf16.mxu0 %v3915_v50 }
 0x24f   :  { %1305 = vmatpush1.bf16.msra.mxu0 %v3910_v49  ;;  %3092 = vmatpush3.bf16.msra.mxu1 %v3260_v51 }
 0x250   :  { %1306 = vmatprep.subr.bf16.mxu0 %v3924_v52  ;;  %3093 = vmatprep.subr.bf16.mxu1 %v3401_v1 }
 0x253   :  { %1307 = vmatpush1.bf16.msra.mxu0 %v3931_v53  ;;  %3094 = vmatpush3.bf16.msra.mxu1 %v3264_v54 }
 0x254   :  { %1596 = vmatprep.subr.bf16.mxu0 %v3815_v44  ;;  %3099 = vmatprep.subr.bf16.mxu1 %v3401_v1 }
 0x2f5   :  { %v1022_v0 = vpop.f32.mrf.mxu0  ;;  %v1063_v10 = vpop.f32.mrf.mxu1 }
 0x2f6   :  { %v1023_v12 = vadd.f32 %v1022_v0, %v3711_v37  ;;  %v1064_v39 = vadd.f32 %v1063_v10, %v3717_v59 }
 0x2f7   :  { %v1024_v15 = vpop.f32.mrf.mxu0  ;;  %v3077_v17 = vpop.f32.mrf.mxu1 }
 0x2f8   :  { %v1076_v18 = vadd.f32 %v1075_v61, %v1023_v12  ;;  %v1025_v27 = vadd.f32 %v1024_v15, %v3714_v42  ;;  %v1121_v61 = vmul.f32 %v1120_v56, %v3805_v3 }
 0x2f9   :  { %v1026_v20 = vpop.f32.mrf.mxu0  ;;  %v1066_v21 = vpop.f32.mrf.mxu1 }
 0x2fa   :  { %v2784_v22 = vmul.f32 -1.442695, %v1076_v18  ;;  %v1086_v32 = vadd.f32 %v1084_v28, %v1025_v27  ;;  %v3266_v18 = vld [vmem:[%s4315_s4 + $0x98] ss:$12 sps:$4 sm:$0xff]   ;;  %v3267_v20 = vld [vmem:[%s4315_s4 + $0x80] ss:$12 sps:$4 sm:$0xff]  }
 0x2fb   :  { %v1027_v60 = vpop.f32.mrf.mxu0  ;;  %v3078_v31 = vpop.f32.mrf.mxu1  ;;  %v3268_v21 = vld [vmem:[%s4315_s4 + $0x68] ss:$12 sps:$4 sm:$0xff]   ;;  %v3270_v27 = vld [vmem:[%s4315_s4 + $0x38] ss:$12 sps:$4 sm:$0xff]   ;;  %v3271_v28 = vld [vmem:[%s4315_s4 + $0x20] ss:$12 sps:$4 sm:$0xff]  }
 0x2fc   :  { %3341 = vpow2.f32 %v2784_v22  ;;  %v2785_v33 = vmul.f32 -1.442695, %v1086_v32  ;;  %v3269_v22 = vld [vmem:[%s4315_s4 + $0x50] ss:$12 sps:$4 sm:$0xff]   ;;  %v3272_v60 = vld [vmem:[%s4315_s4 + $0x8] ss:$12 sps:$4 sm:$0xff]  }
 0x2fd   :  { %v2814_v31 = vld [vmem:[%s4318_s0 + $0x12] sm:$0x3f]  ;;  %v2815_v32 = vld [vmem:[%s4319_s1 + $0x18] sm:$0x3f] }
 0x2fe   :  { %3343 = vpow2.f32 %v2785_v33  ;;  %v1375_v33 = vmul.f32 %v2814_v31, %v3696_v29 }
 0x309   :  { %v3342_v34 = vpop.eup %3341 }
 0x30a   :  { %v1080_v35 = vadd.f32 1.0, %v3342_v34  ;;  %v1378_v34 = vmul.f32 %v2815_v32, %v3698_v30 }
 0x30b   :  { %v3344_v36 = vpop.eup %3343 }
 0x30c   :  { %3345 = vrcp.f32 %v1080_v35  ;;  %v1090_v38 = vadd.f32 1.0, %v3344_v36  ;;  %v1379_v35 = vadd.f32 %v1378_v34, %v1375_v33 }
 0x30e   :  { %3347 = vrcp.f32 %v1090_v38 }
 0x319   :  { %v3346_v41 = vpop.eup %3345 }
 0x31a   :  { %v1093_v43 = vmul.f32 %v3346_v41, %v1064_v39 }
 0x31b   :  { %v3348_v23 = vpop.eup %3347 }
 0x31c   :  { %v1096_v45 = vadd.f32 %v1094_v40, %v1093_v43  ;;  %v1098_v48 = vsub.f32 1.0, %v3348_v23  ;;  %v1100_v55 = vmul.f32 %v3348_v23, %v3805_v3  ;;  %v3265_v3 = vld [vmem:[%s4315_s4 + $0xb0] ss:$12 sps:$4 sm:$0xff]  }
 0x31e   :  { %3349 = vtanh.f32 %v1096_v45 }
 0x32b   :  { %v3350_v51 = vpop.eup %3349 }
 0x32c   :  { %v1099_v54 = vmul.f32 %v3350_v51, %v1098_v48 }
 0x32e   :  { %v1101_v57 = vadd.f32 %v1100_v55, %v1099_v54 }
 0x330   :  { %v1119_v58 = vmul.f32 %v1118_v26, %v1101_v57  ;;  %v1124_v0 = vmul.f32 %v1111_v14, %v1101_v57  ;;  %v1127_v10 = vmul.f32 %v1117_v9, %v1101_v57  ;;  %v1388_v14 = vrot.slane %v1379_v35, 2 }
 0x332   :  { %v1122_v12 = vadd.f32 %v1121_v61, %v1119_v58  ;;  %2788 = vst [vmem:[%s4321_s6 + $0x4] sm:$0x3] %v1124_v0  ;;  %2789 = vst [vmem:[%s4322_s7 + $0xa] sm:$0x3] %v1127_v10  ;;  %v1398_v61 = vrot.slane %v1379_v35, 4 }
 0x334   :  { %1123 = vst [vmem:[#allocation2] sm:$0x3] %v1122_v12 }
 0x33b   :  { %v3962_v15 = vld [vmem:[#allocation2] sm:$0x3] }
 0x33c   :  { %v1131_v17 = vpack.c.bf16 %v3962_v15, %v3962_v15 }
 0x33e   :  { %1325 = vmatmul.mubr.bf16.vlgmr.msra.gmra.mxu0 %v1131_v17  ;;  %3096 = vmatmul.mubr.bf16.vlgmr.msra.gmra.mxu1 %v1131_v17  ;;  %v1419_v17 = vpop.permute.xlu1 %1418 }
 0x33f   :  { %1597 = vmatpush1.bf16.msra.mxu0 %v3820_v5  ;;  %1628 = vmatprep.mubr.bf16.mxu0 %v3402_v2 }
 0x340   :  { %1598 = vmatprep.subr.bf16.mxu0 %v3830_v7  ;;  %3115 = vmatprep.mubr.msk.bf16.mxu1 %vm3403_vm0, %v3401_v1 }
 0x341   :  { %3100 = vmatpush3.bf16.msra.mxu1 %v3265_v3  ;;  %v1413_v3 = vpop.permute.xlu0 %1412 }
 0x342   :  { %3101 = vmatprep.subr.bf16.mxu1 %v3401_v1 }
 0x343   :  { %1599 = vmatpush1.bf16.msra.mxu0 %v3836_v8 }
 0x344   :  { %1600 = vmatprep.subr.bf16.mxu0 %v3846_v11 }
 0x345   :  { %3102 = vmatpush3.bf16.msra.mxu1 %v3266_v18  ;;  %v1421_v18 = vmul.f32 %v3688_v63, %v1419_v17 }
 0x346   :  { %3103 = vmatprep.subr.bf16.mxu1 %v3401_v1 }
 0x347   :  { %1601 = vmatpush1.bf16.msra.mxu0 %v3852_v13 }
 0x348   :  { %1602 = vmatprep.subr.bf16.mxu0 %v3862_v16 }
 0x349   :  { %3104 = vmatpush3.bf16.msra.mxu1 %v3267_v20  ;;  %v1415_v20 = vmul.f32 %v3685_v62, %v1413_v3 }
 0x34a   :  { %3105 = vmatprep.subr.bf16.mxu1 %v3401_v1 }
 0x34b   :  { %1603 = vmatpush1.bf16.msra.mxu0 %v3868_v19 }
 0x34c   :  { %1604 = vmatprep.subr.bf16.mxu0 %v3878_v24 }
 0x34d   :  { %3106 = vmatpush3.bf16.msra.mxu1 %v3268_v21 }
 0x34e   :  { %3107 = vmatprep.subr.bf16.mxu1 %v3401_v1 }
 0x34f   :  { %1605 = vmatpush1.bf16.msra.mxu0 %v3884_v25 }
 0x350   :  { %1606 = vmatprep.subr.bf16.mxu0 %v3894_v46 }
 0x351   :  { %3108 = vmatpush3.bf16.msra.mxu1 %v3269_v22  ;;  %v1422_v22 = vadd.f32 %v1421_v18, %v1415_v20 }
 0x352   :  { %3109 = vmatprep.subr.bf16.mxu1 %v3401_v1 }
 0x353   :  { %1607 = vmatpush1.bf16.msra.mxu0 %v3900_v47  ;;  %v1424_v32 = vsub.f32 1.0, %v1422_v22 }
 0x354   :  { %1608 = vmatprep.subr.bf16.mxu0 %v3915_v50 }
 0x355   :  { %3110 = vmatpush3.bf16.msra.mxu1 %v3270_v27 }
 0x356   :  { %3111 = vmatprep.subr.bf16.mxu1 %v3401_v1 }
 0x357   :  { %1609 = vmatpush1.bf16.msra.mxu0 %v3910_v49 }
 0x358   :  { %1610 = vmatprep.subr.bf16.mxu0 %v3924_v52 }
 0x359   :  { %3112 = vmatpush3.bf16.msra.mxu1 %v3271_v28 }
 0x35a   :  { %3113 = vmatprep.subr.bf16.mxu1 %v3401_v1 }
 0x35b   :  { %1611 = vmatpush1.bf16.msra.mxu0 %v3931_v53 }
 0x35c   :  { %1900 = vmatprep.subr.bf16.mxu0 %v3815_v44 }
 0x35d   :  { %3114 = vmatpush3.bf16.msra.mxu1 %v3272_v60 }
 0x35e   :  { %3119 = vmatprep.subr.bf16.mxu1 %v3401_v1 }
 0x3fe   :  { %v1326_v36 = vpop.f32.mrf.mxu0  ;;  %v1367_v38 = vpop.f32.mrf.mxu1 }
 0x3ff   :  { %v1327_v39 = vadd.f32 %v1326_v36, %v3711_v37  ;;  %v1368_v58 = vadd.f32 %v1367_v38, %v3717_v59 }
 0x400   :  { %v1328_v40 = vpop.f32.mrf.mxu0  ;;  %v3097_v41 = vpop.f32.mrf.mxu1 }
 0x401   :  { %v1380_v43 = vadd.f32 %v1379_v35, %v1327_v39  ;;  %v1329_v9 = vadd.f32 %v1328_v40, %v3714_v42  ;;  %v1425_v35 = vmul.f32 %v1424_v32, %v3962_v15 }
 0x402   :  { %v1330_v45 = vpop.f32.mrf.mxu0  ;;  %v1370_v4 = vpop.f32.mrf.mxu1 }
 0x403   :  { %v2816_v6 = vmul.f32 -1.442695, %v1380_v43  ;;  %v1390_v48 = vadd.f32 %v1388_v14, %v1329_v9  ;;  %v3274_v43 = vld [vmem:[%s4315_s4 + $0x98] ss:$12 sps:$4 sm:$0xff]   ;;  %v3275_v45 = vld [vmem:[%s4315_s4 + $0x80] ss:$12 sps:$4 sm:$0xff]  }
 0x404   :  { %v1331_v23 = vpop.f32.mrf.mxu0  ;;  %v3098_v26 = vpop.f32.mrf.mxu1  ;;  %v3277_v4 = vld [vmem:[%s4315_s4 + $0x50] ss:$12 sps:$4 sm:$0xff]   ;;  %v3279_v9 = vld [vmem:[%s4315_s4 + $0x20] ss:$12 sps:$4 sm:$0xff]   ;;  %v3280_v14 = vld [vmem:[%s4315_s4 + $0x8] ss:$12 sps:$4 sm:$0xff]  }
 0x405   :  { %3351 = vpow2.f32 %v2816_v6  ;;  %v2817_v51 = vmul.f32 -1.442695, %v1390_v48  ;;  %v3278_v6 = vld [vmem:[%s4315_s4 + $0x38] ss:$12 sps:$4 sm:$0xff]   ;;  %v2847_v26 = vld [vmem:[%s4319_s1 + $0x12] sm:$0x3f] }
 0x406   :  { %v2846_v23 = vld [vmem:[%s4318_s0 + $0x18] sm:$0x3f] }
 0x407   :  { %3353 = vpow2.f32 %v2817_v51  ;;  %v1679_v48 = vmul.f32 %v2846_v23, %v3696_v29  ;;  %v1682_v51 = vmul.f32 %v2847_v26, %v3698_v30 }
 0x412   :  { %v3352_v54 = vpop.eup %3351 }
 0x413   :  { %v1384_v55 = vadd.f32 1.0, %v3352_v54  ;;  %v1683_v54 = vadd.f32 %v1682_v51, %v1679_v48 }
 0x414   :  { %v3354_v56 = vpop.eup %3353 }
 0x415   :  { %3355 = vrcp.f32 %v1384_v55  ;;  %v1394_v57 = vadd.f32 1.0, %v3354_v56 }
 0x417   :  { %3357 = vrcp.f32 %v1394_v57 }
 0x422   :  { %v3356_v0 = vpop.eup %3355 }
 0x423   :  { %v1397_v10 = vmul.f32 %v3356_v0, %v1368_v58 }
 0x424   :  { %v3358_v21 = vpop.eup %3357 }
 0x425   :  { %v1400_v12 = vadd.f32 %v1398_v61, %v1397_v10  ;;  %v1402_v27 = vsub.f32 1.0, %v3358_v21  ;;  %v1404_v31 = vmul.f32 %v3358_v21, %v3962_v15  ;;  %v3273_v15 = vld [vmem:[%s4315_s4 + $0xb0] ss:$12 sps:$4 sm:$0xff]  }
 0x427   :  { %3359 = vtanh.f32 %v1400_v12 }
 0x434   :  { %v3360_v28 = vpop.eup %3359 }
 0x435   :  { %v1403_v60 = vmul.f32 %v3360_v28, %v1402_v27 }
 0x437   :  { %v1405_v33 = vadd.f32 %v1404_v31, %v1403_v60 }
 0x439   :  { %v1423_v34 = vmul.f32 %v1422_v22, %v1405_v33  ;;  %v1428_v36 = vmul.f32 %v1415_v20, %v1405_v33  ;;  %v1431_v38 = vmul.f32 %v1421_v18, %v1405_v33  ;;  %v1692_v18 = vrot.slane %v1683_v54, 2 }
 0x43b   :  { %v1426_v39 = vadd.f32 %v1425_v35, %v1423_v34  ;;  %2820 = vst [vmem:[%s4321_s6 + $0x6] sm:$0x3] %v1428_v36  ;;  %2821 = vst [vmem:[%s4322_s7 + $0x8] sm:$0x3] %v1431_v38  ;;  %v1702_v34 = vrot.slane %v1683_v54, 4 }
 0x43d   :  { %1427 = vst [vmem:[#allocation2] sm:$0x3] %v1426_v39  ;;  %v1723_v39 = vpop.permute.xlu1 %1722 }
 0x444   :  { %v4038_v40 = vld [vmem:[#allocation2] sm:$0x3] }
 0x445   :  { %v1435_v41 = vpack.c.bf16 %v4038_v40, %v4038_v40 }
 0x447   :  { %1629 = vmatmul.mubr.bf16.vlgmr.msra.gmra.mxu0 %v1435_v41  ;;  %3116 = vmatmul.mubr.bf16.vlgmr.msra.gmra.mxu1 %v1435_v41  ;;  %v1717_v41 = vpop.permute.xlu0 %1716 }
 0x448   :  { %1901 = vmatpush1.bf16.msra.mxu0 %v3820_v5  ;;  %1932 = vmatprep.mubr.bf16.mxu0 %v3402_v2 }
 0x449   :  { %1902 = vmatprep.subr.bf16.mxu0 %v3830_v7  ;;  %3135 = vmatprep.mubr.msk.bf16.mxu1 %vm3403_vm0, %v3401_v1 }
 0x44a   :  { %3120 = vmatpush3.bf16.msra.mxu1 %v3273_v15  ;;  %v1725_v15 = vmul.f32 %v3688_v63, %v1723_v39 }
 0x44b   :  { %3121 = vmatprep.subr.bf16.mxu1 %v3401_v1 }
 0x44c   :  { %1903 = vmatpush1.bf16.msra.mxu0 %v3836_v8 }
 0x44d   :  { %1904 = vmatprep.subr.bf16.mxu0 %v3846_v11 }
 0x44e   :  { %3122 = vmatpush3.bf16.msra.mxu1 %v3274_v43  ;;  %v1719_v43 = vmul.f32 %v3685_v62, %v1717_v41  ;;  %v2027_v41 = vpop.permute.xlu1 %2026 }
 0x44f   :  { %3123 = vmatprep.subr.bf16.mxu1 %v3401_v1 }
 0x450   :  { %1905 = vmatpush1.bf16.msra.mxu0 %v3852_v13 }
 0x451   :  { %1906 = vmatprep.subr.bf16.mxu0 %v3862_v16 }
 0x452   :  { %3124 = vmatpush3.bf16.msra.mxu1 %v3275_v45 }
 0x453   :  { %3125 = vmatprep.subr.bf16.mxu1 %v3401_v1 }
 0x454   :  { %1907 = vmatpush1.bf16.msra.mxu0 %v3868_v19 }
 0x455   :  { %1908 = vmatprep.subr.bf16.mxu0 %v3878_v24 }
 0x458   :  { %1909 = vmatpush1.bf16.msra.mxu0 %v3884_v25 }
 0x459   :  { %1910 = vmatprep.subr.bf16.mxu0 %v3894_v46 }
 0x45c   :  { %1911 = vmatpush1.bf16.msra.mxu0 %v3900_v47 }
 0x45d   :  { %1912 = vmatprep.subr.bf16.mxu0 %v3915_v50 }
 0x460   :  { %1913 = vmatpush1.bf16.msra.mxu0 %v3910_v49 }
 0x461   :  { %1914 = vmatprep.subr.bf16.mxu0 %v3924_v52 }
 0x464   :  { %1915 = vmatpush1.bf16.msra.mxu0 %v3931_v53 }
 0x465   :  { %2204 = vmatprep.subr.bf16.mxu0 %v3815_v44  ;;  %v3276_v44 = vld [vmem:[%s4315_s4 + $0x68] ss:$12 sps:$4 sm:$0xff]  }
 0x466   :  { %3126 = vmatpush3.bf16.msra.mxu1 %v3276_v44  ;;  %v1726_v44 = vadd.f32 %v1725_v15, %v1719_v43 }
 0x467   :  { %3127 = vmatprep.subr.bf16.mxu1 %v3401_v1 }
 0x468   :  { %v1728_v23 = vsub.f32 1.0, %v1726_v44 }
 0x46a   :  { %3128 = vmatpush3.bf16.msra.mxu1 %v3277_v4  ;;  %v1729_v51 = vmul.f32 %v1728_v23, %v4038_v40 }
 0x46b   :  { %3129 = vmatprep.subr.bf16.mxu1 %v3401_v1 }
 0x46e   :  { %3130 = vmatpush3.bf16.msra.mxu1 %v3278_v6 }
 0x46f   :  { %3131 = vmatprep.subr.bf16.mxu1 %v3401_v1 }
 0x472   :  { %3132 = vmatpush3.bf16.msra.mxu1 %v3279_v9 }
 0x473   :  { %3133 = vmatprep.subr.bf16.mxu1 %v3401_v1 }
 0x476   :  { %3134 = vmatpush3.bf16.msra.mxu1 %v3280_v14 }
 0x477   :  { %3139 = vmatprep.subr.bf16.mxu1 %v3401_v1 }
 0x507   :  { %v1630_v55 = vpop.f32.mrf.mxu0  ;;  %v1671_v56 = vpop.f32.mrf.mxu1 }
 0x508   :  { %v1631_v57 = vadd.f32 %v1630_v55, %v3711_v37  ;;  %v1672_v33 = vadd.f32 %v1671_v56, %v3717_v59 }
 0x509   :  { %v1632_v58 = vpop.f32.mrf.mxu0  ;;  %v3117_v61 = vpop.f32.mrf.mxu1 }
 0x50a   :  { %v1684_v0 = vadd.f32 %v1683_v54, %v1631_v57  ;;  %v1633_v3 = vadd.f32 %v1632_v58, %v3714_v42 }
 0x50b   :  { %v1634_v10 = vpop.f32.mrf.mxu0  ;;  %v1674_v12 = vpop.f32.mrf.mxu1 }
 0x50c   :  { %v2848_v17 = vmul.f32 -1.442695, %v1684_v0  ;;  %v1694_v22 = vadd.f32 %v1692_v18, %v1633_v3 }
 0x50d   :  { %v1635_v20 = vpop.f32.mrf.mxu0  ;;  %v3118_v21 = vpop.f32.mrf.mxu1 }
 0x50e   :  { %3361 = vpow2.f32 %v2848_v17  ;;  %v2849_v27 = vmul.f32 -1.442695, %v1694_v22 }
 0x510   :  { %3363 = vpow2.f32 %v2849_v27 }
 0x51b   :  { %v3362_v28 = vpop.eup %3361 }
 0x51c   :  { %v1688_v60 = vadd.f32 1.0, %v3362_v28 }
 0x51d   :  { %v3364_v31 = vpop.eup %3363 }
 0x51e   :  { %3365 = vrcp.f32 %v1688_v60  ;;  %v1698_v32 = vadd.f32 1.0, %v3364_v31 }
 0x520   :  { %3367 = vrcp.f32 %v1698_v32 }
 0x52b   :  { %v3366_v35 = vpop.eup %3365 }
 0x52c   :  { %v1701_v36 = vmul.f32 %v3366_v35, %v1672_v33 }
 0x52d   :  { %v3368_v45 = vpop.eup %3367 }
 0x52e   :  { %v1704_v38 = vadd.f32 %v1702_v34, %v1701_v36  ;;  %v1706_v4 = vsub.f32 1.0, %v3368_v45  ;;  %v1708_v14 = vmul.f32 %v3368_v45, %v4038_v40 }
 0x530   :  { %3369 = vtanh.f32 %v1704_v38 }
 0x53d   :  { %v3370_v6 = vpop.eup %3369 }
 0x53e   :  { %v1707_v9 = vmul.f32 %v3370_v6, %v1706_v4 }
 0x540   :  { %v1709_v26 = vadd.f32 %v1708_v14, %v1707_v9 }
 0x542   :  { %v1727_v48 = vmul.f32 %v1726_v44, %v1709_v26  ;;  %v1732_v54 = vmul.f32 %v1719_v43, %v1709_v26  ;;  %v1735_v55 = vmul.f32 %v1725_v15, %v1709_v26  ;;  %v2021_v15 = vpop.permute.xlu0 %2020  ;;  %v2029_v43 = vmul.f32 %v3688_v63, %v2027_v41 }
 0x543   :  { %v2023_v45 = vmul.f32 %v3685_v62, %v2021_v15 }
 0x544   :  { %v1730_v56 = vadd.f32 %v1729_v51, %v1727_v48  ;;  %2852 = vst [vmem:[%s4321_s6 + $0x8] sm:$0x3] %v1732_v54  ;;  %2853 = vst [vmem:[%s4322_s7 + $0x6] sm:$0x3] %v1735_v55 }
 0x545   :  { %v2030_v4 = vadd.f32 %v2029_v43, %v2023_v45 }
 0x546   :  { %1731 = vst [vmem:[#allocation2] sm:$0x3] %v1730_v56 }
 0x547   :  { %v2032_v26 = vsub.f32 1.0, %v2030_v4 }
 0x54d   :  { %v4114_v57 = vld [vmem:[#allocation2] sm:$0x3] }
 0x54e   :  { %v1739_v58 = vpack.c.bf16 %v4114_v57, %v4114_v57  ;;  %v2033_v51 = vmul.f32 %v2032_v26, %v4114_v57 }
 0x550   :  { %1933 = vmatmul.mubr.bf16.vlgmr.msra.gmra.mxu0 %v1739_v58  ;;  %3136 = vmatmul.mubr.bf16.vlgmr.msra.gmra.mxu1 %v1739_v58 }
 0x551   :  { %2205 = vmatpush1.bf16.msra.mxu0 %v3820_v5  ;;  %2236 = vmatprep.mubr.bf16.mxu0 %v3402_v2  ;;  %v3281_v5 = vld [vmem:[%s4315_s4 + $0xb0] ss:$12 sps:$4 sm:$0xff]  }
 0x552   :  { %2206 = vmatprep.subr.bf16.mxu0 %v3830_v7  ;;  %3155 = vmatprep.mubr.msk.bf16.mxu1 %vm3403_vm0, %v3401_v1  ;;  %v3282_v7 = vld [vmem:[%s4315_s4 + $0x98] ss:$12 sps:$4 sm:$0xff]  }
 0x553   :  { %3140 = vmatpush3.bf16.msra.mxu1 %v3281_v5 }
 0x554   :  { %3141 = vmatprep.subr.bf16.mxu1 %v3401_v1 }
 0x555   :  { %2207 = vmatpush1.bf16.msra.mxu0 %v3836_v8  ;;  %v3283_v8 = vld [vmem:[%s4315_s4 + $0x80] ss:$12 sps:$4 sm:$0xff]  }
 0x556   :  { %2208 = vmatprep.subr.bf16.mxu0 %v3846_v11  ;;  %v3284_v11 = vld [vmem:[%s4315_s4 + $0x68] ss:$12 sps:$4 sm:$0xff]  }
 0x557   :  { %3142 = vmatpush3.bf16.msra.mxu1 %v3282_v7 }
 0x558   :  { %3143 = vmatprep.subr.bf16.mxu1 %v3401_v1 }
 0x559   :  { %2209 = vmatpush1.bf16.msra.mxu0 %v3852_v13  ;;  %v3285_v13 = vld [vmem:[%s4315_s4 + $0x50] ss:$12 sps:$4 sm:$0xff]  }
 0x55a   :  { %2210 = vmatprep.subr.bf16.mxu0 %v3862_v16  ;;  %v3286_v16 = vld [vmem:[%s4315_s4 + $0x38] ss:$12 sps:$4 sm:$0xff]  }
 0x55b   :  { %3144 = vmatpush3.bf16.msra.mxu1 %v3283_v8  ;;  %v3289_v8 = vld [vmem:[%s4315_s4 + $0xa8] ss:$12 sps:$4 sm:$0xff]  }
 0x55c   :  { %3145 = vmatprep.subr.bf16.mxu1 %v3401_v1 }
 0x55d   :  { %2211 = vmatpush1.bf16.msra.mxu0 %v3868_v19  ;;  %v3287_v19 = vld [vmem:[%s4315_s4 + $0x20] ss:$12 sps:$4 sm:$0xff]  }
 0x55e   :  { %2212 = vmatprep.subr.bf16.mxu0 %v3878_v24  ;;  %v3288_v24 = vld [vmem:[%s4315_s4 + $0x8] ss:$12 sps:$4 sm:$0xff]  }
 0x55f   :  { %3146 = vmatpush3.bf16.msra.mxu1 %v3284_v11  ;;  %v3292_v11 = vld [vmem:[%s4315_s4 + $0xb0] ss:$12 sps:$4 sm:$0xff]  }
 0x560   :  { %3147 = vmatprep.subr.bf16.mxu1 %v3401_v1 }
 0x561   :  { %2213 = vmatpush1.bf16.msra.mxu0 %v3884_v25  ;;  %v2878_v25 = vld [vmem:[%s4318_s0 + $0x1e] sm:$0x3f] }
 0x562   :  { %2214 = vmatprep.subr.bf16.mxu0 %v3894_v46  ;;  %v2879_v46 = vld [vmem:[%s4319_s1 + $0xc] sm:$0x3f] }
 0x563   :  { %3148 = vmatpush3.bf16.msra.mxu1 %v3285_v13  ;;  %v3293_v13 = vld [vmem:[%s4315_s4 + $0x90] ss:$12 sps:$4 sm:$0xff]  }
 0x564   :  { %3149 = vmatprep.subr.bf16.mxu1 %v3401_v1 }
 0x565   :  { %2215 = vmatpush1.bf16.msra.mxu0 %v3900_v47  ;;  %v1983_v47 = vmul.f32 %v2878_v25, %v3696_v29  ;;  %v3300_v25 = vld [vmem:[%s4315_s4 + $0x80] ss:$12 sps:$4 sm:$0xff]  }
 0x566   :  { %2216 = vmatprep.subr.bf16.mxu0 %v3915_v50 }
 0x567   :  { %3150 = vmatpush3.bf16.msra.mxu1 %v3286_v16  ;;  %v3296_v16 = vld [vmem:[%s4315_s4 + $0x98] ss:$12 sps:$4 sm:$0xff]  }
 0x568   :  { %3151 = vmatprep.subr.bf16.mxu1 %v3401_v1 }
 0x569   :  { %2217 = vmatpush1.bf16.msra.mxu0 %v3910_v49  ;;  %v1986_v49 = vmul.f32 %v2879_v46, %v3698_v30  ;;  %v3303_v46 = vld [vmem:[%s4315_s4 + $0x64] ss:$12 sps:$4 sm:$0xff]  }
 0x56a   :  { %2218 = vmatprep.subr.bf16.mxu0 %v3924_v52 }
 0x56b   :  { %3152 = vmatpush3.bf16.msra.mxu1 %v3287_v19  ;;  %v1987_v50 = vadd.f32 %v1986_v49, %v1983_v47  ;;  %v3299_v19 = vld [vmem:[%s4315_s4 + $0x7c] ss:$12 sps:$4 sm:$0xff]   ;;  %v3301_v47 = vld [vmem:[%s4315_s4 + $0x60] ss:$12 sps:$4 sm:$0xff]  }
 0x56c   :  { %3153 = vmatprep.subr.bf16.mxu1 %v3401_v1  ;;  %v3304_v49 = vld [vmem:[%s4315_s4 + $0x68] ss:$12 sps:$4 sm:$0xff]  }
 0x56d   :  { %2219 = vmatpush1.bf16.msra.mxu0 %v3931_v53  ;;  %v1996_v20 = vrot.slane %v1987_v50, 2  ;;  %v2006_v35 = vrot.slane %v1987_v50, 4 }
 0x56f   :  { %3154 = vmatpush3.bf16.msra.mxu1 %v3288_v24  ;;  %v3297_v24 = vld [vmem:[%s4315_s4 + $0x78] ss:$12 sps:$4 sm:$0xff]  }
 0x570   :  { %3159 = vmatprep.subr.bf16.mxu1 %v3401_v1 }
 0x610   :  { %v1934_v52 = vpop.f32.mrf.mxu0  ;;  %v1975_v53 = vpop.f32.mrf.mxu1 }
 0x611   :  { %v1935_v40 = vadd.f32 %v1934_v52, %v3711_v37  ;;  %v1976_v34 = vadd.f32 %v1975_v53, %v3717_v59  ;;  %v3305_v52 = vld [vmem:[%s4315_s4 + $0x48] ss:$12 sps:$4 sm:$0xff]   ;;  %v3308_v53 = vld [vmem:[%s4315_s4 + $0x50] ss:$12 sps:$4 sm:$0xff]  }
 0x612   :  { %v1936_v61 = vpop.f32.mrf.mxu0  ;;  %v3137_v0 = vpop.f32.mrf.mxu1 }
 0x613   :  { %v1988_v10 = vadd.f32 %v1987_v50, %v1935_v40  ;;  %v1937_v18 = vadd.f32 %v1936_v61, %v3714_v42  ;;  %v3307_v50 = vld [vmem:[%s4315_s4 + $0x4c] ss:$12 sps:$4 sm:$0xff]   ;;  %v3311_v40 = vld [vmem:[%s4315_s4 + $0x34] ss:$12 sps:$4 sm:$0xff]   ;;  %v3309_v61 = vld [vmem:[%s4315_s4 + $0x30] ss:$12 sps:$4 sm:$0xff]  }
 0x614   :  { %v1938_v12 = vpop.f32.mrf.mxu0  ;;  %v1978_v17 = vpop.f32.mrf.mxu1  ;;  %v3312_v0 = vld [vmem:[%s4315_s4 + $0x38] ss:$12 sps:$4 sm:$0xff]  }
 0x615   :  { %v2880_v3 = vmul.f32 -1.442695, %v1988_v10  ;;  %v1998_v27 = vadd.f32 %v1996_v20, %v1937_v18  ;;  %v3313_v10 = vld [vmem:[%s4315_s4 + $0x18] ss:$12 sps:$4 sm:$0xff]   ;;  %v3315_v12 = vld [vmem:[%s4315_s4 + $0x1c] ss:$12 sps:$4 sm:$0xff]  }
 0x616   :  { %v1939_v21 = vpop.f32.mrf.mxu0  ;;  %v3138_v22 = vpop.f32.mrf.mxu1  ;;  %v3316_v17 = vld [vmem:[%s4315_s4 + $0x20] ss:$12 sps:$4 sm:$0xff]   ;;  %v3320_v20 = vld [vmem:[%s4315_s4 + $0x8] ss:$12 sps:$4 sm:$0xff]  }
 0x617   :  { %3371 = vpow2.f32 %v2880_v3  ;;  %v2881_v28 = vmul.f32 -1.442695, %v1998_v27  ;;  %v3319_v3 = vld [vmem:[%s4315_s4 + $0x4] ss:$12 sps:$4 sm:$0xff]   ;;  %v3317_v18 = vld [vmem:[%s4315_s4] ss:$12 sps:$4 sm:$0xff]  }
 0x618   :  { %v2910_v21 = vld [vmem:[%s4318_s0 + $0x24] sm:$0x3f] }
 0x619   :  { %3373 = vpow2.f32 %v2881_v28  ;;  %v2911_v22 = vld [vmem:[%s4319_s1 + $0x6] sm:$0x3f]  ;;  %v2287_v27 = vmul.f32 %v2910_v21, %v3696_v29 }
 0x61a   :  { %v2290_v28 = vmul.f32 %v2911_v22, %v3698_v30 }
 0x624   :  { %v3372_v60 = vpop.eup %3371 }
 0x625   :  { %v1992_v31 = vadd.f32 1.0, %v3372_v60  ;;  %v2291_v60 = vadd.f32 %v2290_v28, %v2287_v27 }
 0x626   :  { %v3374_v32 = vpop.eup %3373 }
 0x627   :  { %3375 = vrcp.f32 %v1992_v31  ;;  %v2002_v33 = vadd.f32 1.0, %v3374_v32  ;;  %v2300_v15 = vrot.slane %v2291_v60, 2 }
 0x629   :  { %3377 = vrcp.f32 %v2002_v33 }
 0x634   :  { %v3376_v36 = vpop.eup %3375 }
 0x635   :  { %v2005_v38 = vmul.f32 %v3376_v36, %v1976_v34 }
 0x636   :  { %v3378_v44 = vpop.eup %3377 }
 0x637   :  { %v2008_v39 = vadd.f32 %v2006_v35, %v2005_v38  ;;  %v2010_v6 = vsub.f32 1.0, %v3378_v44  ;;  %v2012_v23 = vmul.f32 %v3378_v44, %v4114_v57  ;;  %v3291_v57 = vld [vmem:[%s4315_s4 + $0xac] ss:$12 sps:$4 sm:$0xff]  }
 0x638   :  { %2508 = vmatprep.subr.bf16.mxu0 %v3291_v57 }
 0x639   :  { %3379 = vtanh.f32 %v2008_v39 }
 0x646   :  { %v3380_v9 = vpop.eup %3379 }
 0x647   :  { %v2011_v14 = vmul.f32 %v3380_v9, %v2010_v6 }
 0x649   :  { %v2013_v48 = vadd.f32 %v2012_v23, %v2011_v14 }
 0x64b   :  { %v2031_v54 = vmul.f32 %v2030_v4, %v2013_v48  ;;  %v2036_v55 = vmul.f32 %v2023_v45, %v2013_v48  ;;  %v2039_v56 = vmul.f32 %v2029_v43, %v2013_v48  ;;  %v2310_v48 = vrot.slane %v2291_v60, 4 }
 0x64d   :  { %v2034_v58 = vadd.f32 %v2033_v51, %v2031_v54  ;;  %2884 = vst [vmem:[%s4321_s6 + $0xa] sm:$0x3] %v2036_v55  ;;  %2885 = vst [vmem:[%s4322_s7 + $0x4] sm:$0x3] %v2039_v56  ;;  %v2331_v56 = vpop.permute.xlu1 %2330 }
 0x64f   :  { %2035 = vst [vmem:[#allocation2] sm:$0x3] %v2034_v58  ;;  %v2325_v58 = vpop.permute.xlu0 %2324 }
 0x650   :  { %v2327_v57 = vmul.f32 %v3685_v62, %v2325_v58 }
 0x656   :  { %v4189_v5 = vld [vmem:[#allocation2] sm:$0x3] }
 0x657   :  { %v2043_v7 = vpack.c.bf16 %v4189_v5, %v4189_v5 }
 0x659   :  { %2237 = vmatmul.mubr.bf16.vlgmr.msra.gmra.mxu0 %v2043_v7  ;;  %3156 = vmatmul.mubr.bf16.vlgmr.msra.gmra.mxu1 %v2043_v7  ;;  %v2333_v7 = vmul.f32 %v3688_v63, %v2331_v56 }
 0x65a   :  { %2540 = vmatprep.mubr.bf16.mxu0 %v3402_v2  ;;  %3175 = vmatprep.mubr.msk.bf16.mxu1 %vm3403_vm0, %v3401_v1  ;;  %v3295_v2 = vld [vmem:[%s4315_s4 + $0x94] ss:$12 sps:$4 sm:$0xff]  }
 0x65b   :  { %2509 = vmatpush1.bf16.msra.mxu0 %v3289_v8  ;;  %3160 = vmatpush3.bf16.msra.mxu1 %v3292_v11  ;;  %v2334_v11 = vadd.f32 %v2333_v7, %v2327_v57 }
 0x65c   :  { %3161 = vmatprep.subr.bf16.mxu1 %v3401_v1  ;;  %2510 = vmatprep.subr.bf16.mxu0 %v3295_v2 }
 0x65f   :  { %2511 = vmatpush1.bf16.msra.mxu0 %v3293_v13  ;;  %3162 = vmatpush3.bf16.msra.mxu1 %v3296_v16 }
 0x660   :  { %3163 = vmatprep.subr.bf16.mxu1 %v3401_v1  ;;  %2512 = vmatprep.subr.bf16.mxu0 %v3299_v19 }
 0x663   :  { %2513 = vmatpush1.bf16.msra.mxu0 %v3297_v24  ;;  %3164 = vmatpush3.bf16.msra.mxu1 %v3300_v25  ;;  %v2336_v24 = vsub.f32 1.0, %v2334_v11 }
 0x664   :  { %3165 = vmatprep.subr.bf16.mxu1 %v3401_v1  ;;  %2514 = vmatprep.subr.bf16.mxu0 %v3303_v46 }
 0x665   :  { %v2337_v46 = vmul.f32 %v2336_v24, %v4189_v5 }
 0x667   :  { %2515 = vmatpush1.bf16.msra.mxu0 %v3301_v47  ;;  %3166 = vmatpush3.bf16.msra.mxu1 %v3304_v49 }
 0x668   :  { %3167 = vmatprep.subr.bf16.mxu1 %v3401_v1  ;;  %2516 = vmatprep.subr.bf16.mxu0 %v3307_v50 }
 0x66b   :  { %2517 = vmatpush1.bf16.msra.mxu0 %v3305_v52  ;;  %3168 = vmatpush3.bf16.msra.mxu1 %v3308_v53 }
 0x66c   :  { %3169 = vmatprep.subr.bf16.mxu1 %v3401_v1  ;;  %2518 = vmatprep.subr.bf16.mxu0 %v3311_v40 }
 0x66f   :  { %2519 = vmatpush1.bf16.msra.mxu0 %v3309_v61  ;;  %3170 = vmatpush3.bf16.msra.mxu1 %v3312_v0  ;;  %v2592_v61 = vld [vmem:[%s4319_s1] sm:$0x3f] }
 0x670   :  { %3171 = vmatprep.subr.bf16.mxu1 %v3401_v1  ;;  %2520 = vmatprep.subr.bf16.mxu0 %v3315_v12 }
 0x673   :  { %2521 = vmatpush1.bf16.msra.mxu0 %v3313_v10  ;;  %3172 = vmatpush3.bf16.msra.mxu1 %v3316_v17  ;;  %v2593_v10 = vmul.f32 %v2592_v61, %v3698_v30 }
 0x674   :  { %2522 = vmatprep.subr.bf16.mxu0 %v3319_v3  ;;  %3173 = vmatprep.subr.bf16.mxu1 %v3401_v1 }
 0x677   :  { %2523 = vmatpush1.bf16.msra.mxu0 %v3317_v18  ;;  %3174 = vmatpush3.bf16.msra.mxu1 %v3320_v20 }
 0x719   :  { %v2238_v31 = vpop.f32.mrf.mxu0  ;;  %v2279_v32 = vpop.f32.mrf.mxu1 }
 0x71a   :  { %v2239_v33 = vadd.f32 %v2238_v31, %v3711_v37  ;;  %v2280_v26 = vadd.f32 %v2279_v32, %v3717_v59 }
 0x71b   :  { %v2240_v1 = vpop.f32.mrf.mxu0  ;;  %v3157_v34 = vpop.f32.mrf.mxu1 }
 0x71c   :  { %v2292_v35 = vadd.f32 %v2291_v60, %v2239_v33  ;;  %v2241_v41 = vadd.f32 %v2240_v1, %v3714_v42 }
 0x71d   :  { %v2242_v36 = vpop.f32.mrf.mxu0  ;;  %v2282_v38 = vpop.f32.mrf.mxu1 }
 0x71e   :  { %v2912_v39 = vmul.f32 -1.442695, %v2292_v35  ;;  %v2302_v44 = vadd.f32 %v2300_v15, %v2241_v41 }
 0x71f   :  { %v2243_v43 = vpop.f32.mrf.mxu0  ;;  %v3158_v45 = vpop.f32.mrf.mxu1 }
 0x720   :  { %3381 = vpow2.f32 %v2912_v39  ;;  %v2913_v4 = vmul.f32 -1.442695, %v2302_v44  ;;  %v2627_v45 = vpop.permute.xlu0 %2626 }
 0x722   :  { %3383 = vpow2.f32 %v2913_v4  ;;  %v2629_v4 = vmul.f32 %v3685_v62, %v2627_v45 }
 0x72d   :  { %v3382_v6 = vpop.eup %3381 }
 0x72e   :  { %v2296_v9 = vadd.f32 1.0, %v3382_v6 }
 0x72f   :  { %v3384_v14 = vpop.eup %3383 }
 0x730   :  { %3385 = vrcp.f32 %v2296_v9  ;;  %v2306_v23 = vadd.f32 1.0, %v3384_v14 }
 0x732   :  { %3387 = vrcp.f32 %v2306_v23 }
 0x73d   :  { %v3386_v51 = vpop.eup %3385 }
 0x73e   :  { %v2309_v54 = vmul.f32 %v3386_v51, %v2280_v26 }
 0x73f   :  { %v3388_v8 = vpop.eup %3387 }
 0x740   :  { %v2312_v55 = vadd.f32 %v2310_v48, %v2309_v54  ;;  %v2314_v2 = vsub.f32 1.0, %v3388_v8  ;;  %v2316_v19 = vmul.f32 %v3388_v8, %v4189_v5  ;;  %v2942_v5 = vld [vmem:[%s4318_s0 + $0x2a] sm:$0x3f] }
 0x741   :  { %v2591_v0 = vmul.f32 %v2942_v5, %v3696_v29 }
 0x742   :  { %3389 = vtanh.f32 %v2312_v55 }
 0x743   :  { %v2594_v12 = vadd.f32 %v2593_v10, %v2591_v0 }
 0x745   :  { %v2603_v32 = vrot.slane %v2594_v12, 2  ;;  %v2613_v39 = vrot.slane %v2594_v12, 4 }
 0x74f   :  { %v3390_v13 = vpop.eup %3389 }
 0x750   :  { %v2315_v16 = vmul.f32 %v3390_v13, %v2314_v2 }
 0x752   :  { %v2317_v25 = vadd.f32 %v2316_v19, %v2315_v16 }
 0x754   :  { %v2335_v47 = vmul.f32 %v2334_v11, %v2317_v25  ;;  %v2340_v49 = vmul.f32 %v2327_v57, %v2317_v25  ;;  %v2343_v50 = vmul.f32 %v2333_v7, %v2317_v25 }
 0x756   :  { %v2338_v52 = vadd.f32 %v2337_v46, %v2335_v47  ;;  %2916 = vst [vmem:[%s4321_s6 + $0xc] sm:$0x3] %v2340_v49  ;;  %2917 = vst [vmem:[%s4322_s7 + $0x2] sm:$0x3] %v2343_v50 }
 0x758   :  { %2339 = vst [vmem:[#allocation2] sm:$0x3] %v2338_v52 }
 0x75f   :  { %v2346_v53 = vld [vmem:[#allocation2] sm:$0x3] }
 0x760   :  { %v2347_v40 = vpack.c.bf16 %v2346_v53, %v2346_v53 }
 0x762   :  { %2541 = vmatmul.mubr.bf16.vlgmr.msra.gmra.mxu0 %v2347_v40  ;;  %3176 = vmatmul.mubr.bf16.vlgmr.msra.gmra.mxu1 %v2347_v40 }
 0x822   :  { %v2542_v17 = vpop.f32.mrf.mxu0  ;;  %v2583_v3 = vpop.f32.mrf.mxu1 }
 0x823   :  { %v2543_v18 = vadd.f32 %v2542_v17, %v3711_v37  ;;  %v2584_v38 = vadd.f32 %v2583_v3, %v3717_v59 }
 0x824   :  { %v2544_v20 = vpop.f32.mrf.mxu0  ;;  %v3177_v21 = vpop.f32.mrf.mxu1 }
 0x825   :  { %v2595_v22 = vadd.f32 %v2594_v12, %v2543_v18  ;;  %v2545_v31 = vadd.f32 %v2544_v20, %v3714_v42  ;;  %v2633_v42 = vpop.permute.xlu1 %2632 }
 0x826   :  { %v2546_v27 = vpop.f32.mrf.mxu0  ;;  %v2586_v28 = vpop.f32.mrf.mxu1  ;;  %v2635_v44 = vmul.f32 %v3688_v63, %v2633_v42 }
 0x827   :  { %v2943_v60 = vmul.f32 -1.442695, %v2595_v22  ;;  %v2605_v29 = vadd.f32 %v2603_v32, %v2545_v31 }
 0x828   :  { %v2547_v33 = vpop.f32.mrf.mxu0  ;;  %v3178_v1 = vpop.f32.mrf.mxu1  ;;  %v2636_v9 = vadd.f32 %v2635_v44, %v2629_v4 }
 0x829   :  { %3391 = vpow2.f32 %v2943_v60  ;;  %v2944_v34 = vmul.f32 -1.442695, %v2605_v29 }
 0x82a   :  { %v2638_v51 = vsub.f32 1.0, %v2636_v9 }
 0x82b   :  { %3393 = vpow2.f32 %v2944_v34 }
 0x82c   :  { %v2639_v54 = vmul.f32 %v2638_v51, %v2346_v53 }
 0x836   :  { %v3392_v30 = vpop.eup %3391 }
 0x837   :  { %v2599_v35 = vadd.f32 1.0, %v3392_v30 }
 0x838   :  { %v3394_v36 = vpop.eup %3393 }
 0x839   :  { %3395 = vrcp.f32 %v2599_v35  ;;  %v2609_v37 = vadd.f32 1.0, %v3394_v36 }
 0x83b   :  { %3397 = vrcp.f32 %v2609_v37 }
 0x846   :  { %v3396_v41 = vpop.eup %3395 }
 0x847   :  { %v2612_v15 = vmul.f32 %v3396_v41, %v2584_v38 }
 0x848   :  { %v3398_v6 = vpop.eup %3397 }
 0x849   :  { %v2615_v43 = vadd.f32 %v2613_v39, %v2612_v15  ;;  %v2617_v14 = vsub.f32 1.0, %v3398_v6  ;;  %v2619_v48 = vmul.f32 %v3398_v6, %v2346_v53 }
 0x84b   :  { %3399 = vtanh.f32 %v2615_v43 }
 0x858   :  { %v3400_v23 = vpop.eup %3399 }
 0x859   :  { %v2618_v26 = vmul.f32 %v3400_v23, %v2617_v14 }
 0x85b   :  { %v2620_v59 = vadd.f32 %v2619_v48, %v2618_v26 }
 0x85d   :  { %v2637_v55 = vmul.f32 %v2636_v9, %v2620_v59  ;;  %v2642_v56 = vmul.f32 %v2629_v4, %v2620_v59  ;;  %v2645_v58 = vmul.f32 %v2635_v44, %v2620_v59 }
 0x85f   :  { %v2640_v7 = vadd.f32 %v2639_v54, %v2637_v55  ;;  %2946 = vst [vmem:[%s4321_s6 + $0xe] sm:$0x3] %v2642_v56  ;;  %2646 = vst [vmem:[%s4322_s7] sm:$0x3] %v2645_v58 }
 0x861   :  { %2641 = vst [vmem:[#allocation2] sm:$0x3] %v2640_v7 }

// kernel: deepspeech2_forward.11
= control target key start
LH: loop header
LB: loop body
LE: loop exit
PB: predicated region body
PF: predicated region fallthrough
CT: control target
= control target key end

     0   :  { %v412_v0 = vmov 0.0   ;;  %vm413_vm0 = vmmov 0   ;;  %v414_v3 = vmov 0   ;;  %v85_v41 = vlaneseq  ;;  %s570_s4 = inlined_call_operand.vmem [shape: bf16[128,384], index: 4, kind: input, shape index: {}]   ;;  %s571_s0 = inlined_call_operand.vmem [shape: f32[16,128], index: 0, kind: input, shape index: {}]   ;;  %s572_s1 = inlined_call_operand.vmem [shape: f32[16,128], index: 1, kind: input, shape index: {}]   ;;  %s573_s2 = inlined_call_operand.vmem [shape: f32[1,128], index: 2, kind: input, shape index: {}]   ;;  %s574_s3 = inlined_call_operand.vmem [shape: f32[1,128], index: 3, kind: input, shape index: {}]   ;;  %s575_s5 = inlined_call_operand.vmem [shape: f32[1,384], index: 5, kind: input, shape index: {}]   ;;  %s576_s6 = inlined_call_operand.vmem [shape: f32[16,384], index: 6, kind: output, shape index: {}]  }
   0x1   :  { %357 = vmatprep.subr.bf16.mxu1 %v412_v0  ;;  %v380_v1 = vld [vmem:[%s570_s4 + $0xac] ss:$12 sps:$4 sm:$0xff]   ;;  %373 = vmatprep.mubr.msk.bf16.mxu1 %vm413_vm0, %v412_v0  ;;  %v382_v2 = vld [vmem:[%s570_s4 + $0xb0] ss:$12 sps:$4 sm:$0xff]   ;;  %v383_v4 = vld [vmem:[%s570_s4 + $0xa8] ss:$12 sps:$4 sm:$0xff]  }
   0x2   :  { %260 = vmatprep.mubr.bf16.mxu0 %v414_v3  ;;  %228 = vmatprep.subr.bf16.mxu0 %v380_v1  ;;  %v384_v5 = vld [vmem:[%s570_s4 + $0x94] ss:$12 sps:$4 sm:$0xff]   ;;  %v386_v6 = vld [vmem:[%s570_s4 + $0x98] ss:$12 sps:$4 sm:$0xff]   ;;  %v387_v7 = vld [vmem:[%s570_s4 + $0x90] ss:$12 sps:$4 sm:$0xff]  }
   0x3   :  { %358 = vmatpush3.bf16.msra.mxu1 %v382_v2  ;;  %229 = vmatpush1.bf16.msra.mxu0 %v383_v4  ;;  %v388_v8 = vld [vmem:[%s570_s4 + $0x7c] ss:$12 sps:$4 sm:$0xff]   ;;  %v390_v9 = vld [vmem:[%s570_s4 + $0x80] ss:$12 sps:$4 sm:$0xff]   ;;  %v391_v10 = vld [vmem:[%s570_s4 + $0x78] ss:$12 sps:$4 sm:$0xff]  }
   0x4   :  { %359 = vmatprep.subr.bf16.mxu1 %v412_v0  ;;  %230 = vmatprep.subr.bf16.mxu0 %v384_v5  ;;  %v392_v11 = vld [vmem:[%s570_s4 + $0x64] ss:$12 sps:$4 sm:$0xff]   ;;  %v394_v12 = vld [vmem:[%s570_s4 + $0x68] ss:$12 sps:$4 sm:$0xff]   ;;  %v395_v13 = vld [vmem:[%s570_s4 + $0x60] ss:$12 sps:$4 sm:$0xff]  }
   0x5   :  { %v396_v14 = vld [vmem:[%s570_s4 + $0x4c] ss:$12 sps:$4 sm:$0xff]   ;;  %v398_v15 = vld [vmem:[%s570_s4 + $0x50] ss:$12 sps:$4 sm:$0xff]   ;;  %v399_v16 = vld [vmem:[%s570_s4 + $0x48] ss:$12 sps:$4 sm:$0xff]  }
   0x6   :  { %v400_v17 = vld [vmem:[%s570_s4 + $0x34] ss:$12 sps:$4 sm:$0xff]   ;;  %v402_v18 = vld [vmem:[%s570_s4 + $0x38] ss:$12 sps:$4 sm:$0xff]   ;;  %v25_v20 = vld [vmem:[%s571_s0 + $0x8] sm:$0xff]  ;;  %v86_v42 = vshrl.u32 %v85_v41, 7 }
   0x7   :  { %360 = vmatpush3.bf16.msra.mxu1 %v386_v6  ;;  %231 = vmatpush1.bf16.msra.mxu0 %v387_v7  ;;  %v24_v19 = vld [vmem:[%s571_s0] sm:$0xff]  ;;  %v27_v22 = vld [vmem:[%s572_s1 + $0x8] sm:$0xff]  ;;  %v403_v23 = vld [vmem:[%s570_s4 + $0x30] ss:$12 sps:$4 sm:$0xff]  }
   0x8   :  { %361 = vmatprep.subr.bf16.mxu1 %v412_v0  ;;  %232 = vmatprep.subr.bf16.mxu0 %v388_v8  ;;  %v26_v21 = vld [vmem:[%s572_s1] sm:$0xff]  ;;  %v29_v25 = vadd.f32 %v27_v22, %v25_v20  ;;  %v404_v27 = vld [vmem:[%s570_s4 + $0x1c] ss:$12 sps:$4 sm:$0xff]   ;;  %v95_v43 = vsub.s32 2, %v86_v42  ;;  %v87_v44 = vsub.s32 0, %v86_v42  ;;  %v91_v46 = vsub.s32 1, %v86_v42 }
   0x9   :  { %v28_v24 = vadd.f32 %v26_v21, %v24_v19  ;;  %v322_v26 = vld [vmem:[%s573_s2] ss:$0 sm:$0xff]  ;;  %v407_v32 = vld [vmem:[%s570_s4 + $0x18] ss:$12 sps:$4 sm:$0xff]   ;;  %v410_v38 = vld [vmem:[%s570_s4 + $0x8] ss:$12 sps:$4 sm:$0xff]  }
   0xa   :  { %v323_v28 = vld [vmem:[%s574_s3] ss:$0 sm:$0xff]  ;;  %v38_v30 = vmul.f32 %v322_v26, %v29_v25  ;;  %v408_v35 = vld [vmem:[%s570_s4 + $0x4] ss:$12 sps:$4 sm:$0xff]  }
   0xb   :  { %362 = vmatpush3.bf16.msra.mxu1 %v390_v9  ;;  %233 = vmatpush1.bf16.msra.mxu0 %v391_v10  ;;  %v37_v29 = vmul.f32 %v322_v26, %v28_v24  ;;  %v406_v31 = vld [vmem:[%s570_s4 + $0x20] ss:$12 sps:$4 sm:$0xff]  }
   0xc   :  { %363 = vmatprep.subr.bf16.mxu1 %v412_v0  ;;  %234 = vmatprep.subr.bf16.mxu0 %v392_v11  ;;  %v47_v34 = vadd.f32 %v323_v28, %v38_v30  ;;  %v411_v39 = vld [vmem:[%s570_s4] ss:$12 sps:$4 sm:$0xff]  }
   0xd   :  { %v46_v33 = vadd.f32 %v323_v28, %v37_v29  ;;  %v83_v45 = vld [vmem:[%s575_s5] sm:$0x7] }
   0xe   :  { %v49_v37 = vmax.f32 %v47_v34, 0.0  ;;  %v96_v47 = vrot.slane %v83_v45, %v95_v43  ;;  %v88_v48 = vrot.slane %v83_v45, %v87_v44  ;;  %v92_v50 = vrot.slane %v83_v45, %v91_v46 }
   0xf   :  { %364 = vmatpush3.bf16.msra.mxu1 %v394_v12  ;;  %235 = vmatpush1.bf16.msra.mxu0 %v395_v13  ;;  %v48_v36 = vmax.f32 %v46_v33, 0.0 }
  0x10   :  { %365 = vmatprep.subr.bf16.mxu1 %v412_v0  ;;  %236 = vmatprep.subr.bf16.mxu0 %v396_v14 }
  0x11   :  { %v50_v40 = vpack.c.bf16 %v49_v37, %v48_v36 }
  0x13   :  { %366 = vmatpush3.bf16.msra.mxu1 %v398_v15  ;;  %237 = vmatpush1.bf16.msra.mxu0 %v399_v16 }
  0x14   :  { %367 = vmatprep.subr.bf16.mxu1 %v412_v0  ;;  %238 = vmatprep.subr.bf16.mxu0 %v400_v17 }
  0x17   :  { %368 = vmatpush3.bf16.msra.mxu1 %v402_v18  ;;  %239 = vmatpush1.bf16.msra.mxu0 %v403_v23 }
  0x18   :  { %369 = vmatprep.subr.bf16.mxu1 %v412_v0  ;;  %240 = vmatprep.subr.bf16.mxu0 %v404_v27 }
  0x1b   :  { %370 = vmatpush3.bf16.msra.mxu1 %v406_v31  ;;  %241 = vmatpush1.bf16.msra.mxu0 %v407_v32 }
  0x1c   :  { %371 = vmatprep.subr.bf16.mxu1 %v412_v0  ;;  %242 = vmatprep.subr.bf16.mxu0 %v408_v35 }
  0x1f   :  { %372 = vmatpush3.bf16.msra.mxu1 %v410_v38  ;;  %243 = vmatpush1.bf16.msra.mxu0 %v411_v39 }
  0x22   :  { %374 = vmatmul.mubr.bf16.vlgmr.msra.gmra.mxu1 %v50_v40  ;;  %261 = vmatmul.mubr.bf16.vlgmr.msra.gmra.mxu0 %v50_v40 }
  0xe2   :  { %v305_v49 = vpop.f32.mrf.mxu1  ;;  %v262_v52 = vpop.f32.mrf.mxu0 }
  0xe3   :  { %v306_v51 = vadd.f32 %v305_v49, %v96_v47  ;;  %v263_v53 = vadd.f32 %v262_v52, %v88_v48 }
  0xe4   :  { %v375_v54 = vpop.f32.mrf.mxu1  ;;  %v264_v55 = vpop.f32.mrf.mxu0 }
  0xe5   :  { %314 = vst [vmem:[%s576_s6 + $0x10] sm:$0xff] %v306_v51  ;;  %312 = vst [vmem:[%s576_s6] sm:$0xff] %v263_v53  ;;  %v265_v56 = vadd.f32 %v264_v55, %v92_v50 }
  0xe6   :  { %v308_v57 = vpop.f32.mrf.mxu1  ;;  %v266_v59 = vpop.f32.mrf.mxu0 }
  0xe7   :  { %v309_v58 = vadd.f32 %v308_v57, %v96_v47  ;;  %313 = vst [vmem:[%s576_s6 + $0x8] sm:$0xff] %v265_v56  ;;  %v267_v60 = vadd.f32 %v266_v59, %v88_v48 }
  0xe8   :  { %v376_v61 = vpop.f32.mrf.mxu1  ;;  %v268_v62 = vpop.f32.mrf.mxu0 }
  0xe9   :  { %317 = vst [vmem:[%s576_s6 + $0x28] sm:$0xff] %v309_v58  ;;  %315 = vst [vmem:[%s576_s6 + $0x18] sm:$0xff] %v267_v60  ;;  %v269_v63 = vadd.f32 %v268_v62, %v92_v50 }
  0xeb   :  { %316 = vst [vmem:[%s576_s6 + $0x20] sm:$0xff] %v269_v63 }

// kernel: deepspeech2_forward.13
= control target key start
LH: loop header
LB: loop body
LE: loop exit
PB: predicated region body
PF: predicated region fallthrough
CT: control target
= control target key end

     0   :  { %v275_v9 = vmov 0.0   ;;  %vm276_vm0 = vmmov 0   ;;  %s363_s0 = inlined_call_operand.vmem [shape: f32[16,128], index: 0, kind: input, shape index: {}]   ;;  %s364_s1 = inlined_call_operand.vmem [shape: f32[16,128], index: 1, kind: input, shape index: {}]   ;;  %s365_s4 = inlined_call_operand.vmem [shape: bf16[128,128], index: 4, kind: input, shape index: {}]   ;;  %s366_s2 = inlined_call_operand.vmem [shape: f32[1,128], index: 2, kind: input, shape index: {}]   ;;  %s367_s3 = inlined_call_operand.vmem [shape: f32[1,128], index: 3, kind: input, shape index: {}]   ;;  %s368_s5 = inlined_call_operand.vmem [shape: f32[1,128], index: 5, kind: input, shape index: {}]   ;;  %s369_s6 = inlined_call_operand.vmem [shape: f32[16,128], index: 6, kind: output, shape index: {}]  }
   0x1   :  { %v24_v0 = vld [vmem:[%s363_s0] sm:$0xff]  ;;  %v25_v2 = vld [vmem:[%s363_s0 + $0x8] sm:$0xff]  ;;  %v255_v8 = vld [vmem:[%s365_s4 + $0x38] sm:$0xff]   ;;  %233 = vmatprep.subr.bf16.mxu0 %v275_v9  ;;  %249 = vmatprep.mubr.msk.bf16.mxu0 %vm276_vm0, %v275_v9 }
   0x2   :  { %v26_v1 = vld [vmem:[%s364_s1] sm:$0xff]  ;;  %v27_v4 = vld [vmem:[%s364_s1 + $0x8] sm:$0xff]  ;;  %234 = vmatpush3.bf16.msra.mxu0 %v255_v8  ;;  %v256_v10 = vld [vmem:[%s365_s4 + $0x30] sm:$0xff]  }
   0x3   :  { %v28_v3 = vadd.f32 %v26_v1, %v24_v0  ;;  %v29_v5 = vadd.f32 %v27_v4, %v25_v2  ;;  %235 = vmatprep.subr.bf16.mxu0 %v275_v9  ;;  %v257_v11 = vld [vmem:[%s365_s4 + $0x28] sm:$0xff]   ;;  %v258_v12 = vld [vmem:[%s365_s4 + $0x20] sm:$0xff]   ;;  %v259_v13 = vld [vmem:[%s365_s4 + $0x18] sm:$0xff]  }
   0x4   :  { %v260_v14 = vld [vmem:[%s365_s4 + $0x10] sm:$0xff]   ;;  %v261_v15 = vld [vmem:[%s365_s4 + $0x8] sm:$0xff]   ;;  %v262_v16 = vld [vmem:[%s365_s4] sm:$0xff]  }
   0x5   :  { %30 = vadd.xlane.f32.xlu0 %v28_v3  ;;  %v36_v6 = vmul.f32 %v28_v3, %v28_v3  ;;  %v37_v7 = vmul.f32 %v29_v5, %v29_v5  ;;  %v213_v34 = vld [vmem:[%s366_s2] ss:$0 sm:$0xff] }
   0x6   :  { %236 = vmatpush3.bf16.msra.mxu0 %v256_v10  ;;  %v214_v39 = vld [vmem:[%s367_s3] ss:$0 sm:$0xff] }
   0x7   :  { %38 = vadd.xlane.f32.xlu1 %v36_v6  ;;  %237 = vmatprep.subr.bf16.mxu0 %v275_v9  ;;  %v215_v44 = vld [vmem:[%s368_s5] ss:$0 sm:$0xff] }
   0x9   :  { %32 = vadd.xlane.f32.xlu0 %v29_v5 }
   0xa   :  { %238 = vmatpush3.bf16.msra.mxu0 %v257_v11 }
   0xb   :  { %40 = vadd.xlane.f32.xlu1 %v37_v7  ;;  %239 = vmatprep.subr.bf16.mxu0 %v275_v9 }
   0xe   :  { %240 = vmatpush3.bf16.msra.mxu0 %v258_v12 }
   0xf   :  { %241 = vmatprep.subr.bf16.mxu0 %v275_v9 }
  0x12   :  { %242 = vmatpush3.bf16.msra.mxu0 %v259_v13 }
  0x13   :  { %243 = vmatprep.subr.bf16.mxu0 %v275_v9 }
  0x16   :  { %244 = vmatpush3.bf16.msra.mxu0 %v260_v14 }
  0x17   :  { %245 = vmatprep.subr.bf16.mxu0 %v275_v9 }
  0x1a   :  { %246 = vmatpush3.bf16.msra.mxu0 %v261_v15 }
  0x1b   :  { %247 = vmatprep.subr.bf16.mxu0 %v275_v9 }
  0x1e   :  { %248 = vmatpush3.bf16.msra.mxu0 %v262_v16 }
  0x8e   :  { %v31_v17 = vpop.xlane.xlu0 %30 }
  0x8f   :  { %v34_v18 = vmul.f32 0.015625, %v31_v17 }
  0x90   :  { %v39_v19 = vpop.xlane.xlu1 %38 }
  0x91   :  { %v44_v20 = vmul.f32 %v34_v18, %v34_v18  ;;  %v42_v21 = vmul.f32 0.015625, %v39_v19  ;;  %v48_v31 = vsub.f32 %v28_v3, %v34_v18 }
  0x92   :  { %v33_v22 = vpop.xlane.xlu0 %32 }
  0x93   :  { %v46_v23 = vsub.f32 %v42_v21, %v44_v20  ;;  %v35_v24 = vmul.f32 0.015625, %v33_v22 }
  0x94   :  { %v41_v25 = vpop.xlane.xlu1 %40 }
  0x95   :  { %v50_v26 = vadd.f32 1e-05, %v46_v23  ;;  %v45_v27 = vmul.f32 %v35_v24, %v35_v24  ;;  %v43_v28 = vmul.f32 0.015625, %v41_v25  ;;  %v49_v35 = vsub.f32 %v29_v5, %v35_v24 }
  0x97   :  { %263 = vrsqrt.f32 %v50_v26  ;;  %v47_v29 = vsub.f32 %v43_v28, %v45_v27 }
  0x99   :  { %v51_v30 = vadd.f32 1e-05, %v47_v29 }
  0x9b   :  { %265 = vrsqrt.f32 %v51_v30 }
  0xa4   :  { %v264_v32 = vpop.eup %263 }
  0xa5   :  { %v54_v33 = vmul.f32 %v264_v32, %v48_v31 }
  0xa7   :  { %v63_v38 = vmul.f32 %v213_v34, %v54_v33 }
  0xa8   :  { %v266_v36 = vpop.eup %265 }
  0xa9   :  { %v55_v37 = vmul.f32 %v266_v36, %v49_v35  ;;  %v72_v41 = vadd.f32 %v214_v39, %v63_v38 }
  0xab   :  { %v64_v40 = vmul.f32 %v213_v34, %v55_v37 }
  0xad   :  { %v73_v42 = vadd.f32 %v214_v39, %v64_v40 }
  0xaf   :  { %v74_v43 = vpack.c.bf16 %v73_v42, %v72_v41 }
  0xb1   :  { %250 = vmatmul.mubr.bf16.vlgmr.msra.gmra.mxu0 %v74_v43 }
 0x171   :  { %v180_v45 = vpop.f32.mrf.mxu0 }
 0x172   :  { %v181_v46 = vadd.f32 %v215_v44, %v180_v45 }
 0x173   :  { %v251_v47 = vpop.f32.mrf.mxu0 }
 0x174   :  { %187 = vmax.xlane.f32.xlu0 %v181_v46 }
 0x175   :  { %v183_v48 = vpop.f32.mrf.mxu0 }
 0x176   :  { %v184_v49 = vadd.f32 %v215_v44, %v183_v48 }
 0x177   :  { %v252_v50 = vpop.f32.mrf.mxu0 }
 0x178   :  { %189 = vmax.xlane.f32.xlu1 %v184_v49 }
 0x1fd   :  { %v188_v51 = vpop.xlane.xlu0 %187 }
 0x1fe   :  { %v191_v52 = vsub.f32 %v181_v46, %v188_v51 }
 0x200   :  { %v193_v53 = vmul.f32 1.442695, %v191_v52 }
 0x201   :  { %v190_v54 = vpop.xlane.xlu1 %189 }
 0x202   :  { %267 = vpow2.f32 %v193_v53  ;;  %v192_v55 = vsub.f32 %v184_v49, %v190_v54 }
 0x204   :  { %v195_v56 = vmul.f32 1.442695, %v192_v55 }
 0x206   :  { %269 = vpow2.f32 %v195_v56 }
 0x20f   :  { %v268_v57 = vpop.eup %267 }
 0x210   :  { %197 = vadd.xlane.f32.xlu0 %v268_v57 }
 0x213   :  { %v270_v58 = vpop.eup %269 }
 0x214   :  { %199 = vadd.xlane.f32.xlu1 %v270_v58 }
 0x299   :  { %v198_v59 = vpop.xlane.xlu0 %197 }
 0x29a   :  { %271 = vlog2.f32 %v198_v59 }
 0x29d   :  { %v200_v60 = vpop.xlane.xlu1 %199 }
 0x29e   :  { %273 = vlog2.f32 %v200_v60 }
 0x2a7   :  { %v272_v61 = vpop.eup %271 }
 0x2a8   :  { %v202_v62 = vmul.f32 0.6931472, %v272_v61 }
 0x2aa   :  { %v205_v63 = vsub.f32 %v191_v52, %v202_v62 }
 0x2ab   :  { %v274_v0 = vpop.eup %273 }
 0x2ac   :  { %207 = vst [vmem:[%s369_s6] sm:$0xff] %v205_v63  ;;  %v204_v1 = vmul.f32 0.6931472, %v274_v0 }
 0x2ae   :  { %v206_v2 = vsub.f32 %v192_v55, %v204_v1 }
 0x2b0   :  { %208 = vst [vmem:[%s369_s6 + $0x8] sm:$0xff] %v206_v2 }

</bundles_post_ra>
